<compile_context>
chip_gen: v7x
topology: tpu7x:2x2x1
jax: 0.10.0
libtpu: 0.0.40
codegen_flags: <defaults>
</compile_context>

<pallas_src>
import functools
import math

import jax
import jax.numpy as jnp
from jax.experimental import pallas as pl
from jax.experimental.pallas import tpu as pltpu


# ---------------------------------------------------------------------------
# Fused kernel
# ---------------------------------------------------------------------------

def _xception_fused_kernel(
        x_ref,                                    # (B*L0, 3*Cin) im2col'd input
        w1, b1, w2, b2,                           # fused-tap k=3 conv weights
        wd1, bd1, wp1, bp1, wd2, bd2, wp2, bp2,   # depthwise/pointwise block
        wf1, bf1, wf2, bf2, wh, bh,               # fc1, fc2, fused heads
        out_ref,                                  # (B, Hpad) lane-dense slab
        s1, q2, s2, q3, q4,                       # VMEM scratch
        *, B, L0, mm_dtype):
    f32 = jnp.float32
    L1, L2 = L0 // 2, L0 // 4
    N0, N1, N2 = B * L0, B * L1, B * L2

    def mm(a, b):
        if mm_dtype is not None:      # bf16 operands, f32 accumulation (MXU-native)
            return jnp.dot(a.astype(mm_dtype), b.astype(mm_dtype),
                           preferred_element_type=f32)
        return jnp.dot(a, b, preferred_element_type=f32,
                       precision=jax.lax.Precision.HIGHEST)

    def mm_exact(a, b):               # segment-mean pooling stays exact f32
        return jnp.dot(a, b, preferred_element_type=f32,
                       precision=jax.lax.Precision.HIGHEST)

    def seg_masks(n, l):
        # (n,1) masks zeroing the k=3 taps that would cross a batch boundary.
        rows = jax.lax.broadcasted_iota(jnp.int32, (n, 1), 0)
        mprev = jnp.ones((n, 1), f32)
        mnext = jnp.ones((n, 1), f32)
        for s in range(B):                       # B is small & static
            mprev = jnp.where(rows == s * l, 0.0, mprev)
            mnext = jnp.where(rows == (s + 1) * l - 1, 0.0, mnext)
        return mprev, mnext

    def stage(pad_ref, n, val):
        # Write val into the pad interior (8-aligned) and zero only the two
        # halo rows that the shifted views will touch.
        c = pad_ref.shape[1]
        pad_ref[7:8, :] = jnp.zeros((1, c), f32)
        pad_ref[8 + n:9 + n, :] = jnp.zeros((1, c), f32)
        pad_ref[8:8 + n, :] = val

    def halo_views(pad_ref, n, mprev, mnext):
        prev = pad_ref[7:7 + n, :] * mprev
        cent = pad_ref[8:8 + n, :]
        nxt = pad_ref[9:9 + n, :] * mnext
        return prev, cent, nxt

    def maxpool2(src_ref, n_out):
        # MaxPool1d(k=2, s=2) on the VPU: even/odd strided reads + max.
        even = src_ref[pl.ds(0, n_out, 2), :]    # rows 0,2,4,...
        odd = src_ref[pl.ds(1, n_out, 2), :]     # rows 1,3,5,...
        return jnp.maximum(even, odd)

    # ---- conv1: one im2col matmul over the whole (B*L0) slab --------------
    s1[...] = jnp.maximum(mm(x_ref[...], w1[...]) + b1[...], 0.0)   # (N0, 32)

    # ---- maxpool 1 -> stage conv2 halos ------------------------------------
    stage(q2, N1, maxpool2(s1, N1))                                 # (N1, 32)

    # ---- conv2: im2col (3 shifted views -> one K=96 matmul) ---------------
    mp1, mn1 = seg_masks(N1, L1)
    pv, cv, nv = halo_views(q2, N1, mp1, mn1)
    patch = jnp.concatenate([pv, cv, nv], axis=1)                   # (N1, 96)
    s2[...] = jnp.maximum(mm(patch, w2[...]) + b2[...], 0.0)        # (N1, 64)

    # ---- maxpool 2 -> stage dwconv1 halos ----------------------------------
    stage(q3, N2, maxpool2(s2, N2))                                 # (N2, 64)

    # ---- dwconv1 (VPU shifted MACs) + pwconv1 (MXU) ------------------------
    mp2, mn2 = seg_masks(N2, L2)
    pv, cv, nv = halo_views(q3, N2, mp2, mn2)
    wd = wd1[...]                                                   # (3, 64)
    h = jnp.maximum(pv * wd[0:1, :] + cv * wd[1:2, :] + nv * wd[2:3, :]
                    + bd1[...], 0.0)
    h = jnp.maximum(mm(h, wp1[...]) + bp1[...], 0.0)                # (N2, 128)

    # ---- dwconv2 + pwconv2 --------------------------------------------------
    stage(q4, N2, h)
    pv, cv, nv = halo_views(q4, N2, mp2, mn2)
    wd = wd2[...]                                                   # (3, 128)
    h = jnp.maximum(pv * wd[0:1, :] + cv * wd[1:2, :] + nv * wd[2:3, :]
                    + bd2[...], 0.0)
    h = jnp.maximum(mm(h, wp2[...]) + bp2[...], 0.0)                # (N2, 256)

    # ---- global average pool per batch segment (one tiny exact matmul) ----
    rb = jax.lax.broadcasted_iota(jnp.int32, (B, N2), 0)
    ci = jax.lax.broadcasted_iota(jnp.int32, (B, N2), 1)
    pool_w = jnp.logical_and(ci >= rb * L2,
                             ci < (rb + 1) * L2).astype(f32) * (1.0 / L2)
    g = mm_exact(pool_w, h)                                         # (B, 256)

    # ---- classifier (dropout == identity, eval mode) -----------------------
    g = jnp.maximum(mm(g, wf1[...]) + bf1[...], 0.0)                # fc1 + ReLU
    g = jnp.maximum(mm(g, wf2[...]) + bf2[...], 0.0)                # fc2 + ReLU
    out_ref[...] = mm(g, wh[...]) + bh[...]                         # fused heads


# ---------------------------------------------------------------------------
# Wrapper
# ---------------------------------------------------------------------------

def _split_heads(slab, num_type_classes, num_size_classes, num_type_size_classes):
    o = 0
    out_check = jax.nn.sigmoid(slab[:, o:o + 1]); o += 1
    out_type = slab[:, o:o + num_type_classes]; o += num_type_classes
    out_size_cls = slab[:, o:o + num_size_classes]; o += num_size_classes
    out_type_size = slab[:, o:o + num_type_size_classes]; o += num_type_size_classes
    out_size_reg = jax.nn.softplus(slab[:, o:o + 1])
    return out_check, out_type, out_size_cls, out_type_size, out_size_reg


def xception1d_forward(params, x_ncl, num_type_classes=3, num_size_classes=7,
                       num_type_size_classes=13, mm_dtype=None):
    """x_ncl: (B, Cin, L) PyTorch layout.  Returns the 5 head outputs.

    mm_dtype=jnp.bfloat16 selects the MXU-native bf16-operand path
    (recommended on v6e/v7x); None keeps exact f32 matmuls.
    """
    B, Cin, L0 = x_ncl.shape
    assert L0 % 4 == 0, "wrapper assumes L divisible by 4 (two 2x pools)"
    N0, N1, N2 = B * L0, B * L0 // 2, B * L0 // 4
    hpad = params['heads']['w'].shape[1]

    # Boundary layout plumbing (no compute): channels-last + k=3 im2col of the
    # raw input, so conv1 inside the kernel is a single matmul with K=3*Cin.
    xt = jnp.transpose(x_ncl, (0, 2, 1)).astype(jnp.float32)        # (B, L, Cin)
    xp = jnp.pad(xt, ((0, 0), (1, 1), (0, 0)))                      # 'same' halo
    patch0 = jnp.concatenate([xp[:, :-2, :], xp[:, 1:-1, :], xp[:, 2:, :]],
                             axis=-1).reshape(N0, 3 * Cin)

    kern = functools.partial(_xception_fused_kernel, B=B, L0=L0, mm_dtype=mm_dtype)
    p = params
    slab = pl.pallas_call(
        kern,
        out_shape=jax.ShapeDtypeStruct((B, hpad), jnp.float32),
        scratch_shapes=[
            pltpu.VMEM((N0, 32), jnp.float32),        # s1: conv1 out (pre-pool)
            pltpu.VMEM((N1 + 16, 32), jnp.float32),   # q2: pooled1 + conv2 halos
            pltpu.VMEM((N1, 64), jnp.float32),        # s2: conv2 out (pre-pool)
            pltpu.VMEM((N2 + 16, 64), jnp.float32),   # q3: pooled2 + dwconv1 halos
            pltpu.VMEM((N2 + 16, 128), jnp.float32),  # q4: pwconv1 + dwconv2 halos
        ],
        compiler_params=pltpu.CompilerParams(
            vmem_limit_bytes=32 * 1024 * 1024),       # fits v5e/v6e/v7x budgets
    )(patch0,
      p['conv1']['w'], p['conv1']['b'],
      p['conv2']['w'], p['conv2']['b'],
      p['dwconv1']['w'], p['dwconv1']['b'],
      p['pwconv1']['w'], p['pwconv1']['b'],
      p['dwconv2']['w'], p['dwconv2']['b'],
      p['pwconv2']['w'], p['pwconv2']['b'],
      p['fc1']['w'], p['fc1']['b'],
      p['fc2']['w'], p['fc2']['b'],
      p['heads']['w'], p['heads']['b'])

    return _split_heads(slab, num_type_classes, num_size_classes,
                        num_type_size_classes)


# ---------------------------------------------------------------------------
# Parameters (xavier_uniform weights, zero biases — mirrors initialize_weights)
# ---------------------------------------------------------------------------

def _xavier_uniform(key, shape, fan_in, fan_out):
    a = math.sqrt(6.0 / (fan_in + fan_out))
    return jax.random.uniform(key, shape, jnp.float32, -a, a)


def build_params(key, input_channels=3, num_type_classes=3,
                 num_size_classes=7, num_type_size_classes=13):
    ks = iter(jax.random.split(key, 16))

    def conv_k3(cin, cout):      # PyTorch (cout, cin, 3) -> ours (3*cin, cout), tap-major
        w = _xavier_uniform(next(ks), (3, cin, cout), cin * 3, cout * 3)
        return {'w': w.reshape(3 * cin, cout),
                'b': jnp.zeros((1, cout), jnp.float32)}

    def dwconv_k3(c):            # PyTorch (c, 1, 3) -> ours (3, c)
        return {'w': _xavier_uniform(next(ks), (3, c), 3, c * 3),
                'b': jnp.zeros((1, c), jnp.float32)}

    def linear(cin, cout):       # PyTorch (cout, cin) -> ours (cin, cout)
        return {'w': _xavier_uniform(next(ks), (cin, cout), cin, cout),
                'b': jnp.zeros((1, cout), jnp.float32)}

    p = {
        'conv1': conv_k3(input_channels, 32),
        'conv2': conv_k3(32, 64),
        'dwconv1': dwconv_k3(64),
        'pwconv1': linear(64, 128),     # k=1 conv == per-position linear
        'dwconv2': dwconv_k3(128),
        'pwconv2': linear(128, 256),
        'fc1': linear(256, 512),
        'fc2': linear(512, 256),
    }

    # Fuse the five heads into one lane-dense, zero-padded (256, 128) matmul.
    heads = [linear(256, 1),
             linear(256, num_type_classes),
             linear(256, num_size_classes),
             linear(256, num_type_size_classes),
             linear(256, 1)]
    wh = jnp.concatenate([h['w'] for h in heads], axis=1)
    total = wh.shape[1]
    hpad = max(128, ((total + 127) // 128) * 128)
    wh = jnp.pad(wh, ((0, 0), (0, hpad - total)))
    p['heads'] = {'w': wh, 'b': jnp.zeros((1, hpad), jnp.float32)}
    return p


# ---------------------------------------------------------------------------
# Pure-JAX reference (same parameters, same PyTorch forward semantics)
# ---------------------------------------------------------------------------

def _reference_forward(p, x_ncl, num_type_classes, num_size_classes,
                       num_type_size_classes):
    hi = jax.lax.Precision.HIGHEST
    x = jnp.transpose(x_ncl, (0, 2, 1)).astype(jnp.float32)         # (B, L, Cin)

    def conv3(h, w, b):          # w: (3*Cin, Cout) tap-major [prev;cent;next]
        cin = h.shape[-1]
        w3 = w.reshape(3, cin, -1)
        hp = jnp.pad(h, ((0, 0), (1, 1), (0, 0)))
        y = (jnp.einsum('blc,cd->bld', hp[:, :-2], w3[0], precision=hi)
             + jnp.einsum('blc,cd->bld', hp[:, 1:-1], w3[1], precision=hi)
             + jnp.einsum('blc,cd->bld', hp[:, 2:], w3[2], precision=hi)) + b
        return jax.nn.relu(y)

    def pool2(h):
        bb, ll, cc = h.shape
        return jnp.max(h.reshape(bb, ll // 2, 2, cc), axis=2)

    def dw3(h, w, b):            # w: (3, C)
        hp = jnp.pad(h, ((0, 0), (1, 1), (0, 0)))
        y = hp[:, :-2] * w[0] + hp[:, 1:-1] * w[1] + hp[:, 2:] * w[2] + b
        return jax.nn.relu(y)

    def lin(h, w, b):
        return jnp.einsum('...c,cd->...d', h, w, precision=hi) + b

    h = conv3(x, p['conv1']['w'], p['conv1']['b'])
    h = pool2(h)
    h = conv3(h, p['conv2']['w'], p['conv2']['b'])
    h = pool2(h)
    h = dw3(h, p['dwconv1']['w'], p['dwconv1']['b'])
    h = jax.nn.relu(lin(h, p['pwconv1']['w'], p['pwconv1']['b']))
    h = dw3(h, p['dwconv2']['w'], p['dwconv2']['b'])
    h = jax.nn.relu(lin(h, p['pwconv2']['w'], p['pwconv2']['b']))
    g = jnp.mean(h, axis=1)                                          # (B, 256)
    g = jax.nn.relu(lin(g, p['fc1']['w'], p['fc1']['b']))
    g = jax.nn.relu(lin(g, p['fc2']['w'], p['fc2']['b']))
    slab = lin(g, p['heads']['w'], p['heads']['b'])
    return _split_heads(slab, num_type_classes, num_size_classes,
                        num_type_size_classes)


# ---------------------------------------------------------------------------
# Main
# ---------------------------------------------------------------------------

if __name__ == "__main__":
    key = jax.random.PRNGKey(0)
    kp, kx = jax.random.split(key)

    B, Cin, L = 2, 3, 64
    nt, ns, nts = 3, 7, 13

    params = build_params(kp, input_channels=Cin, num_type_classes=nt,
                          num_size_classes=ns, num_type_size_classes=nts)
    x = jax.random.normal(kx, (B, Cin, L), jnp.float32)   # PyTorch NCL layout

    # Exact f32 matmul path (matches PyTorch numerics closely).
    fwd = jax.jit(functools.partial(
        xception1d_forward, num_type_classes=nt, num_size_classes=ns,
        num_type_size_classes=nts))
    outs = jax.block_until_ready(fwd(params, x))

    out_check, out_type, out_size_cls, out_type_size, out_size_reg = outs
    assert out_check.shape == (B, 1)
    assert out_type.shape == (B, nt)
    assert out_size_cls.shape == (B, ns)
    assert out_type_size.shape == (B, nts)
    assert out_size_reg.shape == (B, 1)

    refs = _reference_forward(params, x, nt, ns, nts)
    for got, ref in zip(outs, refs):
        err = float(jnp.max(jnp.abs(got - ref)))
        assert err < 2e-3, f"f32 kernel mismatch vs reference: {err}"

    # bf16-operand MXU path (recommended on v6e / v7x, whose MXUs are bf16-native).
    fwd_bf16 = jax.jit(functools.partial(
        xception1d_forward, num_type_classes=nt, num_size_classes=ns,
        num_type_size_classes=nts, mm_dtype=jnp.bfloat16))
    outs_bf16 = jax.block_until_ready(fwd_bf16(params, x))
    for got, ref in zip(outs_bf16, refs):
        err = float(jnp.max(jnp.abs(got - ref)))
        assert err < 1e-1, f"bf16 kernel mismatch vs reference: {err}"

    print("KERNEL_OK")
</pallas_src>

<mosaic_0001>
module attributes {stable_mosaic.version = 11 : i64} {
  func.func @_xception_fused_kernel(%arg0: memref<128x9xf32, #tpu.memory_space<vmem>>, %arg1: memref<9x32xf32, #tpu.memory_space<vmem>>, %arg2: memref<1x32xf32, #tpu.memory_space<vmem>>, %arg3: memref<96x64xf32, #tpu.memory_space<vmem>>, %arg4: memref<1x64xf32, #tpu.memory_space<vmem>>, %arg5: memref<3x64xf32, #tpu.memory_space<vmem>>, %arg6: memref<1x64xf32, #tpu.memory_space<vmem>>, %arg7: memref<64x128xf32, #tpu.memory_space<vmem>>, %arg8: memref<1x128xf32, #tpu.memory_space<vmem>>, %arg9: memref<3x128xf32, #tpu.memory_space<vmem>>, %arg10: memref<1x128xf32, #tpu.memory_space<vmem>>, %arg11: memref<128x256xf32, #tpu.memory_space<vmem>>, %arg12: memref<1x256xf32, #tpu.memory_space<vmem>>, %arg13: memref<256x512xf32, #tpu.memory_space<vmem>>, %arg14: memref<1x512xf32, #tpu.memory_space<vmem>>, %arg15: memref<512x256xf32, #tpu.memory_space<vmem>>, %arg16: memref<1x256xf32, #tpu.memory_space<vmem>>, %arg17: memref<256x128xf32, #tpu.memory_space<vmem>>, %arg18: memref<1x128xf32, #tpu.memory_space<vmem>>, %arg19: memref<2x128xf32, #tpu.memory_space<vmem>>, %arg20: memref<128x32xf32, #tpu.memory_space<vmem>>, %arg21: memref<80x32xf32, #tpu.memory_space<vmem>>, %arg22: memref<64x64xf32, #tpu.memory_space<vmem>>, %arg23: memref<48x64xf32, #tpu.memory_space<vmem>>, %arg24: memref<48x128xf32, #tpu.memory_space<vmem>>) attributes {dimension_semantics = [], scalar_prefetch = 0 : i64, scratch_operands = 5 : i64, tpu.core_type = #tpu.core_type<tc>} {
    %c0 = arith.constant 0 : index
    %c0_0 = arith.constant 0 : index
    %0 = vector.load %arg0[%c0, %c0_0] : memref<128x9xf32, #tpu.memory_space<vmem>>, vector<128x9xf32>
    %c0_1 = arith.constant 0 : index
    %c0_2 = arith.constant 0 : index
    %1 = vector.load %arg1[%c0_1, %c0_2] : memref<9x32xf32, #tpu.memory_space<vmem>>, vector<9x32xf32>
    %cst = arith.constant dense<0.000000e+00> : vector<128x32xf32>
    %2 = tpu.matmul %0, %1, %cst {dimension_numbers = #tpu.dot_dimension_numbers<[1], [0], [0], [1], [0, 0, 1, 1], [], []>, precision = #tpu.contract_precision<fp32>} : vector<128x9xf32>, vector<9x32xf32>, vector<128x32xf32> -> vector<128x32xf32>
    %c0_3 = arith.constant 0 : index
    %c0_4 = arith.constant 0 : index
    %3 = vector.load %arg2[%c0_3, %c0_4] : memref<1x32xf32, #tpu.memory_space<vmem>>, vector<1x32xf32>
    %4 = vector.broadcast %3 : vector<1x32xf32> to vector<128x32xf32>
    %5 = arith.addf %2, %4 : vector<128x32xf32>
    %cst_5 = arith.constant 0.000000e+00 : f32
    %6 = vector.broadcast %cst_5 : f32 to vector<128x32xf32>
    %7 = arith.maximumf %5, %6 : vector<128x32xf32>
    %c0_6 = arith.constant 0 : index
    %c0_7 = arith.constant 0 : index
    %8 = vector.load %arg20[%c0_6, %c0_7] : memref<128x32xf32, #tpu.memory_space<vmem>>, vector<128x32xf32>
    tpu.vector_store %arg20[%c0_6, %c0_7], %7 {strides = array<i32>} : memref<128x32xf32, #tpu.memory_space<vmem>>, vector<128x32xf32>,
    %c0_8 = arith.constant 0 : index
    %c0_9 = arith.constant 0 : index
    %9 = tpu.strided_load %arg20[%c0_8, %c0_9] {strides = array<i32: 2, 1>} : memref<128x32xf32, #tpu.memory_space<vmem>>, vector<64x32xf32>
    %c1 = arith.constant 1 : index
    %c0_10 = arith.constant 0 : index
    %10 = tpu.strided_load %arg20[%c1, %c0_10] {strides = array<i32: 2, 1>} : memref<128x32xf32, #tpu.memory_space<vmem>>, vector<64x32xf32>
    %11 = arith.maximumf %9, %10 : vector<64x32xf32>
    %cst_11 = arith.constant 0.000000e+00 : f32
    %12 = vector.broadcast %cst_11 : f32 to vector<1x32xf32>
    %c7 = arith.constant 7 : index
    %c0_12 = arith.constant 0 : index
    %13 = vector.load %arg21[%c7, %c0_12] : memref<80x32xf32, #tpu.memory_space<vmem>>, vector<1x32xf32>
    tpu.vector_store %arg21[%c7, %c0_12], %12 {strides = array<i32>} : memref<80x32xf32, #tpu.memory_space<vmem>>, vector<1x32xf32>,
    %cst_13 = arith.constant 0.000000e+00 : f32
    %14 = vector.broadcast %cst_13 : f32 to vector<1x32xf32>
    %c72 = arith.constant 72 : index
    %c0_14 = arith.constant 0 : index
    %15 = vector.load %arg21[%c72, %c0_14] : memref<80x32xf32, #tpu.memory_space<vmem>>, vector<1x32xf32>
    tpu.vector_store %arg21[%c72, %c0_14], %14 {strides = array<i32>} : memref<80x32xf32, #tpu.memory_space<vmem>>, vector<1x32xf32>,
    %c8 = arith.constant 8 : index
    %c0_15 = arith.constant 0 : index
    %16 = vector.load %arg21[%c8, %c0_15] : memref<80x32xf32, #tpu.memory_space<vmem>>, vector<64x32xf32>
    tpu.vector_store %arg21[%c8, %c0_15], %11 {strides = array<i32>} : memref<80x32xf32, #tpu.memory_space<vmem>>, vector<64x32xf32>,
    %17 = tpu.iota {dimensions = array<i32: 0>} : vector<64x1xi32>
    %cst_16 = arith.constant 1.000000e+00 : f32
    %18 = vector.broadcast %cst_16 : f32 to vector<64x1xf32>
    %cst_17 = arith.constant 1.000000e+00 : f32
    %19 = vector.broadcast %cst_17 : f32 to vector<64x1xf32>
    %c0_i32 = arith.constant 0 : i32
    %20 = vector.broadcast %c0_i32 : i32 to vector<64x1xi32>
    %21 = arith.cmpi eq, %17, %20 : vector<64x1xi32>
    %cst_18 = arith.constant 0.000000e+00 : f32
    %22 = vector.broadcast %cst_18 : f32 to vector<64x1xf32>
    %23 = arith.select %21, %22, %18 : vector<64x1xi1>, vector<64x1xf32>
    %c31_i32 = arith.constant 31 : i32
    %24 = vector.broadcast %c31_i32 : i32 to vector<64x1xi32>
    %25 = arith.cmpi eq, %17, %24 : vector<64x1xi32>
    %cst_19 = arith.constant 0.000000e+00 : f32
    %26 = vector.broadcast %cst_19 : f32 to vector<64x1xf32>
    %27 = arith.select %25, %26, %19 : vector<64x1xi1>, vector<64x1xf32>
    %c32_i32 = arith.constant 32 : i32
    %28 = vector.broadcast %c32_i32 : i32 to vector<64x1xi32>
    %29 = arith.cmpi eq, %17, %28 : vector<64x1xi32>
    %cst_20 = arith.constant 0.000000e+00 : f32
    %30 = vector.broadcast %cst_20 : f32 to vector<64x1xf32>
    %31 = arith.select %29, %30, %23 : vector<64x1xi1>, vector<64x1xf32>
    %c63_i32 = arith.constant 63 : i32
    %32 = vector.broadcast %c63_i32 : i32 to vector<64x1xi32>
    %33 = arith.cmpi eq, %17, %32 : vector<64x1xi32>
    %cst_21 = arith.constant 0.000000e+00 : f32
    %34 = vector.broadcast %cst_21 : f32 to vector<64x1xf32>
    %35 = arith.select %33, %34, %27 : vector<64x1xi1>, vector<64x1xf32>
    %c7_22 = arith.constant 7 : index
    %c0_23 = arith.constant 0 : index
    %36 = vector.load %arg21[%c7_22, %c0_23] : memref<80x32xf32, #tpu.memory_space<vmem>>, vector<64x32xf32>
    %37 = vector.broadcast %31 : vector<64x1xf32> to vector<64x32xf32>
    %38 = arith.mulf %36, %37 : vector<64x32xf32>
    %c8_24 = arith.constant 8 : index
    %c0_25 = arith.constant 0 : index
    %39 = vector.load %arg21[%c8_24, %c0_25] : memref<80x32xf32, #tpu.memory_space<vmem>>, vector<64x32xf32>
    %c9 = arith.constant 9 : index
    %c0_26 = arith.constant 0 : index
    %40 = vector.load %arg21[%c9, %c0_26] : memref<80x32xf32, #tpu.memory_space<vmem>>, vector<64x32xf32>
    %41 = vector.broadcast %35 : vector<64x1xf32> to vector<64x32xf32>
    %42 = arith.mulf %40, %41 : vector<64x32xf32>
    %43 = tpu.concatenate %38, %39, %42 in 1 : vector<64x32xf32>, vector<64x32xf32>, vector<64x32xf32> -> vector<64x96xf32>
    %c0_27 = arith.constant 0 : index
    %c0_28 = arith.constant 0 : index
    %44 = vector.load %arg3[%c0_27, %c0_28] : memref<96x64xf32, #tpu.memory_space<vmem>>, vector<96x64xf32>
    %cst_29 = arith.constant dense<0.000000e+00> : vector<64x64xf32>
    %45 = tpu.matmul %43, %44, %cst_29 {dimension_numbers = #tpu.dot_dimension_numbers<[1], [0], [0], [1], [0, 0, 1, 1], [], []>, precision = #tpu.contract_precision<fp32>} : vector<64x96xf32>, vector<96x64xf32>, vector<64x64xf32> -> vector<64x64xf32>
    %c0_30 = arith.constant 0 : index
    %c0_31 = arith.constant 0 : index
    %46 = vector.load %arg4[%c0_30, %c0_31] : memref<1x64xf32, #tpu.memory_space<vmem>>, vector<1x64xf32>
    %47 = vector.broadcast %46 : vector<1x64xf32> to vector<64x64xf32>
    %48 = arith.addf %45, %47 : vector<64x64xf32>
    %cst_32 = arith.constant 0.000000e+00 : f32
    %49 = vector.broadcast %cst_32 : f32 to vector<64x64xf32>
    %50 = arith.maximumf %48, %49 : vector<64x64xf32>
    %c0_33 = arith.constant 0 : index
    %c0_34 = arith.constant 0 : index
    %51 = vector.load %arg22[%c0_33, %c0_34] : memref<64x64xf32, #tpu.memory_space<vmem>>, vector<64x64xf32>
    tpu.vector_store %arg22[%c0_33, %c0_34], %50 {strides = array<i32>} : memref<64x64xf32, #tpu.memory_space<vmem>>, vector<64x64xf32>,
    %c0_35 = arith.constant 0 : index
    %c0_36 = arith.constant 0 : index
    %52 = tpu.strided_load %arg22[%c0_35, %c0_36] {strides = array<i32: 2, 1>} : memref<64x64xf32, #tpu.memory_space<vmem>>, vector<32x64xf32>
    %c1_37 = arith.constant 1 : index
    %c0_38 = arith.constant 0 : index
    %53 = tpu.strided_load %arg22[%c1_37, %c0_38] {strides = array<i32: 2, 1>} : memref<64x64xf32, #tpu.memory_space<vmem>>, vector<32x64xf32>
    %54 = arith.maximumf %52, %53 : vector<32x64xf32>
    %cst_39 = arith.constant 0.000000e+00 : f32
    %55 = vector.broadcast %cst_39 : f32 to vector<1x64xf32>
    %c7_40 = arith.constant 7 : index
    %c0_41 = arith.constant 0 : index
    %56 = vector.load %arg23[%c7_40, %c0_41] : memref<48x64xf32, #tpu.memory_space<vmem>>, vector<1x64xf32>
    tpu.vector_store %arg23[%c7_40, %c0_41], %55 {strides = array<i32>} : memref<48x64xf32, #tpu.memory_space<vmem>>, vector<1x64xf32>,
    %cst_42 = arith.constant 0.000000e+00 : f32
    %57 = vector.broadcast %cst_42 : f32 to vector<1x64xf32>
    %c40 = arith.constant 40 : index
    %c0_43 = arith.constant 0 : index
    %58 = vector.load %arg23[%c40, %c0_43] : memref<48x64xf32, #tpu.memory_space<vmem>>, vector<1x64xf32>
    tpu.vector_store %arg23[%c40, %c0_43], %57 {strides = array<i32>} : memref<48x64xf32, #tpu.memory_space<vmem>>, vector<1x64xf32>,
    %c8_44 = arith.constant 8 : index
    %c0_45 = arith.constant 0 : index
    %59 = vector.load %arg23[%c8_44, %c0_45] : memref<48x64xf32, #tpu.memory_space<vmem>>, vector<32x64xf32>
    tpu.vector_store %arg23[%c8_44, %c0_45], %54 {strides = array<i32>} : memref<48x64xf32, #tpu.memory_space<vmem>>, vector<32x64xf32>,
    %60 = tpu.iota {dimensions = array<i32: 0>} : vector<32x1xi32>
    %cst_46 = arith.constant 1.000000e+00 : f32
    %61 = vector.broadcast %cst_46 : f32 to vector<32x1xf32>
    %cst_47 = arith.constant 1.000000e+00 : f32
    %62 = vector.broadcast %cst_47 : f32 to vector<32x1xf32>
    %c0_i32_48 = arith.constant 0 : i32
    %63 = vector.broadcast %c0_i32_48 : i32 to vector<32x1xi32>
    %64 = arith.cmpi eq, %60, %63 : vector<32x1xi32>
    %cst_49 = arith.constant 0.000000e+00 : f32
    %65 = vector.broadcast %cst_49 : f32 to vector<32x1xf32>
    %66 = arith.select %64, %65, %61 : vector<32x1xi1>, vector<32x1xf32>
    %c15_i32 = arith.constant 15 : i32
    %67 = vector.broadcast %c15_i32 : i32 to vector<32x1xi32>
    %68 = arith.cmpi eq, %60, %67 : vector<32x1xi32>
    %cst_50 = arith.constant 0.000000e+00 : f32
    %69 = vector.broadcast %cst_50 : f32 to vector<32x1xf32>
    %70 = arith.select %68, %69, %62 : vector<32x1xi1>, vector<32x1xf32>
    %c16_i32 = arith.constant 16 : i32
    %71 = vector.broadcast %c16_i32 : i32 to vector<32x1xi32>
    %72 = arith.cmpi eq, %60, %71 : vector<32x1xi32>
    %cst_51 = arith.constant 0.000000e+00 : f32
    %73 = vector.broadcast %cst_51 : f32 to vector<32x1xf32>
    %74 = arith.select %72, %73, %66 : vector<32x1xi1>, vector<32x1xf32>
    %c31_i32_52 = arith.constant 31 : i32
    %75 = vector.broadcast %c31_i32_52 : i32 to vector<32x1xi32>
    %76 = arith.cmpi eq, %60, %75 : vector<32x1xi32>
    %cst_53 = arith.constant 0.000000e+00 : f32
    %77 = vector.broadcast %cst_53 : f32 to vector<32x1xf32>
    %78 = arith.select %76, %77, %70 : vector<32x1xi1>, vector<32x1xf32>
    %c7_54 = arith.constant 7 : index
    %c0_55 = arith.constant 0 : index
    %79 = vector.load %arg23[%c7_54, %c0_55] : memref<48x64xf32, #tpu.memory_space<vmem>>, vector<32x64xf32>
    %80 = vector.broadcast %74 : vector<32x1xf32> to vector<32x64xf32>
    %81 = arith.mulf %79, %80 : vector<32x64xf32>
    %c8_56 = arith.constant 8 : index
    %c0_57 = arith.constant 0 : index
    %82 = vector.load %arg23[%c8_56, %c0_57] : memref<48x64xf32, #tpu.memory_space<vmem>>, vector<32x64xf32>
    %c9_58 = arith.constant 9 : index
    %c0_59 = arith.constant 0 : index
    %83 = vector.load %arg23[%c9_58, %c0_59] : memref<48x64xf32, #tpu.memory_space<vmem>>, vector<32x64xf32>
    %84 = vector.broadcast %78 : vector<32x1xf32> to vector<32x64xf32>
    %85 = arith.mulf %83, %84 : vector<32x64xf32>
    %c0_60 = arith.constant 0 : index
    %c0_61 = arith.constant 0 : index
    %86 = vector.load %arg5[%c0_60, %c0_61] : memref<3x64xf32, #tpu.memory_space<vmem>>, vector<3x64xf32>
    %87 = vector.extract_strided_slice %86 {offsets = [0, 0], sizes = [1, 64], strides = [1, 1]} : vector<3x64xf32> to vector<1x64xf32>
    %88 = vector.broadcast %87 : vector<1x64xf32> to vector<32x64xf32>
    %89 = arith.mulf %81, %88 : vector<32x64xf32>
    %90 = vector.extract_strided_slice %86 {offsets = [1, 0], sizes = [1, 64], strides = [1, 1]} : vector<3x64xf32> to vector<1x64xf32>
    %91 = vector.broadcast %90 : vector<1x64xf32> to vector<32x64xf32>
    %92 = arith.mulf %82, %91 : vector<32x64xf32>
    %93 = arith.addf %89, %92 : vector<32x64xf32>
    %94 = vector.extract_strided_slice %86 {offsets = [2, 0], sizes = [1, 64], strides = [1, 1]} : vector<3x64xf32> to vector<1x64xf32>
    %95 = vector.broadcast %94 : vector<1x64xf32> to vector<32x64xf32>
    %96 = arith.mulf %85, %95 : vector<32x64xf32>
    %97 = arith.addf %93, %96 : vector<32x64xf32>
    %c0_62 = arith.constant 0 : index
    %c0_63 = arith.constant 0 : index
    %98 = vector.load %arg6[%c0_62, %c0_63] : memref<1x64xf32, #tpu.memory_space<vmem>>, vector<1x64xf32>
    %99 = vector.broadcast %98 : vector<1x64xf32> to vector<32x64xf32>
    %100 = arith.addf %97, %99 : vector<32x64xf32>
    %cst_64 = arith.constant 0.000000e+00 : f32
    %101 = vector.broadcast %cst_64 : f32 to vector<32x64xf32>
    %102 = arith.maximumf %100, %101 : vector<32x64xf32>
    %c0_65 = arith.constant 0 : index
    %c0_66 = arith.constant 0 : index
    %103 = vector.load %arg7[%c0_65, %c0_66] : memref<64x128xf32, #tpu.memory_space<vmem>>, vector<64x128xf32>
    %cst_67 = arith.constant dense<0.000000e+00> : vector<32x128xf32>
    %104 = tpu.matmul %102, %103, %cst_67 {dimension_numbers = #tpu.dot_dimension_numbers<[1], [0], [0], [1], [0, 0, 1, 1], [], []>, precision = #tpu.contract_precision<fp32>} : vector<32x64xf32>, vector<64x128xf32>, vector<32x128xf32> -> vector<32x128xf32>
    %c0_68 = arith.constant 0 : index
    %c0_69 = arith.constant 0 : index
    %105 = vector.load %arg8[%c0_68, %c0_69] : memref<1x128xf32, #tpu.memory_space<vmem>>, vector<1x128xf32>
    %106 = vector.broadcast %105 : vector<1x128xf32> to vector<32x128xf32>
    %107 = arith.addf %104, %106 : vector<32x128xf32>
    %cst_70 = arith.constant 0.000000e+00 : f32
    %108 = vector.broadcast %cst_70 : f32 to vector<32x128xf32>
    %109 = arith.maximumf %107, %108 : vector<32x128xf32>
    %cst_71 = arith.constant 0.000000e+00 : f32
    %110 = vector.broadcast %cst_71 : f32 to vector<1x128xf32>
    %c7_72 = arith.constant 7 : index
    %c0_73 = arith.constant 0 : index
    %111 = vector.load %arg24[%c7_72, %c0_73] : memref<48x128xf32, #tpu.memory_space<vmem>>, vector<1x128xf32>
    tpu.vector_store %arg24[%c7_72, %c0_73], %110 {strides = array<i32>} : memref<48x128xf32, #tpu.memory_space<vmem>>, vector<1x128xf32>,
    %cst_74 = arith.constant 0.000000e+00 : f32
    %112 = vector.broadcast %cst_74 : f32 to vector<1x128xf32>
    %c40_75 = arith.constant 40 : index
    %c0_76 = arith.constant 0 : index
    %113 = vector.load %arg24[%c40_75, %c0_76] : memref<48x128xf32, #tpu.memory_space<vmem>>, vector<1x128xf32>
    tpu.vector_store %arg24[%c40_75, %c0_76], %112 {strides = array<i32>} : memref<48x128xf32, #tpu.memory_space<vmem>>, vector<1x128xf32>,
    %c8_77 = arith.constant 8 : index
    %c0_78 = arith.constant 0 : index
    %114 = vector.load %arg24[%c8_77, %c0_78] : memref<48x128xf32, #tpu.memory_space<vmem>>, vector<32x128xf32>
    tpu.vector_store %arg24[%c8_77, %c0_78], %109 {strides = array<i32>} : memref<48x128xf32, #tpu.memory_space<vmem>>, vector<32x128xf32>,
    %c7_79 = arith.constant 7 : index
    %c0_80 = arith.constant 0 : index
    %115 = vector.load %arg24[%c7_79, %c0_80] : memref<48x128xf32, #tpu.memory_space<vmem>>, vector<32x128xf32>
    %116 = vector.broadcast %74 : vector<32x1xf32> to vector<32x128xf32>
    %117 = arith.mulf %115, %116 : vector<32x128xf32>
    %c8_81 = arith.constant 8 : index
    %c0_82 = arith.constant 0 : index
    %118 = vector.load %arg24[%c8_81, %c0_82] : memref<48x128xf32, #tpu.memory_space<vmem>>, vector<32x128xf32>
    %c9_83 = arith.constant 9 : index
    %c0_84 = arith.constant 0 : index
    %119 = vector.load %arg24[%c9_83, %c0_84] : memref<48x128xf32, #tpu.memory_space<vmem>>, vector<32x128xf32>
    %120 = vector.broadcast %78 : vector<32x1xf32> to vector<32x128xf32>
    %121 = arith.mulf %119, %120 : vector<32x128xf32>
    %c0_85 = arith.constant 0 : index
    %c0_86 = arith.constant 0 : index
    %122 = vector.load %arg9[%c0_85, %c0_86] : memref<3x128xf32, #tpu.memory_space<vmem>>, vector<3x128xf32>
    %123 = vector.extract_strided_slice %122 {offsets = [0, 0], sizes = [1, 128], strides = [1, 1]} : vector<3x128xf32> to vector<1x128xf32>
    %124 = vector.broadcast %123 : vector<1x128xf32> to vector<32x128xf32>
    %125 = arith.mulf %117, %124 : vector<32x128xf32>
    %126 = vector.extract_strided_slice %122 {offsets = [1, 0], sizes = [1, 128], strides = [1, 1]} : vector<3x128xf32> to vector<1x128xf32>
    %127 = vector.broadcast %126 : vector<1x128xf32> to vector<32x128xf32>
    %128 = arith.mulf %118, %127 : vector<32x128xf32>
    %129 = arith.addf %125, %128 : vector<32x128xf32>
    %130 = vector.extract_strided_slice %122 {offsets = [2, 0], sizes = [1, 128], strides = [1, 1]} : vector<3x128xf32> to vector<1x128xf32>
    %131 = vector.broadcast %130 : vector<1x128xf32> to vector<32x128xf32>
    %132 = arith.mulf %121, %131 : vector<32x128xf32>
    %133 = arith.addf %129, %132 : vector<32x128xf32>
    %c0_87 = arith.constant 0 : index
    %c0_88 = arith.constant 0 : index
    %134 = vector.load %arg10[%c0_87, %c0_88] : memref<1x128xf32, #tpu.memory_space<vmem>>, vector<1x128xf32>
    %135 = vector.broadcast %134 : vector<1x128xf32> to vector<32x128xf32>
    %136 = arith.addf %133, %135 : vector<32x128xf32>
    %cst_89 = arith.constant 0.000000e+00 : f32
    %137 = vector.broadcast %cst_89 : f32 to vector<32x128xf32>
    %138 = arith.maximumf %136, %137 : vector<32x128xf32>
    %c0_90 = arith.constant 0 : index
    %c0_91 = arith.constant 0 : index
    %139 = vector.load %arg11[%c0_90, %c0_91] : memref<128x256xf32, #tpu.memory_space<vmem>>, vector<128x256xf32>
    %cst_92 = arith.constant dense<0.000000e+00> : vector<32x256xf32>
    %140 = tpu.matmul %138, %139, %cst_92 {dimension_numbers = #tpu.dot_dimension_numbers<[1], [0], [0], [1], [0, 0, 1, 1], [], []>, precision = #tpu.contract_precision<fp32>} : vector<32x128xf32>, vector<128x256xf32>, vector<32x256xf32> -> vector<32x256xf32>
    %c0_93 = arith.constant 0 : index
    %c0_94 = arith.constant 0 : index
    %141 = vector.load %arg12[%c0_93, %c0_94] : memref<1x256xf32, #tpu.memory_space<vmem>>, vector<1x256xf32>
    %142 = vector.broadcast %141 : vector<1x256xf32> to vector<32x256xf32>
    %143 = arith.addf %140, %142 : vector<32x256xf32>
    %cst_95 = arith.constant 0.000000e+00 : f32
    %144 = vector.broadcast %cst_95 : f32 to vector<32x256xf32>
    %145 = arith.maximumf %143, %144 : vector<32x256xf32>
    %146 = tpu.iota {dimensions = array<i32: 0>} : vector<2x32xi32>
    %147 = tpu.iota {dimensions = array<i32: 1>} : vector<2x32xi32>
    %c16_i32_96 = arith.constant 16 : i32
    %148 = vector.broadcast %c16_i32_96 : i32 to vector<2x32xi32>
    %149 = arith.muli %146, %148 : vector<2x32xi32>
    %150 = arith.cmpi sge, %147, %149 : vector<2x32xi32>
    %c1_i32 = arith.constant 1 : i32
    %151 = vector.broadcast %c1_i32 : i32 to vector<2x32xi32>
    %152 = arith.addi %146, %151 : vector<2x32xi32>
    %c16_i32_97 = arith.constant 16 : i32
    %153 = vector.broadcast %c16_i32_97 : i32 to vector<2x32xi32>
    %154 = arith.muli %152, %153 : vector<2x32xi32>
    %155 = arith.cmpi slt, %147, %154 : vector<2x32xi32>
    %156 = arith.andi %150, %155 : vector<2x32xi1>
    %157 = arith.extui %156 : vector<2x32xi1> to vector<2x32xi32>
    %158 = arith.sitofp %157 : vector<2x32xi32> to vector<2x32xf32>
    %cst_98 = arith.constant 6.250000e-02 : f32
    %159 = vector.broadcast %cst_98 : f32 to vector<2x32xf32>
    %160 = arith.mulf %158, %159 : vector<2x32xf32>
    %cst_99 = arith.constant dense<0.000000e+00> : vector<2x256xf32>
    %161 = tpu.matmul %160, %145, %cst_99 {dimension_numbers = #tpu.dot_dimension_numbers<[1], [0], [0], [1], [0, 0, 1, 1], [], []>, precision = #tpu.contract_precision<fp32>} : vector<2x32xf32>, vector<32x256xf32>, vector<2x256xf32> -> vector<2x256xf32>
    %c0_100 = arith.constant 0 : index
    %c0_101 = arith.constant 0 : index
    %162 = vector.load %arg13[%c0_100, %c0_101] : memref<256x512xf32, #tpu.memory_space<vmem>>, vector<256x512xf32>
    %cst_102 = arith.constant dense<0.000000e+00> : vector<2x512xf32>
    %163 = tpu.matmul %161, %162, %cst_102 {dimension_numbers = #tpu.dot_dimension_numbers<[1], [0], [0], [1], [0, 0, 1, 1], [], []>, precision = #tpu.contract_precision<fp32>} : vector<2x256xf32>, vector<256x512xf32>, vector<2x512xf32> -> vector<2x512xf32>
    %c0_103 = arith.constant 0 : index
    %c0_104 = arith.constant 0 : index
    %164 = vector.load %arg14[%c0_103, %c0_104] : memref<1x512xf32, #tpu.memory_space<vmem>>, vector<1x512xf32>
    %165 = vector.broadcast %164 : vector<1x512xf32> to vector<2x512xf32>
    %166 = arith.addf %163, %165 : vector<2x512xf32>
    %cst_105 = arith.constant 0.000000e+00 : f32
    %167 = vector.broadcast %cst_105 : f32 to vector<2x512xf32>
    %168 = arith.maximumf %166, %167 : vector<2x512xf32>
    %c0_106 = arith.constant 0 : index
    %c0_107 = arith.constant 0 : index
    %169 = vector.load %arg15[%c0_106, %c0_107] : memref<512x256xf32, #tpu.memory_space<vmem>>, vector<512x256xf32>
    %cst_108 = arith.constant dense<0.000000e+00> : vector<2x256xf32>
    %170 = tpu.matmul %168, %169, %cst_108 {dimension_numbers = #tpu.dot_dimension_numbers<[1], [0], [0], [1], [0, 0, 1, 1], [], []>, precision = #tpu.contract_precision<fp32>} : vector<2x512xf32>, vector<512x256xf32>, vector<2x256xf32> -> vector<2x256xf32>
    %c0_109 = arith.constant 0 : index
    %c0_110 = arith.constant 0 : index
    %171 = vector.load %arg16[%c0_109, %c0_110] : memref<1x256xf32, #tpu.memory_space<vmem>>, vector<1x256xf32>
    %172 = vector.broadcast %171 : vector<1x256xf32> to vector<2x256xf32>
    %173 = arith.addf %170, %172 : vector<2x256xf32>
    %cst_111 = arith.constant 0.000000e+00 : f32
    %174 = vector.broadcast %cst_111 : f32 to vector<2x256xf32>
    %175 = arith.maximumf %173, %174 : vector<2x256xf32>
    %c0_112 = arith.constant 0 : index
    %c0_113 = arith.constant 0 : index
    %176 = vector.load %arg17[%c0_112, %c0_113] : memref<256x128xf32, #tpu.memory_space<vmem>>, vector<256x128xf32>
    %cst_114 = arith.constant dense<0.000000e+00> : vector<2x128xf32>
    %177 = tpu.matmul %175, %176, %cst_114 {dimension_numbers = #tpu.dot_dimension_numbers<[1], [0], [0], [1], [0, 0, 1, 1], [], []>, precision = #tpu.contract_precision<fp32>} : vector<2x256xf32>, vector<256x128xf32>, vector<2x128xf32> -> vector<2x128xf32>
    %c0_115 = arith.constant 0 : index
    %c0_116 = arith.constant 0 : index
    %178 = vector.load %arg18[%c0_115, %c0_116] : memref<1x128xf32, #tpu.memory_space<vmem>>, vector<1x128xf32>
    %179 = vector.broadcast %178 : vector<1x128xf32> to vector<2x128xf32>
    %180 = arith.addf %177, %179 : vector<2x128xf32>
    %c0_117 = arith.constant 0 : index
    %c0_118 = arith.constant 0 : index
    %181 = vector.load %arg19[%c0_117, %c0_118] : memref<2x128xf32, #tpu.memory_space<vmem>>, vector<2x128xf32>
    tpu.vector_store %arg19[%c0_117, %c0_118], %180 {strides = array<i32>} : memref<2x128xf32, #tpu.memory_space<vmem>>, vector<2x128xf32>,
    return
  }
}

</mosaic_0001>

<bundles_post_ra>
// kernel: xception1d_forward.1
= control target key start
LH: loop header
LB: loop body
LE: loop exit
PB: predicated region body
PF: predicated region fallthrough
CT: control target
= control target key end

     0   :  { %s21390_s0 = inlined_call_operand.vmem [shape: f32[128,9], index: 0, kind: input, shape index: {}]   ;;  %s21391_s1 = inlined_call_operand.vmem [shape: f32[9,32], index: 1, kind: input, shape index: {}]   ;;  %s21392_s2 = inlined_call_operand.vmem [shape: f32[1,32], index: 2, kind: input, shape index: {}]   ;;  %s21393_s3 = inlined_call_operand.vmem [shape: f32[96,64], index: 3, kind: input, shape index: {}]   ;;  %s21394_s4 = inlined_call_operand.vmem [shape: f32[1,64], index: 4, kind: input, shape index: {}]   ;;  %s21395_s5 = inlined_call_operand.vmem [shape: f32[3,64], index: 5, kind: input, shape index: {}]   ;;  %s21396_s6 = inlined_call_operand.vmem [shape: f32[1,64], index: 6, kind: input, shape index: {}]   ;;  %s21397_s7 = inlined_call_operand.vmem [shape: f32[64,128], index: 7, kind: input, shape index: {}]   ;;  %s21398_s8 = inlined_call_operand.hbm [shape: f32[1,128], index: 8, kind: input, shape index: {}]   ;;  %s21399_s9 = inlined_call_operand.hbm [shape: f32[3,128], index: 9, kind: input, shape index: {}]   ;;  %s21400_s10 = inlined_call_operand.vmem [shape: f32[1,128], index: 10, kind: input, shape index: {}]   ;;  %s21401_s11 = inlined_call_operand.vmem [shape: f32[128,256], index: 11, kind: input, shape index: {}]   ;;  %s21402_s12 = inlined_call_operand.hbm [shape: f32[1,256], index: 12, kind: input, shape index: {}]   ;;  %s21403_s13 = inlined_call_operand.hbm [shape: f32[256,512], index: 13, kind: input, shape index: {}]   ;;  %s21404_s14 = inlined_call_operand.hbm [shape: f32[1,512], index: 14, kind: input, shape index: {}]   ;;  %s21405_s15 = inlined_call_operand.hbm [shape: f32[512,256], index: 15, kind: input, shape index: {}]   ;;  %s21406_s16 = inlined_call_operand.vmem [shape: f32[1,256], index: 16, kind: input, shape index: {}]   ;;  %s21407_s17 = inlined_call_operand.hbm [shape: f32[256,128], index: 17, kind: input, shape index: {}]   ;;  %s21408_s18 = inlined_call_operand.hbm [shape: f32[1,128], index: 18, kind: input, shape index: {}]   ;;  %s21409_s19 = inlined_call_operand.vmem [shape: f32[2,128], index: 19, kind: output, shape index: {}]  }
   0x1   :  { %22405 = sst [smem:[#allocation218_spill]] %s21390_s0 }
   0x2   :  { %22406 = sst [smem:[#allocation219_spill]] %s21391_s1 }
   0x3   :  { %22407 = sst [smem:[#allocation220_spill]] %s21392_s2 }
   0x4   :  { %22408 = sst [smem:[#allocation221_spill]] %s21393_s3 }
   0x5   :  { %24 = vsyncpa [#allocation8], 0 }
   0x6   :  { %25 = vsyncpa [#allocation10], 0 }
   0x7   :  { %26 = vsyncpa [#allocation13], 0 }
   0x8   :  { %27 = vsyncpa [#allocation16], 0 }
   0x9   :  { %28 = vsyncpa [#allocation19], 0  ;;  %s15152_s0 = smov [#allocation9]   ;;  %s15153_s20 = smov [#allocation12]  }
   0xa   :  { %s61_s30 = sshll.u32 %s15152_s0, 4  ;;  %s84_s21 = sshll.u32 %s15153_s20, 4  ;;  %s62_s30 = int_to_ptr.vmem [resolvable:$true] %s61_s30  ;;  %s15269_s21 = int_to_ptr.vmem [resolvable:$true] %s84_s21 }
   0xb   :  { %s14966_s2 = scalar_lea.hbm %s21399_s9, 64 }
   0xc   :  { %p14967_p0 = scmp.ne.s32.totalorder %s21399_s9, %s14966_s2  ;;  %p14970_p1 = scmp.lt.u32.totalorder %s14966_s2, %s21399_s9 }
   0xe   :  { %p14972_p2 = pnand %p14970_p1, %p14967_p0 }
  0x10   :  { %14975 = shalt.err (!%p14972_p2)
}
  0x11   :  { %s14976_s26 = scalar_lea.vmem %s62_s30, 64  ;;  %p14981_p4 = scmp.lt.s32.totalorder %s62_s30, %s62_s30 }
  0x12   :  { %p14977_p3 = scmp.ne.s32.totalorder %s62_s30, %s14976_s26  ;;  %p14982_p5 = scmp.lt.s32.totalorder %s14976_s26, %s14976_s26 }
  0x14   :  { %p14983_p6 = por %p14982_p5, %p14981_p4 }
  0x16   :  { %p14984_p7 = pnand %p14983_p6, %p14977_p3 }
  0x18   :  { %14987 = shalt.err (!%p14984_p7)
}
  0x19   :  { %64 = dma.hbm_to_vmem [thread:$0]  %s21399_s9, 64, %s62_s30, [#allocation10]  }
  0x1a   :  { %s14988_s20 = scalar_lea.hbm %s21403_s13, 16384 }
  0x1b   :  { %p14989_p8 = scmp.ne.s32.totalorder %s21403_s13, %s14988_s20  ;;  %p14992_p9 = scmp.lt.u32.totalorder %s14988_s20, %s21403_s13 }
  0x1d   :  { %p14994_p10 = pnand %p14992_p9, %p14989_p8 }
  0x1f   :  { %14997 = shalt.err (!%p14994_p10)
}
  0x20   :  { %s14998_s24 = scalar_lea.vmem %s15269_s21, 16384  ;;  %p15003_p12 = scmp.lt.s32.totalorder %s15269_s21, %s15269_s21 }
  0x21   :  { %p14999_p11 = scmp.ne.s32.totalorder %s15269_s21, %s14998_s24  ;;  %p15004_p13 = scmp.lt.s32.totalorder %s14998_s24, %s14998_s24 }
  0x23   :  { %p15005_p0 = por %p15004_p13, %p15003_p12 }
  0x25   :  { %p15006_p1 = pnand %p15005_p0, %p14999_p11 }
  0x27   :  { %15009 = shalt.err (!%p15006_p1)
}
  0x28   :  { %s15154_s9 = smov 512   ;;  %s15155_s30 = smov 32  }
  0x29   :  { %90 = dma.hbm_to_vmem [thread:$0]  %s21403_s13, 16384, %s15269_s21, [#allocation13], %s15154_s9, %s15154_s9, %s15155_s30  }
  0x2a   :  { %s15156_s26 = smov [#allocation15]   ;;  %s15010_s0 = scalar_lea.hbm %s21405_s15, 16384 }
  0x2b   :  { %s106_s27 = sshll.u32 %s15156_s26, 4  ;;  %p15011_p2 = scmp.ne.s32.totalorder %s21405_s15, %s15010_s0  ;;  %s107_s27 = int_to_ptr.vmem [resolvable:$true] %s106_s27 }
  0x2c   :  { %p15014_p3 = scmp.lt.u32.totalorder %s15010_s0, %s21405_s15 }
  0x2e   :  { %p15016_p4 = pnand %p15014_p3, %p15011_p2 }
  0x30   :  { %15019 = shalt.err (!%p15016_p4)
}
  0x31   :  { %s15020_s23 = scalar_lea.vmem %s107_s27, 16384  ;;  %p15025_p6 = scmp.lt.s32.totalorder %s107_s27, %s107_s27 }
  0x32   :  { %p15021_p5 = scmp.ne.s32.totalorder %s107_s27, %s15020_s23  ;;  %p15026_p7 = scmp.lt.s32.totalorder %s15020_s23, %s15020_s23 }
  0x34   :  { %p15027_p8 = por %p15026_p7, %p15025_p6 }
  0x36   :  { %p15028_p9 = pnand %p15027_p8, %p15021_p5 }
  0x38   :  { %15031 = shalt.err (!%p15028_p9)
}
  0x39   :  { %s15157_s13 = smov 256   ;;  %s15158_s21 = smov 16  }
  0x3a   :  { %112 = dma.hbm_to_vmem [thread:$0]  %s21405_s15, 16384, %s107_s27, [#allocation16], %s15157_s13, %s15157_s13, %s15158_s21  }
  0x3b   :  { %s15159_s25 = smov [#allocation7]   ;;  %s15160_s26 = smov [#allocation11]  }
  0x3c   :  { %s51_s3 = sshll.u32 %s15159_s25, 4  ;;  %s75_s28 = sshll.u32 %s15160_s26, 4  ;;  %s52_s3 = int_to_ptr.vmem [resolvable:$true] %s51_s3  ;;  %s76_s28 = int_to_ptr.vmem [resolvable:$true] %s75_s28 }
  0x3d   :  { %s15032_s20 = scalar_lea.hbm %s21398_s8, 16 }
  0x3e   :  { %p15033_p10 = scmp.ne.s32.totalorder %s21398_s8, %s15032_s20  ;;  %p15036_p11 = scmp.lt.u32.totalorder %s15032_s20, %s21398_s8 }
  0x40   :  { %p15038_p12 = pnand %p15036_p11, %p15033_p10 }
  0x42   :  { %15041 = shalt.err (!%p15038_p12)
}
  0x43   :  { %s15042_s15 = scalar_lea.vmem %s52_s3, 16  ;;  %s15046_s27 = scalar_lea.vmem %s52_s3, 32 }
  0x44   :  { %p15043_p13 = scmp.ne.s32.totalorder %s52_s3, %s15042_s15  ;;  %p15047_p0 = scmp.lt.s32.totalorder %s52_s3, %s52_s3 }
  0x45   :  { %p15048_p1 = scmp.lt.s32.totalorder %s15046_s27, %s15042_s15 }
  0x47   :  { %p15049_p2 = por %p15048_p1, %p15047_p0 }
  0x49   :  { %p15050_p3 = pnand %p15049_p2, %p15043_p13 }
  0x4b   :  { %15053 = shalt.err (!%p15050_p3)
}
  0x4c   :  { %54 = dma.hbm_to_vmem [thread:$0]  %s21398_s8, 16, %s52_s3, [#allocation8]  }
  0x4d   :  { %s15054_s25 = scalar_lea.hbm %s21402_s12, 32 }
  0x4e   :  { %p15055_p4 = scmp.ne.s32.totalorder %s21402_s12, %s15054_s25  ;;  %p15058_p5 = scmp.lt.u32.totalorder %s15054_s25, %s21402_s12 }
  0x50   :  { %p15060_p6 = pnand %p15058_p5, %p15055_p4 }
  0x52   :  { %15063 = shalt.err (!%p15060_p6)
}
  0x53   :  { %s15064_s1 = scalar_lea.vmem %s76_s28, 32  ;;  %p15069_p8 = scmp.lt.s32.totalorder %s76_s28, %s76_s28 }
  0x54   :  { %p15065_p7 = scmp.ne.s32.totalorder %s76_s28, %s15064_s1  ;;  %p15070_p9 = scmp.lt.s32.totalorder %s15064_s1, %s15064_s1 }
  0x56   :  { %p15071_p10 = por %p15070_p9, %p15069_p8 }
  0x58   :  { %p15072_p11 = pnand %p15071_p10, %p15065_p7 }
  0x5a   :  { %15075 = shalt.err (!%p15072_p11)
}
  0x5b   :  { %78 = dma.hbm_to_vmem [thread:$0]  %s21402_s12, 32, %s76_s28, [#allocation10]  }
  0x5c   :  { %s15161_s22 = smov [#allocation14]   ;;  %s15162_s23 = smov [#allocation17]  }
  0x5d   :  { %s97_s2 = sshll.u32 %s15161_s22, 4  ;;  %s120_s15 = sshll.u32 %s15162_s23, 4  ;;  %s98_s2 = int_to_ptr.vmem [resolvable:$true] %s97_s2  ;;  %s121_s15 = int_to_ptr.vmem [resolvable:$true] %s120_s15 }
  0x5e   :  { %s15076_s21 = scalar_lea.hbm %s21404_s14, 64 }
  0x5f   :  { %p15077_p12 = scmp.ne.s32.totalorder %s21404_s14, %s15076_s21  ;;  %p15080_p13 = scmp.lt.u32.totalorder %s15076_s21, %s21404_s14 }
  0x61   :  { %p15082_p0 = pnand %p15080_p13, %p15077_p12 }
  0x63   :  { %15085 = shalt.err (!%p15082_p0)
}
  0x64   :  { %s15086_s12 = scalar_lea.vmem %s98_s2, 64  ;;  %p15091_p2 = scmp.lt.s32.totalorder %s98_s2, %s98_s2 }
  0x65   :  { %p15087_p1 = scmp.ne.s32.totalorder %s98_s2, %s15086_s12  ;;  %p15092_p3 = scmp.lt.s32.totalorder %s15086_s12, %s15086_s12 }
  0x67   :  { %p15093_p4 = por %p15092_p3, %p15091_p2 }
  0x69   :  { %p15094_p5 = pnand %p15093_p4, %p15087_p1 }
  0x6b   :  { %15097 = shalt.err (!%p15094_p5)
}
  0x6c   :  { %100 = dma.hbm_to_vmem [thread:$0]  %s21404_s14, 64, %s98_s2, [#allocation13]  }
  0x6d   :  { %s15098_s1 = scalar_lea.hbm %s21407_s17, 4096 }
  0x6e   :  { %p15099_p6 = scmp.ne.s32.totalorder %s21407_s17, %s15098_s1  ;;  %p15102_p7 = scmp.lt.u32.totalorder %s15098_s1, %s21407_s17 }
  0x70   :  { %p15104_p8 = pnand %p15102_p7, %p15099_p6 }
  0x72   :  { %15107 = shalt.err (!%p15104_p8)
}
  0x73   :  { %s15108_s27 = scalar_lea.vmem %s121_s15, 4096  ;;  %p15113_p10 = scmp.lt.s32.totalorder %s121_s15, %s121_s15 }
  0x74   :  { %p15109_p9 = scmp.ne.s32.totalorder %s121_s15, %s15108_s27  ;;  %p15114_p11 = scmp.lt.s32.totalorder %s15108_s27, %s15108_s27 }
  0x76   :  { %p15115_p12 = por %p15114_p11, %p15113_p10 }
  0x78   :  { %p15116_p13 = pnand %p15115_p12, %p15109_p9 }
  0x7a   :  { %15119 = shalt.err (!%p15116_p13)
}
  0x7b   :  { %s15163_s14 = smov 128   ;;  %s15164_s2 = smov 8  }
  0x7c   :  { %126 = dma.hbm_to_vmem [thread:$0]  %s21407_s17, 4096, %s121_s15, [#allocation16], %s15163_s14, %s15163_s14, %s15164_s2  }
  0x7d   :  { %s15165_s24 = smov [#allocation18]   ;;  %s15120_s12 = scalar_lea.hbm %s21408_s18, 16 }
  0x7e   :  { %s133_s9 = sshll.u32 %s15165_s24, 4  ;;  %p15121_p0 = scmp.ne.s32.totalorder %s21408_s18, %s15120_s12  ;;  %s134_s9 = int_to_ptr.vmem [resolvable:$true] %s133_s9 }
  0x7f   :  { %p15124_p1 = scmp.lt.u32.totalorder %s15120_s12, %s21408_s18 }
  0x81   :  { %p15126_p2 = pnand %p15124_p1, %p15121_p0 }
  0x83   :  { %15129 = shalt.err (!%p15126_p2)
}
  0x84   :  { %s15130_s1 = scalar_lea.vmem %s134_s9, 16  ;;  %s15134_s17 = scalar_lea.vmem %s134_s9, 32 }
  0x85   :  { %p15131_p3 = scmp.ne.s32.totalorder %s134_s9, %s15130_s1  ;;  %p15135_p4 = scmp.lt.s32.totalorder %s134_s9, %s134_s9 }
  0x86   :  { %p15136_p5 = scmp.lt.s32.totalorder %s15134_s17, %s15130_s1 }
  0x88   :  { %p15137_p6 = por %p15136_p5, %p15135_p4 }
  0x8a   :  { %p15138_p7 = pnand %p15137_p6, %p15131_p3 }
  0x8c   :  { %15141 = shalt.err (!%p15138_p7)
}
  0x8d   :  { %136 = dma.hbm_to_vmem [thread:$0]  %s21408_s18, 16, %s134_s9, [#allocation19]  }
  0x8e   :  { %15142 = dma.done.wait [#allocation8], 16  }
  0x8f   :  { %15143 = vsyncadd [#allocation8], 4294967280 }
  0x90   :  { %15144 = dma.done.wait [#allocation10], 96  }
  0x91   :  { %15145 = vsyncadd [#allocation10], 4294967200 }
  0x92   :  { %15146 = dma.done.wait [#allocation13], 16448  }
  0x93   :  { %15147 = vsyncadd [#allocation13], 4294950848 }
  0x94   :  { %15148 = dma.done.wait [#allocation16], 20480  }
  0x95   :  { %15149 = vsyncadd [#allocation16], 4294946816 }
  0x96   :  { %15150 = dma.done.wait [#allocation19], 16  }
  0x97   :  { %15151 = vsyncadd [#allocation19], 4294967280  ;;  %vm235_vm0 = vcmask 1040384   ;;  %vm186_vm1 = vcmask 72704   ;;  %s22409_s23 = sld [smem:[#allocation219_spill]]  ;;  %s22410_s13 = sld [smem:[#allocation218_spill]] }
  0x98   :  { %vm1415_vm2 = vcmask 253952   ;;  %s22411_s1 = sld [smem:[#allocation221_spill]]  ;;  %s22412_s22 = sld [smem:[#allocation220_spill]]  ;;  %vm1359_vm3 = vcmask 261120   ;;  %vm1611_vm7 = vcmask 523264   ;;  %vm1639_vm8 = vcmask 785408  }
  0x99   :  { %vm2589_vm10 = vcmask 516096  }
  0x9d   :  { %v177_v0 = vld [vmem:[%s22409_s23] sm:$0xff]  ;;  %v178_v1 = vld [vmem:[%s22409_s23 + $0x8] sm:$0x1]  ;;  %v163_v7 = vld [vmem:[%s22410_s13 + $0x10] sm:$0xff] }
  0x9e   :  { %v161_v2 = vld [vmem:[%s22410_s13] sm:$0xff]  ;;  %v237_v3 = vsel %vm235_vm0, %v178_v1, 0  ;;  %v240_v4 = vand.u32 4294901760, %v177_v0  ;;  %v162_v6 = vld [vmem:[%s22410_s13 + $0x8] sm:$0xff]  ;;  %v164_v8 = vld [vmem:[%s22410_s13 + $0x18] sm:$0xff]  ;;  %v194_v12 = vsel %vm186_vm1, %v163_v7, 0 }
  0x9f   :  { %v188_v5 = vsel %vm186_vm1, %v161_v2, 0  ;;  %v243_v9 = vand.u32 4294901760, %v237_v3  ;;  %v191_v11 = vsel %vm186_vm1, %v162_v6, 0  ;;  %v165_v13 = vld [vmem:[%s22410_s13 + $0x20] sm:$0xff]  ;;  %v15403_v16 = vand.u32 4294901760, %v194_v12  ;;  %v166_v22 = vld [vmem:[%s22410_s13 + $0x28] sm:$0xff] }
  0xa0   :  { %v15392_v10 = vand.u32 4294901760, %v188_v5  ;;  %v15399_v14 = vand.u32 4294901760, %v191_v11  ;;  %v15401_v15 = vsub.f32 %v177_v0, %v240_v4  ;;  %v197_v17 = vsel %vm186_vm1, %v164_v8, 0  ;;  %v167_v39 = vld [vmem:[%s22410_s13 + $0x30] sm:$0xff]  ;;  %v168_v48 = vld [vmem:[%s22410_s13 + $0x38] sm:$0xff]  ;;  %v169_v49 = vld [vmem:[%s22410_s13 + $0x40] sm:$0xff] }
  0xa1   :  { %v15406_v18 = vpack.c.bf16 %v243_v9, %v240_v4  ;;  %v15411_v20 = vsub.f32 %v237_v3, %v243_v9  ;;  %v15413_v21 = vand.u32 4294901760, %v197_v17  ;;  %v15423_v25 = vsub.f32 %v194_v12, %v15403_v16  ;;  %v170_v50 = vld [vmem:[%s22410_s13 + $0x48] sm:$0xff]  ;;  %v171_v59 = vld [vmem:[%s22410_s13 + $0x50] sm:$0xff]  ;;  %v172_v60 = vld [vmem:[%s22410_s13 + $0x58] sm:$0xff] }
  0xa2   :  { %v15409_v19 = vsub.f32 %v188_v5, %v15392_v10  ;;  %v15419_v23 = vsub.f32 %v191_v11, %v15399_v14  ;;  %v469_v24 = vand.u32 4294901760, %v15401_v15  ;;  %v200_v26 = vsel %vm186_vm1, %v165_v13, 0  ;;  %v173_v5 = vld [vmem:[%s22410_s13 + $0x60] sm:$0xff] }
  0xa3   :  { %12443 = vmatprep.subr.bf16.mxu0 %v15406_v18  ;;  %v476_v28 = vand.u32 4294901760, %v15411_v20  ;;  %v15430_v29 = vsub.f32 %v197_v17, %v15413_v21  ;;  %v15432_v30 = vand.u32 4294901760, %v200_v26  ;;  %v328_v33 = vand.u32 4294901760, %v15423_v25 }
  0xa4   :  { %v308_v27 = vand.u32 4294901760, %v15409_v19  ;;  %12445 = vmatpush3.bf16.msra.mxu0 %v15406_v18  ;;  %v318_v31 = vand.u32 4294901760, %v15419_v23  ;;  %v470_v32 = vsub.f32 %v15401_v15, %v469_v24  ;;  %v203_v34 = vsel %vm186_vm1, %v166_v22, 0  ;;  %v174_v22 = vld [vmem:[%s22410_s13 + $0x68] sm:$0xff] }
  0xa5   :  { %v477_v36 = vsub.f32 %v15411_v20, %v476_v28  ;;  %v338_v37 = vand.u32 4294901760, %v15430_v29  ;;  %v15449_v38 = vsub.f32 %v200_v26, %v15432_v30  ;;  %v329_v42 = vsub.f32 %v15423_v25, %v328_v33 }
  0xa6   :  { %v309_v35 = vsub.f32 %v15409_v19, %v308_v27  ;;  %v319_v40 = vsub.f32 %v15419_v23, %v318_v31  ;;  %v471_v41 = vand.u32 4294901760, %v470_v32  ;;  %v15460_v43 = vand.u32 4294901760, %v203_v34 }
  0xa7   :  { %v478_v45 = vand.u32 4294901760, %v477_v36  ;;  %v339_v46 = vsub.f32 %v15430_v29, %v338_v37  ;;  %v348_v47 = vand.u32 4294901760, %v15449_v38  ;;  %v330_v52 = vand.u32 4294901760, %v329_v42 }
  0xa8   :  { %v310_v44 = vand.u32 4294901760, %v309_v35  ;;  %v320_v51 = vand.u32 4294901760, %v319_v40  ;;  %v15476_v53 = vsub.f32 %v203_v34, %v15460_v43  ;;  %v206_v54 = vsel %vm186_vm1, %v167_v39, 0 }
  0xa9   :  { %v12446_v55 = vpack.c.bf16 %v478_v45, %v471_v41  ;;  %v340_v56 = vand.u32 4294901760, %v339_v46  ;;  %v349_v57 = vsub.f32 %v15449_v38, %v348_v47  ;;  %v15482_v58 = vand.u32 4294901760, %v206_v54 }
  0xaa   :  { %11930 = vmatprep.mubr.f32.mxu0 %v310_v44  ;;  %v358_v61 = vand.u32 4294901760, %v15476_v53  ;;  %v209_v62 = vsel %vm186_vm1, %v168_v48, 0  ;;  %v212_v63 = vsel %vm186_vm1, %v169_v49, 0  ;;  %v215_v0 = vsel %vm186_vm1, %v170_v50, 0  ;;  %v175_v48 = vld [vmem:[%s22410_s13 + $0x70] sm:$0xff] }
  0xab   :  { %11931 = vmatmul.mubr.f32.vlgmr.msra.gmra.mrb[0].mxu0 %v320_v51  ;;  %12447 = vmatprep.subr.bf16.mxu0 %v12446_v55  ;;  %v350_v1 = vand.u32 4294901760, %v349_v57  ;;  %v15495_v2 = vsub.f32 %v206_v54, %v15482_v58  ;;  %v15497_v3 = vand.u32 4294901760, %v209_v62  ;;  %v15499_v4 = vand.u32 4294901760, %v212_v63 }
  0xac   :  { %11933 = vmatprep.mubr.f32.mxu0 %v330_v52  ;;  %12449 = vmatpush3.bf16.msra.mxu0 %v12446_v55  ;;  %v359_v6 = vsub.f32 %v15476_v53, %v358_v61  ;;  %v15507_v7 = vand.u32 4294901760, %v215_v0  ;;  %v218_v8 = vsel %vm186_vm1, %v171_v59, 0  ;;  %v221_v9 = vsel %vm186_vm1, %v172_v60, 0  ;;  %v176_v59 = vld [vmem:[%s22410_s13 + $0x78] sm:$0xff] }
  0xad   :  { %v368_v11 = vand.u32 4294901760, %v15495_v2  ;;  %v15513_v12 = vsub.f32 %v209_v62, %v15497_v3  ;;  %v15516_v13 = vsub.f32 %v212_v63, %v15499_v4  ;;  %v15518_v17 = vand.u32 4294901760, %v218_v8 }
  0xae   :  { %v360_v26 = vand.u32 4294901760, %v359_v6  ;;  %v15524_v32 = vsub.f32 %v215_v0, %v15507_v7  ;;  %v15526_v34 = vand.u32 4294901760, %v221_v9  ;;  %v224_v35 = vsel %vm186_vm1, %v173_v5, 0 }
  0xaf   :  { %11934 = vmatmul.mubr.f32.gmra.mrb[2].mxu0 %v340_v56  ;;  %v369_v36 = vsub.f32 %v15495_v2, %v368_v11  ;;  %v378_v39 = vand.u32 4294901760, %v15513_v12  ;;  %v388_v40 = vand.u32 4294901760, %v15516_v13  ;;  %v15535_v41 = vsub.f32 %v218_v8, %v15518_v17 }
  0xb0   :  { %11936 = vmatprep.mubr.f32.mxu0 %v350_v1  ;;  %v398_v42 = vand.u32 4294901760, %v15524_v32  ;;  %v15539_v44 = vsub.f32 %v221_v9, %v15526_v34  ;;  %v15541_v45 = vand.u32 4294901760, %v224_v35  ;;  %v227_v46 = vsel %vm186_vm1, %v174_v22, 0 }
  0xb1   :  { %v370_v49 = vand.u32 4294901760, %v369_v36  ;;  %v379_v50 = vsub.f32 %v15513_v12, %v378_v39  ;;  %v389_v51 = vsub.f32 %v15516_v13, %v388_v40  ;;  %v408_v52 = vand.u32 4294901760, %v15535_v41 }
  0xb2   :  { %v399_v54 = vsub.f32 %v15524_v32, %v398_v42  ;;  %v418_v55 = vand.u32 4294901760, %v15539_v44  ;;  %v15559_v56 = vsub.f32 %v224_v35, %v15541_v45  ;;  %v15561_v57 = vand.u32 4294901760, %v227_v46 }
  0xb3   :  { %11937 = vmatmul.mubr.f32.gmra.mrb[4].mxu0 %v360_v26  ;;  %v380_v60 = vand.u32 4294901760, %v379_v50  ;;  %v390_v62 = vand.u32 4294901760, %v389_v51  ;;  %v409_v63 = vsub.f32 %v15535_v41, %v408_v52  ;;  %v230_v0 = vsel %vm186_vm1, %v175_v48, 0 }
  0xb4   :  { %11939 = vmatprep.mubr.f32.mxu0 %v370_v49  ;;  %v428_v1 = vand.u32 4294901760, %v15559_v56  ;;  %v15572_v5 = vsub.f32 %v227_v46, %v15561_v57  ;;  %v15574_v6 = vand.u32 4294901760, %v230_v0  ;;  %v233_v8 = vsel %vm186_vm1, %v176_v59, 0 }
  0xb5   :  { %v12450_v9 = vpack.c.bf16 %v15411_v20, %v15401_v15  ;;  %v400_v22 = vand.u32 4294901760, %v399_v54  ;;  %v419_v26 = vsub.f32 %v15539_v44, %v418_v55  ;;  %v15583_v36 = vand.u32 4294901760, %v233_v8 }
  0xb6   :  { %v438_v35 = vand.u32 4294901760, %v15572_v5  ;;  %v410_v46 = vand.u32 4294901760, %v409_v63  ;;  %v429_v48 = vsub.f32 %v15559_v56, %v428_v1  ;;  %v15589_v49 = vsub.f32 %v230_v0, %v15574_v6 }
  0xb7   :  { %11940 = vmatmul.mubr.f32.gmra.mrb[6].mxu0 %v380_v60  ;;  %12451 = vmatprep.subr.bf16.mxu0 %v12450_v9  ;;  %v12458_v50 = vpack.c.bf16 %v476_v28, %v469_v24  ;;  %v15596_v51 = vsub.f32 %v233_v8, %v15583_v36  ;;  %v420_v59 = vand.u32 4294901760, %v419_v26  ;;  %v15799_v8 = vld [vmem:[%s22411_s1 + $0x38] sm:$0xff] }
  0xb8   :  { %11942 = vmatprep.mubr.f32.mxu0 %v390_v62  ;;  %v448_v54 = vand.u32 4294901760, %v15589_v49  ;;  %v439_v60 = vsub.f32 %v15572_v5, %v438_v35  ;;  %v430_v63 = vand.u32 4294901760, %v429_v48  ;;  %v1686_v26 = vand.u32 4294901760, %v15799_v8 }
  0xb9   :  { %v458_v62 = vand.u32 4294901760, %v15596_v51 }
  0xba   :  { %v449_v15 = vsub.f32 %v15589_v49, %v448_v54  ;;  %v440_v20 = vand.u32 4294901760, %v439_v60  ;;  %v15819_v60 = vld [vmem:[%s22411_s1 + $0x40] sm:$0xff] }
  0xbb   :  { %11943 = vmatmul.mubr.f32.gmra.mrb[8].mxu0 %v400_v22  ;;  %v459_v24 = vsub.f32 %v15596_v51, %v458_v62 }
  0xbc   :  { %11945 = vmatprep.mubr.f32.mxu0 %v410_v46  ;;  %v450_v28 = vand.u32 4294901760, %v449_v15  ;;  %v1689_v15 = vand.u32 4294901760, %v15819_v60 }
  0xbd   :  { %v460_v0 = vand.u32 4294901760, %v459_v24 }
  0xbf   :  { %11946 = vmatmul.mubr.f32.gmra.mrb[10].mxu0 %v420_v59 }
  0xc0   :  { %11948 = vmatprep.mubr.f32.mxu0 %v430_v63 }
  0xc3   :  { %11949 = vmatmul.mubr.f32.gmra.mrb[12].mxu0 %v440_v20 }
  0xc4   :  { %11951 = vmatprep.mubr.f32.mxu0 %v450_v28 }
  0xc7   :  { %11952 = vmatmul.mubr.f32.gmra.mrb[14].mxu0 %v460_v0  ;;  %v21413_v0 = vlaneseq }
  0xc8   :  { %11958 = vmatprep.mubr.f32.mxu0 %v15392_v10 }
  0xcb   :  { %11959 = vmatmul.mubr.f32.vlgmr.msra.gmra.mrb[0].mxu0 %v15399_v14 }
  0xcc   :  { %12453 = vmatpush3.bf16.msra.mxu0 %v12450_v9  ;;  %11961 = vmatprep.mubr.f32.mxu0 %v15403_v16 }
  0xcd   :  { %12455 = vmatprep.subr.bf16.mxu0 %v15406_v18 }
  0xcf   :  { %11962 = vmatmul.mubr.f32.gmra.mrb[2].mxu0 %v15413_v21 }
  0xd0   :  { %11964 = vmatprep.mubr.f32.mxu0 %v15432_v30 }
  0xd3   :  { %11965 = vmatmul.mubr.f32.gmra.mrb[4].mxu0 %v15460_v43 }
  0xd4   :  { %11967 = vmatprep.mubr.f32.mxu0 %v15482_v58 }
  0xd7   :  { %11968 = vmatmul.mubr.f32.gmra.mrb[6].mxu0 %v15497_v3 }
  0xd8   :  { %11970 = vmatprep.mubr.f32.mxu0 %v15499_v4 }
  0xdb   :  { %11971 = vmatmul.mubr.f32.gmra.mrb[8].mxu0 %v15507_v7 }
  0xdc   :  { %11973 = vmatprep.mubr.f32.mxu0 %v15518_v17 }
  0xdf   :  { %11974 = vmatmul.mubr.f32.gmra.mrb[10].mxu0 %v15526_v34 }
  0xe0   :  { %11976 = vmatprep.mubr.f32.mxu0 %v15541_v45 }
  0xe3   :  { %11977 = vmatmul.mubr.f32.gmra.mrb[12].mxu0 %v15561_v57 }
  0xe4   :  { %11979 = vmatprep.mubr.f32.mxu0 %v15574_v6 }
  0xe7   :  { %11980 = vmatmul.mubr.f32.gmra.mrb[14].mxu0 %v15583_v36 }
  0xe8   :  { %11986 = vmatprep.mubr.f32.mxu0 %v15409_v19 }
  0xeb   :  { %11987 = vmatmul.mubr.f32.vlgmr.msra.gmra.mrb[0].mxu0 %v15419_v23  ;;  %v15737_v23 = vld [vmem:[%s22412_s22] ss:$0 sm:$0xff] }
  0xec   :  { %12457 = vmatpush3.bf16.msra.mxu0 %v15406_v18  ;;  %11989 = vmatprep.mubr.f32.mxu0 %v15423_v25 }
  0xed   :  { %12459 = vmatprep.subr.bf16.mxu0 %v12458_v50 }
  0xef   :  { %11990 = vmatmul.mubr.f32.gmra.mrb[2].mxu0 %v15430_v29 }
  0xf0   :  { %11992 = vmatprep.mubr.f32.mxu0 %v15449_v38 }
  0xf3   :  { %11993 = vmatmul.mubr.f32.gmra.mrb[4].mxu0 %v15476_v53  ;;  %v15748_v53 = vld [vmem:[%s22411_s1 + $0x10] sm:$0xff] }
  0xf4   :  { %11995 = vmatprep.mubr.f32.mxu0 %v15495_v2  ;;  %v1671_v2 = vand.u32 4294901760, %v15748_v53 }
  0xf7   :  { %11996 = vmatmul.mubr.f32.gmra.mrb[6].mxu0 %v15513_v12 }
  0xf8   :  { %11998 = vmatprep.mubr.f32.mxu0 %v15516_v13 }
  0xfb   :  { %11999 = vmatmul.mubr.f32.gmra.mrb[8].mxu0 %v15524_v32  ;;  %v15770_v32 = vld [vmem:[%s22411_s1 + $0x20] sm:$0xff] }
  0xfc   :  { %12001 = vmatprep.mubr.f32.mxu0 %v15535_v41 }
  0xff   :  { %12002 = vmatmul.mubr.f32.gmra.mrb[10].mxu0 %v15539_v44 }
 0x100   :  { %12004 = vmatprep.mubr.f32.mxu0 %v15559_v56 }
 0x103   :  { %12005 = vmatmul.mubr.f32.gmra.mrb[12].mxu0 %v15572_v5 }
 0x104   :  { %12007 = vmatprep.mubr.f32.mxu0 %v15589_v49 }
 0x107   :  { %12008 = vmatmul.mubr.f32.gmra.mrb[14].mxu0 %v15596_v51 }
 0x108   :  { %12014 = vmatprep.mubr.f32.mxu0 %v308_v27 }
 0x10b   :  { %12015 = vmatmul.mubr.f32.vlgmr.msra.gmra.mrb[0].mxu0 %v318_v31 }
 0x10c   :  { %12461 = vmatpush3.bf16.msra.mxu0 %v12458_v50  ;;  %12017 = vmatprep.mubr.f32.mxu0 %v328_v33 }
 0x10d   :  { %12463 = vmatprep.subr.bf16.mxu0 %v15406_v18 }
 0x10f   :  { %12018 = vmatmul.mubr.f32.gmra.mrb[2].mxu0 %v338_v37 }
 0x110   :  { %12020 = vmatprep.mubr.f32.mxu0 %v348_v47 }
 0x113   :  { %12021 = vmatmul.mubr.f32.gmra.mrb[4].mxu0 %v358_v61 }
 0x114   :  { %12023 = vmatprep.mubr.f32.mxu0 %v368_v11 }
 0x117   :  { %12024 = vmatmul.mubr.f32.gmra.mrb[6].mxu0 %v378_v39 }
 0x118   :  { %12026 = vmatprep.mubr.f32.mxu0 %v388_v40  ;;  %v1677_v40 = vand.u32 4294901760, %v15770_v32 }
 0x11b   :  { %12027 = vmatmul.mubr.f32.gmra.mrb[8].mxu0 %v398_v42 }
 0x11c   :  { %12029 = vmatprep.mubr.f32.mxu0 %v408_v52 }
 0x11f   :  { %12030 = vmatmul.mubr.f32.gmra.mrb[10].mxu0 %v418_v55 }
 0x120   :  { %12032 = vmatprep.mubr.f32.mxu0 %v428_v1 }
 0x123   :  { %12033 = vmatmul.mubr.f32.gmra.mrb[12].mxu0 %v438_v35 }
 0x124   :  { %12035 = vmatprep.mubr.f32.mxu0 %v448_v54 }
 0x127   :  { %12036 = vmatmul.mubr.f32.gmra.mrb[14].mxu0 %v458_v62  ;;  %v15824_v62 = vld [vmem:[%s22411_s1 + $0x48] sm:$0xff] }
 0x128   :  { %12042 = vmatprep.mubr.f32.mxu0 %v15392_v10  ;;  %v1692_v20 = vand.u32 4294901760, %v15824_v62 }
 0x12b   :  { %12043 = vmatmul.mubr.f32.vlgmr.msra.gmra.mrb[0].mxu0 %v15399_v14 }
 0x12c   :  { %12465 = vmatpush3.bf16.msra.mxu0 %v15406_v18  ;;  %12045 = vmatprep.mubr.f32.mxu0 %v15403_v16 }
 0x12f   :  { %12046 = vmatmul.mubr.f32.gmra.mrb[2].mxu0 %v15413_v21 }
 0x130   :  { %12048 = vmatprep.mubr.f32.mxu0 %v15432_v30 }
 0x133   :  { %12049 = vmatmul.mubr.f32.gmra.mrb[4].mxu0 %v15460_v43 }
 0x134   :  { %12051 = vmatprep.mubr.f32.mxu0 %v15482_v58 }
 0x137   :  { %12052 = vmatmul.mubr.f32.gmra.mrb[6].mxu0 %v15497_v3 }
 0x138   :  { %12054 = vmatprep.mubr.f32.mxu0 %v15499_v4 }
 0x13b   :  { %12055 = vmatmul.mubr.f32.gmra.mrb[8].mxu0 %v15507_v7 }
 0x13c   :  { %12057 = vmatprep.mubr.f32.mxu0 %v15518_v17 }
 0x13f   :  { %12058 = vmatmul.mubr.f32.gmra.mrb[10].mxu0 %v15526_v34 }
 0x140   :  { %12060 = vmatprep.mubr.f32.mxu0 %v15541_v45 }
 0x143   :  { %12061 = vmatmul.mubr.f32.gmra.mrb[12].mxu0 %v15561_v57 }
 0x144   :  { %12063 = vmatprep.mubr.f32.mxu0 %v15574_v6 }
 0x147   :  { %12064 = vmatmul.mubr.f32.gmra.mrb[14].mxu0 %v15583_v36 }
 0x148   :  { %12070 = vmatprep.mubr.f32.mxu0 %v15392_v10  ;;  %v21414_v10 = vmov 0.0  }
 0x149   :  { %1417 = vst.msk [vmem:[#allocation3 + $0x48] sm:$0x1] %vm1415_vm2, %v21414_v10  ;;  %1416 = vst.msk [vmem:[#allocation3 + $0x7] sm:$0x1] %vm1415_vm2, %v21414_v10 }
 0x14a   :  { %3381 = vst [vmem:[#allocation6 + $0x7] sm:$0x1] %v21414_v10  ;;  %3382 = vst [vmem:[#allocation6 + $0x28] sm:$0x1] %v21414_v10 }
 0x14b   :  { %12071 = vmatmul.mubr.f32.vlgmr.msra.gmra.mrb[0].mxu0 %v15399_v14  ;;  %v15717_v14 = vld [vmem:[%s22411_s1] sm:$0xff] }
 0x14c   :  { %12073 = vmatprep.mubr.f32.mxu0 %v15403_v16  ;;  %v15722_v16 = vld [vmem:[%s22411_s1 + $0x8] sm:$0xff]  ;;  %v1665_v18 = vand.u32 4294901760, %v15717_v14 }
 0x14d   :  { %v1668_v19 = vand.u32 4294901760, %v15722_v16 }
 0x14f   :  { %12074 = vmatmul.mubr.f32.gmra.mrb[2].mxu0 %v15413_v21  ;;  %v15730_v21 = vpack.c.bf16 %v1668_v19, %v1665_v18 }
 0x150   :  { %12076 = vmatprep.mubr.f32.mxu0 %v15432_v30 }
 0x151   :  { %12467 = vmatprep.subr.bf16.mxu1 %v15730_v21 }
 0x152   :  { %12469 = vmatpush3.bf16.msra.mxu1 %v15730_v21 }
 0x153   :  { %12077 = vmatmul.mubr.f32.gmra.mrb[4].mxu0 %v15460_v43 }
 0x154   :  { %12079 = vmatprep.mubr.f32.mxu0 %v15482_v58  ;;  %v15753_v58 = vld [vmem:[%s22411_s1 + $0x18] sm:$0xff] }
 0x157   :  { %12080 = vmatmul.mubr.f32.gmra.mrb[6].mxu0 %v15497_v3  ;;  %v1674_v3 = vand.u32 4294901760, %v15753_v58 }
 0x158   :  { %12082 = vmatprep.mubr.f32.mxu0 %v15499_v4 }
 0x159   :  { %v15763_v13 = vpack.c.bf16 %v1674_v3, %v1671_v2 }
 0x15b   :  { %12083 = vmatmul.mubr.f32.gmra.mrb[8].mxu0 %v15507_v7  ;;  %12471 = vmatprep.subr.bf16.mxu1 %v15763_v13 }
 0x15c   :  { %12085 = vmatprep.mubr.f32.mxu0 %v15518_v17  ;;  %12473 = vmatpush3.bf16.msra.mxu1 %v15763_v13 }
 0x15f   :  { %12086 = vmatmul.mubr.f32.gmra.mrb[10].mxu0 %v15526_v34  ;;  %v15775_v34 = vld [vmem:[%s22411_s1 + $0x28] sm:$0xff] }
 0x160   :  { %12088 = vmatprep.mubr.f32.mxu0 %v15541_v45  ;;  %v1680_v44 = vand.u32 4294901760, %v15775_v34 }
 0x162   :  { %v15789_v5 = vpack.c.bf16 %v1680_v44, %v1677_v40 }
 0x163   :  { %12089 = vmatmul.mubr.f32.gmra.mrb[12].mxu0 %v15561_v57 }
 0x164   :  { %12091 = vmatprep.mubr.f32.mxu0 %v15574_v6  ;;  %v15794_v6 = vld [vmem:[%s22411_s1 + $0x30] sm:$0xff]  ;;  %12475 = vmatprep.subr.bf16.mxu1 %v15789_v5 }
 0x165   :  { %v1683_v22 = vand.u32 4294901760, %v15794_v6  ;;  %12477 = vmatpush3.bf16.msra.mxu1 %v15789_v5 }
 0x167   :  { %12092 = vmatmul.mubr.f32.gmra.mrb[14].mxu0 %v15583_v36  ;;  %v15812_v51 = vpack.c.bf16 %v1686_v26, %v1683_v22 }
 0x168   :  { %3595 = vmatprep.mubr.f32.mxu0 %v21414_v10 }
 0x169   :  { %12479 = vmatprep.subr.bf16.mxu1 %v15812_v51 }
 0x16a   :  { %12481 = vmatpush3.bf16.msra.mxu1 %v15812_v51 }
 0x21e   :  { %v12072_v25 = vpop.f32.mrb[0].mxu0 }
 0x21f   :  { %v14674_v27 = vadd.f32 %v12072_v25, %v15737_v23  ;;  %v1249_v29 = vpop.f32.mrb[1].mxu0 }
 0x220   :  { %v14675_v30 = vadd.f32 %v15737_v23, %v1249_v29 }
 0x221   :  { %v1344_v31 = vmax.f32 %v14674_v27, 0.0 }
 0x222   :  { %v1343_v33 = vmax.f32 %v14675_v30, 0.0  ;;  %v12075_v37 = vpop.f32.mrb[2].mxu0 }
 0x223   :  { %1361 = vst.msk [vmem:[#allocation2 + $0x8] sm:$0xff] %vm1359_vm3, %v1344_v31  ;;  %v14676_v38 = vadd.f32 %v12075_v37, %v15737_v23  ;;  %v1261_v43 = vpop.f32.mrb[3].mxu0  ;;  %v15837_v31 = vpack.c.bf16 %v1692_v20, %v1689_v15 }
 0x224   :  { %1360 = vst.msk [vmem:[#allocation2] sm:$0xff] %vm1359_vm3, %v1343_v33  ;;  %v14677_v47 = vadd.f32 %v15737_v23, %v1261_v43  ;;  %v15849_v43 = vld [vmem:[%s22411_s1 + $0x58] sm:$0xff] }
 0x225   :  { %v1346_v61 = vmax.f32 %v14676_v38, 0.0  ;;  %v15844_v38 = vld [vmem:[%s22411_s1 + $0x50] sm:$0xff]  ;;  %12483 = vmatprep.subr.bf16.mxu1 %v15837_v31  ;;  %s15167_s1 = smov 64  }
 0x226   :  { %v1345_v4 = vmax.f32 %v14677_v47, 0.0  ;;  %v12078_v7 = vpop.f32.mrb[4].mxu0  ;;  %12485 = vmatpush3.bf16.msra.mxu1 %v15837_v31 }
 0x227   :  { %1363 = vst.msk [vmem:[#allocation2 + $0x18] sm:$0xff] %vm1359_vm3, %v1346_v61  ;;  %v14678_v11 = vadd.f32 %v12078_v7, %v15737_v23  ;;  %v1273_v12 = vpop.f32.mrb[5].mxu0  ;;  %v1698_v7 = vand.u32 4294901760, %v15849_v43 }
 0x228   :  { %1362 = vst.msk [vmem:[#allocation2 + $0x10] sm:$0xff] %vm1359_vm3, %v1345_v4  ;;  %v14679_v17 = vadd.f32 %v15737_v23, %v1273_v12  ;;  %v1695_v4 = vand.u32 4294901760, %v15844_v38 }
 0x229   :  { %v1348_v39 = vmax.f32 %v14678_v11, 0.0 }
 0x22a   :  { %v1347_v41 = vmax.f32 %v14679_v17, 0.0  ;;  %v12081_v42 = vpop.f32.mrb[6].mxu0  ;;  %v15857_v17 = vshrl.u32 %v21413_v0, 7 }
 0x22b   :  { %1365 = vst.msk [vmem:[#allocation2 + $0x28] sm:$0xff] %vm1359_vm3, %v1348_v39  ;;  %v14680_v45 = vadd.f32 %v12081_v42, %v15737_v23  ;;  %v1285_v52 = vpop.f32.mrb[7].mxu0  ;;  %v1376_v55 = vld [vmem:[#allocation2] ss:$2 sm:$0xff]  ;;  %v1392_v56 = vld [vmem:[#allocation2 + $0x1] ss:$2 sm:$0xff] }
 0x22c   :  { %1364 = vst.msk [vmem:[#allocation2 + $0x20] sm:$0xff] %vm1359_vm3, %v1347_v41  ;;  %v14681_v57 = vadd.f32 %v15737_v23, %v1285_v52  ;;  %v1407_v1 = vmax.f32 %v1376_v55, %v1392_v56  ;;  %22413 = vst [vmem:[#allocation25_spill] sm:$0xff] %v15857_v17  ;;  %v15866_v52 = vpack.c.bf16 %v1698_v7, %v1695_v4  ;;  %vm1435_vm6 = vcmp.eq.s32.totalorder %v15857_v17, 0 }
 0x22d   :  { %v1350_v9 = vmax.f32 %v14680_v45, 0.0 }
 0x22e   :  { %v1349_v35 = vmax.f32 %v14681_v57, 0.0  ;;  %v12084_v36 = vpop.f32.mrb[8].mxu0  ;;  %1418 = vst.msk [vmem:[#allocation3 + $0x8] sm:$0xff] %vm1359_vm3, %v1407_v1  ;;  %v15873_v57 = vsub.f32 %v15717_v14, %v1665_v18  ;;  %v15878_v1 = vsub.f32 %v15722_v16, %v1668_v19  ;;  %12487 = vmatprep.subr.bf16.mxu1 %v15866_v52  ;;  %v1430_v14 = vadd.s32 24, %v15857_v17 }
 0x22f   :  { %v1378_v46 = vld [vmem:[#allocation2 + $0x10] ss:$2 sm:$0xff]  ;;  %v1394_v48 = vld [vmem:[#allocation2 + $0x11] ss:$2 sm:$0xff]  ;;  %1367 = vst.msk [vmem:[#allocation2 + $0x38] sm:$0xff] %vm1359_vm3, %v1350_v9  ;;  %v14682_v49 = vadd.f32 %v12084_v36, %v15737_v23  ;;  %v1297_v50 = vpop.f32.mrb[9].mxu0  ;;  %12489 = vmatpush3.bf16.msra.mxu1 %v15866_v52 }
 0x230   :  { %1366 = vst.msk [vmem:[#allocation2 + $0x30] sm:$0xff] %vm1359_vm3, %v1349_v35  ;;  %v14683_v54 = vadd.f32 %v15737_v23, %v1297_v50  ;;  %v1408_v59 = vmax.f32 %v1378_v46, %v1394_v48  ;;  %v1824_v18 = vand.u32 4294901760, %v15873_v57  ;;  %v1831_v16 = vand.u32 4294901760, %v15878_v1 }
 0x231   :  { %v1352_v63 = vmax.f32 %v14682_v49, 0.0  ;;  %vm1454_vm4 = vcmp.eq.s32.totalorder %v1430_v14, 31  ;;  %v15948_v14 = vsub.f32 %v15794_v6, %v1683_v22 }
 0x232   :  { %v1351_v24 = vmax.f32 %v14683_v54, 0.0  ;;  %v12087_v28 = vpop.f32.mrb[10].mxu0  ;;  %1419 = vst.msk [vmem:[#allocation3 + $0x10] sm:$0xff] %vm1359_vm3, %v1408_v59 }
 0x233   :  { %v1380_v25 = vld [vmem:[#allocation2 + $0x20] ss:$2 sm:$0xff]  ;;  %v1396_v27 = vld [vmem:[#allocation2 + $0x21] ss:$2 sm:$0xff]  ;;  %1369 = vst.msk [vmem:[#allocation2 + $0x48] sm:$0xff] %vm1359_vm3, %v1352_v63  ;;  %v14684_v29 = vadd.f32 %v12087_v28, %v15737_v23  ;;  %v1309_v30 = vpop.f32.mrb[11].mxu0  ;;  %v1832_v28 = vsub.f32 %v15878_v1, %v1831_v16 }
 0x234   :  { %1368 = vst.msk [vmem:[#allocation2 + $0x40] sm:$0xff] %vm1359_vm3, %v1351_v24  ;;  %v14685_v33 = vadd.f32 %v15737_v23, %v1309_v30  ;;  %v1409_v37 = vmax.f32 %v1380_v25, %v1396_v27  ;;  %v1825_v24 = vsub.f32 %v15873_v57, %v1824_v18  ;;  %v15901_v30 = vsub.f32 %v15748_v53, %v1671_v2 }
 0x235   :  { %v1354_v47 = vmax.f32 %v14684_v29, 0.0  ;;  %v1515_v61 = vld [vmem:[#allocation3 + $0x8] sm:$0xff] }
 0x236   :  { %v1353_v11 = vmax.f32 %v14685_v33, 0.0  ;;  %v12090_v12 = vpop.f32.mrb[12].mxu0  ;;  %1547 = vrot.lane.b32.xlu0 %v1515_v61, %s15155_s30  ;;  %1420 = vst.msk [vmem:[#allocation3 + $0x18] sm:$0xff] %vm1359_vm3, %v1409_v37  ;;  %v1826_v37 = vand.u32 4294901760, %v1825_v24  ;;  %v1838_v53 = vand.u32 4294901760, %v15901_v30  ;;  %v21423_v24 = vand.u32 4294901760, %v15948_v14 }
 0x237   :  { %v1382_v39 = vld [vmem:[#allocation2 + $0x30] ss:$2 sm:$0xff]  ;;  %v1398_v41 = vld [vmem:[#allocation2 + $0x31] ss:$2 sm:$0xff]  ;;  %1371 = vst.msk [vmem:[#allocation2 + $0x58] sm:$0xff] %vm1359_vm3, %v1354_v47  ;;  %v14686_v42 = vadd.f32 %v12090_v12, %v15737_v23  ;;  %v1321_v45 = vpop.f32.mrb[13].mxu0 }
 0x238   :  { %1370 = vst.msk [vmem:[#allocation2 + $0x50] sm:$0xff] %vm1359_vm3, %v1353_v11  ;;  %v14687_v55 = vadd.f32 %v15737_v23, %v1321_v45  ;;  %v1410_v56 = vmax.f32 %v1382_v39, %v1398_v41  ;;  %v1833_v47 = vand.u32 4294901760, %v1832_v28  ;;  %v1839_v41 = vsub.f32 %v15901_v30, %v1838_v53 }
 0x239   :  { %v1356_v9 = vmax.f32 %v14686_v42, 0.0  ;;  %v1523_v35 = vld [vmem:[#allocation3 + $0x9] sm:$0xff]  ;;  %v15926_v45 = vsub.f32 %v15770_v32, %v1677_v40 }
 0x23a   :  { %v1516_v36 = vld [vmem:[#allocation3 + $0x10] sm:$0xff]  ;;  %v1355_v46 = vmax.f32 %v14687_v55, 0.0  ;;  %v12093_v48 = vpop.f32.mrb[14].mxu0  ;;  %1579 = vrot.lane.b32.xlu1 %v1523_v35, %s15167_s1  ;;  %1421 = vst.msk [vmem:[#allocation3 + $0x20] sm:$0xff] %vm1359_vm3, %v1410_v56  ;;  %v15931_v55 = vsub.f32 %v15775_v34, %v1680_v44  ;;  %v21418_v56 = vmov 1.0   ;;  %v1840_v32 = vand.u32 4294901760, %v1839_v41 }
 0x23b   :  { %1549 = vrot.lane.b32.xlu0 %v1516_v36, %s15155_s30  ;;  %v1384_v19 = vld [vmem:[#allocation2 + $0x40] ss:$2 sm:$0xff]  ;;  %v1400_v49 = vld [vmem:[#allocation2 + $0x41] ss:$2 sm:$0xff]  ;;  %1373 = vst.msk [vmem:[#allocation2 + $0x68] sm:$0xff] %vm1359_vm3, %v1356_v9  ;;  %v14688_v50 = vadd.f32 %v12093_v48, %v15737_v23  ;;  %v1333_v54 = vpop.f32.mrb[15].mxu0 }
 0x23c   :  { %1372 = vst.msk [vmem:[#allocation2 + $0x60] sm:$0xff] %vm1359_vm3, %v1355_v46  ;;  %v14689_v59 = vadd.f32 %v15737_v23, %v1333_v54  ;;  %v1411_v63 = vmax.f32 %v1384_v19, %v1400_v49  ;;  %v15906_v23 = vsub.f32 %v15753_v58, %v1674_v3  ;;  %v15915_v3 = vpack.c.bf16 %v1833_v47, %v1826_v37 }
 0x23d   :  { %v1358_v25 = vmax.f32 %v14688_v50, 0.0  ;;  %v1524_v27 = vld [vmem:[#allocation3 + $0x11] sm:$0xff]  ;;  %v15937_v9 = vsel %vm1454_vm4, 0.0, %v21418_v56  ;;  %v1852_v34 = vand.u32 4294901760, %v15926_v45  ;;  %v21425_v44 = vand.u32 4294901760, %v15931_v55 }
 0x23e   :  { %v1517_v29 = vld [vmem:[#allocation3 + $0x18] sm:$0xff]  ;;  %v1357_v33 = vmax.f32 %v14689_v59, 0.0  ;;  %1581 = vrot.lane.b32.xlu1 %v1524_v27, %s15167_s1  ;;  %1422 = vst.msk [vmem:[#allocation3 + $0x28] sm:$0xff] %vm1359_vm3, %v1411_v63  ;;  %v1845_v2 = vand.u32 4294901760, %v15906_v23  ;;  %12491 = vmatprep.subr.bf16.mxu1 %v15915_v3  ;;  %v15953_v50 = vsub.f32 %v15799_v8, %v1686_v26  ;;  %v15976_v37 = vsub.f32 %v15819_v60, %v1689_v15 }
 0x23f   :  { %1551 = vrot.lane.b32.xlu0 %v1517_v29, %s15155_s30  ;;  %v1386_v61 = vld [vmem:[#allocation2 + $0x50] ss:$2 sm:$0xff]  ;;  %v1402_v11 = vld [vmem:[#allocation2 + $0x51] ss:$2 sm:$0xff]  ;;  %1375 = vst.msk [vmem:[#allocation2 + $0x78] sm:$0xff] %vm1359_vm3, %v1358_v25  ;;  %v1853_v59 = vsub.f32 %v15926_v45, %v1852_v34  ;;  %v1860_v6 = vsub.f32 %v15931_v55, %v21425_v44  ;;  %v1867_v29 = vsub.f32 %v15948_v14, %v21423_v24  ;;  %v1434_v60 = vadd.s32 56, %v15857_v17 }
 0x240   :  { %1374 = vst.msk [vmem:[#allocation2 + $0x70] sm:$0xff] %vm1359_vm3, %v1357_v33  ;;  %v1412_v58 = vmax.f32 %v1386_v61, %v1402_v11  ;;  %v1846_v42 = vsub.f32 %v15906_v23, %v1845_v2  ;;  %v21422_v8 = vand.u32 4294901760, %v15953_v50  ;;  %v15981_v47 = vsub.f32 %v15824_v62, %v1692_v20 }
 0x241   :  { %v1518_v12 = vld [vmem:[#allocation3 + $0x20] sm:$0xff]  ;;  %v1854_v28 = vand.u32 4294901760, %v1853_v59  ;;  %v1861_v25 = vand.u32 4294901760, %v1860_v6  ;;  %vm1490_vm5 = vcmp.eq.s32.totalorder %v1434_v60, 63 }
 0x242   :  { %v1525_v39 = vld [vmem:[#allocation3 + $0x19] sm:$0xff]  ;;  %1553 = vrot.lane.b32.xlu1 %v1518_v12, %s15155_s30  ;;  %1423 = vst.msk [vmem:[#allocation3 + $0x30] sm:$0xff] %vm1359_vm3, %v1412_v58  ;;  %v1847_v40 = vand.u32 4294901760, %v1846_v42  ;;  %v1874_v33 = vsub.f32 %v15953_v50, %v21422_v8  ;;  %v1868_v58 = vand.u32 4294901760, %v1867_v29  ;;  %v21420_v41 = vand.u32 4294901760, %v15981_v47  ;;  %v1499_v60 = vld [vmem:[#allocation3 + $0x7] sm:$0xff] }
 0x243   :  { %1583 = vrot.lane.b32.xlu0 %v1525_v39, %s15167_s1  ;;  %v1388_v35 = vld [vmem:[#allocation2 + $0x60] ss:$2 sm:$0xff]  ;;  %v1404_v36 = vld [vmem:[#allocation2 + $0x61] ss:$2 sm:$0xff]  ;;  %v15985_v61 = vpack.c.bf16 %v1861_v25, %v1854_v28  ;;  %v21421_v39 = vand.u32 4294901760, %v15976_v37  ;;  %v1498_v59 = vsel %vm1490_vm5, 0.0, %v21418_v56  ;;  %v16029_v25 = vpack.c.bf16 %v15878_v1, %v15873_v57 }
 0x244   :  { %v1413_v46 = vmax.f32 %v1388_v35, %v1404_v36  ;;  %v15943_v49 = vpack.c.bf16 %v1847_v40, %v1840_v32  ;;  %v1875_v12 = vand.u32 4294901760, %v1874_v33  ;;  %v1888_v42 = vsub.f32 %v15981_v47, %v21420_v41 }
 0x245   :  { %v1519_v48 = vld [vmem:[#allocation3 + $0x28] sm:$0xff]  ;;  %v1881_v20 = vsub.f32 %v15976_v37, %v21421_v39  ;;  %v16002_v35 = vsub.f32 %v15844_v38, %v1695_v4  ;;  %v16008_v36 = vsub.f32 %v15849_v43, %v1698_v7  ;;  %v16037_v29 = vpack.c.bf16 %v15931_v55, %v15926_v45 }
 0x246   :  { %v1526_v19 = vld [vmem:[#allocation3 + $0x21] sm:$0xff]  ;;  %1424 = vst.msk [vmem:[#allocation3 + $0x38] sm:$0xff] %vm1359_vm3, %v1413_v46  ;;  %v15991_v62 = vpack.c.bf16 %v1875_v12, %v1868_v58  ;;  %v1889_v46 = vand.u32 4294901760, %v1888_v42  ;;  %v16041_v33 = vpack.c.bf16 %v15953_v50, %v15948_v14  ;;  %v16053_v12 = vsel %vm1435_vm6, 0.0, %v21418_v56 }
 0x247   :  { %1555 = vrot.lane.b32.xlu0 %v1519_v48, %s15155_s30  ;;  %v1534_v54 = vmul.f32 %v1526_v19, %v15937_v9  ;;  %v1390_v22 = vld [vmem:[#allocation2 + $0x70] ss:$2 sm:$0xff]  ;;  %v1406_v63 = vld [vmem:[#allocation2 + $0x71] ss:$2 sm:$0xff]  ;;  %v1882_v40 = vand.u32 4294901760, %v1881_v20  ;;  %v21417_v48 = vand.u32 4294901760, %v16002_v35  ;;  %v16049_v58 = vpack.c.bf16 %v16008_v36, %v16002_v35 }
 0x248   :  { %v1414_v26 = vmax.f32 %v1390_v22, %v1406_v63  ;;  %v21416_v19 = vand.u32 4294901760, %v16008_v36  ;;  %v1507_v20 = vmul.f32 %v1499_v60, %v16053_v12  ;;  %v1503_v10 = vld [vmem:[#allocation3 + $0x27] sm:$0xff]  ;;  %v22414_v57 = vand.u32 4294901760, %v15931_v55 }
 0x249   :  { %1585 = vrot.lane.b32.xlu1 %v1534_v54, %s15167_s1  ;;  %v1527_v27 = vld [vmem:[#allocation3 + $0x29] sm:$0xff]  ;;  %v16013_v38 = vpack.c.bf16 %v1889_v46, %v1882_v40  ;;  %v1895_v4 = vsub.f32 %v16002_v35, %v21417_v48  ;;  %v22420_v55 = vand.u32 4294901760, %v16002_v35 }
 0x24a   :  { %1425 = vst.msk [vmem:[#allocation3 + $0x40] sm:$0xff] %vm1359_vm3, %v1414_v26  ;;  %v1520_v11 = vld [vmem:[#allocation3 + $0x30] sm:$0xff]  ;;  %v1902_v43 = vsub.f32 %v16008_v36, %v21416_v19  ;;  %v12570_v1 = vpack.c.bf16 %v22414_v57, %v1852_v34  ;;  %v22421_v34 = vand.u32 4294901760, %v16008_v36 }
 0x24b   :  { %1587 = vrot.lane.b32.xlu0 %v1527_v27, %s15167_s1  ;;  %v1896_v22 = vand.u32 4294901760, %v1895_v4  ;;  %v16033_v27 = vpack.c.bf16 %v15906_v23, %v15901_v30  ;;  %v22417_v30 = vand.u32 4294901760, %v15953_v50 }
 0x24c   :  { %v1903_v63 = vand.u32 4294901760, %v1902_v43  ;;  %v1500_v43 = vld [vmem:[#allocation3 + $0xf] sm:$0xff] }
 0x24d   :  { %1557 = vrot.lane.b32.xlu1 %v1520_v11, %s15155_s30  ;;  %v1521_v15 = vld [vmem:[#allocation3 + $0x38] sm:$0xff]  ;;  %v16045_v11 = vpack.c.bf16 %v15981_v47, %v15976_v37 }
 0x24e   :  { %v1528_v32 = vld [vmem:[#allocation3 + $0x31] sm:$0xff]  ;;  %v16024_v28 = vpack.c.bf16 %v1903_v63, %v1896_v22  ;;  %v1431_v22 = vadd.s32 32, %v15857_v17 }
 0x24f   :  { %1559 = vrot.lane.b32.xlu0 %v1521_v15, %s15155_s30 }
 0x250   :  { %vm1471_vm9 = vcmp.eq.s32.totalorder %v1431_v22, 32 }
 0x251   :  { %1589 = vrot.lane.b32.xlu1 %v1528_v32, %s15167_s1  ;;  %v1529_v54 = vld [vmem:[#allocation3 + $0x39] sm:$0xff]  ;;  %v1530_v6 = vld [vmem:[#allocation3 + $0x41] sm:$0xff]  ;;  %v1479_v0 = vsel %vm1471_vm9, 0.0, %v21418_v56 }
 0x252   :  { %v1522_v7 = vld [vmem:[#allocation3 + $0x40] sm:$0xff]  ;;  %v1538_v26 = vmul.f32 %v1530_v6, %v1498_v59 }
 0x253   :  { %1591 = vrot.lane.b32.xlu0 %v1529_v54, %s15167_s1 }
 0x255   :  { %1561 = vrot.lane.b32.xlu1 %v1522_v7, %s15155_s30 }
 0x259   :  { %1593 = vrot.lane.b32.xlu1 %v1538_v26, %s15167_s1 }
 0x2a8   :  { %v1548_v15 = vpop.permute.xlu0 %1547 }
 0x2a9   :  { %v1603_v42 = vsel %vm1359_vm3, %v1507_v20, %v1548_v15  ;;  %v1501_v20 = vld [vmem:[#allocation3 + $0x17] sm:$0xff] }
 0x2ac   :  { %v1580_v32 = vpop.permute.xlu1 %1579 }
 0x2ad   :  { %v1550_v40 = vpop.permute.xlu0 %1549  ;;  %v1612_v46 = vsel %vm1611_vm7, %v1603_v42, %v1580_v32 }
 0x2ae   :  { %v1641_v54 = vsel %vm1639_vm8, %v1612_v46, 0  ;;  %v1604_v7 = vsel %vm1359_vm3, %v1500_v43, %v1550_v40 }
 0x2af   :  { %v16059_v4 = vand.u32 4294901760, %v1641_v54 }
 0x2b0   :  { %v1582_v59 = vpop.permute.xlu1 %1581 }
 0x2b1   :  { %v1552_v6 = vpop.permute.xlu0 %1551  ;;  %v16064_v63 = vsub.f32 %v1641_v54, %v16059_v4  ;;  %v1613_v26 = vsel %vm1611_vm7, %v1604_v7, %v1582_v59 }
 0x2b2   :  { %v1644_v60 = vsel %vm1639_vm8, %v1613_v26, 0  ;;  %v1605_v32 = vsel %vm1359_vm3, %v1501_v20, %v1552_v6 }
 0x2b3   :  { %v16068_v15 = vand.u32 4294901760, %v1644_v60  ;;  %v1743_v42 = vand.u32 4294901760, %v16064_v63 }
 0x2b4   :  { %v1554_v7 = vpop.permute.xlu1 %1553 }
 0x2b5   :  { %v1584_v46 = vpop.permute.xlu0 %1583  ;;  %v16073_v40 = vsub.f32 %v1644_v60, %v16068_v15  ;;  %v1744_v54 = vsub.f32 %v16064_v63, %v1743_v42  ;;  %v1502_v60 = vld [vmem:[#allocation3 + $0x1f] sm:$0xff] }
 0x2b6   :  { %v1614_v43 = vsel %vm1611_vm7, %v1605_v32, %v1584_v46  ;;  %v1606_v46 = vsel %vm1359_vm3, %v1502_v60, %v1554_v7 }
 0x2b7   :  { %v1647_v59 = vsel %vm1639_vm8, %v1614_v43, 0  ;;  %v1745_v6 = vand.u32 4294901760, %v1744_v54  ;;  %v1753_v22 = vand.u32 4294901760, %v16073_v40  ;;  %v1511_v43 = vmul.f32 %v1503_v10, %v1479_v0 }
 0x2b8   :  { %v16080_v26 = vand.u32 4294901760, %v1647_v59 }
 0x2b9   :  { %v1556_v20 = vpop.permute.xlu0 %1555  ;;  %12118 = vmatprep.mubr.f32.mxu1 %v1745_v6  ;;  %v1754_v32 = vsub.f32 %v16073_v40, %v1753_v22 }
 0x2ba   :  { %v16085_v19 = vsub.f32 %v1647_v59, %v16080_v26  ;;  %v1607_v39 = vsel %vm1359_vm3, %v1511_v43, %v1556_v20 }
 0x2bb   :  { %v1586_v48 = vpop.permute.xlu1 %1585  ;;  %v1755_v41 = vand.u32 4294901760, %v1754_v32 }
 0x2bc   :  { %v1615_v56 = vsel %vm1611_vm7, %v1606_v46, %v1586_v48  ;;  %v1763_v54 = vand.u32 4294901760, %v16085_v19 }
 0x2bd   :  { %v1650_v8 = vsel %vm1639_vm8, %v1615_v56, 0  ;;  %v1588_v59 = vpop.permute.xlu0 %1587  ;;  %12119 = vmatmul.mubr.f32.vlgmr.msra.gmra.mrb[0].mxu1 %v1755_v41  ;;  %v1504_v41 = vld [vmem:[#allocation3 + $0x2f] sm:$0xff] }
 0x2be   :  { %v16095_v24 = vand.u32 4294901760, %v1650_v8  ;;  %v1616_v6 = vsel %vm1611_vm7, %v1607_v39, %v1588_v59  ;;  %v1764_v10 = vsub.f32 %v16085_v19, %v1763_v54  ;;  %12493 = vmatpush3.bf16.msra.mxu1 %v15915_v3  ;;  %v1505_v3 = vld [vmem:[#allocation3 + $0x37] sm:$0xff] }
 0x2bf   :  { %v1653_v0 = vsel %vm1639_vm8, %v1616_v6, 0  ;;  %v1558_v48 = vpop.permute.xlu1 %1557  ;;  %12495 = vmatprep.subr.bf16.mxu1 %v15943_v49 }
 0x2c0   :  { %v16104_v7 = vsub.f32 %v1650_v8, %v16095_v24  ;;  %v16106_v20 = vand.u32 4294901760, %v1653_v0  ;;  %v1765_v56 = vand.u32 4294901760, %v1764_v10  ;;  %v1608_v46 = vsel %vm1359_vm3, %v1504_v41, %v1558_v48 }
 0x2c1   :  { %v1560_v60 = vpop.permute.xlu0 %1559 }
 0x2c2   :  { %v16110_v39 = vsub.f32 %v1653_v0, %v16106_v20  ;;  %12121 = vmatprep.mubr.f32.mxu1 %v1765_v56  ;;  %v21424_v32 = vand.u32 4294901760, %v16104_v7  ;;  %12497 = vmatpush3.bf16.msra.mxu1 %v15943_v49  ;;  %v1609_v10 = vsel %vm1359_vm3, %v1505_v3, %v1560_v60 }
 0x2c3   :  { %v1590_v43 = vpop.permute.xlu1 %1589  ;;  %12499 = vmatprep.subr.bf16.mxu1 %v15985_v61 }
 0x2c4   :  { %v1617_v8 = vsel %vm1611_vm7, %v1608_v46, %v1590_v43  ;;  %v1774_v59 = vsub.f32 %v16104_v7, %v21424_v32  ;;  %v1783_v6 = vand.u32 4294901760, %v16110_v39 }
 0x2c5   :  { %v1656_v0 = vsel %vm1639_vm8, %v1617_v8, 0  ;;  %v1592_v56 = vpop.permute.xlu0 %1591 }
 0x2c6   :  { %v16123_v48 = vand.u32 4294901760, %v1656_v0  ;;  %v1618_v49 = vsel %vm1611_vm7, %v1609_v10, %v1592_v56  ;;  %v1775_v41 = vand.u32 4294901760, %v1774_v59  ;;  %v1784_v46 = vsub.f32 %v16110_v39, %v1783_v6  ;;  %12501 = vmatpush3.bf16.msra.mxu1 %v15985_v61  ;;  %v1506_v59 = vld [vmem:[#allocation3 + $0x3f] sm:$0xff] }
 0x2c7   :  { %v1659_v43 = vsel %vm1639_vm8, %v1618_v49, 0  ;;  %v1562_v32 = vpop.permute.xlu1 %1561  ;;  %12503 = vmatprep.subr.bf16.mxu1 %v15991_v62 }
 0x2c8   :  { %v16132_v44 = vsub.f32 %v1656_v0, %v16123_v48  ;;  %v16134_v60 = vand.u32 4294901760, %v1659_v43  ;;  %12122 = vmatmul.mubr.f32.gmra.mrb[2].mxu1 %v1775_v41  ;;  %v1785_v3 = vand.u32 4294901760, %v1784_v46  ;;  %v1610_v56 = vsel %vm1359_vm3, %v1506_v59, %v1562_v32 }
 0x2ca   :  { %v16138_v8 = vsub.f32 %v1659_v43, %v16134_v60  ;;  %12124 = vmatprep.mubr.f32.mxu1 %v1785_v3  ;;  %v1793_v10 = vand.u32 4294901760, %v16132_v44  ;;  %12505 = vmatpush3.bf16.msra.mxu1 %v15991_v62 }
 0x2cb   :  { %v1594_v49 = vpop.permute.xlu1 %1593  ;;  %12507 = vmatprep.subr.bf16.mxu1 %v16013_v38 }
 0x2cc   :  { %v1619_v61 = vsel %vm1611_vm7, %v1610_v56, %v1594_v49  ;;  %v1794_v0 = vsub.f32 %v16132_v44, %v1793_v10  ;;  %v1803_v41 = vand.u32 4294901760, %v16138_v8 }
 0x2cd   :  { %v1662_v46 = vsel %vm1639_vm8, %v1619_v61, 0 }
 0x2ce   :  { %v16150_v43 = vand.u32 4294901760, %v1662_v46  ;;  %v1795_v3 = vand.u32 4294901760, %v1794_v0  ;;  %v1804_v32 = vsub.f32 %v16138_v8, %v1803_v41  ;;  %12509 = vmatpush3.bf16.msra.mxu1 %v16013_v38  ;;  %v12562_v38 = vpack.c.bf16 %v1831_v16, %v1824_v18 }
 0x2cf   :  { %12511 = vmatprep.subr.bf16.mxu1 %v16024_v28  ;;  %v22415_v18 = vand.u32 4294901760, %v16104_v7  ;;  %v22416_v16 = vand.u32 4294901760, %v15948_v14  ;;  %v2687_v14 = vld [vmem:[%s21397_s7 + $0x18] sm:$0xff] }
 0x2d0   :  { %v16157_v62 = vsub.f32 %v1662_v46, %v16150_v43  ;;  %12125 = vmatmul.mubr.f32.gmra.mrb[4].mxu1 %v1795_v3  ;;  %v1805_v59 = vand.u32 4294901760, %v1804_v32 }
 0x2d1   :  { %v12574_v23 = vpack.c.bf16 %v22417_v30, %v22416_v16 }
 0x2d2   :  { %12127 = vmatprep.mubr.f32.mxu1 %v1805_v59  ;;  %v1813_v56 = vand.u32 4294901760, %v16157_v62  ;;  %12513 = vmatpush3.bf16.msra.mxu1 %v16024_v28  ;;  %v12566_v28 = vpack.c.bf16 %v1845_v2, %v1838_v53  ;;  %v22418_v53 = vand.u32 4294901760, %v15976_v37  ;;  %v22419_v2 = vand.u32 4294901760, %v15981_v47  ;;  %v2689_v37 = vld [vmem:[%s21397_s7 + $0x28] sm:$0xff] }
 0x2d3   :  { %12515 = vmatprep.subr.bf16.mxu1 %v16029_v25  ;;  %v2721_v47 = vand.u32 4294901760, %v2687_v14 }
 0x2d4   :  { %v1814_v49 = vsub.f32 %v16157_v62, %v1813_v56  ;;  %v12578_v45 = vpack.c.bf16 %v22419_v2, %v22418_v53 }
 0x2d6   :  { %v1815_v61 = vand.u32 4294901760, %v1814_v49 }
 0x2d8   :  { %12128 = vmatmul.mubr.f32.gmra.mrb[6].mxu1 %v1815_v61 }
 0x2d9   :  { %12154 = vmatprep.mubr.f32.mxu1 %v16059_v4 }
 0x2dc   :  { %12155 = vmatmul.mubr.f32.vlgmr.msra.gmra.mrb[0].mxu1 %v16068_v15 }
 0x2dd   :  { %12517 = vmatpush3.bf16.msra.mxu1 %v16029_v25  ;;  %12157 = vmatprep.mubr.f32.mxu1 %v16080_v26 }
 0x2de   :  { %12519 = vmatprep.subr.bf16.mxu1 %v16033_v27 }
 0x2e0   :  { %12158 = vmatmul.mubr.f32.gmra.mrb[2].mxu1 %v16095_v24 }
 0x2e1   :  { %12521 = vmatpush3.bf16.msra.mxu1 %v16033_v27  ;;  %12160 = vmatprep.mubr.f32.mxu1 %v16106_v20 }
 0x2e2   :  { %12523 = vmatprep.subr.bf16.mxu1 %v16037_v29 }
 0x2e4   :  { %12161 = vmatmul.mubr.f32.gmra.mrb[4].mxu1 %v16123_v48 }
 0x2e5   :  { %12525 = vmatpush3.bf16.msra.mxu1 %v16037_v29  ;;  %12163 = vmatprep.mubr.f32.mxu1 %v16134_v60 }
 0x2e6   :  { %12527 = vmatprep.subr.bf16.mxu1 %v16041_v33 }
 0x2e8   :  { %12164 = vmatmul.mubr.f32.gmra.mrb[6].mxu1 %v16150_v43 }
 0x2e9   :  { %12529 = vmatpush3.bf16.msra.mxu1 %v16041_v33  ;;  %12190 = vmatprep.mubr.f32.mxu1 %v16064_v63 }
 0x2ea   :  { %12531 = vmatprep.subr.bf16.mxu1 %v16045_v11 }
 0x2ed   :  { %12533 = vmatpush3.bf16.msra.mxu1 %v16045_v11  ;;  %v2690_v11 = vld [vmem:[%s21397_s7 + $0x30] sm:$0xff] }
 0x2ee   :  { %12535 = vmatprep.subr.bf16.mxu1 %v16049_v58 }
 0x2f1   :  { %12537 = vmatpush3.bf16.msra.mxu1 %v16049_v58  ;;  %v2691_v58 = vld [vmem:[%s21397_s7 + $0x38] sm:$0xff] }
 0x2f2   :  { %12539 = vmatprep.subr.bf16.mxu1 %v15730_v21  ;;  %v2733_v63 = vand.u32 4294901760, %v2691_v58 }
 0x2f4   :  { %12191 = vmatmul.mubr.f32.vlgmr.msra.gmra.mrb[0].mxu1 %v16073_v40  ;;  %v2875_v61 = vsub.f32 %v2691_v58, %v2733_v63 }
 0x2f5   :  { %12193 = vmatprep.mubr.f32.mxu1 %v16085_v19  ;;  %12541 = vmatpush3.bf16.msra.mxu1 %v15730_v21  ;;  %v2727_v19 = vand.u32 4294901760, %v2689_v37 }
 0x2f6   :  { %12543 = vmatprep.subr.bf16.mxu1 %v15763_v13 }
 0x2f8   :  { %12194 = vmatmul.mubr.f32.gmra.mrb[2].mxu1 %v16104_v7  ;;  %v2847_v7 = vsub.f32 %v2687_v14, %v2721_v47 }
 0x2f9   :  { %12196 = vmatprep.mubr.f32.mxu1 %v16110_v39  ;;  %12545 = vmatpush3.bf16.msra.mxu1 %v15763_v13 }
 0x2fa   :  { %12547 = vmatprep.subr.bf16.mxu1 %v15789_v5 }
 0x2fc   :  { %12197 = vmatmul.mubr.f32.gmra.mrb[4].mxu1 %v16132_v44  ;;  %v12582_v44 = vpack.c.bf16 %v22421_v34, %v22420_v55 }
 0x2fd   :  { %12199 = vmatprep.mubr.f32.mxu1 %v16138_v8  ;;  %12549 = vmatpush3.bf16.msra.mxu1 %v15789_v5 }
 0x2fe   :  { %12551 = vmatprep.subr.bf16.mxu1 %v15812_v51 }
 0x300   :  { %12200 = vmatmul.mubr.f32.gmra.mrb[6].mxu1 %v16157_v62 }
 0x301   :  { %12553 = vmatpush3.bf16.msra.mxu1 %v15812_v51  ;;  %12226 = vmatprep.mubr.f32.mxu1 %v1743_v42 }
 0x302   :  { %12555 = vmatprep.subr.bf16.mxu1 %v15837_v31 }
 0x305   :  { %12557 = vmatpush3.bf16.msra.mxu1 %v15837_v31 }
 0x306   :  { %12559 = vmatprep.subr.bf16.mxu1 %v15866_v52 }
 0x309   :  { %12561 = vmatpush3.bf16.msra.mxu1 %v15866_v52 }
 0x30a   :  { %12563 = vmatprep.subr.bf16.mxu1 %v12562_v38 }
 0x30c   :  { %12227 = vmatmul.mubr.f32.vlgmr.msra.gmra.mrb[0].mxu1 %v1753_v22 }
 0x30d   :  { %12229 = vmatprep.mubr.f32.mxu1 %v1763_v54  ;;  %12565 = vmatpush3.bf16.msra.mxu1 %v12562_v38 }
 0x30e   :  { %12567 = vmatprep.subr.bf16.mxu1 %v12566_v28 }
 0x310   :  { %12230 = vmatmul.mubr.f32.gmra.mrb[2].mxu1 %v22415_v18 }
 0x311   :  { %12232 = vmatprep.mubr.f32.mxu1 %v1783_v6  ;;  %12569 = vmatpush3.bf16.msra.mxu1 %v12566_v28 }
 0x312   :  { %12571 = vmatprep.subr.bf16.mxu1 %v12570_v1 }
 0x314   :  { %12233 = vmatmul.mubr.f32.gmra.mrb[4].mxu1 %v1793_v10 }
 0x315   :  { %12235 = vmatprep.mubr.f32.mxu1 %v1803_v41  ;;  %12573 = vmatpush3.bf16.msra.mxu1 %v12570_v1  ;;  %v2861_v41 = vsub.f32 %v2689_v37, %v2727_v19  ;;  %v2876_v1 = vand.u32 4294901760, %v2875_v61 }
 0x316   :  { %12575 = vmatprep.subr.bf16.mxu1 %v12574_v23 }
 0x317   :  { %v2862_v32 = vand.u32 4294901760, %v2861_v41  ;;  %v2877_v30 = vsub.f32 %v2875_v61, %v2876_v1 }
 0x318   :  { %12236 = vmatmul.mubr.f32.gmra.mrb[6].mxu1 %v1813_v56 }
 0x319   :  { %12577 = vmatpush3.bf16.msra.mxu1 %v12574_v23  ;;  %12262 = vmatprep.mubr.f32.mxu1 %v16059_v4  ;;  %v2863_v56 = vsub.f32 %v2861_v41, %v2862_v32  ;;  %v2878_v53 = vand.u32 4294901760, %v2877_v30  ;;  %v1429_v30 = vadd.s32 16, %v15857_v17 }
 0x31a   :  { %12579 = vmatprep.subr.bf16.mxu1 %v12578_v45 }
 0x31b   :  { %v2864_v28 = vand.u32 4294901760, %v2863_v56  ;;  %v2636_v56 = vld [vmem:[%s21395_s5] sm:$0x7]  ;;  %vm2606_vm12 = vcmp.eq.s32.totalorder %v1429_v30, 16 }
 0x31d   :  { %12581 = vmatpush3.bf16.msra.mxu1 %v12578_v45 }
 0x31e   :  { %12583 = vmatprep.subr.bf16.mxu1 %v12582_v44 }
 0x321   :  { %12585 = vmatpush3.bf16.msra.mxu1 %v12582_v44 }
 0x322   :  { %12587 = vmatprep.subr.bf16.mxu1 %v15730_v21 }
 0x324   :  { %12263 = vmatmul.mubr.f32.vlgmr.msra.gmra.mrb[0].mxu1 %v16068_v15 }
 0x325   :  { %12265 = vmatprep.mubr.f32.mxu1 %v16080_v26  ;;  %12589 = vmatpush3.bf16.msra.mxu1 %v15730_v21  ;;  %v22422_v21 = vmov 0.0  }
 0x326   :  { %12591 = vmatprep.subr.bf16.mxu1 %v15763_v13  ;;  %2590 = vst.msk [vmem:[#allocation5 + $0x7] sm:$0x1] %vm2589_vm10, %v22422_v21  ;;  %2591 = vst.msk [vmem:[#allocation5 + $0x28] sm:$0x1] %vm2589_vm10, %v22422_v21 }
 0x328   :  { %12266 = vmatmul.mubr.f32.gmra.mrb[2].mxu1 %v16095_v24 }
 0x329   :  { %12268 = vmatprep.mubr.f32.mxu1 %v16106_v20  ;;  %12593 = vmatpush3.bf16.msra.mxu1 %v15763_v13  ;;  %v2684_v13 = vld [vmem:[%s21397_s7] sm:$0xff] }
 0x32a   :  { %12595 = vmatprep.subr.bf16.mxu1 %v15789_v5 }
 0x32c   :  { %12269 = vmatmul.mubr.f32.gmra.mrb[4].mxu1 %v16123_v48 }
 0x32d   :  { %12271 = vmatprep.mubr.f32.mxu1 %v16134_v60  ;;  %12597 = vmatpush3.bf16.msra.mxu1 %v15789_v5  ;;  %v2685_v5 = vld [vmem:[%s21397_s7 + $0x8] sm:$0xff] }
 0x32e   :  { %12599 = vmatprep.subr.bf16.mxu1 %v15812_v51 }
 0x330   :  { %12272 = vmatmul.mubr.f32.gmra.mrb[6].mxu1 %v16150_v43 }
 0x331   :  { %12601 = vmatpush3.bf16.msra.mxu1 %v15812_v51  ;;  %12298 = vmatprep.mubr.f32.mxu1 %v16059_v4  ;;  %v2686_v51 = vld [vmem:[%s21397_s7 + $0x10] sm:$0xff]  ;;  %v2730_v4 = vand.u32 4294901760, %v2690_v11 }
 0x332   :  { %12603 = vmatprep.subr.bf16.mxu1 %v15837_v31  ;;  %v2718_v50 = vand.u32 4294901760, %v2686_v51 }
 0x333   :  { %v16311_v40 = vpack.c.bf16 %v2733_v63, %v2730_v4  ;;  %v2868_v49 = vsub.f32 %v2690_v11, %v2730_v4 }
 0x334   :  { %v16295_v25 = vpack.c.bf16 %v2721_v47, %v2718_v50  ;;  %v2840_v54 = vsub.f32 %v2686_v51, %v2718_v50 }
 0x335   :  { %12605 = vmatpush3.bf16.msra.mxu1 %v15837_v31  ;;  %v2712_v31 = vand.u32 4294901760, %v2684_v13  ;;  %v2869_v57 = vand.u32 4294901760, %v2868_v49  ;;  %v16330_v44 = vpack.c.bf16 %v2875_v61, %v2868_v49  ;;  %v1428_v61 = vadd.s32 8, %v15857_v17 }
 0x336   :  { %12607 = vmatprep.subr.bf16.mxu1 %v15866_v52  ;;  %v2841_v6 = vand.u32 4294901760, %v2840_v54  ;;  %v16326_v55 = vpack.c.bf16 %v2847_v7, %v2840_v54 }
 0x337   :  { %v2826_v29 = vsub.f32 %v2684_v13, %v2712_v31  ;;  %v2870_v16 = vsub.f32 %v2868_v49, %v2869_v57  ;;  %v16363_v49 = vsub.s32 2, %v15857_v17  ;;  %vm2597_vm11 = vcmp.eq.s32.totalorder %v1428_v61, 15 }
 0x338   :  { %v2842_v8 = vsub.f32 %v2840_v54, %v2841_v6 }
 0x339   :  { %12609 = vmatpush3.bf16.msra.mxu1 %v15866_v52  ;;  %v2715_v52 = vand.u32 4294901760, %v2685_v5  ;;  %v2871_v23 = vand.u32 4294901760, %v2870_v16  ;;  %22425 = vst [vmem:[#allocation28_spill] sm:$0xff] %v16363_v49 }
 0x33a   :  { %v2843_v46 = vand.u32 4294901760, %v2842_v8 }
 0x33b   :  { %v16293_v35 = vpack.c.bf16 %v2715_v52, %v2712_v31  ;;  %v2833_v33 = vsub.f32 %v2685_v5, %v2715_v52  ;;  %v16322_v2 = vpack.c.bf16 %v2878_v53, %v2871_v23  ;;  %v16338_v31 = vpack.c.bf16 %v2876_v1, %v2869_v57  ;;  %v11410_v52 = vld [vmem:[%s21394_s4] ss:$0 sm:$0xff] }
 0x33c   :  { %12299 = vmatmul.mubr.f32.vlgmr.msra.gmra.mrb[0].mxu1 %v16068_v15  ;;  %v2827_v15 = vand.u32 4294901760, %v2826_v29 }
 0x33d   :  { %12301 = vmatprep.mubr.f32.mxu1 %v16080_v26  ;;  %12611 = vmatprep.subr.bf16.mxu1 %v16293_v35  ;;  %v2834_v42 = vand.u32 4294901760, %v2833_v33  ;;  %v16324_v45 = vpack.c.bf16 %v2833_v33, %v2826_v29 }
 0x33e   :  { %12613 = vmatpush3.bf16.msra.mxu1 %v16293_v35  ;;  %v2828_v26 = vsub.f32 %v2826_v29, %v2827_v15 }
 0x33f   :  { %12615 = vmatprep.subr.bf16.mxu1 %v16295_v25  ;;  %v2835_v22 = vsub.f32 %v2833_v33, %v2834_v42  ;;  %v16332_v13 = vpack.c.bf16 %v2834_v42, %v2827_v15 }
 0x340   :  { %12302 = vmatmul.mubr.f32.gmra.mrb[2].mxu1 %v16095_v24  ;;  %v2688_v24 = vld [vmem:[%s21397_s7 + $0x20] sm:$0xff] }
 0x341   :  { %12304 = vmatprep.mubr.f32.mxu1 %v16106_v20  ;;  %v2724_v36 = vand.u32 4294901760, %v2688_v24  ;;  %v2829_v20 = vand.u32 4294901760, %v2828_v26  ;;  %v2836_v39 = vand.u32 4294901760, %v2835_v22 }
 0x342   :  { %12617 = vmatpush3.bf16.msra.mxu1 %v16295_v25 }
 0x343   :  { %v16300_v27 = vpack.c.bf16 %v2727_v19, %v2724_v36  ;;  %v2854_v0 = vsub.f32 %v2688_v24, %v2724_v36 }
 0x344   :  { %12305 = vmatmul.mubr.f32.gmra.mrb[4].mxu1 %v16123_v48  ;;  %v2848_v48 = vand.u32 4294901760, %v2847_v7 }
 0x345   :  { %12307 = vmatprep.mubr.f32.mxu1 %v16134_v60  ;;  %12619 = vmatprep.subr.bf16.mxu1 %v16300_v27  ;;  %v16315_v60 = vpack.c.bf16 %v2836_v39, %v2829_v20  ;;  %v2855_v3 = vand.u32 4294901760, %v2854_v0  ;;  %v16328_v34 = vpack.c.bf16 %v2861_v41, %v2854_v0 }
 0x346   :  { %12621 = vmatpush3.bf16.msra.mxu1 %v16300_v27  ;;  %v2849_v10 = vsub.f32 %v2847_v7, %v2848_v48  ;;  %v16334_v5 = vpack.c.bf16 %v2848_v48, %v2841_v6 }
 0x347   :  { %12623 = vmatprep.subr.bf16.mxu1 %v16311_v40  ;;  %v2856_v59 = vsub.f32 %v2854_v0, %v2855_v3  ;;  %v16336_v51 = vpack.c.bf16 %v2862_v32, %v2855_v3  ;;  %v16353_v32 = vsub.s32 0, %v15857_v17 }
 0x348   :  { %12308 = vmatmul.mubr.f32.gmra.mrb[6].mxu1 %v16150_v43  ;;  %v2850_v43 = vand.u32 4294901760, %v2849_v10 }
 0x349   :  { %v2857_v38 = vand.u32 4294901760, %v2856_v59  ;;  %22423 = vst [vmem:[#allocation26_spill] sm:$0xff] %v16353_v32  ;;  %v16356_v59 = vsub.s32 1, %v15857_v17  ;;  %v2640_v1 = vrot.slane %v2636_v56, %v16353_v32 }
 0x34a   :  { %12625 = vmatpush3.bf16.msra.mxu1 %v16311_v40  ;;  %v16318_v62 = vpack.c.bf16 %v2850_v43, %v2843_v46 }
 0x34b   :  { %12627 = vmatprep.subr.bf16.mxu1 %v16315_v60  ;;  %v16320_v18 = vpack.c.bf16 %v2864_v28, %v2857_v38  ;;  %22424 = vst [vmem:[#allocation27_spill] sm:$0xff] %v16356_v59  ;;  %v2648_v16 = vrot.slane %v2636_v56, %v16356_v59 }
 0x40f   :  { %v12300_v14 = vpop.f32.mrb[0].mxu1 }
 0x410   :  { %v14690_v50 = vadd.f32 %v12300_v14, %v11410_v52  ;;  %v2508_v24 = vpop.f32.mrb[1].mxu1  ;;  %v2660_v14 = vrot.slane %v2636_v56, %v16363_v49 }
 0x411   :  { %v14691_v37 = vadd.f32 %v11410_v52, %v2508_v24 }
 0x412   :  { %v2555_v47 = vmax.f32 %v14690_v50, 0.0 }
 0x413   :  { %v2554_v36 = vmax.f32 %v14691_v37, 0.0  ;;  %v12303_v19 = vpop.f32.mrb[2].mxu1 }
 0x414   :  { %2563 = vst.msk [vmem:[#allocation4 + $0x8] sm:$0xff] %vm1611_vm7, %v2555_v47  ;;  %v14692_v29 = vadd.f32 %v12303_v19, %v11410_v52  ;;  %v2520_v33 = vpop.f32.mrb[3].mxu1 }
 0x415   :  { %2562 = vst.msk [vmem:[#allocation4] sm:$0xff] %vm1611_vm7, %v2554_v36  ;;  %v14693_v11 = vadd.f32 %v11410_v52, %v2520_v33 }
 0x416   :  { %v2557_v58 = vmax.f32 %v14692_v29, 0.0 }
 0x417   :  { %v2556_v4 = vmax.f32 %v14693_v11, 0.0  ;;  %v12306_v63 = vpop.f32.mrb[4].mxu1 }
 0x418   :  { %2565 = vst.msk [vmem:[#allocation4 + $0x18] sm:$0xff] %vm1611_vm7, %v2557_v58  ;;  %v14694_v15 = vadd.f32 %v12306_v63, %v11410_v52  ;;  %v2532_v42 = vpop.f32.mrb[5].mxu1 }
 0x419   :  { %2564 = vst.msk [vmem:[#allocation4 + $0x10] sm:$0xff] %vm1611_vm7, %v2556_v4  ;;  %v14695_v26 = vadd.f32 %v11410_v52, %v2532_v42  ;;  %v22426_v4 = vmov 1.0  }
 0x41a   :  { %v2559_v22 = vmax.f32 %v14694_v15, 0.0  ;;  %v16374_v63 = vsel %vm2597_vm11, 0.0, %v22426_v4  ;;  %v11411_v15 = vld [vmem:[%s21396_s6] ss:$0 sm:$0xff] }
 0x41b   :  { %v2558_v54 = vmax.f32 %v14695_v26, 0.0  ;;  %v12309_v7 = vpop.f32.mrb[6].mxu1 }
 0x41c   :  { %v2570_v20 = vld [vmem:[#allocation4] ss:$2 sm:$0xff]  ;;  %v2578_v39 = vld [vmem:[#allocation4 + $0x1] ss:$2 sm:$0xff]  ;;  %2567 = vst.msk [vmem:[#allocation4 + $0x28] sm:$0xff] %vm1611_vm7, %v2559_v22  ;;  %v14696_v6 = vadd.f32 %v12309_v7, %v11410_v52  ;;  %v2544_v48 = vpop.f32.mrb[7].mxu1 }
 0x41d   :  { %v2585_v8 = vmax.f32 %v2570_v20, %v2578_v39  ;;  %2566 = vst.msk [vmem:[#allocation4 + $0x20] sm:$0xff] %vm1611_vm7, %v2558_v54  ;;  %v14697_v10 = vadd.f32 %v11410_v52, %v2544_v48  ;;  %v16380_v22 = vsel %vm2606_vm12, 0.0, %v22426_v4 }
 0x41e   :  { %v2561_v0 = vmax.f32 %v14696_v6, 0.0 }
 0x41f   :  { %2592 = vst.msk [vmem:[#allocation5 + $0x8] sm:$0xff] %vm1611_vm7, %v2585_v8  ;;  %v2560_v41 = vmax.f32 %v14697_v10, 0.0 }
 0x420   :  { %v2572_v46 = vld [vmem:[#allocation4 + $0x10] ss:$2 sm:$0xff]  ;;  %v2580_v43 = vld [vmem:[#allocation4 + $0x11] ss:$2 sm:$0xff]  ;;  %2569 = vst.msk [vmem:[#allocation4 + $0x38] sm:$0xff] %vm1611_vm7, %v2561_v0 }
 0x421   :  { %v2586_v3 = vmax.f32 %v2572_v46, %v2580_v43  ;;  %2568 = vst.msk [vmem:[#allocation4 + $0x30] sm:$0xff] %vm1611_vm7, %v2560_v41 }
 0x423   :  { %2593 = vst.msk [vmem:[#allocation5 + $0x10] sm:$0xff] %vm1611_vm7, %v2586_v3 }
 0x424   :  { %v2574_v38 = vld [vmem:[#allocation4 + $0x20] ss:$2 sm:$0xff]  ;;  %v2582_v28 = vld [vmem:[#allocation4 + $0x21] ss:$2 sm:$0xff] }
 0x425   :  { %v2587_v57 = vmax.f32 %v2574_v38, %v2582_v28 }
 0x426   :  { %v2616_v23 = vld [vmem:[#allocation5 + $0x7] sm:$0xff] }
 0x427   :  { %v2624_v53 = vld [vmem:[#allocation5 + $0x8] sm:$0xff]  ;;  %2594 = vst.msk [vmem:[#allocation5 + $0x18] sm:$0xff] %vm1611_vm7, %v2587_v57  ;;  %v2620_v52 = vmul.f32 %v2616_v23, %v16053_v12 }
 0x428   :  { %v2576_v50 = vld [vmem:[#allocation4 + $0x30] ss:$2 sm:$0xff]  ;;  %v2584_v24 = vld [vmem:[#allocation4 + $0x31] ss:$2 sm:$0xff]  ;;  %v2649_v36 = vmul.f32 %v2648_v16, %v2624_v53 }
 0x429   :  { %v2588_v37 = vmax.f32 %v2576_v50, %v2584_v24  ;;  %v2641_v47 = vmul.f32 %v2640_v1, %v2620_v52 }
 0x42a   :  { %v2628_v19 = vld [vmem:[#allocation5 + $0x9] sm:$0xff] }
 0x42b   :  { %v2617_v29 = vld [vmem:[#allocation5 + $0xf] sm:$0xff]  ;;  %2595 = vst.msk [vmem:[#allocation5 + $0x20] sm:$0xff] %vm1611_vm7, %v2588_v37  ;;  %v2653_v11 = vadd.f32 %v2649_v36, %v2641_v47  ;;  %v2661_v58 = vmul.f32 %v2660_v14, %v2628_v19 }
 0x42c   :  { %v2625_v33 = vld [vmem:[#allocation5 + $0x10] sm:$0xff]  ;;  %v2642_v42 = vmul.f32 %v2640_v1, %v2617_v29 }
 0x42d   :  { %v2650_v26 = vmul.f32 %v2648_v16, %v2625_v33  ;;  %v2665_v54 = vadd.f32 %v2661_v58, %v2653_v11 }
 0x42e   :  { %v2629_v7 = vld [vmem:[#allocation5 + $0x11] sm:$0xff] }
 0x42f   :  { %v2618_v20 = vld [vmem:[#allocation5 + $0x17] sm:$0xff]  ;;  %v2676_v6 = vadd.f32 %v11411_v15, %v2665_v54  ;;  %v2633_v48 = vmul.f32 %v2629_v7, %v16374_v63  ;;  %v2654_v10 = vadd.f32 %v2650_v26, %v2642_v42 }
 0x430   :  { %v2626_v39 = vld [vmem:[#allocation5 + $0x18] sm:$0xff]  ;;  %v2622_v8 = vmul.f32 %v2618_v20, %v16380_v22 }
 0x431   :  { %v2680_v0 = vmax.f32 %v2676_v6, 0.0  ;;  %v2662_v41 = vmul.f32 %v2660_v14, %v2633_v48  ;;  %v2651_v43 = vmul.f32 %v2648_v16, %v2626_v39 }
 0x432   :  { %v2643_v46 = vmul.f32 %v2640_v1, %v2622_v8  ;;  %v2630_v3 = vld [vmem:[#allocation5 + $0x19] sm:$0xff]  ;;  %v2631_v23 = vld [vmem:[#allocation5 + $0x21] sm:$0xff] }
 0x433   :  { %v2619_v56 = vld [vmem:[#allocation5 + $0x1f] sm:$0xff]  ;;  %v2700_v38 = vsel %vm1611_vm7, %v2680_v0, 0  ;;  %v2666_v28 = vadd.f32 %v2662_v41, %v2654_v10  ;;  %v2663_v30 = vmul.f32 %v2660_v14, %v2630_v3  ;;  %v2635_v52 = vmul.f32 %v2631_v23, %v15937_v9 }
 0x434   :  { %v2627_v61 = vld [vmem:[#allocation5 + $0x20] sm:$0xff]  ;;  %v2655_v57 = vadd.f32 %v2651_v43, %v2643_v46  ;;  %v16385_v53 = vand.u32 4294901760, %v2700_v38  ;;  %v2644_v50 = vmul.f32 %v2640_v1, %v2619_v56 }
 0x435   :  { %v2652_v24 = vmul.f32 %v2648_v16, %v2627_v61  ;;  %v2677_v37 = vadd.f32 %v11411_v15, %v2666_v28  ;;  %v2664_v29 = vmul.f32 %v2660_v14, %v2635_v52  ;;  %v3464_v52 = vld [vmem:[%s21401_s11 + $0x48] sm:$0xff] }
 0x436   :  { %v2667_v47 = vadd.f32 %v2663_v30, %v2655_v57  ;;  %v2785_v36 = vsub.f32 %v2700_v38, %v16385_v53 }
 0x437   :  { %v2656_v19 = vadd.f32 %v2652_v24, %v2644_v50  ;;  %v2681_v33 = vmax.f32 %v2677_v37, 0.0  ;;  %v3466_v50 = vld [vmem:[%s21401_s11 + $0x58] sm:$0xff]  ;;  %v3515_v24 = vand.u32 4294901760, %v3464_v52 }
 0x438   :  { %v2678_v11 = vadd.f32 %v11411_v15, %v2667_v47  ;;  %v2786_v58 = vand.u32 4294901760, %v2785_v36  ;;  %v3519_v37 = vand.u32 4294901760, %v3466_v50  ;;  %v3463_v47 = vld [vmem:[%s21401_s11 + $0x40] sm:$0xff] }
 0x439   :  { %v2668_v4 = vadd.f32 %v2664_v29, %v2656_v19  ;;  %v2703_v42 = vsel %vm1611_vm7, %v2681_v33, 0  ;;  %v3517_v29 = vand.u32 4294901760, %v3463_v47 }
 0x43a   :  { %v2682_v26 = vmax.f32 %v2678_v11, 0.0  ;;  %v2787_v54 = vsub.f32 %v2785_v36, %v2786_v58  ;;  %v16390_v7 = vand.u32 4294901760, %v2703_v42 }
 0x43b   :  { %v2679_v20 = vadd.f32 %v11411_v15, %v2668_v4 }
 0x43c   :  { %v2706_v1 = vsel %vm1611_vm7, %v2682_v26, 0  ;;  %v2788_v16 = vand.u32 4294901760, %v2787_v54  ;;  %v2795_v39 = vsub.f32 %v2703_v42, %v16390_v7  ;;  %v16509_v42 = vpack.c.bf16 %v3519_v37, %v3515_v24 }
 0x43d   :  { %v16394_v6 = vand.u32 4294901760, %v2706_v1  ;;  %v2683_v48 = vmax.f32 %v2679_v20, 0.0 }
 0x43e   :  { %12326 = vmatprep.mubr.f32.mxu1 %v2788_v16  ;;  %v2796_v14 = vand.u32 4294901760, %v2795_v39  ;;  %22431 = vst [vmem:[#allocation33_spill] sm:$0xff] %v16509_v42  ;;  %v3470_v16 = vld [vmem:[%s21401_s11 + $0x78] sm:$0xff] }
 0x43f   :  { %v2805_v8 = vsub.f32 %v2706_v1, %v16394_v6  ;;  %v2709_v10 = vsel %vm1611_vm7, %v2683_v48, 0  ;;  %v3468_v1 = vld [vmem:[%s21401_s11 + $0x68] sm:$0xff]  ;;  %v16531_v48 = vsub.f32 %v3466_v50, %v3519_v37 }
 0x440   :  { %v16398_v0 = vand.u32 4294901760, %v2709_v10  ;;  %v2797_v41 = vsub.f32 %v2795_v39, %v2796_v14 }
 0x441   :  { %v2806_v46 = vand.u32 4294901760, %v2805_v8 }
 0x442   :  { %v2815_v15 = vsub.f32 %v2709_v10, %v16398_v0  ;;  %v2798_v43 = vand.u32 4294901760, %v2797_v41  ;;  %v3469_v10 = vld [vmem:[%s21401_s11 + $0x70] sm:$0xff]  ;;  %v3474_v41 = vld [vmem:[%s21401_s11 + $0x98] sm:$0xff] }
 0x443   :  { %v2807_v3 = vsub.f32 %v2805_v8, %v2806_v46 }
 0x444   :  { %v2816_v56 = vand.u32 4294901760, %v2815_v15  ;;  %12327 = vmatmul.mubr.f32.vlgmr.msra.gmra.mrb[8].mxu1 %v2798_v43  ;;  %v3527_v43 = vand.u32 4294901760, %v3470_v16 }
 0x445   :  { %v2808_v61 = vand.u32 4294901760, %v2807_v3  ;;  %12629 = vmatpush3.bf16.msra.mxu1 %v16315_v60 }
 0x446   :  { %v2817_v38 = vsub.f32 %v2815_v15, %v2816_v56  ;;  %12631 = vmatprep.subr.bf16.mxu1 %v16318_v62 }
 0x447   :  { %12329 = vmatprep.mubr.f32.mxu1 %v2808_v61  ;;  %v3473_v61 = vld [vmem:[%s21401_s11 + $0x90] sm:$0xff] }
 0x448   :  { %v2818_v28 = vand.u32 4294901760, %v2817_v38  ;;  %v3529_v38 = vand.u32 4294901760, %v3469_v10  ;;  %v3537_v50 = vand.u32 4294901760, %v3473_v61 }
 0x449   :  { %12633 = vmatpush3.bf16.msra.mxu1 %v16318_v62  ;;  %v3457_v62 = vld [vmem:[%s21401_s11 + $0x10] sm:$0xff] }
 0x44a   :  { %12330 = vmatmul.mubr.f32.gmra.mrb[10].mxu1 %v2818_v28  ;;  %12635 = vmatprep.subr.bf16.mxu1 %v16320_v18 }
 0x44b   :  { %12348 = vmatprep.mubr.f32.mxu1 %v16385_v53 }
 0x44d   :  { %12637 = vmatpush3.bf16.msra.mxu1 %v16320_v18 }
 0x44e   :  { %12639 = vmatprep.subr.bf16.mxu1 %v16322_v2 }
 0x451   :  { %12641 = vmatpush3.bf16.msra.mxu1 %v16322_v2  ;;  %v3505_v2 = vand.u32 4294901760, %v3457_v62 }
 0x452   :  { %12643 = vmatprep.subr.bf16.mxu1 %v16324_v45 }
 0x453   :  { %v16507_v4 = vsub.f32 %v3457_v62, %v3505_v2 }
 0x454   :  { %12349 = vmatmul.mubr.f32.vlgmr.msra.gmra.mrb[8].mxu1 %v16390_v7 }
 0x455   :  { %12351 = vmatprep.mubr.f32.mxu1 %v16394_v6  ;;  %12645 = vmatpush3.bf16.msra.mxu1 %v16324_v45 }
 0x456   :  { %12647 = vmatprep.subr.bf16.mxu1 %v16326_v55 }
 0x458   :  { %12352 = vmatmul.mubr.f32.gmra.mrb[10].mxu1 %v16398_v0 }
 0x459   :  { %12649 = vmatpush3.bf16.msra.mxu1 %v16326_v55  ;;  %12370 = vmatprep.mubr.f32.mxu1 %v2785_v36  ;;  %v3465_v36 = vld [vmem:[%s21401_s11 + $0x50] sm:$0xff] }
 0x45a   :  { %12651 = vmatprep.subr.bf16.mxu1 %v16328_v34  ;;  %v3521_v33 = vand.u32 4294901760, %v3465_v36 }
 0x45d   :  { %12653 = vmatpush3.bf16.msra.mxu1 %v16328_v34  ;;  %v3460_v34 = vld [vmem:[%s21401_s11 + $0x28] sm:$0xff] }
 0x45e   :  { %12655 = vmatprep.subr.bf16.mxu1 %v16330_v44 }
 0x461   :  { %12657 = vmatpush3.bf16.msra.mxu1 %v16330_v44  ;;  %v3462_v44 = vld [vmem:[%s21401_s11 + $0x38] sm:$0xff] }
 0x462   :  { %12659 = vmatprep.subr.bf16.mxu1 %v16293_v35 }
 0x464   :  { %12371 = vmatmul.mubr.f32.vlgmr.msra.gmra.mrb[8].mxu1 %v2795_v39  ;;  %v3467_v39 = vld [vmem:[%s21401_s11 + $0x60] sm:$0xff] }
 0x465   :  { %12373 = vmatprep.mubr.f32.mxu1 %v2805_v8  ;;  %12661 = vmatpush3.bf16.msra.mxu1 %v16293_v35  ;;  %v16535_v8 = vsub.f32 %v3463_v47, %v3517_v29  ;;  %v3525_v3 = vand.u32 4294901760, %v3467_v39 }
 0x466   :  { %12663 = vmatprep.subr.bf16.mxu1 %v16295_v25 }
 0x468   :  { %12374 = vmatmul.mubr.f32.gmra.mrb[10].mxu1 %v2815_v15  ;;  %v3523_v15 = vand.u32 4294901760, %v3468_v1 }
 0x469   :  { %12665 = vmatpush3.bf16.msra.mxu1 %v16295_v25  ;;  %12392 = vmatprep.mubr.f32.mxu1 %v2786_v58 }
 0x46a   :  { %12667 = vmatprep.subr.bf16.mxu1 %v16300_v27  ;;  %v16563_v62 = vsub.f32 %v3468_v1, %v3523_v15 }
 0x46d   :  { %12669 = vmatpush3.bf16.msra.mxu1 %v16300_v27 }
 0x46e   :  { %12671 = vmatprep.subr.bf16.mxu1 %v16311_v40 }
 0x471   :  { %12673 = vmatpush3.bf16.msra.mxu1 %v16311_v40 }
 0x472   :  { %12675 = vmatprep.subr.bf16.mxu1 %v16332_v13 }
 0x474   :  { %12393 = vmatmul.mubr.f32.vlgmr.msra.gmra.mrb[8].mxu1 %v2796_v14  ;;  %v16533_v14 = vpack.c.bf16 %v3521_v33, %v3517_v29 }
 0x475   :  { %12395 = vmatprep.mubr.f32.mxu1 %v2806_v46  ;;  %12677 = vmatpush3.bf16.msra.mxu1 %v16332_v13  ;;  %v3507_v13 = vand.u32 4294901760, %v3460_v34  ;;  %v16546_v46 = vsub.f32 %v3465_v36, %v3521_v33 }
 0x476   :  { %12679 = vmatprep.subr.bf16.mxu1 %v16334_v5  ;;  %22432 = vst [vmem:[#allocation34_spill] sm:$0xff] %v16533_v14 }
 0x477   :  { %v16511_v26 = vsub.f32 %v3460_v34, %v3507_v13  ;;  %v3475_v34 = vld [vmem:[%s21401_s11 + $0xa0] sm:$0xff] }
 0x478   :  { %12396 = vmatmul.mubr.f32.gmra.mrb[10].mxu1 %v2816_v56  ;;  %v3471_v56 = vld [vmem:[%s21401_s11 + $0x80] sm:$0xff]  ;;  %v3541_v36 = vand.u32 4294901760, %v3475_v34 }
 0x479   :  { %12681 = vmatpush3.bf16.msra.mxu1 %v16334_v5  ;;  %12414 = vmatprep.mubr.f32.mxu1 %v16385_v53  ;;  %v3511_v5 = vand.u32 4294901760, %v3462_v44 }
 0x47a   :  { %12683 = vmatprep.subr.bf16.mxu1 %v16336_v51 }
 0x47b   :  { %v16483_v23 = vpack.c.bf16 %v3511_v5, %v3507_v13  ;;  %v16513_v54 = vsub.f32 %v3462_v44, %v3511_v5  ;;  %v3477_v44 = vld [vmem:[%s21401_s11 + $0xb0] sm:$0xff]  ;;  %v3480_v13 = vld [vmem:[%s21401_s11 + $0xc8] sm:$0xff]  ;;  %v16578_v5 = vpack.c.bf16 %v3529_v38, %v3525_v3 }
 0x47c   :  { %v3545_v29 = vand.u32 4294901760, %v3477_v44  ;;  %v3547_v33 = vand.u32 4294901760, %v3480_v13 }
 0x47d   :  { %12685 = vmatpush3.bf16.msra.mxu1 %v16336_v51  ;;  %v3459_v51 = vld [vmem:[%s21401_s11 + $0x20] sm:$0xff]  ;;  %22429 = vst [vmem:[#allocation31_spill] sm:$0xff] %v16483_v23  ;;  %22434 = vst [vmem:[#allocation36_spill] sm:$0xff] %v16578_v5 }
 0x47e   :  { %12687 = vmatprep.subr.bf16.mxu1 %v16338_v31  ;;  %v3509_v57 = vand.u32 4294901760, %v3459_v51 }
 0x481   :  { %12689 = vmatpush3.bf16.msra.mxu1 %v16338_v31  ;;  %v3461_v31 = vld [vmem:[%s21401_s11 + $0x30] sm:$0xff] }
 0x482   :  { %12691 = vmatprep.subr.bf16.mxu1 %v16293_v35  ;;  %v3513_v30 = vand.u32 4294901760, %v3461_v31 }
 0x484   :  { %12415 = vmatmul.mubr.f32.vlgmr.msra.gmra.mrb[8].mxu1 %v16390_v7  ;;  %v16517_v20 = vsub.f32 %v3461_v31, %v3513_v30 }
 0x485   :  { %12417 = vmatprep.mubr.f32.mxu1 %v16394_v6  ;;  %12693 = vmatpush3.bf16.msra.mxu1 %v16293_v35  ;;  %v3456_v35 = vld [vmem:[%s21401_s11 + $0x8] sm:$0xff] }
 0x486   :  { %12695 = vmatprep.subr.bf16.mxu1 %v16295_v25 }
 0x488   :  { %12418 = vmatmul.mubr.f32.gmra.mrb[10].mxu1 %v16398_v0 }
 0x489   :  { %12697 = vmatpush3.bf16.msra.mxu1 %v16295_v25  ;;  %12436 = vmatprep.mubr.f32.mxu1 %v16385_v53  ;;  %v3458_v25 = vld [vmem:[%s21401_s11 + $0x18] sm:$0xff]  ;;  %v16485_v53 = vpack.c.bf16 %v3513_v30, %v3509_v57 }
 0x48a   :  { %12699 = vmatprep.subr.bf16.mxu1 %v16300_v27  ;;  %v3503_v60 = vand.u32 4294901760, %v3458_v25  ;;  %v3482_v30 = vld [vmem:[%s21401_s11 + $0xd8] sm:$0xff] }
 0x48b   :  { %22430 = vst [vmem:[#allocation32_spill] sm:$0xff] %v16485_v53 }
 0x48c   :  { %v16503_v11 = vsub.f32 %v3458_v25, %v3503_v60  ;;  %v3533_v25 = vand.u32 4294901760, %v3471_v56 }
 0x48d   :  { %12701 = vmatpush3.bf16.msra.mxu1 %v16300_v27  ;;  %v3499_v27 = vand.u32 4294901760, %v3456_v35 }
 0x48e   :  { %12703 = vmatprep.subr.bf16.mxu1 %v16311_v40  ;;  %v16596_v1 = vpack.c.bf16 %v3537_v50, %v3533_v25 }
 0x48f   :  { %v16465_v45 = vpack.c.bf16 %v3503_v60, %v3499_v27  ;;  %v16500_v19 = vsub.f32 %v3456_v35, %v3499_v27  ;;  %v3535_v35 = vand.u32 4294901760, %v3474_v41  ;;  %v3476_v27 = vld [vmem:[%s21401_s11 + $0xa8] sm:$0xff]  ;;  %v3478_v60 = vld [vmem:[%s21401_s11 + $0xb8] sm:$0xff] }
 0x490   :  { %v3539_v37 = vand.u32 4294901760, %v3476_v27  ;;  %v3543_v47 = vand.u32 4294901760, %v3478_v60  ;;  %22437 = vst [vmem:[#allocation39_spill] sm:$0xff] %v16596_v1 }
 0x491   :  { %12705 = vmatpush3.bf16.msra.mxu1 %v16311_v40  ;;  %v3455_v40 = vld [vmem:[%s21401_s11] sm:$0xff]  ;;  %22427 = vst [vmem:[#allocation29_spill] sm:$0xff] %v16465_v45  ;;  %12707 = vmatprep.subr.bf16.mxu0 %v16465_v45 }
 0x492   :  { %v3501_v18 = vand.u32 4294901760, %v3455_v40 }
 0x494   :  { %12437 = vmatmul.mubr.f32.vlgmr.msra.gmra.mrb[8].mxu1 %v16390_v7  ;;  %v16467_v55 = vpack.c.bf16 %v3505_v2, %v3501_v18  ;;  %v16505_v58 = vsub.f32 %v3455_v40, %v3501_v18  ;;  %v16515_v7 = vsub.f32 %v3459_v51, %v3509_v57  ;;  %v16561_v40 = vpack.c.bf16 %v3527_v43, %v3523_v15  ;;  %v3484_v15 = vld [vmem:[%s21401_s11 + $0xe8] sm:$0xff] }
 0x495   :  { %12439 = vmatprep.mubr.f32.mxu1 %v16394_v6  ;;  %v16529_v6 = vsub.f32 %v3464_v52, %v3515_v24  ;;  %v16565_v18 = vsub.f32 %v3470_v16, %v3527_v43  ;;  %v16567_v2 = vsub.f32 %v3467_v39, %v3525_v3  ;;  %v16580_v51 = vsub.f32 %v3469_v10, %v3529_v38  ;;  %v3483_v38 = vld [vmem:[%s21401_s11 + $0xe0] sm:$0xff] }
 0x496   :  { %22428 = vst [vmem:[#allocation30_spill] sm:$0xff] %v16467_v55  ;;  %12709 = vmatpush1.bf16.msra.mxu0 %v16467_v55  ;;  %22433 = vst [vmem:[#allocation35_spill] sm:$0xff] %v16561_v40  ;;  %v16590_v52 = vsub.f32 %v3474_v41, %v3535_v35  ;;  %v16592_v24 = vsub.f32 %v3471_v56, %v3533_v25  ;;  %v16598_v16 = vsub.f32 %v3473_v61, %v3537_v50  ;;  %v3481_v41 = vld [vmem:[%s21401_s11 + $0xd0] sm:$0xff]  ;;  %v3486_v61 = vld [vmem:[%s21401_s11 + $0xf8] sm:$0xff] }
 0x497   :  { %12711 = vmatprep.subr.bf16.mxu0 %v16483_v23  ;;  %v16600_v39 = vsub.f32 %v3476_v27, %v3539_v37  ;;  %v3551_v10 = vand.u32 4294901760, %v3482_v30  ;;  %v16611_v43 = vpack.c.bf16 %v3543_v47, %v3539_v37  ;;  %v16613_v3 = vsub.f32 %v3478_v60, %v3543_v47  ;;  %v3485_v60 = vld [vmem:[%s21401_s11 + $0xf0] sm:$0xff] }
 0x498   :  { %12440 = vmatmul.mubr.f32.gmra.mrb[10].mxu1 %v16398_v0  ;;  %v3472_v0 = vld [vmem:[%s21401_s11 + $0x88] sm:$0xff]  ;;  %22436 = vst [vmem:[#allocation38_spill] sm:$0xff] %v16592_v24  ;;  %22438 = vst [vmem:[#allocation40_spill] sm:$0xff] %v16598_v16  ;;  %v16615_v56 = vsub.f32 %v3475_v34, %v3541_v36  ;;  %v16627_v25 = vsub.f32 %v3480_v13, %v3547_v33  ;;  %v3553_v37 = vand.u32 4294901760, %v3481_v41  ;;  %v3555_v47 = vand.u32 4294901760, %v3484_v15 }
 0x499   :  { %4595 = vmatprep.mubr.f32.mxu1 %v22422_v21  ;;  %v3531_v28 = vand.u32 4294901760, %v3472_v0  ;;  %22439 = vst [vmem:[#allocation41_spill] sm:$0xff] %v16600_v39  ;;  %22440 = vst [vmem:[#allocation42_spill] sm:$0xff] %v16611_v43  ;;  %v16629_v27 = vsub.f32 %v3482_v30, %v3551_v10  ;;  %v16635_v34 = vpack.c.bf16 %v3551_v10, %v3547_v33  ;;  %v21439_v13 = vand.u32 4294901760, %v16500_v19 }
 0x49a   :  { %12713 = vmatpush1.bf16.msra.mxu0 %v16485_v53  ;;  %22441 = vst [vmem:[#allocation43_spill] sm:$0xff] %v16613_v3  ;;  %22442 = vst [vmem:[#allocation44_spill] sm:$0xff] %v16615_v56  ;;  %v21438_v30 = vand.u32 4294901760, %v16503_v11  ;;  %v16642_v17 = vsub.f32 %v3481_v41, %v3553_v37 }
 0x49b   :  { %12715 = vmatprep.subr.bf16.mxu0 %v16509_v42  ;;  %v16582_v31 = vpack.c.bf16 %v3535_v35, %v3531_v28  ;;  %v16584_v57 = vsub.f32 %v3472_v0, %v3531_v28  ;;  %v3479_v0 = vld [vmem:[%s21401_s11 + $0xc0] sm:$0xff]  ;;  %v16623_v28 = vpack.c.bf16 %v3545_v29, %v3541_v36  ;;  %v16625_v35 = vsub.f32 %v3477_v44, %v3545_v29 }
 0x49c   :  { %22445 = vst [vmem:[#allocation47_spill] sm:$0xff] %v16627_v25  ;;  %22446 = vst [vmem:[#allocation48_spill] sm:$0xff] %v16629_v27  ;;  %v3549_v50 = vand.u32 4294901760, %v3479_v0  ;;  %v3559_v36 = vand.u32 4294901760, %v3486_v61  ;;  %v3557_v44 = vand.u32 4294901760, %v3483_v38  ;;  %v3655_v41 = vsub.f32 %v16503_v11, %v21438_v30 }
 0x49d   :  { %22435 = vst [vmem:[#allocation37_spill] sm:$0xff] %v16582_v31  ;;  %22443 = vst [vmem:[#allocation45_spill] sm:$0xff] %v16623_v28 }
 0x49e   :  { %12717 = vmatpush1.bf16.msra.mxu0 %v16533_v14  ;;  %22444 = vst [vmem:[#allocation46_spill] sm:$0xff] %v16625_v35  ;;  %22447 = vst [vmem:[#allocation49_spill] sm:$0xff] %v16635_v34  ;;  %v16640_v29 = vsub.f32 %v3479_v0, %v3549_v50  ;;  %v16646_v33 = vsub.f32 %v3486_v61, %v3559_v36  ;;  %v16648_v10 = vsub.f32 %v3483_v38, %v3557_v44 }
 0x49f   :  { %12719 = vmatprep.subr.bf16.mxu0 %v16561_v40  ;;  %22449 = vst [vmem:[#allocation51_spill] sm:$0xff] %v16642_v17  ;;  %v3643_v0 = vsub.f32 %v16500_v19, %v21439_v13  ;;  %v3656_v38 = vand.u32 4294901760, %v3655_v41  ;;  %v21444_v41 = vand.u32 4294901760, %v16511_v26  ;;  %v21447_v13 = vand.u32 4294901760, %v16513_v54 }
 0x4a0   :  { %22448 = vst [vmem:[#allocation50_spill] sm:$0xff] %v16640_v29  ;;  %22451 = vst [vmem:[#allocation53_spill] sm:$0xff] %v16646_v33 }
 0x4a1   :  { %22452 = vst [vmem:[#allocation54_spill] sm:$0xff] %v16648_v10  ;;  %v3644_v61 = vand.u32 4294901760, %v3643_v0 }
 0x4a2   :  { %12721 = vmatpush1.bf16.msra.mxu0 %v16578_v5  ;;  %v16644_v5 = vsub.f32 %v3484_v15, %v3555_v47  ;;  %v16662_v15 = vpack.c.bf16 %v3559_v36, %v3555_v47 }
 0x4a3   :  { %12723 = vmatprep.subr.bf16.mxu0 %v16582_v31  ;;  %v3561_v31 = vand.u32 4294901760, %v3485_v60 }
 0x4a4   :  { %22450 = vst [vmem:[#allocation52_spill] sm:$0xff] %v16644_v5  ;;  %22455 = vst [vmem:[#allocation57_spill] sm:$0xff] %v16662_v15 }
 0x4a6   :  { %12725 = vmatpush1.bf16.msra.mxu0 %v16596_v1  ;;  %v16653_v1 = vsub.f32 %v3485_v60, %v3561_v31  ;;  %v16667_v60 = vpack.c.bf16 %v3561_v31, %v3557_v44  ;;  %v21450_v31 = vand.u32 4294901760, %v16515_v7  ;;  %v21451_v44 = vand.u32 4294901760, %v16517_v20 }
 0x4a7   :  { %12727 = vmatprep.subr.bf16.mxu0 %v16611_v43  ;;  %v16651_v43 = vpack.c.bf16 %v3553_v37, %v3549_v50  ;;  %v21440_v50 = vand.u32 4294901760, %v16507_v4  ;;  %v12738_v37 = vpack.c.bf16 %v3656_v38, %v3644_v61  ;;  %v3667_v38 = vsub.f32 %v16511_v26, %v21444_v41 }
 0x4a8   :  { %22454 = vst [vmem:[#allocation56_spill] sm:$0xff] %v16653_v1  ;;  %22456 = vst [vmem:[#allocation58_spill] sm:$0xff] %v16667_v60 }
 0x4a9   :  { %22453 = vst [vmem:[#allocation55_spill] sm:$0xff] %v16651_v43  ;;  %v3661_v47 = vsub.f32 %v16507_v4, %v21440_v50  ;;  %v3685_v50 = vsub.f32 %v16517_v20, %v21451_v44  ;;  %v21460_v44 = vand.u32 4294901760, %v16563_v62 }
 0x4aa   :  { %12729 = vmatpush1.bf16.msra.mxu0 %v16623_v28  ;;  %v21441_v28 = vand.u32 4294901760, %v16505_v58 }
 0x4ab   :  { %12731 = vmatprep.subr.bf16.mxu0 %v16635_v34  ;;  %v3662_v0 = vand.u32 4294901760, %v3661_v47  ;;  %v3673_v47 = vsub.f32 %v16515_v7, %v21450_v31  ;;  %v3686_v41 = vand.u32 4294901760, %v3685_v50 }
 0x4ac   :  { %v3649_v30 = vsub.f32 %v16505_v58, %v21441_v28  ;;  %v3668_v28 = vand.u32 4294901760, %v3667_v38 }
 0x4ae   :  { %12733 = vmatpush1.bf16.msra.mxu0 %v16651_v43  ;;  %v3650_v36 = vand.u32 4294901760, %v3649_v30  ;;  %v3679_v30 = vsub.f32 %v16513_v54, %v21447_v13  ;;  %v21459_v13 = vand.u32 4294901760, %v16546_v46 }
 0x4af   :  { %12735 = vmatprep.subr.bf16.mxu0 %v16662_v15  ;;  %v21458_v15 = vand.u32 4294901760, %v16535_v8 }
 0x4b0   :  { %v16681_v61 = vpack.c.bf16 %v3662_v0, %v3650_v36  ;;  %v21452_v36 = vand.u32 4294901760, %v16529_v6  ;;  %v21457_v0 = vand.u32 4294901760, %v16531_v48 }
 0x4b1   :  { %v3697_v50 = vsub.f32 %v16535_v8, %v21458_v15  ;;  %v3715_v15 = vsub.f32 %v16563_v62, %v21460_v44  ;;  %v21473_v44 = vand.u32 4294901760, %v16590_v52 }
 0x4b2   :  { %12737 = vmatpush1.bf16.msra.mxu0 %v16667_v60  ;;  %v3674_v60 = vand.u32 4294901760, %v3673_v47  ;;  %v3691_v31 = vsub.f32 %v16529_v6, %v21452_v36  ;;  %v3703_v38 = vsub.f32 %v16531_v48, %v21457_v0  ;;  %v3709_v47 = vsub.f32 %v16546_v46, %v21459_v13 }
 0x4b3   :  { %12739 = vmatprep.subr.bf16.mxu0 %v12738_v37  ;;  %v3680_v37 = vand.u32 4294901760, %v3679_v30  ;;  %v21465_v36 = vand.u32 4294901760, %v16565_v18  ;;  %v3698_v34 = vand.u32 4294901760, %v3697_v50  ;;  %v21466_v0 = vand.u32 4294901760, %v16567_v2 }
 0x4b4   :  { %v16707_v30 = vpack.c.bf16 %v3686_v41, %v3674_v60  ;;  %v3710_v40 = vand.u32 4294901760, %v3709_v47  ;;  %v21467_v60 = vand.u32 4294901760, %v16580_v51  ;;  %v21468_v13 = vand.u32 4294901760, %v16584_v57 }
 0x4b5   :  { %v16699_v43 = vpack.c.bf16 %v3680_v37, %v3668_v28  ;;  %v3692_v28 = vand.u32 4294901760, %v3691_v31  ;;  %v3704_v37 = vand.u32 4294901760, %v3703_v38  ;;  %v3727_v31 = vsub.f32 %v16565_v18, %v21465_v36 }
 0x4b6   :  { %v16727_v38 = vpack.c.bf16 %v3710_v40, %v3698_v34  ;;  %v3721_v50 = vsub.f32 %v16567_v2, %v21466_v0  ;;  %v3733_v47 = vsub.f32 %v16580_v51, %v21467_v60  ;;  %v21474_v36 = vand.u32 4294901760, %v16592_v24 }
 0x4b7   :  { %v16719_v41 = vpack.c.bf16 %v3704_v37, %v3692_v28  ;;  %v3716_v28 = vand.u32 4294901760, %v3715_v15  ;;  %v3728_v37 = vand.u32 4294901760, %v3727_v31  ;;  %v21475_v40 = vand.u32 4294901760, %v16598_v16 }
 0x4b8   :  { %v3722_v14 = vand.u32 4294901760, %v3721_v50  ;;  %v3734_v42 = vand.u32 4294901760, %v3733_v47  ;;  %v3739_v0 = vsub.f32 %v16584_v57, %v21468_v13  ;;  %v3751_v15 = vsub.f32 %v16590_v52, %v21473_v44 }
 0x4b9   :  { %v16739_v34 = vpack.c.bf16 %v3728_v37, %v3716_v28  ;;  %v3745_v50 = vsub.f32 %v16592_v24, %v21474_v36  ;;  %v3757_v47 = vsub.f32 %v16598_v16, %v21475_v40  ;;  %v21476_v60 = vand.u32 4294901760, %v16600_v39 }
 0x4ba   :  { %v16747_v31 = vpack.c.bf16 %v3734_v42, %v3722_v14  ;;  %v3740_v28 = vand.u32 4294901760, %v3739_v0  ;;  %v3752_v37 = vand.u32 4294901760, %v3751_v15  ;;  %v21481_v13 = vand.u32 4294901760, %v16613_v3 }
 0x4bb   :  { %v3746_v53 = vand.u32 4294901760, %v3745_v50  ;;  %v3758_v23 = vand.u32 4294901760, %v3757_v47  ;;  %v21482_v44 = vand.u32 4294901760, %v16615_v56  ;;  %v21483_v42 = vand.u32 4294901760, %v16625_v35 }
 0x4bc   :  { %v16759_v14 = vpack.c.bf16 %v3752_v37, %v3740_v28  ;;  %v3763_v36 = vsub.f32 %v16600_v39, %v21476_v60  ;;  %v3775_v0 = vsub.f32 %v16613_v3, %v21481_v13  ;;  %v21484_v40 = vand.u32 4294901760, %v16627_v25 }
 0x4bd   :  { %v16767_v15 = vpack.c.bf16 %v3758_v23, %v3746_v53  ;;  %v3769_v50 = vsub.f32 %v16615_v56, %v21482_v44  ;;  %v3781_v47 = vsub.f32 %v16625_v35, %v21483_v42  ;;  %v21485_v60 = vand.u32 4294901760, %v16629_v27 }
 0x4be   :  { %v3764_v28 = vand.u32 4294901760, %v3763_v36  ;;  %v3776_v37 = vand.u32 4294901760, %v3775_v0  ;;  %v21486_v13 = vand.u32 4294901760, %v16640_v29  ;;  %v21487_v23 = vand.u32 4294901760, %v16642_v17 }
 0x4bf   :  { %22457 = vst [vmem:[#allocation59_spill] sm:$0xff] %v16767_v15  ;;  %v3770_v55 = vand.u32 4294901760, %v3769_v50  ;;  %v3782_v45 = vand.u32 4294901760, %v3781_v47  ;;  %v3787_v44 = vsub.f32 %v16627_v25, %v21484_v40  ;;  %v3799_v36 = vsub.f32 %v16629_v27, %v21485_v60 }
 0x4c0   :  { %v16779_v53 = vpack.c.bf16 %v3776_v37, %v3764_v28  ;;  %v3793_v50 = vsub.f32 %v16640_v29, %v21486_v13  ;;  %v3805_v47 = vsub.f32 %v16642_v17, %v21487_v23  ;;  %v21488_v42 = vand.u32 4294901760, %v16644_v5 }
 0x4c1   :  { %v16787_v0 = vpack.c.bf16 %v3782_v45, %v3770_v55  ;;  %v3788_v28 = vand.u32 4294901760, %v3787_v44  ;;  %v3800_v37 = vand.u32 4294901760, %v3799_v36  ;;  %v21491_v40 = vand.u32 4294901760, %v16646_v33 }
 0x4c2   :  { %22458 = vst [vmem:[#allocation60_spill] sm:$0xff] %v16779_v53  ;;  %v3794_v53 = vand.u32 4294901760, %v3793_v50  ;;  %v3806_v15 = vand.u32 4294901760, %v3805_v47  ;;  %v21489_v60 = vand.u32 4294901760, %v16648_v10  ;;  %v21490_v45 = vand.u32 4294901760, %v16653_v1 }
 0x4c3   :  { %22459 = vst [vmem:[#allocation61_spill] sm:$0xff] %v16787_v0  ;;  %v16799_v55 = vpack.c.bf16 %v3800_v37, %v3788_v28  ;;  %v3811_v13 = vsub.f32 %v16644_v5, %v21488_v42  ;;  %v3823_v44 = vsub.f32 %v16646_v33, %v21491_v40 }
 0x4c4   :  { %v16807_v36 = vpack.c.bf16 %v3806_v15, %v3794_v53  ;;  %v3817_v50 = vsub.f32 %v16648_v10, %v21489_v60  ;;  %v3829_v47 = vsub.f32 %v16653_v1, %v21490_v45 }
 0x4c5   :  { %22460 = vst [vmem:[#allocation62_spill] sm:$0xff] %v16799_v55  ;;  %v3812_v28 = vand.u32 4294901760, %v3811_v13  ;;  %v3824_v37 = vand.u32 4294901760, %v3823_v44  ;;  %v11412_v44 = vld [vmem:[#allocation7] ss:$0 sm:$0xff] }
 0x4c6   :  { %v3818_v23 = vand.u32 4294901760, %v3817_v50  ;;  %v3830_v55 = vand.u32 4294901760, %v3829_v47 }
 0x4c7   :  { %v16815_v0 = vpack.c.bf16 %v3824_v37, %v3812_v28 }
 0x4c8   :  { %v16817_v42 = vpack.c.bf16 %v3830_v55, %v3818_v23  ;;  %v3407_v55 = vld [vmem:[#allocation9] sm:$0x7] }
 0x4c9   :  { %v3411_v50 = vrot.slane %v3407_v55, %v16353_v32  ;;  %v3419_v10 = vrot.slane %v3407_v55, %v16356_v59 }
 0x567   :  { %v12438_v47 = vpop.f32.mrb[8].mxu1 }
 0x568   :  { %v14698_v13 = vadd.f32 %v12438_v47, %v11412_v44  ;;  %v3355_v45 = vpop.f32.mrb[9].mxu1 }
 0x569   :  { %v14699_v28 = vadd.f32 %v11412_v44, %v3355_v45 }
 0x56a   :  { %v3378_v60 = vmax.f32 %v14698_v13, 0.0  ;;  %v3431_v13 = vrot.slane %v3407_v55, %v16363_v49 }
 0x56b   :  { %v3377_v53 = vmax.f32 %v14699_v28, 0.0  ;;  %v12441_v37 = vpop.f32.mrb[10].mxu1 }
 0x56c   :  { %3384 = vst [vmem:[#allocation6 + $0x10] sm:$0xff] %v3378_v60  ;;  %v14700_v15 = vadd.f32 %v12441_v37, %v11412_v44  ;;  %v3367_v40 = vpop.f32.mrb[11].mxu1 }
 0x56d   :  { %3383 = vst [vmem:[#allocation6 + $0x8] sm:$0xff] %v3377_v53  ;;  %v14701_v25 = vadd.f32 %v11412_v44, %v3367_v40  ;;  %v3420_v5 = vmul.f32 %v3419_v10, %v3377_v53 }
 0x56e   :  { %v3380_v23 = vmax.f32 %v14700_v15, 0.0 }
 0x56f   :  { %v3379_v29 = vmax.f32 %v14701_v25, 0.0  ;;  %v3421_v25 = vmul.f32 %v3419_v10, %v3378_v60 }
 0x570   :  { %3386 = vst [vmem:[#allocation6 + $0x20] sm:$0xff] %v3380_v23 }
 0x571   :  { %3385 = vst [vmem:[#allocation6 + $0x18] sm:$0xff] %v3379_v29  ;;  %v3422_v53 = vmul.f32 %v3419_v10, %v3379_v29 }
 0x574   :  { %v3387_v47 = vld [vmem:[#allocation6 + $0x7] sm:$0xff]  ;;  %v3388_v1 = vld [vmem:[#allocation6 + $0xf] sm:$0xff] }
 0x575   :  { %v3391_v45 = vmul.f32 %v3387_v47, %v16053_v12  ;;  %v3399_v28 = vld [vmem:[#allocation6 + $0x9] sm:$0xff]  ;;  %v3413_v33 = vmul.f32 %v3411_v50, %v3388_v1  ;;  %v11413_v12 = vld [vmem:[%s21400_s10] ss:$0 sm:$0xff]  ;;  %v3423_v47 = vmul.f32 %v3419_v10, %v3380_v23 }
 0x576   :  { %v3432_v32 = vmul.f32 %v3431_v13, %v3399_v28 }
 0x577   :  { %v3412_v37 = vmul.f32 %v3411_v50, %v3391_v45  ;;  %v3402_v40 = vld [vmem:[#allocation6 + $0x21] sm:$0xff]  ;;  %v3425_v49 = vadd.f32 %v3421_v25, %v3413_v33 }
 0x578   :  { %v3400_v15 = vld [vmem:[#allocation6 + $0x11] sm:$0xff]  ;;  %v3406_v17 = vmul.f32 %v3402_v40, %v15937_v9  ;;  %v3390_v35 = vld [vmem:[#allocation6 + $0x1f] sm:$0xff] }
 0x579   :  { %v3389_v44 = vld [vmem:[#allocation6 + $0x17] sm:$0xff]  ;;  %v3424_v27 = vadd.f32 %v3420_v5, %v3412_v37  ;;  %v3404_v59 = vmul.f32 %v3400_v15, %v16374_v63  ;;  %v3415_v1 = vmul.f32 %v3411_v50, %v3390_v35 }
 0x57a   :  { %v3393_v56 = vmul.f32 %v3389_v44, %v16380_v22  ;;  %v3401_v55 = vld [vmem:[#allocation6 + $0x19] sm:$0xff]  ;;  %v3435_v45 = vmul.f32 %v3431_v13, %v3406_v17 }
 0x57b   :  { %v3436_v60 = vadd.f32 %v3432_v32, %v3424_v27  ;;  %v3433_v39 = vmul.f32 %v3431_v13, %v3404_v59  ;;  %v3427_v5 = vadd.f32 %v3423_v47, %v3415_v1  ;;  %v3434_v40 = vmul.f32 %v3431_v13, %v3401_v55  ;;  %v22463_v47 = vld [vmem:[#allocation61_spill] sm:$0xff] }
 0x57c   :  { %v3414_v9 = vmul.f32 %v3411_v50, %v3393_v56 }
 0x57d   :  { %v3447_v28 = vadd.f32 %v11413_v12, %v3436_v60  ;;  %v3437_v37 = vadd.f32 %v3433_v39, %v3425_v49  ;;  %v3439_v22 = vadd.f32 %v3435_v45, %v3427_v5  ;;  %v22464_v45 = vld [vmem:[#allocation62_spill] sm:$0xff]  ;;  %v22472_v60 = vpack.c.bf16 %v16580_v51, %v16567_v2  ;;  %v22474_v5 = vld [vmem:[#allocation40_spill] sm:$0xff] }
 0x57e   :  { %v3426_v63 = vadd.f32 %v3422_v53, %v3414_v9  ;;  %v22473_v9 = vpack.c.bf16 %v16590_v52, %v16584_v57 }
 0x57f   :  { %v3451_v15 = vmax.f32 %v3447_v28, 0.0  ;;  %v3448_v44 = vadd.f32 %v11413_v12, %v3437_v37  ;;  %v3450_v24 = vadd.f32 %v11413_v12, %v3439_v22  ;;  %v22475_v28 = vld [vmem:[#allocation38_spill] sm:$0xff] }
 0x580   :  { %v3438_v3 = vadd.f32 %v3434_v40, %v3426_v63  ;;  %v22476_v37 = vpack.c.bf16 %v22474_v5, %v22475_v28  ;;  %v22477_v63 = vld [vmem:[#allocation43_spill] sm:$0xff]  ;;  %v22478_v40 = vld [vmem:[#allocation41_spill] sm:$0xff] }
 0x581   :  { %v16861_v16 = vand.u32 4294901760, %v3451_v15  ;;  %v3452_v29 = vmax.f32 %v3448_v44, 0.0  ;;  %v3454_v10 = vmax.f32 %v3450_v24, 0.0  ;;  %v22479_v22 = vpack.c.bf16 %v22477_v63, %v22478_v40  ;;  %v22481_v44 = vld [vmem:[#allocation44_spill] sm:$0xff] }
 0x582   :  { %v3449_v35 = vadd.f32 %v11413_v12, %v3438_v3 }
 0x583   :  { %v16864_v17 = vsub.f32 %v3451_v15, %v16861_v16  ;;  %v16866_v32 = vand.u32 4294901760, %v3452_v29  ;;  %v16874_v27 = vand.u32 4294901760, %v3454_v10  ;;  %v22480_v15 = vld [vmem:[#allocation46_spill] sm:$0xff] }
 0x584   :  { %v3453_v59 = vmax.f32 %v3449_v35, 0.0  ;;  %v22483_v35 = vld [vmem:[#allocation48_spill] sm:$0xff] }
 0x585   :  { %v21528_v49 = vand.u32 4294901760, %v16864_v17  ;;  %v16870_v39 = vsub.f32 %v3452_v29, %v16866_v32  ;;  %v16888_v25 = vsub.f32 %v3454_v10, %v16874_v27  ;;  %v22482_v29 = vpack.c.bf16 %v22480_v15, %v22481_v44  ;;  %v22484_v10 = vld [vmem:[#allocation47_spill] sm:$0xff] }
 0x586   :  { %v16872_v56 = vand.u32 4294901760, %v3453_v59 }
 0x587   :  { %v3599_v3 = vsub.f32 %v16864_v17, %v21528_v49  ;;  %v21527_v24 = vand.u32 4294901760, %v16870_v39  ;;  %v21525_v53 = vand.u32 4294901760, %v16888_v25  ;;  %v22515_v49 = vand.u32 4294901760, %v16511_v26 }
 0x588   :  { %v16881_v33 = vsub.f32 %v3453_v59, %v16872_v56  ;;  %v22485_v59 = vpack.c.bf16 %v22483_v35, %v22484_v10 }
 0x589   :  { %v3600_v23 = vand.u32 4294901760, %v3599_v3  ;;  %v3610_v50 = vsub.f32 %v16870_v39, %v21527_v24  ;;  %v22486_v3 = vld [vmem:[#allocation51_spill] sm:$0xff] }
 0x58a   :  { %v21526_v13 = vand.u32 4294901760, %v16881_v33 }
 0x58b   :  { %3601 = vmatmul.mubr.f32.vlgmr.msra.gmra.mrb[16].mxu0 %v3600_v23  ;;  %v3611_v12 = vand.u32 4294901760, %v3610_v50  ;;  %v22487_v23 = vld [vmem:[#allocation50_spill] sm:$0xff] }
 0x58c   :  { %12741 = vmatpush1.bf16.msra.mxu0 %v16681_v61  ;;  %3606 = vmatprep.mubr.f32.mxu0 %v22422_v21  ;;  %v3621_v55 = vsub.f32 %v16881_v33, %v21526_v13  ;;  %v3632_v61 = vsub.f32 %v16888_v25, %v21525_v53  ;;  %v22488_v50 = vpack.c.bf16 %v22486_v3, %v22487_v23  ;;  %v22513_v53 = vand.u32 4294901760, %v16505_v58 }
 0x58d   :  { %12743 = vmatprep.subr.bf16.mxu0 %v16699_v43  ;;  %v22514_v13 = vand.u32 4294901760, %v16507_v4 }
 0x58e   :  { %v3622_v1 = vand.u32 4294901760, %v3621_v55  ;;  %v3633_v43 = vand.u32 4294901760, %v3632_v61  ;;  %v22490_v55 = vld [vmem:[#allocation52_spill] sm:$0xff] }
 0x58f   :  { %3612 = vmatmul.mubr.f32.gmra.mrb[18].mxu0 %v3611_v12  ;;  %v22489_v12 = vld [vmem:[#allocation53_spill] sm:$0xff]  ;;  %v22492_v61 = vld [vmem:[#allocation56_spill] sm:$0xff]  ;;  %v12836_v24 = vpack.c.bf16 %v22514_v13, %v22513_v53  ;;  %v22521_v13 = vand.u32 4294901760, %v16531_v48  ;;  %v22529_v53 = vand.u32 4294901760, %v16580_v51  ;;  %v22536_v51 = vand.u32 4294901760, %v22477_v63 }
 0x590   :  { %12745 = vmatpush1.bf16.msra.mxu0 %v16707_v30  ;;  %3617 = vmatprep.mubr.f32.mxu0 %v22422_v21  ;;  %v22461_v30 = vld [vmem:[#allocation59_spill] sm:$0xff]  ;;  %v22543_v63 = vand.u32 4294901760, %v22490_v55 }
 0x591   :  { %12747 = vmatprep.subr.bf16.mxu0 %v16719_v41  ;;  %v22462_v41 = vld [vmem:[#allocation60_spill] sm:$0xff] }
 0x593   :  { %3623 = vmatmul.mubr.f32.gmra.mrb[20].mxu0 %v3622_v1  ;;  %v22491_v1 = vpack.c.bf16 %v22489_v12, %v22490_v55  ;;  %v5071_v55 = vld [vmem:[#allocation12 + $0x28] sm:$0xff] }
 0x594   :  { %12749 = vmatpush1.bf16.msra.mxu0 %v16727_v38  ;;  %3628 = vmatprep.mubr.f32.mxu0 %v22422_v21  ;;  %v22465_v38 = vpack.c.bf16 %v16503_v11, %v16500_v19 }
 0x595   :  { %12751 = vmatprep.subr.bf16.mxu0 %v16739_v34  ;;  %v22466_v34 = vpack.c.bf16 %v16507_v4, %v16505_v58  ;;  %v22520_v4 = vand.u32 4294901760, %v16529_v6 }
 0x597   :  { %3634 = vmatmul.mubr.f32.gmra.mrb[22].mxu0 %v3633_v43  ;;  %v22493_v43 = vld [vmem:[#allocation54_spill] sm:$0xff] }
 0x598   :  { %12753 = vmatpush1.bf16.msra.mxu0 %v16747_v31  ;;  %3864 = vmatprep.mubr.f32.mxu0 %v22422_v21  ;;  %v22467_v31 = vpack.c.bf16 %v16513_v54, %v16511_v26  ;;  %v12842_v26 = vpack.c.bf16 %v22521_v13, %v22520_v4 }
 0x599   :  { %12755 = vmatprep.subr.bf16.mxu0 %v16759_v14  ;;  %v22469_v14 = vpack.c.bf16 %v16531_v48, %v16529_v6  ;;  %v22527_v48 = vand.u32 4294901760, %v16881_v33 }
 0x59c   :  { %12757 = vmatpush1.bf16.msra.mxu0 %v22461_v30  ;;  %v22494_v30 = vpack.c.bf16 %v22492_v61, %v22493_v43 }
 0x59d   :  { %12759 = vmatprep.subr.bf16.mxu0 %v22462_v41  ;;  %v22495_v41 = vld [vmem:[#allocation29_spill] sm:$0xff] }
 0x5a0   :  { %12761 = vmatpush1.bf16.msra.mxu0 %v22463_v47  ;;  %v22496_v47 = vld [vmem:[#allocation30_spill] sm:$0xff] }
 0x5a1   :  { %12763 = vmatprep.subr.bf16.mxu0 %v22464_v45  ;;  %v22497_v45 = vld [vmem:[#allocation31_spill] sm:$0xff] }
 0x5a4   :  { %12765 = vmatpush1.bf16.msra.mxu0 %v16807_v36  ;;  %v22471_v36 = vpack.c.bf16 %v16565_v18, %v16563_v62 }
 0x5a5   :  { %12767 = vmatprep.subr.bf16.mxu0 %v16815_v0  ;;  %v22470_v0 = vpack.c.bf16 %v16546_v46, %v16535_v8 }
 0x5a8   :  { %12769 = vmatpush1.bf16.msra.mxu0 %v16817_v42  ;;  %v22468_v42 = vpack.c.bf16 %v16517_v20, %v16515_v7 }
 0x5a9   :  { %12771 = vmatprep.subr.bf16.mxu0 %v22465_v38  ;;  %v22498_v38 = vld [vmem:[#allocation32_spill] sm:$0xff] }
 0x5ab   :  { %3866 = vmatmul.mubr.f32.vlgmr.msra.gmra.mrb[16].mxu0 %v16861_v16 }
 0x5ac   :  { %12773 = vmatpush1.bf16.msra.mxu0 %v22466_v34  ;;  %3871 = vmatprep.mubr.f32.mxu0 %v22422_v21  ;;  %v22499_v34 = vld [vmem:[#allocation33_spill] sm:$0xff] }
 0x5ad   :  { %12775 = vmatprep.subr.bf16.mxu0 %v22467_v31  ;;  %v22500_v31 = vld [vmem:[#allocation34_spill] sm:$0xff] }
 0x5af   :  { %3873 = vmatmul.mubr.f32.gmra.mrb[18].mxu0 %v16866_v32 }
 0x5b0   :  { %12777 = vmatpush1.bf16.msra.mxu0 %v22468_v42  ;;  %3878 = vmatprep.mubr.f32.mxu0 %v22422_v21  ;;  %v22501_v42 = vld [vmem:[#allocation35_spill] sm:$0xff] }
 0x5b1   :  { %12779 = vmatprep.subr.bf16.mxu0 %v22469_v14  ;;  %v22502_v14 = vld [vmem:[#allocation36_spill] sm:$0xff] }
 0x5b3   :  { %3880 = vmatmul.mubr.f32.gmra.mrb[20].mxu0 %v16872_v56 }
 0x5b4   :  { %12781 = vmatpush1.bf16.msra.mxu0 %v22470_v0  ;;  %3885 = vmatprep.mubr.f32.mxu0 %v22422_v21  ;;  %v22503_v0 = vld [vmem:[#allocation37_spill] sm:$0xff] }
 0x5b5   :  { %12783 = vmatprep.subr.bf16.mxu0 %v22471_v36  ;;  %v22504_v36 = vld [vmem:[#allocation39_spill] sm:$0xff] }
 0x5b7   :  { %3887 = vmatmul.mubr.f32.gmra.mrb[22].mxu0 %v16874_v27 }
 0x5b8   :  { %12785 = vmatpush1.bf16.msra.mxu0 %v22472_v60  ;;  %4021 = vmatprep.mubr.f32.mxu0 %v22422_v21  ;;  %v22505_v60 = vld [vmem:[#allocation42_spill] sm:$0xff] }
 0x5b9   :  { %12787 = vmatprep.subr.bf16.mxu0 %v22473_v9  ;;  %v22506_v9 = vld [vmem:[#allocation45_spill] sm:$0xff] }
 0x5bc   :  { %12789 = vmatpush1.bf16.msra.mxu0 %v22476_v37  ;;  %v22507_v37 = vld [vmem:[#allocation49_spill] sm:$0xff] }
 0x5bd   :  { %12791 = vmatprep.subr.bf16.mxu0 %v22479_v22  ;;  %v22508_v22 = vld [vmem:[#allocation55_spill] sm:$0xff] }
 0x5c0   :  { %12793 = vmatpush1.bf16.msra.mxu0 %v22482_v29  ;;  %v22509_v29 = vld [vmem:[#allocation57_spill] sm:$0xff] }
 0x5c1   :  { %12795 = vmatprep.subr.bf16.mxu0 %v22485_v59  ;;  %v22510_v59 = vand.u32 4294901760, %v16500_v19  ;;  %v22518_v19 = vand.u32 4294901760, %v16515_v7 }
 0x5c4   :  { %12797 = vmatpush1.bf16.msra.mxu0 %v22488_v50  ;;  %v22511_v50 = vand.u32 4294901760, %v16503_v11  ;;  %v22519_v11 = vand.u32 4294901760, %v16517_v20  ;;  %v22525_v20 = vand.u32 4294901760, %v16563_v62 }
 0x5c5   :  { %12799 = vmatprep.subr.bf16.mxu0 %v22491_v1 }
 0x5c6   :  { %v12834_v1 = vpack.c.bf16 %v22511_v50, %v22510_v59  ;;  %v12840_v58 = vpack.c.bf16 %v22519_v11, %v22518_v19 }
 0x5c8   :  { %12801 = vmatpush1.bf16.msra.mxu0 %v22494_v30  ;;  %v22512_v30 = vld [vmem:[#allocation58_spill] sm:$0xff] }
 0x5c9   :  { %12803 = vmatprep.subr.bf16.mxu0 %v22495_v41 }
 0x5cb   :  { %4024 = vmatmul.mubr.f32.vlgmr.msra.gmra.mrb[16].mxu0 %v16864_v17 }
 0x5cc   :  { %12805 = vmatpush1.bf16.msra.mxu0 %v22496_v47  ;;  %4029 = vmatprep.mubr.f32.mxu0 %v22422_v21 }
 0x5cd   :  { %12807 = vmatprep.subr.bf16.mxu0 %v22497_v45 }
 0x5cf   :  { %4032 = vmatmul.mubr.f32.gmra.mrb[18].mxu0 %v16870_v39 }
 0x5d0   :  { %12809 = vmatpush1.bf16.msra.mxu0 %v22498_v38  ;;  %4037 = vmatprep.mubr.f32.mxu0 %v22422_v21 }
 0x5d1   :  { %12811 = vmatprep.subr.bf16.mxu0 %v22499_v34 }
 0x5d3   :  { %4040 = vmatmul.mubr.f32.gmra.mrb[20].mxu0 %v16881_v33  ;;  %v22533_v33 = vand.u32 4294901760, %v22475_v28  ;;  %v22539_v28 = vand.u32 4294901760, %v22484_v10  ;;  %v22546_v10 = vand.u32 4294901760, %v22492_v61  ;;  %v5066_v61 = vld [vmem:[#allocation12] sm:$0xff] }
 0x5d4   :  { %12813 = vmatpush1.bf16.msra.mxu0 %v22500_v31  ;;  %4045 = vmatprep.mubr.f32.mxu0 %v22422_v21 }
 0x5d5   :  { %12815 = vmatprep.subr.bf16.mxu0 %v22501_v42 }
 0x5d7   :  { %4048 = vmatmul.mubr.f32.gmra.mrb[22].mxu0 %v16888_v25 }
 0x5d8   :  { %12817 = vmatpush1.bf16.msra.mxu0 %v22502_v14  ;;  %4150 = vmatprep.mubr.f32.mxu0 %v22422_v21 }
 0x5d9   :  { %12819 = vmatprep.subr.bf16.mxu0 %v22503_v0 }
 0x5dc   :  { %12821 = vmatpush1.bf16.msra.mxu0 %v22504_v36 }
 0x5dd   :  { %12823 = vmatprep.subr.bf16.mxu0 %v22505_v60 }
 0x5e0   :  { %12825 = vmatpush1.bf16.msra.mxu0 %v22506_v9 }
 0x5e1   :  { %12827 = vmatprep.subr.bf16.mxu0 %v22507_v37  ;;  %v22516_v37 = vand.u32 4294901760, %v16513_v54  ;;  %v22522_v54 = vand.u32 4294901760, %v16870_v39  ;;  %v22528_v39 = vand.u32 4294901760, %v16567_v2  ;;  %v22535_v2 = vand.u32 4294901760, %v22478_v40 }
 0x5e2   :  { %v22542_v40 = vand.u32 4294901760, %v22486_v3  ;;  %v22548_v3 = vld [vmem:[#allocation55_spill] sm:$0xff] }
 0x5e4   :  { %12829 = vmatpush1.bf16.msra.mxu0 %v22508_v22  ;;  %v12838_v22 = vpack.c.bf16 %v22516_v37, %v22515_v49  ;;  %v22524_v49 = vand.u32 4294901760, %v16546_v46  ;;  %v22530_v46 = vand.u32 4294901760, %v16584_v57  ;;  %v22531_v37 = vand.u32 4294901760, %v16590_v52 }
 0x5e5   :  { %12831 = vmatprep.subr.bf16.mxu0 %v22509_v29  ;;  %v22517_v29 = vand.u32 4294901760, %v16864_v17  ;;  %v22523_v17 = vand.u32 4294901760, %v16535_v8  ;;  %v12848_v8 = vpack.c.bf16 %v22529_v53, %v22528_v39  ;;  %v12854_v57 = vpack.c.bf16 %v22536_v51, %v22535_v2 }
 0x5e6   :  { %v12850_v62 = vpack.c.bf16 %v22531_v37, %v22530_v46  ;;  %v22537_v52 = vand.u32 4294901760, %v22481_v44  ;;  %v22544_v44 = vand.u32 4294901760, %v22489_v12  ;;  %v5067_v12 = vld [vmem:[#allocation12 + $0x8] sm:$0xff] }
 0x5e7   :  { %v12844_v7 = vpack.c.bf16 %v22524_v49, %v22523_v17  ;;  %v5082_v49 = vld [vmem:[#allocation12 + $0x80] sm:$0xff]  ;;  %v5091_v46 = vld [vmem:[#allocation12 + $0xc8] sm:$0xff] }
 0x5e8   :  { %12833 = vmatpush1.bf16.msra.mxu0 %v22512_v30  ;;  %v12862_v11 = vpack.c.bf16 %v22544_v44, %v22543_v63  ;;  %v5234_v53 = vand.u32 4294901760, %v5082_v49  ;;  %v5095_v37 = vld [vmem:[#allocation12 + $0xe8] sm:$0xff]  ;;  %v5098_v63 = vld [vmem:[#allocation12 + $0x100] sm:$0xff] }
 0x5e9   :  { %12835 = vmatprep.subr.bf16.mxu0 %v12834_v1  ;;  %v22541_v1 = vand.u32 4294901760, %v22487_v23  ;;  %v22549_v23 = vld [vmem:[#allocation57_spill] sm:$0xff] }
 0x5ea   :  { %v17131_v2 = vsub.f32 %v5082_v49, %v5234_v53  ;;  %v5102_v44 = vld [vmem:[#allocation12 + $0x120] sm:$0xff] }
 0x5eb   :  { %4154 = vmatmul.mubr.f32.vlgmr.msra.gmra.mrb[16].mxu0 %v22517_v29  ;;  %v12860_v19 = vpack.c.bf16 %v22542_v40, %v22541_v1  ;;  %v5103_v1 = vld [vmem:[#allocation12 + $0x128] sm:$0xff] }
 0x5ec   :  { %12837 = vmatpush1.bf16.msra.mxu0 %v12836_v24  ;;  %4159 = vmatprep.mubr.f32.mxu0 %v22422_v21  ;;  %v22526_v24 = vand.u32 4294901760, %v16565_v18  ;;  %v22532_v18 = vand.u32 4294901760, %v16888_v25  ;;  %v22538_v25 = vand.u32 4294901760, %v22480_v15  ;;  %v22545_v15 = vand.u32 4294901760, %v22493_v43 }
 0x5ed   :  { %12839 = vmatprep.subr.bf16.mxu0 %v12838_v22  ;;  %v22534_v22 = vand.u32 4294901760, %v22474_v5  ;;  %v22540_v5 = vand.u32 4294901760, %v22483_v35  ;;  %v22547_v35 = vld [vmem:[#allocation49_spill] sm:$0xff]  ;;  %v5216_v43 = vand.u32 4294901760, %v5067_v12 }
 0x5ee   :  { %v12846_v6 = vpack.c.bf16 %v22526_v24, %v22525_v20  ;;  %v12856_v59 = vpack.c.bf16 %v22538_v25, %v22537_v52 }
 0x5ef   :  { %4163 = vmatmul.mubr.f32.gmra.mrb[18].mxu0 %v22522_v54  ;;  %v12852_v29 = vpack.c.bf16 %v22534_v22, %v22533_v33  ;;  %v12858_v50 = vpack.c.bf16 %v22540_v5, %v22539_v28  ;;  %v5087_v54 = vld [vmem:[#allocation12 + $0xa8] sm:$0xff]  ;;  %v5240_v33 = vand.u32 4294901760, %v5091_v46  ;;  %v5090_v22 = vld [vmem:[#allocation12 + $0xc0] sm:$0xff] }
 0x5f0   :  { %12841 = vmatpush1.bf16.msra.mxu0 %v12840_v58  ;;  %4168 = vmatprep.mubr.f32.mxu0 %v22422_v21  ;;  %v12864_v58 = vpack.c.bf16 %v22546_v10, %v22545_v15  ;;  %v5252_v10 = vand.u32 4294901760, %v5103_v1 }
 0x5f1   :  { %12843 = vmatprep.subr.bf16.mxu0 %v12842_v26  ;;  %v5083_v26 = vld [vmem:[#allocation12 + $0x88] sm:$0xff]  ;;  %v17136_v52 = vsub.f32 %v5091_v46, %v5240_v33 }
 0x5f2   :  { %v5232_v24 = vand.u32 4294901760, %v5083_v26 }
 0x5f3   :  { %4172 = vmatmul.mubr.f32.gmra.mrb[20].mxu0 %v22527_v48 }
 0x5f4   :  { %12845 = vmatpush1.bf16.msra.mxu0 %v12844_v7  ;;  %4177 = vmatprep.mubr.f32.mxu0 %v22422_v21  ;;  %v5086_v7 = vld [vmem:[#allocation12 + $0xa0] sm:$0xff]  ;;  %v17122_v48 = vsub.f32 %v5083_v26, %v5232_v24  ;;  %v5119_v26 = vld [vmem:[#allocation12 + $0x1a8] sm:$0xff] }
 0x5f5   :  { %12847 = vmatprep.subr.bf16.mxu0 %v12846_v6  ;;  %v5236_v6 = vand.u32 4294901760, %v5087_v54 }
 0x5f7   :  { %4181 = vmatmul.mubr.f32.gmra.mrb[22].mxu0 %v22532_v18 }
 0x5f8   :  { %12849 = vmatpush1.bf16.msra.mxu0 %v12848_v8  ;;  %4347 = vmatprep.mubr.f32.mxu0 %v22422_v21  ;;  %v5238_v8 = vand.u32 4294901760, %v5086_v7 }
 0x5f9   :  { %12851 = vmatprep.subr.bf16.mxu0 %v12850_v62  ;;  %v17126_v62 = vsub.f32 %v5087_v54, %v5236_v6 }
 0x5fa   :  { %v17133_v51 = vsub.f32 %v5086_v7, %v5238_v8  ;;  %v5114_v7 = vld [vmem:[#allocation12 + $0x180] sm:$0xff] }
 0x5fb   :  { %22560 = vst [vmem:[#allocation48_spill] sm:$0xff] %v17126_v62 }
 0x5fc   :  { %12853 = vmatpush1.bf16.msra.mxu0 %v12852_v29  ;;  %v5094_v29 = vld [vmem:[#allocation12 + $0xe0] sm:$0xff] }
 0x5fd   :  { %12855 = vmatprep.subr.bf16.mxu0 %v12854_v57  ;;  %v5244_v57 = vand.u32 4294901760, %v5095_v37  ;;  %v5246_v5 = vand.u32 4294901760, %v5094_v29 }
 0x5ff   :  { %v17140_v28 = vsub.f32 %v5095_v37, %v5244_v57 }
 0x600   :  { %12857 = vmatpush1.bf16.msra.mxu0 %v12856_v59  ;;  %v5242_v59 = vand.u32 4294901760, %v5090_v22 }
 0x601   :  { %12859 = vmatprep.subr.bf16.mxu0 %v12858_v50  ;;  %v5099_v50 = vld [vmem:[#allocation12 + $0x108] sm:$0xff] }
 0x602   :  { %v17142_v40 = vsub.f32 %v5090_v22, %v5242_v59  ;;  %v5248_v15 = vand.u32 4294901760, %v5099_v50 }
 0x604   :  { %12861 = vmatpush1.bf16.msra.mxu0 %v12860_v19  ;;  %v17144_v19 = vpack.c.bf16 %v5236_v6, %v5232_v24  ;;  %v17170_v54 = vpack.c.bf16 %v5252_v10, %v5248_v15  ;;  %v5118_v24 = vld [vmem:[#allocation12 + $0x1a0] sm:$0xff] }
 0x605   :  { %12863 = vmatprep.subr.bf16.mxu0 %v12862_v11  ;;  %v17147_v11 = vsub.f32 %v5094_v29, %v5246_v5  ;;  %v5270_v22 = vand.u32 4294901760, %v5118_v24  ;;  %v5123_v29 = vld [vmem:[#allocation12 + $0x1c8] sm:$0xff] }
 0x606   :  { %22563 = vst [vmem:[#allocation50_spill] sm:$0xff] %v17144_v19  ;;  %22568 = vst [vmem:[#allocation29_spill] sm:$0xff] %v17170_v54 }
 0x608   :  { %12865 = vmatpush1.bf16.msra.mxu0 %v12864_v58  ;;  %v17150_v58 = vpack.c.bf16 %v5238_v8, %v5234_v53  ;;  %v5268_v8 = vand.u32 4294901760, %v5119_v26 }
 0x609   :  { %12867 = vmatprep.subr.bf16.mxu0 %v22495_v41  ;;  %v5220_v41 = vand.u32 4294901760, %v5071_v55 }
 0x60a   :  { %22564 = vst [vmem:[#allocation53_spill] sm:$0xff] %v17150_v58 }
 0x60b   :  { %4349 = vmatmul.mubr.f32.vlgmr.msra.gmra.mrb[16].mxu0 %v16861_v16  ;;  %v17119_v20 = vpack.c.bf16 %v5220_v41, %v5216_v43 }
 0x60c   :  { %12869 = vmatpush1.bf16.msra.mxu0 %v22496_v47  ;;  %4354 = vmatprep.mubr.f32.mxu0 %v22422_v21  ;;  %v5070_v47 = vld [vmem:[#allocation12 + $0x20] sm:$0xff] }
 0x60d   :  { %12871 = vmatprep.subr.bf16.mxu0 %v22497_v45  ;;  %v5218_v45 = vand.u32 4294901760, %v5066_v61  ;;  %22558 = vst [vmem:[#allocation46_spill] sm:$0xff] %v17119_v20 }
 0x60f   :  { %4356 = vmatmul.mubr.f32.gmra.mrb[18].mxu0 %v16866_v32 }
 0x610   :  { %12873 = vmatpush1.bf16.msra.mxu0 %v22498_v38  ;;  %4361 = vmatprep.mubr.f32.mxu0 %v22422_v21  ;;  %v5079_v38 = vld [vmem:[#allocation12 + $0x68] sm:$0xff] }
 0x611   :  { %12875 = vmatprep.subr.bf16.mxu0 %v22499_v34  ;;  %v5222_v34 = vand.u32 4294901760, %v5070_v47 }
 0x613   :  { %4363 = vmatmul.mubr.f32.gmra.mrb[20].mxu0 %v16872_v56  ;;  %v17124_v39 = vpack.c.bf16 %v5222_v34, %v5218_v45 }
 0x614   :  { %12877 = vmatpush1.bf16.msra.mxu0 %v22500_v31  ;;  %4368 = vmatprep.mubr.f32.mxu0 %v22422_v21 }
 0x615   :  { %12879 = vmatprep.subr.bf16.mxu0 %v22501_v42  ;;  %v5074_v42 = vld [vmem:[#allocation12 + $0x40] sm:$0xff]  ;;  %22559 = vst [vmem:[#allocation44_spill] sm:$0xff] %v17124_v39 }
 0x617   :  { %4370 = vmatmul.mubr.f32.gmra.mrb[22].mxu0 %v16874_v27 }
 0x618   :  { %12881 = vmatpush1.bf16.msra.mxu0 %v22502_v14  ;;  %4472 = vmatprep.mubr.f32.mxu0 %v22422_v21  ;;  %v5078_v14 = vld [vmem:[#allocation12 + $0x60] sm:$0xff] }
 0x619   :  { %12883 = vmatprep.subr.bf16.mxu0 %v22503_v0  ;;  %v17103_v0 = vsub.f32 %v5067_v12, %v5216_v43  ;;  %v5230_v4 = vand.u32 4294901760, %v5078_v14  ;;  %v5107_v12 = vld [vmem:[#allocation12 + $0x148] sm:$0xff] }
 0x61b   :  { %22550 = vst [vmem:[#allocation59_spill] sm:$0xff] %v17103_v0  ;;  %v17117_v17 = vsub.f32 %v5078_v14, %v5230_v4 }
 0x61c   :  { %12885 = vmatpush1.bf16.msra.mxu0 %v22504_v36  ;;  %v17107_v36 = vsub.f32 %v5066_v61, %v5218_v45  ;;  %v17154_v61 = vsub.f32 %v5103_v1, %v5252_v10  ;;  %v5106_v45 = vld [vmem:[#allocation12 + $0x140] sm:$0xff] }
 0x61d   :  { %12887 = vmatprep.subr.bf16.mxu0 %v22505_v60  ;;  %v17109_v60 = vsub.f32 %v5070_v47, %v5222_v34  ;;  %22557 = vst [vmem:[#allocation41_spill] sm:$0xff] %v17117_v17  ;;  %v5256_v47 = vand.u32 4294901760, %v5107_v12  ;;  %v5258_v14 = vand.u32 4294901760, %v5106_v45  ;;  %v5122_v1 = vld [vmem:[#allocation12 + $0x1c0] sm:$0xff] }
 0x61e   :  { %22552 = vst [vmem:[#allocation61_spill] sm:$0xff] %v17107_v36 }
 0x61f   :  { %22553 = vst [vmem:[#allocation62_spill] sm:$0xff] %v17109_v60  ;;  %v17173_v6 = vsub.f32 %v5106_v45, %v5258_v14 }
 0x620   :  { %12889 = vmatpush1.bf16.msra.mxu0 %v22506_v9 }
 0x621   :  { %12891 = vmatprep.subr.bf16.mxu0 %v22547_v35  ;;  %v5250_v35 = vand.u32 4294901760, %v5098_v63  ;;  %22569 = vst [vmem:[#allocation30_spill] sm:$0xff] %v17173_v6 }
 0x623   :  { %v17156_v43 = vsub.f32 %v5098_v63, %v5250_v35  ;;  %v5126_v63 = vld [vmem:[#allocation12 + $0x1e0] sm:$0xff] }
 0x624   :  { %12893 = vmatpush1.bf16.msra.mxu0 %v22548_v3  ;;  %v17152_v3 = vsub.f32 %v5099_v50, %v5248_v15  ;;  %v5272_v15 = vand.u32 4294901760, %v5123_v29  ;;  %v5278_v45 = vand.u32 4294901760, %v5126_v63 }
 0x625   :  { %12895 = vmatprep.subr.bf16.mxu0 %v22549_v23  ;;  %v5254_v23 = vand.u32 4294901760, %v5102_v44 }
 0x627   :  { %v17180_v37 = vpack.c.bf16 %v5254_v23, %v5250_v35 }
 0x628   :  { %12897 = vmatpush1.bf16.msra.mxu0 %v22512_v30 }
 0x629   :  { %12947 = vmatprep.subr.bf16.mxu0 %v17119_v20  ;;  %22572 = vst [vmem:[#allocation33_spill] sm:$0xff] %v17180_v37  ;;  %v22595_v20 = vlaneseq }
 0x62b   :  { %4474 = vmatmul.mubr.f32.vlgmr.msra.gmra.mrb[16].mxu0 %v16861_v16  ;;  %v5075_v16 = vld [vmem:[#allocation12 + $0x48] sm:$0xff] }
 0x62c   :  { %4479 = vmatprep.mubr.f32.mxu0 %v22422_v21  ;;  %v5224_v31 = vand.u32 4294901760, %v5075_v16  ;;  %12949 = vmatpush1.bf16.msra.mxu0 %v17124_v39  ;;  %v5150_v39 = vld [vmem:[#allocation12 + $0x2a0] sm:$0xff] }
 0x62e   :  { %v17111_v9 = vsub.f32 %v5075_v16, %v5224_v31  ;;  %v5110_v16 = vld [vmem:[#allocation12 + $0x160] sm:$0xff] }
 0x62f   :  { %4481 = vmatmul.mubr.f32.gmra.mrb[18].mxu0 %v16866_v32  ;;  %v5228_v32 = vand.u32 4294901760, %v5079_v38 }
 0x630   :  { %4486 = vmatprep.mubr.f32.mxu0 %v22422_v21  ;;  %22554 = vst [vmem:[#allocation40_spill] sm:$0xff] %v17111_v9 }
 0x631   :  { %v17113_v30 = vsub.f32 %v5079_v38, %v5228_v32  ;;  %v17128_v18 = vpack.c.bf16 %v5228_v32, %v5224_v31  ;;  %v17161_v38 = vsub.f32 %v5102_v44, %v5254_v23  ;;  %v17164_v31 = vsub.f32 %v5107_v12, %v5256_v47 }
 0x632   :  { %v17166_v32 = vpack.c.bf16 %v5246_v5, %v5242_v59  ;;  %v17182_v59 = vsub.f32 %v5119_v26, %v5268_v8  ;;  %v17189_v44 = vsub.f32 %v5118_v24, %v5270_v22  ;;  %v5274_v23 = vand.u32 4294901760, %v5122_v1  ;;  %v5134_v24 = vld [vmem:[#allocation12 + $0x220] sm:$0xff] }
 0x633   :  { %4488 = vmatmul.mubr.f32.gmra.mrb[20].mxu0 %v16872_v56  ;;  %v17105_v56 = vsub.f32 %v5071_v55, %v5220_v41  ;;  %22555 = vst [vmem:[#allocation38_spill] sm:$0xff] %v17113_v30  ;;  %22561 = vst [vmem:[#allocation47_spill] sm:$0xff] %v17128_v18  ;;  %12951 = vmatprep.subr.bf16.mxu0 %v17128_v18  ;;  %v5111_v55 = vld [vmem:[#allocation12 + $0x168] sm:$0xff]  ;;  %v17158_v41 = vpack.c.bf16 %v5244_v57, %v5240_v33  ;;  %v5266_v33 = vand.u32 4294901760, %v5114_v7 }
 0x634   :  { %4493 = vmatprep.mubr.f32.mxu0 %v22422_v21  ;;  %v5260_v34 = vand.u32 4294901760, %v5111_v55  ;;  %22566 = vst [vmem:[#allocation56_spill] sm:$0xff] %v17166_v32  ;;  %v5127_v57 = vld [vmem:[#allocation12 + $0x1e8] sm:$0xff]  ;;  %22573 = vst [vmem:[#allocation34_spill] sm:$0xff] %v17182_v59  ;;  %v17194_v12 = vsub.f32 %v5123_v29, %v5272_v15 }
 0x635   :  { %22551 = vst [vmem:[#allocation60_spill] sm:$0xff] %v17105_v56  ;;  %22565 = vst [vmem:[#allocation52_spill] sm:$0xff] %v17158_v41  ;;  %v17184_v5 = vsub.f32 %v5114_v7, %v5266_v33  ;;  %v5276_v10 = vand.u32 4294901760, %v5127_v57  ;;  %v5130_v7 = vld [vmem:[#allocation12 + $0x200] sm:$0xff]  ;;  %v17208_v29 = vpack.c.bf16 %v5270_v22, %v5266_v33  ;;  %v5151_v18 = vld [vmem:[#allocation12 + $0x2a8] sm:$0xff] }
 0x636   :  { %v17186_v50 = vpack.c.bf16 %v5260_v34, %v5256_v47  ;;  %22576 = vst [vmem:[#allocation37_spill] sm:$0xff] %v17189_v44  ;;  %22578 = vst [vmem:[#allocation42_spill] sm:$0xff] %v17194_v12  ;;  %v5131_v47 = vld [vmem:[#allocation12 + $0x208] sm:$0xff] }
 0x637   :  { %4495 = vmatmul.mubr.f32.gmra.mrb[22].mxu0 %v16874_v27  ;;  %v5226_v27 = vand.u32 4294901760, %v5074_v42  ;;  %22574 = vst [vmem:[#allocation35_spill] sm:$0xff] %v17184_v5  ;;  %v5280_v26 = vand.u32 4294901760, %v5131_v47  ;;  %22584 = vst [vmem:[#allocation63_spill] sm:$0xff] %v17208_v29  ;;  %v22589_v33 = vld [vmem:[#allocation25_spill] sm:$0xff] }
 0x638   :  { %22575 = vst [vmem:[#allocation36_spill] sm:$0xff] %v17186_v50  ;;  %v4513_v22 = vadd.s32 1, %v22589_v33 }
 0x639   :  { %v17115_v13 = vsub.f32 %v5074_v42, %v5226_v27  ;;  %v17138_v25 = vpack.c.bf16 %v5230_v4, %v5226_v27  ;;  %v17168_v42 = vsub.f32 %v5111_v55, %v5260_v34  ;;  %v5262_v27 = vand.u32 4294901760, %v5110_v16  ;;  %v5115_v4 = vld [vmem:[#allocation12 + $0x188] sm:$0xff] }
 0x63a   :  { %v5264_v49 = vand.u32 4294901760, %v5115_v4  ;;  %v17196_v55 = vsub.f32 %v5127_v57, %v5276_v10  ;;  %v17198_v34 = vsub.f32 %v5122_v1, %v5274_v23  ;;  %v5282_v57 = vand.u32 4294901760, %v5130_v7  ;;  %v5139_v1 = vld [vmem:[#allocation12 + $0x248] sm:$0xff] }
 0x63b   :  { %22556 = vst [vmem:[#allocation43_spill] sm:$0xff] %v17115_v13  ;;  %22562 = vst [vmem:[#allocation51_spill] sm:$0xff] %v17138_v25  ;;  %12953 = vmatpush1.bf16.msra.mxu0 %v17138_v25  ;;  %v17175_v53 = vsub.f32 %v5110_v16, %v5262_v27  ;;  %v17192_v35 = vpack.c.bf16 %v5262_v27, %v5258_v14  ;;  %v5135_v16 = vld [vmem:[#allocation12 + $0x228] sm:$0xff]  ;;  %v17206_v27 = vsub.f32 %v5131_v47, %v5280_v26 }
 0x63c   :  { %12955 = vmatprep.subr.bf16.mxu0 %v17144_v19  ;;  %22567 = vst [vmem:[#allocation54_spill] sm:$0xff] %v17168_v42  ;;  %v17178_v46 = vsub.f32 %v5115_v4, %v5264_v49  ;;  %22579 = vst [vmem:[#allocation45_spill] sm:$0xff] %v17196_v55  ;;  %v17200_v4 = vpack.c.bf16 %v5268_v8, %v5264_v49  ;;  %v5284_v14 = vand.u32 4294901760, %v5135_v16  ;;  %v5147_v25 = vld [vmem:[#allocation12 + $0x288] sm:$0xff] }
 0x63d   :  { %22570 = vst [vmem:[#allocation31_spill] sm:$0xff] %v17175_v53  ;;  %22577 = vst [vmem:[#allocation39_spill] sm:$0xff] %v17192_v35  ;;  %v17212_v8 = vpack.c.bf16 %v5276_v10, %v5272_v15 }
 0x63e   :  { %22571 = vst [vmem:[#allocation32_spill] sm:$0xff] %v17178_v46  ;;  %22580 = vst [vmem:[#allocation58_spill] sm:$0xff] %v17198_v34  ;;  %v17210_v49 = vsub.f32 %v5135_v16, %v5284_v14  ;;  %v17223_v16 = vpack.c.bf16 %v5278_v45, %v5274_v23 }
 0x63f   :  { %12957 = vmatpush1.bf16.msra.mxu0 %v17150_v58  ;;  %22581 = vst [vmem:[#allocation49_spill] sm:$0xff] %v17200_v4  ;;  %22583 = vst [vmem:[#allocation57_spill] sm:$0xff] %v17206_v27 }
 0x640   :  { %12959 = vmatprep.subr.bf16.mxu0 %v17158_v41  ;;  %22585 = vst [vmem:[#allocation64_spill] sm:$0xff] %v17210_v49  ;;  %22586 = vst [vmem:[#allocation65_spill] sm:$0xff] %v17212_v8  ;;  %v5138_v41 = vld [vmem:[#allocation12 + $0x240] sm:$0xff] }
 0x641   :  { %22591 = vst [vmem:[#allocation69_spill] sm:$0xff] %v17223_v16  ;;  %v5290_v15 = vand.u32 4294901760, %v5138_v41 }
 0x643   :  { %12961 = vmatpush1.bf16.msra.mxu0 %v17166_v32  ;;  %v5288_v32 = vand.u32 4294901760, %v5139_v1 }
 0x644   :  { %12963 = vmatprep.subr.bf16.mxu0 %v17170_v54  ;;  %v5143_v54 = vld [vmem:[#allocation12 + $0x268] sm:$0xff] }
 0x645   :  { %v5292_v47 = vand.u32 4294901760, %v5143_v54  ;;  %v17221_v58 = vsub.f32 %v5139_v1, %v5288_v32  ;;  %v5300_v1 = vand.u32 4294901760, %v5151_v18 }
 0x647   :  { %12965 = vmatpush1.bf16.msra.mxu0 %v17180_v37  ;;  %v5286_v37 = vand.u32 4294901760, %v5134_v24  ;;  %22590 = vst [vmem:[#allocation68_spill] sm:$0xff] %v17221_v58  ;;  %v17225_v10 = vsub.f32 %v5143_v54, %v5292_v47  ;;  %v4514_v54 = vmul.u32 16, %v4513_v22  ;;  %v5159_v58 = vld [vmem:[#allocation12 + $0x2e8] sm:$0xff]  ;;  %v5158_v22 = vld [vmem:[#allocation12 + $0x2e0] sm:$0xff] }
 0x648   :  { %12967 = vmatprep.subr.bf16.mxu0 %v17186_v50  ;;  %v17203_v50 = vsub.f32 %v5126_v63, %v5278_v45  ;;  %v17215_v63 = vsub.f32 %v5130_v7, %v5282_v57  ;;  %v17229_v7 = vpack.c.bf16 %v5284_v14, %v5280_v26  ;;  %v5296_v45 = vand.u32 4294901760, %v5147_v25 }
 0x649   :  { %22592 = vst [vmem:[#allocation70_spill] sm:$0xff] %v17225_v10  ;;  %v17237_v10 = vpack.c.bf16 %v5286_v37, %v5282_v57  ;;  %v5302_v14 = vand.u32 4294901760, %v5150_v39 }
 0x64a   :  { %22582 = vst [vmem:[#allocation55_spill] sm:$0xff] %v17203_v50  ;;  %22587 = vst [vmem:[#allocation66_spill] sm:$0xff] %v17215_v63  ;;  %v17239_v26 = vsub.f32 %v5147_v25, %v5296_v45 }
 0x64b   :  { %12969 = vmatpush1.bf16.msra.mxu0 %v17192_v35  ;;  %v5142_v35 = vld [vmem:[#allocation12 + $0x260] sm:$0xff]  ;;  %22594 = vst [vmem:[#allocation72_spill] sm:$0xff] %v17229_v7  ;;  %22597 = vst [vmem:[#allocation74_spill] sm:$0xff] %v17237_v10 }
 0x64c   :  { %12971 = vmatprep.subr.bf16.mxu0 %v17200_v4  ;;  %v17217_v4 = vsub.f32 %v5134_v24, %v5286_v37  ;;  %v5294_v19 = vand.u32 4294901760, %v5142_v35  ;;  %v5146_v24 = vld [vmem:[#allocation12 + $0x280] sm:$0xff]  ;;  %22598 = vst [vmem:[#allocation75_spill] sm:$0xff] %v17239_v26  ;;  %v5308_v37 = vand.u32 4294901760, %v5159_v58 }
 0x64e   :  { %22588 = vst [vmem:[#allocation67_spill] sm:$0xff] %v17217_v4  ;;  %v4510_v4 = vand.u32 127, %v22595_v20  ;;  %v17234_v23 = vsub.f32 %v5142_v35, %v5294_v19  ;;  %v17241_v20 = vsub.f32 %v5151_v18, %v5300_v1 }
 0x64f   :  { %12973 = vmatpush1.bf16.msra.mxu0 %v17208_v29  ;;  %v17227_v29 = vsub.f32 %v5138_v41, %v5290_v15  ;;  %v5298_v41 = vand.u32 4294901760, %v5146_v24 }
 0x650   :  { %12975 = vmatprep.subr.bf16.mxu0 %v17212_v8  ;;  %v4511_v8 = vmul.u32 16, %v22589_v33  ;;  %22596 = vst [vmem:[#allocation73_spill] sm:$0xff] %v17234_v23  ;;  %22599 = vst [vmem:[#allocation76_spill] sm:$0xff] %v17241_v20  ;;  %v5154_v23 = vld [vmem:[#allocation12 + $0x2c0] sm:$0xff]  ;;  %vm17254_vm14 = vcmp.lt.s32.totalorder %v4510_v4, %v4514_v54 }
 0x651   :  { %22593 = vst [vmem:[#allocation71_spill] sm:$0xff] %v17227_v29  ;;  %v5155_v29 = vld [vmem:[#allocation12 + $0x2c8] sm:$0xff]  ;;  %v17243_v33 = vsub.f32 %v5146_v24, %v5298_v41  ;;  %v5306_v24 = vand.u32 4294901760, %v5154_v23  ;;  %v5162_v20 = vld [vmem:[#allocation12 + $0x300] sm:$0xff] }
 0x652   :  { %v5304_v35 = vand.u32 4294901760, %v5155_v29  ;;  %vm17250_vm13 = vcmp.ge.s32.totalorder %v4510_v4, %v4511_v8  ;;  %v17265_v8 = vpack.c.bf16 %v5300_v1, %v5296_v45  ;;  %v5166_v4 = vld [vmem:[#allocation12 + $0x320] sm:$0xff]  ;;  %v17279_v45 = vpack.c.bf16 %v5302_v14, %v5298_v41 }
 0x653   :  { %12977 = vmatpush1.bf16.msra.mxu0 %v17223_v16  ;;  %22600 = vst [vmem:[#allocation77_spill] sm:$0xff] %v17243_v33  ;;  %v17245_v16 = vpack.c.bf16 %v5292_v47, %v5288_v32  ;;  %v17261_v32 = vpack.c.bf16 %v5294_v19, %v5290_v15  ;;  %v17263_v47 = vsub.f32 %v5159_v58, %v5308_v37  ;;  %vm4516_vm15 = vmand %vm17250_vm13, %vm17254_vm14  ;;  %v5314_v54 = vand.u32 4294901760, %v5162_v20 }
 0x654   :  { %12979 = vmatprep.subr.bf16.mxu0 %v17229_v7  ;;  %v17248_v7 = vsub.f32 %v5150_v39, %v5302_v14  ;;  %v17259_v18 = vsub.f32 %v5155_v29, %v5304_v35  ;;  %v5310_v39 = vand.u32 4294901760, %v5158_v22  ;;  %22610 = vst [vmem:[#allocation83_spill] sm:$0xff] %v17265_v8  ;;  %v17272_v19 = vsub.f32 %v5154_v23, %v5306_v24 }
 0x655   :  { %22601 = vst [vmem:[#allocation78_spill] sm:$0xff] %v17245_v16  ;;  %22608 = vst [vmem:[#allocation81_spill] sm:$0xff] %v17261_v32  ;;  %v5318_v1 = vand.u32 4294901760, %v5166_v4  ;;  %v11414_v57 = vsel %vm4516_vm15, 1.0, %v22422_v21  ;;  %v17284_v25 = vsub.f32 %v5162_v20, %v5314_v54 }
 0x656   :  { %22602 = vst [vmem:[#allocation79_spill] sm:$0xff] %v17248_v7  ;;  %22607 = vst [vmem:[#allocation80_spill] sm:$0xff] %v17259_v18  ;;  %v5167_v7 = vld [vmem:[#allocation12 + $0x328] sm:$0xff]  ;;  %v17274_v58 = vsub.f32 %v5158_v22, %v5310_v39  ;;  %v4519_v41 = vmul.f32 0.0625, %v11414_v57  ;;  %v3487_v22 = vld [vmem:[#allocation11] sm:$0x3] }
 0x657   :  { %12981 = vmatpush1.bf16.msra.mxu0 %v17237_v10  ;;  %22609 = vst [vmem:[#allocation82_spill] sm:$0xff] %v17263_v47  ;;  %v5163_v10 = vld [vmem:[#allocation12 + $0x308] sm:$0xff]  ;;  %22611 = vst [vmem:[#allocation84_spill] sm:$0xff] %v17272_v19  ;;  %v5316_v29 = vand.u32 4294901760, %v5167_v7  ;;  %v17289_v23 = vsub.f32 %v5166_v4, %v5318_v1  ;;  %v22623_v4 = vld [vmem:[#allocation27_spill] sm:$0xff] }
 0x658   :  { %12983 = vmatprep.subr.bf16.mxu0 %v17245_v16  ;;  %v5312_v33 = vand.u32 4294901760, %v5163_v10  ;;  %22612 = vst [vmem:[#allocation85_spill] sm:$0xff] %v17274_v58  ;;  %22614 = vst [vmem:[#allocation87_spill] sm:$0xff] %v17279_v45  ;;  %v4521_v20 = vsel %vm1359_vm3, %v4519_v41, 0 }
 0x659   :  { %v17282_v16 = vsub.f32 %v5167_v7, %v5316_v29  ;;  %22616 = vst [vmem:[#allocation89_spill] sm:$0xff] %v17284_v25  ;;  %22618 = vst [vmem:[#allocation91_spill] sm:$0xff] %v17289_v23  ;;  %v17298_v7 = vpack.c.bf16 %v5318_v1, %v5314_v54 }
 0x65a   :  { %v17277_v15 = vsub.f32 %v5163_v10, %v5312_v33  ;;  %v17292_v10 = vpack.c.bf16 %v5310_v39, %v5306_v24  ;;  %v17294_v14 = vpack.c.bf16 %v5316_v29, %v5312_v33  ;;  %v17304_v24 = vand.u32 4294901760, %v4521_v20 }
 0x65b   :  { %12985 = vmatpush1.bf16.msra.mxu0 %v17261_v32  ;;  %22615 = vst [vmem:[#allocation88_spill] sm:$0xff] %v17282_v16  ;;  %v17286_v32 = vpack.c.bf16 %v5308_v37, %v5304_v35  ;;  %22621 = vst [vmem:[#allocation94_spill] sm:$0xff] %v17298_v7  ;;  %v22622_v35 = vld [vmem:[#allocation26_spill] sm:$0xff] }
 0x65c   :  { %12987 = vmatprep.subr.bf16.mxu0 %v17265_v8  ;;  %22613 = vst [vmem:[#allocation86_spill] sm:$0xff] %v17277_v15  ;;  %22619 = vst [vmem:[#allocation92_spill] sm:$0xff] %v17292_v10  ;;  %v3492_v37 = vrot.slane %v3487_v22, %v22622_v35 }
 0x65d   :  { %22617 = vst [vmem:[#allocation90_spill] sm:$0xff] %v17286_v32  ;;  %22620 = vst [vmem:[#allocation93_spill] sm:$0xff] %v17294_v14 }
 0x65f   :  { %12989 = vmatpush1.bf16.msra.mxu0 %v17279_v45 }
 0x660   :  { %12991 = vmatprep.subr.bf16.mxu0 %v17286_v32  ;;  %v3496_v32 = vrot.slane %v3487_v22, %v22623_v4 }
 0x663   :  { %12993 = vmatpush1.bf16.msra.mxu0 %v17292_v10  ;;  %v17307_v10 = vsub.f32 %v4521_v20, %v17304_v24 }
 0x664   :  { %12995 = vmatprep.subr.bf16.mxu0 %v17294_v14 }
 0x667   :  { %12997 = vmatpush1.bf16.msra.mxu0 %v17298_v7  ;;  %v21601_v7 = vand.u32 4294901760, %v17307_v10 }
 0x6fe   :  { %v4475_v39 = vpop.f32.mrb[16].mxu0 }
 0x6ff   :  { %v14702_v33 = vadd.f32 %v4475_v39, %v3492_v37  ;;  %v4477_v29 = vpop.f32.mrb[17].mxu0 }
 0x700   :  { %v14703_v57 = vadd.f32 %v4477_v29, %v3496_v32 }
 0x701   :  { %v4501_v14 = vmax.f32 %v14702_v33, 0.0 }
 0x702   :  { %v4502_v54 = vmax.f32 %v14703_v57, 0.0  ;;  %v4482_v1 = vpop.f32.mrb[18].mxu0 }
 0x703   :  { %v4525_v45 = vand.u32 4294901760, %v4501_v14  ;;  %v14704_v41 = vadd.f32 %v4482_v1, %v3492_v37  ;;  %v4484_v8 = vpop.f32.mrb[19].mxu0 }
 0x704   :  { %v4523_v35 = vand.u32 4294901760, %v4502_v54  ;;  %v14705_v23 = vadd.f32 %v4484_v8, %v3496_v32  ;;  %v4599_v8 = vsub.f32 %v17307_v10, %v21601_v7 }
 0x705   :  { %v17310_v22 = vsub.f32 %v4501_v14, %v4525_v45  ;;  %v4503_v4 = vmax.f32 %v14704_v41, 0.0 }
 0x706   :  { %v17312_v25 = vsub.f32 %v4502_v54, %v4523_v35  ;;  %v4504_v39 = vmax.f32 %v14705_v23, 0.0  ;;  %v4489_v29 = vpop.f32.mrb[20].mxu0 }
 0x707   :  { %v4615_v20 = vand.u32 4294901760, %v17310_v22  ;;  %v4529_v16 = vand.u32 4294901760, %v4503_v4  ;;  %v14706_v33 = vadd.f32 %v4489_v29, %v3492_v37  ;;  %v4491_v57 = vpop.f32.mrb[21].mxu0 }
 0x708   :  { %v4609_v15 = vand.u32 4294901760, %v17312_v25  ;;  %v4527_v1 = vand.u32 4294901760, %v4504_v39  ;;  %v14707_v58 = vadd.f32 %v4491_v57, %v3496_v32 }
 0x709   :  { %v4616_v14 = vsub.f32 %v17310_v22, %v4615_v20  ;;  %v17320_v41 = vpack.c.bf16 %v4529_v16, %v4525_v45  ;;  %v17322_v54 = vsub.f32 %v4503_v4, %v4529_v16  ;;  %v4505_v23 = vmax.f32 %v14706_v33, 0.0 }
 0x70a   :  { %v17324_v19 = vsub.f32 %v4504_v39, %v4527_v1  ;;  %v4506_v47 = vmax.f32 %v14707_v58, 0.0  ;;  %v4496_v29 = vpop.f32.mrb[22].mxu0  ;;  %v17326_v18 = vpack.c.bf16 %v4527_v1, %v4523_v35  ;;  %v4610_v26 = vsub.f32 %v17312_v25, %v4609_v15 }
 0x70b   :  { %v4617_v57 = vand.u32 4294901760, %v4616_v14  ;;  %v4627_v63 = vand.u32 4294901760, %v17322_v54  ;;  %v4533_v49 = vand.u32 4294901760, %v4505_v23  ;;  %v14708_v7 = vadd.f32 %v4496_v29, %v3492_v37  ;;  %v4498_v27 = vpop.f32.mrb[23].mxu0 }
 0x70c   :  { %v4621_v45 = vand.u32 4294901760, %v17324_v19  ;;  %v4531_v50 = vand.u32 4294901760, %v4506_v47  ;;  %v14709_v16 = vadd.f32 %v4498_v27, %v3496_v32  ;;  %12899 = vmatprep.subr.bf16.mxu1 %v17326_v18  ;;  %v4611_v4 = vand.u32 4294901760, %v4610_v26 }
 0x70d   :  { %v4628_v58 = vsub.f32 %v17322_v54, %v4627_v63  ;;  %v4638_v39 = vsub.f32 %v4505_v23, %v4533_v49  ;;  %v4507_v35 = vmax.f32 %v14708_v7, 0.0  ;;  %12901 = vmatpush1.bf16.msra.mxu1 %v17320_v41  ;;  %v12914_v33 = vpack.c.bf16 %v17324_v19, %v17312_v25 }
 0x70e   :  { %v4632_v1 = vsub.f32 %v4506_v47, %v4531_v50  ;;  %v4508_v14 = vmax.f32 %v14709_v16, 0.0  ;;  %v4622_v37 = vsub.f32 %v17324_v19, %v4621_v45  ;;  %v12916_v29 = vpack.c.bf16 %v17322_v54, %v17310_v22 }
 0x70f   :  { %v4629_v27 = vand.u32 4294901760, %v4628_v58  ;;  %v4639_v32 = vand.u32 4294901760, %v4638_v39  ;;  %v4537_v34 = vand.u32 4294901760, %v4507_v35  ;;  %v12930_v26 = vpack.c.bf16 %v4621_v45, %v4609_v15 }
 0x710   :  { %v4633_v55 = vand.u32 4294901760, %v4632_v1  ;;  %v4535_v12 = vand.u32 4294901760, %v4508_v14  ;;  %v4623_v23 = vand.u32 4294901760, %v4622_v37  ;;  %v12932_v7 = vpack.c.bf16 %v4627_v63, %v4615_v20 }
 0x711   :  { %v12904_v44 = vpack.c.bf16 %v4537_v34, %v4533_v49  ;;  %v4650_v5 = vsub.f32 %v4507_v35, %v4537_v34  ;;  %v12908_v59 = vpack.c.bf16 %v4629_v27, %v4617_v57  ;;  %v4640_v16 = vsub.f32 %v4638_v39, %v4639_v32 }
 0x712   :  { %v4644_v46 = vsub.f32 %v4508_v14, %v4535_v12  ;;  %v12902_v25 = vpack.c.bf16 %v4535_v12, %v4531_v50  ;;  %v12906_v47 = vpack.c.bf16 %v4623_v23, %v4611_v4  ;;  %v4600_v22 = vand.u32 4294901760, %v4599_v8 }
 0x713   :  { %v4651_v53 = vand.u32 4294901760, %v4650_v5  ;;  %v12920_v19 = vpack.c.bf16 %v4650_v5, %v4638_v39  ;;  %v4634_v54 = vsub.f32 %v4632_v1, %v4633_v55  ;;  %v4641_v49 = vand.u32 4294901760, %v4640_v16 }
 0x714   :  { %v4645_v6 = vand.u32 4294901760, %v4644_v46  ;;  %12903 = vmatprep.subr.bf16.mxu1 %v12902_v25  ;;  %v12918_v58 = vpack.c.bf16 %v4644_v46, %v4632_v1  ;;  %v21642_v8 = vand.u32 4294901760, %v17117_v17  ;;  %v21639_v4 = vand.u32 4294901760, %v17122_v48 }
 0x715   :  { %v4652_v42 = vsub.f32 %v4650_v5, %v4651_v53  ;;  %12905 = vmatpush1.bf16.msra.mxu1 %v12904_v44  ;;  %v12936_v15 = vpack.c.bf16 %v4651_v53, %v4639_v32  ;;  %v4635_v20 = vand.u32 4294901760, %v4634_v54  ;;  %v21652_v53 = vand.u32 4294901760, %v17105_v56 }
 0x716   :  { %12907 = vmatprep.subr.bf16.mxu1 %v12906_v47  ;;  %v4646_v45 = vsub.f32 %v4644_v46, %v4645_v6  ;;  %v12934_v63 = vpack.c.bf16 %v4645_v6, %v4633_v55  ;;  %v21653_v6 = vand.u32 4294901760, %v17103_v0  ;;  %v21649_v46 = vand.u32 4294901760, %v17107_v36 }
 0x717   :  { %v4653_v34 = vand.u32 4294901760, %v4652_v42  ;;  %v22624_v42 = vand.u32 4294901760, %v17307_v10  ;;  %v21647_v55 = vand.u32 4294901760, %v17111_v9  ;;  %v21638_v39 = vand.u32 4294901760, %v17126_v62 }
 0x718   :  { %4601 = vmatmul.mubr.f32.vlgmr.msra.gmra.mrb[12].mxu1 %v4600_v22  ;;  %v4647_v50 = vand.u32 4294901760, %v4646_v45  ;;  %v13202_v5 = vpack.c.bf16 %v21652_v53, %v21653_v6  ;;  %v21637_v35 = vand.u32 4294901760, %v17131_v2  ;;  %v21631_v14 = vand.u32 4294901760, %v17136_v52  ;;  %v22625_v22 = vld [vmem:[#allocation54_spill] sm:$0xff]  ;;  %v22650_v6 = vld [vmem:[#allocation84_spill] sm:$0xff] }
 0x719   :  { %12909 = vmatpush1.bf16.msra.mxu1 %v12908_v59  ;;  %v12912_v12 = vpack.c.bf16 %v4653_v34, %v4641_v49  ;;  %4711 = vmatprep.mubr.f32.mxu1 %v22422_v21  ;;  %v21648_v59 = vand.u32 4294901760, %v17109_v60  ;;  %v13210_v1 = vpack.c.bf16 %v21638_v39, %v21639_v4  ;;  %v21628_v27 = vand.u32 4294901760, %v17147_v11  ;;  %v17472_v39 = vld [vmem:[#allocation12 + $0x348] sm:$0xff] }
 0x71a   :  { %v12910_v57 = vpack.c.bf16 %v4647_v50, %v4635_v20  ;;  %v21624_v23 = vand.u32 4294901760, %v17154_v61  ;;  %v21620_v47 = vand.u32 4294901760, %v17161_v38  ;;  %v21616_v54 = vand.u32 4294901760, %v22625_v22  ;;  %v22628_v20 = vld [vmem:[#allocation32_spill] sm:$0xff]  ;;  %v17474_v4 = vld [vmem:[#allocation12 + $0x368] sm:$0xff] }
 0x71b   :  { %v21619_v50 = vand.u32 4294901760, %v22628_v20  ;;  %v17496_v53 = vld [vmem:[#allocation12 + $0x3a8] sm:$0xff] }
 0x71c   :  { %12911 = vmatprep.subr.bf16.mxu1 %v12910_v57 }
 0x71d   :  { %12913 = vmatpush1.bf16.msra.mxu1 %v12912_v12  ;;  %v22629_v12 = vld [vmem:[#allocation34_spill] sm:$0xff] }
 0x71e   :  { %12915 = vmatprep.subr.bf16.mxu1 %v12914_v33  ;;  %v21632_v33 = vand.u32 4294901760, %v17133_v51  ;;  %v21618_v57 = vand.u32 4294901760, %v22629_v12 }
 0x720   :  { %4713 = vmatmul.mubr.f32.vlgmr.msra.gmra.mrb[12].mxu1 %v17304_v24  ;;  %v13212_v37 = vpack.c.bf16 %v21632_v33, %v21637_v35 }
 0x721   :  { %12917 = vmatpush1.bf16.msra.mxu1 %v12916_v29  ;;  %4799 = vmatprep.mubr.f32.mxu1 %v22422_v21  ;;  %v21629_v29 = vand.u32 4294901760, %v17142_v40 }
 0x722   :  { %12919 = vmatprep.subr.bf16.mxu1 %v12918_v58 }
 0x725   :  { %12921 = vmatpush1.bf16.msra.mxu1 %v12920_v19  ;;  %v21617_v19 = vand.u32 4294901760, %v17164_v31 }
 0x726   :  { %12923 = vmatprep.subr.bf16.mxu1 %v17326_v18 }
 0x727   :  { %v13222_v34 = vpack.c.bf16 %v21616_v54, %v21617_v19  ;;  %v22635_v54 = vld [vmem:[#allocation55_spill] sm:$0xff] }
 0x728   :  { %4802 = vmatmul.mubr.f32.vlgmr.msra.gmra.mrb[12].mxu1 %v17307_v10  ;;  %v21643_v10 = vand.u32 4294901760, %v17115_v13  ;;  %v21633_v19 = vand.u32 4294901760, %v22635_v54 }
 0x729   :  { %12925 = vmatpush1.bf16.msra.mxu1 %v17320_v41  ;;  %4880 = vmatprep.mubr.f32.mxu1 %v22422_v21 }
 0x72a   :  { %12927 = vmatprep.subr.bf16.mxu1 %v12902_v25 }
 0x72d   :  { %12929 = vmatpush1.bf16.msra.mxu1 %v12904_v44 }
 0x72e   :  { %12931 = vmatprep.subr.bf16.mxu1 %v12930_v26  ;;  %v21625_v26 = vand.u32 4294901760, %v17152_v3 }
 0x730   :  { %4884 = vmatmul.mubr.f32.vlgmr.msra.gmra.mrb[12].mxu1 %v22624_v42  ;;  %v13218_v16 = vpack.c.bf16 %v21624_v23, %v21625_v26  ;;  %v22639_v23 = vld [vmem:[#allocation67_spill] sm:$0xff] }
 0x731   :  { %12933 = vmatpush1.bf16.msra.mxu1 %v12932_v7  ;;  %4978 = vmatprep.mubr.f32.mxu1 %v22422_v21  ;;  %v13216_v7 = vpack.c.bf16 %v21628_v27, %v21629_v29  ;;  %v21640_v26 = vand.u32 4294901760, %v22639_v23  ;;  %v22641_v27 = vld [vmem:[#allocation70_spill] sm:$0xff]  ;;  %v22667_v23 = vld [vmem:[#allocation91_spill] sm:$0xff] }
 0x732   :  { %12935 = vmatprep.subr.bf16.mxu1 %v12934_v63  ;;  %v22627_v63 = vld [vmem:[#allocation31_spill] sm:$0xff]  ;;  %v21644_v29 = vand.u32 4294901760, %v22641_v27 }
 0x733   :  { %v21614_v49 = vand.u32 4294901760, %v22627_v63 }
 0x735   :  { %12937 = vmatpush1.bf16.msra.mxu1 %v12936_v15  ;;  %v22626_v15 = vld [vmem:[#allocation30_spill] sm:$0xff] }
 0x736   :  { %12939 = vmatprep.subr.bf16.mxu1 %v17326_v18  ;;  %v21646_v18 = vand.u32 4294901760, %v17113_v30  ;;  %v21615_v45 = vand.u32 4294901760, %v22626_v15 }
 0x738   :  { %4980 = vmatmul.mubr.f32.vlgmr.msra.gmra.mrb[12].mxu1 %v17304_v24  ;;  %v13224_v42 = vpack.c.bf16 %v21614_v49, %v21615_v45  ;;  %v22634_v49 = vld [vmem:[#allocation58_spill] sm:$0xff] }
 0x739   :  { %12941 = vmatpush1.bf16.msra.mxu1 %v17320_v41  ;;  %5058 = vmatprep.mubr.f32.mxu1 %v22422_v21  ;;  %v13204_v21 = vpack.c.bf16 %v21648_v59, %v21649_v46  ;;  %v13206_v41 = vpack.c.bf16 %v21646_v18, %v21647_v55  ;;  %v21636_v45 = vand.u32 4294901760, %v22634_v49 }
 0x73a   :  { %12943 = vmatprep.subr.bf16.mxu1 %v12902_v25  ;;  %v21621_v25 = vand.u32 4294901760, %v17156_v43 }
 0x73c   :  { %v13220_v58 = vpack.c.bf16 %v21620_v47, %v21621_v25  ;;  %v22637_v47 = vld [vmem:[#allocation64_spill] sm:$0xff] }
 0x73d   :  { %12945 = vmatpush1.bf16.msra.mxu1 %v12904_v44  ;;  %v13208_v44 = vpack.c.bf16 %v21642_v8, %v21643_v10  ;;  %v21634_v25 = vand.u32 4294901760, %v22637_v47  ;;  %v22648_v10 = vld [vmem:[#allocation80_spill] sm:$0xff]  ;;  %v22652_v8 = vld [vmem:[#allocation86_spill] sm:$0xff] }
 0x73e   :  { %13203 = vmatprep.subr.bf16.mxu1 %v13202_v5  ;;  %v22630_v5 = vld [vmem:[#allocation35_spill] sm:$0xff] }
 0x740   :  { %5060 = vmatmul.mubr.f32.vlgmr.msra.gmra.mrb[12].mxu1 %v17304_v24  ;;  %v21630_v24 = vand.u32 4294901760, %v17140_v28 }
 0x741   :  { %13205 = vmatpush1.bf16.msra.mxu1 %v13204_v21  ;;  %v21623_v21 = vand.u32 4294901760, %v22630_v5 }
 0x742   :  { %13207 = vmatprep.subr.bf16.mxu1 %v13206_v41  ;;  %v13214_v32 = vpack.c.bf16 %v21630_v24, %v21631_v14  ;;  %v22631_v41 = vld [vmem:[#allocation37_spill] sm:$0xff] }
 0x743   :  { %v22643_v14 = vld [vmem:[#allocation73_spill] sm:$0xff] }
 0x744   :  { %v21650_v33 = vand.u32 4294901760, %v22643_v14 }
 0x745   :  { %13209 = vmatpush1.bf16.msra.mxu1 %v13208_v44  ;;  %v21622_v44 = vand.u32 4294901760, %v22631_v41 }
 0x746   :  { %13211 = vmatprep.subr.bf16.mxu1 %v13210_v1  ;;  %v13226_v1 = vpack.c.bf16 %v21618_v57, %v21619_v50  ;;  %v22636_v57 = vld [vmem:[#allocation57_spill] sm:$0xff] }
 0x747   :  { %v21635_v50 = vand.u32 4294901760, %v22636_v57 }
 0x749   :  { %13213 = vmatpush1.bf16.msra.mxu1 %v13212_v37  ;;  %v22632_v37 = vld [vmem:[#allocation42_spill] sm:$0xff] }
 0x74a   :  { %13215 = vmatprep.subr.bf16.mxu1 %v13214_v32  ;;  %v21627_v32 = vand.u32 4294901760, %v22632_v37 }
 0x74d   :  { %13217 = vmatpush1.bf16.msra.mxu1 %v13216_v7  ;;  %v22633_v7 = vld [vmem:[#allocation45_spill] sm:$0xff] }
 0x74e   :  { %13219 = vmatprep.subr.bf16.mxu1 %v13218_v16  ;;  %v21626_v16 = vand.u32 4294901760, %v22633_v7 }
 0x751   :  { %13221 = vmatpush1.bf16.msra.mxu1 %v13220_v58  ;;  %v13228_v58 = vpack.c.bf16 %v21622_v44, %v21623_v21  ;;  %v22638_v44 = vld [vmem:[#allocation66_spill] sm:$0xff] }
 0x752   :  { %13223 = vmatprep.subr.bf16.mxu1 %v13222_v34  ;;  %v13230_v34 = vpack.c.bf16 %v21626_v16, %v21627_v32  ;;  %v21641_v21 = vand.u32 4294901760, %v22638_v44  ;;  %v22640_v16 = vld [vmem:[#allocation68_spill] sm:$0xff]  ;;  %v21673_v44 = vand.u32 4294901760, %v22667_v23 }
 0x753   :  { %v21645_v32 = vand.u32 4294901760, %v22640_v16  ;;  %v22666_v16 = vld [vmem:[#allocation89_spill] sm:$0xff] }
 0x755   :  { %13225 = vmatpush1.bf16.msra.mxu1 %v13224_v42  ;;  %v13232_v42 = vpack.c.bf16 %v21633_v19, %v21636_v45  ;;  %v13236_v19 = vpack.c.bf16 %v21640_v26, %v21641_v21  ;;  %v22645_v45 = vld [vmem:[#allocation76_spill] sm:$0xff]  ;;  %v22647_v21 = vld [vmem:[#allocation79_spill] sm:$0xff]  ;;  %v22658_v26 = vand.u32 4294901760, %v17472_v39 }
 0x756   :  { %13227 = vmatprep.subr.bf16.mxu1 %v13226_v1  ;;  %v13234_v1 = vpack.c.bf16 %v21634_v25, %v21635_v50  ;;  %v22644_v25 = vld [vmem:[#allocation75_spill] sm:$0xff]  ;;  %v21655_v35 = vand.u32 4294901760, %v22645_v45  ;;  %v22653_v45 = vld [vmem:[#allocation88_spill] sm:$0xff]  ;;  %v22655_v46 = vand.u32 4294901760, %v22647_v21 }
 0x757   :  { %v21656_v50 = vand.u32 4294901760, %v22644_v25  ;;  %v22656_v25 = vand.u32 4294901760, %v22648_v10  ;;  %v22665_v21 = vand.u32 4294901760, %v22653_v45 }
 0x759   :  { %13229 = vmatpush1.bf16.msra.mxu1 %v13228_v58  ;;  %v22642_v58 = vld [vmem:[#allocation71_spill] sm:$0xff]  ;;  %v13242_v55 = vpack.c.bf16 %v21655_v35, %v21656_v50  ;;  %v17515_v35 = vsub.f32 %v17472_v39, %v22658_v26  ;;  %v22664_v26 = vand.u32 4294901760, %v22652_v8 }
 0x75a   :  { %13231 = vmatprep.subr.bf16.mxu1 %v13230_v34  ;;  %v21651_v24 = vand.u32 4294901760, %v22642_v58  ;;  %v13238_v34 = vpack.c.bf16 %v21644_v29, %v21645_v32  ;;  %v22649_v32 = vld [vmem:[#allocation82_spill] sm:$0xff] }
 0x75b   :  { %v22657_v14 = vand.u32 4294901760, %v22649_v32  ;;  %22659 = vst [vmem:[#allocation54_spill] sm:$0xff] %v17515_v35  ;;  %v22662_v32 = vand.u32 4294901760, %v22650_v6 }
 0x75d   :  { %13233 = vmatpush1.bf16.msra.mxu1 %v13232_v42  ;;  %v13240_v42 = vpack.c.bf16 %v21650_v33, %v21651_v24  ;;  %v17490_v33 = vld [vmem:[#allocation12 + $0x340] sm:$0xff]  ;;  %v17494_v24 = vld [vmem:[#allocation12 + $0x388] sm:$0xff]  ;;  %v13246_v58 = vpack.c.bf16 %v22657_v14, %v22656_v25 }
 0x75e   :  { %13235 = vmatprep.subr.bf16.mxu1 %v13234_v1  ;;  %v22646_v1 = vld [vmem:[#allocation77_spill] sm:$0xff]  ;;  %v5322_v27 = vand.u32 4294901760, %v17490_v33 }
 0x75f   :  { %v22654_v50 = vand.u32 4294901760, %v22646_v1  ;;  %v17524_v14 = vld [vmem:[#allocation12 + $0x380] sm:$0xff]  ;;  %v13250_v1 = vpack.c.bf16 %v22665_v21, %v22664_v26 }
 0x760   :  { %v5182_v25 = vld [vmem:[#allocation12 + $0x3a0] sm:$0xff]  ;;  %v17537_v47 = vsub.f32 %v17490_v33, %v5322_v27  ;;  %v5330_v6 = vand.u32 4294901760, %v17524_v14 }
 0x761   :  { %13237 = vmatpush1.bf16.msra.mxu1 %v13236_v19  ;;  %v17492_v19 = vld [vmem:[#allocation12 + $0x360] sm:$0xff]  ;;  %v13244_v59 = vpack.c.bf16 %v22655_v46, %v22654_v50  ;;  %v5328_v46 = vand.u32 4294901760, %v17494_v24  ;;  %v5332_v50 = vand.u32 4294901760, %v17496_v53 }
 0x762   :  { %13239 = vmatprep.subr.bf16.mxu1 %v13238_v34  ;;  %v22651_v34 = vld [vmem:[#allocation85_spill] sm:$0xff]  ;;  %v5326_v18 = vand.u32 4294901760, %v17492_v19  ;;  %22668 = vst [vmem:[#allocation31_spill] sm:$0xff] %v17537_v47  ;;  %v21675_v33 = vand.u32 4294901760, %v17537_v47 }
 0x763   :  { %v17546_v21 = vsub.f32 %v17494_v24, %v5328_v46  ;;  %v17549_v26 = vsub.f32 %v17496_v53, %v5332_v50 }
 0x764   :  { %v17540_v57 = vsub.f32 %v17492_v19, %v5326_v18  ;;  %v17558_v19 = vsub.f32 %v17524_v14, %v5330_v6 }
 0x765   :  { %13241 = vmatpush1.bf16.msra.mxu1 %v13240_v42  ;;  %v22660_v42 = vand.u32 4294901760, %v17474_v4  ;;  %22670 = vst [vmem:[#allocation34_spill] sm:$0xff] %v17546_v21  ;;  %22671 = vst [vmem:[#allocation35_spill] sm:$0xff] %v17549_v26 }
 0x766   :  { %13243 = vmatprep.subr.bf16.mxu1 %v13242_v55  ;;  %v22663_v55 = vand.u32 4294901760, %v22651_v34  ;;  %22669 = vst [vmem:[#allocation32_spill] sm:$0xff] %v17540_v57  ;;  %v5334_v34 = vand.u32 4294901760, %v5182_v25  ;;  %v21688_v14 = vand.u32 4294901760, %v17558_v19 }
 0x767   :  { %v17520_v29 = vsub.f32 %v17474_v4, %v22660_v42  ;;  %v21677_v42 = vand.u32 4294901760, %v22666_v16  ;;  %v21689_v16 = vand.u32 4294901760, %v17546_v21 }
 0x768   :  { %v13248_v10 = vpack.c.bf16 %v22663_v55, %v22662_v32  ;;  %v21676_v32 = vand.u32 4294901760, %v17515_v35  ;;  %v17560_v55 = vsub.f32 %v5182_v25, %v5334_v34 }
 0x769   :  { %22661 = vst [vmem:[#allocation30_spill] sm:$0xff] %v17520_v29  ;;  %13245 = vmatpush1.bf16.msra.mxu1 %v13244_v59  ;;  %v13252_v59 = vpack.c.bf16 %v21673_v44, %v21677_v42  ;;  %v22673_v53 = vand.u32 4294901760, %v17520_v29  ;;  %v21686_v44 = vand.u32 4294901760, %v17549_v26  ;;  %v5186_v42 = vld [vmem:[#allocation12 + $0x3c0] sm:$0xff] }
 0x76a   :  { %13247 = vmatprep.subr.bf16.mxu1 %v13246_v58  ;;  %v21674_v58 = vand.u32 4294901760, %v17540_v57  ;;  %22672 = vst [vmem:[#allocation37_spill] sm:$0xff] %v17560_v55  ;;  %v21687_v25 = vand.u32 4294901760, %v17560_v55  ;;  %v5190_v57 = vld [vmem:[#allocation12 + $0x3e0] sm:$0xff]  ;;  %v22675_v55 = vand.u32 4294901760, %v17474_v4  ;;  %v17612_v4 = vpack.c.bf16 %v5332_v50, %v5328_v46 }
 0x76b   :  { %v13254_v24 = vpack.c.bf16 %v22673_v53, %v21676_v32  ;;  %v5187_v53 = vld [vmem:[#allocation12 + $0x3c8] sm:$0xff]  ;;  %v5342_v47 = vand.u32 4294901760, %v5190_v57 }
 0x76d   :  { %13249 = vmatpush1.bf16.msra.mxu1 %v13248_v10  ;;  %v13256_v10 = vpack.c.bf16 %v21674_v58, %v21675_v33  ;;  %v5191_v58 = vld [vmem:[#allocation12 + $0x3e8] sm:$0xff]  ;;  %v5336_v33 = vand.u32 4294901760, %v5187_v53 }
 0x76e   :  { %13251 = vmatprep.subr.bf16.mxu1 %v13250_v1  ;;  %v13258_v1 = vpack.c.bf16 %v21686_v44, %v21689_v16  ;;  %v5340_v32 = vand.u32 4294901760, %v5191_v58  ;;  %v17588_v44 = vsub.f32 %v5190_v57, %v5342_v47  ;;  %v22674_v16 = vand.u32 4294901760, %v17472_v39  ;;  %v22676_v39 = vld [vmem:[#allocation46_spill] sm:$0xff] }
 0x76f   :  { %v17582_v21 = vsub.f32 %v5187_v53, %v5336_v33 }
 0x770   :  { %v17584_v26 = vsub.f32 %v5191_v58, %v5340_v32  ;;  %v17598_v53 = vpack.c.bf16 %v22675_v55, %v22674_v16  ;;  %v17615_v16 = vpack.c.bf16 %v5334_v34, %v5330_v6  ;;  %v22677_v55 = vand.u32 4294901760, %v17103_v0 }
 0x771   :  { %13253 = vmatpush1.bf16.msra.mxu1 %v13252_v59  ;;  %v13260_v59 = vpack.c.bf16 %v21687_v25, %v21688_v14  ;;  %v21695_v25 = vand.u32 4294901760, %v17582_v21  ;;  %v21692_v14 = vand.u32 4294901760, %v17588_v44 }
 0x772   :  { %13255 = vmatprep.subr.bf16.mxu1 %v13254_v24  ;;  %v5338_v24 = vand.u32 4294901760, %v5186_v42  ;;  %12999 = vmatprep.subr.bf16.mxu0 %v17598_v53 }
 0x775   :  { %13257 = vmatpush1.bf16.msra.mxu1 %v13256_v10  ;;  %v17586_v10 = vsub.f32 %v5186_v42, %v5338_v24  ;;  %v17604_v42 = vpack.c.bf16 %v5326_v18, %v5322_v27  ;;  %v17619_v18 = vpack.c.bf16 %v5340_v32, %v5336_v33  ;;  %v17621_v27 = vpack.c.bf16 %v5342_v47, %v5338_v24 }
 0x776   :  { %13259 = vmatprep.subr.bf16.mxu1 %v13258_v1  ;;  %v21694_v1 = vand.u32 4294901760, %v17584_v26  ;;  %v22679_v47 = vand.u32 4294901760, %v17107_v36  ;;  %v22680_v24 = vand.u32 4294901760, %v17109_v60 }
 0x777   :  { %13001 = vmatpush1.bf16.msra.mxu0 %v17604_v42 }
 0x778   :  { %v13262_v57 = vpack.c.bf16 %v21694_v1, %v21695_v25  ;;  %13003 = vmatprep.subr.bf16.mxu0 %v17612_v4  ;;  %v5370_v33 = vsub.f32 %v17107_v36, %v22679_v47  ;;  %v22687_v25 = vand.u32 4294901760, %v17115_v13 }
 0x779   :  { %13261 = vmatpush1.bf16.msra.mxu1 %v13260_v59  ;;  %v21693_v59 = vand.u32 4294901760, %v17586_v10 }
 0x77a   :  { %13263 = vmatprep.subr.bf16.mxu1 %v13262_v57  ;;  %v5364_v57 = vsub.f32 %v17103_v0, %v22677_v55  ;;  %v5382_v55 = vsub.f32 %v17109_v60, %v22680_v24  ;;  %v5371_v24 = vand.u32 4294901760, %v5370_v33  ;;  %v22695_v0 = vld [vmem:[#allocation51_spill] sm:$0xff] }
 0x77b   :  { %v13264_v58 = vpack.c.bf16 %v21692_v14, %v21693_v59  ;;  %13005 = vmatpush1.bf16.msra.mxu0 %v17615_v16  ;;  %v22682_v59 = vand.u32 4294901760, %v17111_v9 }
 0x77c   :  { %13007 = vmatprep.subr.bf16.mxu0 %v17619_v18  ;;  %v5365_v6 = vand.u32 4294901760, %v5364_v57  ;;  %v5383_v1 = vand.u32 4294901760, %v5382_v55 }
 0x77d   :  { %13265 = vmatpush1.bf16.msra.mxu1 %v13264_v58  ;;  %v22678_v58 = vand.u32 4294901760, %v17105_v56  ;;  %v5388_v57 = vsub.f32 %v17111_v9, %v22682_v59  ;;  %v5394_v59 = vsub.f32 %v17115_v13, %v22687_v25  ;;  %v22690_v9 = vld [vmem:[#allocation44_spill] sm:$0xff]  ;;  %v22692_v25 = vand.u32 4294901760, %v17122_v48 }
 0x77e   :  { %13267 = vmatprep.subr.bf16.mxu1 %v22676_v39 }
 0x77f   :  { %v5376_v46 = vsub.f32 %v17105_v56, %v22678_v58  ;;  %13009 = vmatpush1.bf16.msra.mxu0 %v17621_v27  ;;  %v5412_v55 = vsub.f32 %v17122_v48, %v22692_v25  ;;  %v5395_v36 = vand.u32 4294901760, %v5394_v59 }
 0x781   :  { %v5377_v34 = vand.u32 4294901760, %v5376_v46  ;;  %v22683_v46 = vand.u32 4294901760, %v17113_v30  ;;  %v5413_v25 = vand.u32 4294901760, %v5412_v55  ;;  %v22705_v55 = vld [vmem:[#allocation53_spill] sm:$0xff] }
 0x783   :  { %v13010_v50 = vpack.c.bf16 %v5377_v34, %v5365_v6  ;;  %v5400_v6 = vsub.f32 %v17113_v30, %v22683_v46  ;;  %v5389_v46 = vand.u32 4294901760, %v5388_v57  ;;  %v22693_v57 = vld [vmem:[#allocation47_spill] sm:$0xff] }
 0x785   :  { %13011 = vmatprep.subr.bf16.mxu0 %v13010_v50  ;;  %v5401_v30 = vand.u32 4294901760, %v5400_v6  ;;  %v22694_v6 = vand.u32 4294901760, %v17126_v62 }
 0x787   :  { %v13014_v60 = vpack.c.bf16 %v5401_v30, %v5389_v46  ;;  %v22704_v46 = vand.u32 4294901760, %v17147_v11 }
 0x813   :  { %v5061_v32 = vpop.f32.mrb[12].mxu1 }
 0x814   :  { %v17637_v14 = vand.u32 4294901760, %v5061_v32  ;;  %v5063_v58 = vpop.f32.mrb[13].mxu1 }
 0x815   :  { %v17645_v34 = vand.u32 4294901760, %v5063_v58 }
 0x816   :  { %22681 = vst [vmem:[#allocation42_spill] sm:$0xff] %v17637_v14  ;;  %v17648_v50 = vsub.f32 %v5061_v32, %v17637_v14  ;;  %v22689_v32 = vand.u32 4294901760, %v17117_v17 }
 0x817   :  { %22684 = vst [vmem:[#allocation95_spill] sm:$0xff] %v17645_v34  ;;  %v17651_v47 = vsub.f32 %v5063_v58, %v17645_v34  ;;  %6355 = vmatprep.mubr.f32.mxu1 %v17645_v34 }
 0x818   :  { %22685 = vst [vmem:[#allocation96_spill] sm:$0xff] %v17648_v50  ;;  %v17658_v39 = vand.u32 4294901760, %v17648_v50  ;;  %6357 = vmatmul.mubr.f32.vlgmr.msra.gmra.mrb[14].mxu1 %v17637_v14  ;;  %v5406_v58 = vsub.f32 %v17117_v17, %v22689_v32  ;;  %v5424_v32 = vsub.f32 %v17126_v62, %v22694_v6  ;;  %v13012_v17 = vpack.c.bf16 %v5383_v1, %v5371_v24 }
 0x819   :  { %22686 = vst [vmem:[#allocation97_spill] sm:$0xff] %v17651_v47  ;;  %13269 = vmatpush1.bf16.msra.mxu1 %v22690_v9  ;;  %6492 = vmatprep.mubr.f32.mxu1 %v17645_v34  ;;  %v17667_v33 = vand.u32 4294901760, %v17651_v47  ;;  %v22701_v1 = vand.u32 4294901760, %v17136_v52 }
 0x81a   :  { %22688 = vst [vmem:[#allocation98_spill] sm:$0xff] %v17658_v39  ;;  %v5353_v13 = vsub.f32 %v17648_v50, %v17658_v39  ;;  %13271 = vmatprep.subr.bf16.mxu1 %v22693_v57  ;;  %v5407_v56 = vand.u32 4294901760, %v5406_v58  ;;  %v22697_v39 = vand.u32 4294901760, %v17131_v2  ;;  %v22698_v50 = vand.u32 4294901760, %v17133_v51 }
 0x81b   :  { %22691 = vst [vmem:[#allocation99_spill] sm:$0xff] %v17667_v33  ;;  %v5347_v9 = vsub.f32 %v17651_v47, %v17667_v33  ;;  %v22700_v33 = vld [vmem:[#allocation50_spill] sm:$0xff]  ;;  %v5425_v30 = vand.u32 4294901760, %v5424_v32  ;;  %v5436_v24 = vsub.f32 %v17136_v52, %v22701_v1  ;;  %v5454_v58 = vsub.f32 %v17147_v11, %v22704_v46  ;;  %v22708_v46 = vld [vmem:[#allocation52_spill] sm:$0xff] }
 0x81c   :  { %v5418_v57 = vsub.f32 %v17131_v2, %v22697_v39  ;;  %v5430_v6 = vsub.f32 %v17133_v51, %v22698_v50  ;;  %v17689_v62 = vand.u32 4294901760, %v5353_v13  ;;  %v13016_v39 = vpack.c.bf16 %v5407_v56, %v5395_v36 }
 0x81d   :  { %13273 = vmatpush1.bf16.msra.mxu1 %v22695_v0  ;;  %v17681_v14 = vand.u32 4294901760, %v5347_v9  ;;  %v22702_v9 = vand.u32 4294901760, %v17140_v28  ;;  %v22703_v50 = vand.u32 4294901760, %v17142_v40  ;;  %v13018_v36 = vpack.c.bf16 %v5425_v30, %v5413_v25  ;;  %v22712_v30 = vld [vmem:[#allocation29_spill] sm:$0xff] }
 0x81e   :  { %22699 = vst [vmem:[#allocation101_spill] sm:$0xff] %v17689_v62  ;;  %13275 = vmatprep.subr.bf16.mxu1 %v22700_v33  ;;  %v5419_v32 = vand.u32 4294901760, %v5418_v57  ;;  %v5431_v1 = vand.u32 4294901760, %v5430_v6  ;;  %v22709_v57 = vand.u32 4294901760, %v17156_v43 }
 0x81f   :  { %22696 = vst [vmem:[#allocation100_spill] sm:$0xff] %v17681_v14  ;;  %v5448_v59 = vsub.f32 %v17140_v28, %v22702_v9  ;;  %5349 = vmatprep.mubr.f32.mxu0 %v17681_v14  ;;  %v5442_v13 = vsub.f32 %v17142_v40, %v22703_v50  ;;  %v22706_v9 = vand.u32 4294901760, %v17152_v3  ;;  %v5437_v50 = vand.u32 4294901760, %v5436_v24 }
 0x820   :  { %5355 = vmatmul.mubr.f32.vlgmr.msra.gmra.mrb[24].mxu0 %v17689_v62  ;;  %v22707_v62 = vand.u32 4294901760, %v17154_v61  ;;  %v5466_v6 = vsub.f32 %v17156_v43, %v22709_v57 }
 0x821   :  { %13013 = vmatpush1.bf16.msra.mxu0 %v13012_v17  ;;  %13277 = vmatpush1.bf16.msra.mxu1 %v22705_v55  ;;  %v5460_v14 = vsub.f32 %v17152_v3, %v22706_v9  ;;  %v5449_v33 = vand.u32 4294901760, %v5448_v59  ;;  %v5443_v17 = vand.u32 4294901760, %v5442_v13  ;;  %v5455_v55 = vand.u32 4294901760, %v5454_v58 }
 0x822   :  { %v5472_v56 = vsub.f32 %v17154_v61, %v22707_v62  ;;  %5746 = vmatprep.mubr.f32.mxu0 %v17645_v34  ;;  %13015 = vmatprep.subr.bf16.mxu0 %v13014_v60  ;;  %v22710_v9 = vand.u32 4294901760, %v17161_v38  ;;  %v22711_v62 = vld [vmem:[#allocation56_spill] sm:$0xff]  ;;  %v13020_v34 = vpack.c.bf16 %v5431_v1, %v5419_v32  ;;  %v22713_v59 = vand.u32 4294901760, %v17164_v31 }
 0x823   :  { %13279 = vmatprep.subr.bf16.mxu1 %v22708_v46  ;;  %v5461_v60 = vand.u32 4294901760, %v5460_v14  ;;  %v13022_v24 = vpack.c.bf16 %v5449_v33, %v5437_v50  ;;  %v22714_v58 = vand.u32 4294901760, %v22625_v22  ;;  %v13024_v46 = vpack.c.bf16 %v5455_v55, %v5443_v17 }
 0x824   :  { %v5478_v0 = vsub.f32 %v17161_v38, %v22710_v9  ;;  %v5473_v25 = vand.u32 4294901760, %v5472_v56  ;;  %v5484_v13 = vsub.f32 %v17164_v31, %v22713_v59  ;;  %v5467_v9 = vand.u32 4294901760, %v5466_v6 }
 0x825   :  { %13017 = vmatpush1.bf16.msra.mxu0 %v13016_v39  ;;  %13281 = vmatpush1.bf16.msra.mxu1 %v22711_v62  ;;  %v5496_v57 = vsub.f32 %v22625_v22, %v22714_v58  ;;  %v22715_v62 = vld [vmem:[#allocation33_spill] sm:$0xff]  ;;  %v22716_v32 = vand.u32 4294901760, %v22626_v15  ;;  %v22717_v33 = vand.u32 4294901760, %v22627_v63  ;;  %v22719_v55 = vand.u32 4294901760, %v22628_v20 }
 0x826   :  { %13019 = vmatprep.subr.bf16.mxu0 %v13018_v36  ;;  %13283 = vmatprep.subr.bf16.mxu1 %v22712_v30  ;;  %v5479_v39 = vand.u32 4294901760, %v5478_v0  ;;  %v13026_v14 = vpack.c.bf16 %v5473_v25, %v5461_v60  ;;  %v22718_v36 = vld [vmem:[#allocation36_spill] sm:$0xff]  ;;  %v5485_v50 = vand.u32 4294901760, %v5484_v13  ;;  %v22721_v60 = vand.u32 4294901760, %v22630_v5  ;;  %v22723_v13 = vld [vmem:[#allocation39_spill] sm:$0xff] }
 0x827   :  { %v5490_v1 = vsub.f32 %v22626_v15, %v22716_v32  ;;  %v5502_v56 = vsub.f32 %v22627_v63, %v22717_v33  ;;  %v5497_v59 = vand.u32 4294901760, %v5496_v57  ;;  %v5508_v0 = vsub.f32 %v22628_v20, %v22719_v55  ;;  %v22729_v30 = vld [vmem:[#allocation63_spill] sm:$0xff] }
 0x828   :  { %v13028_v6 = vpack.c.bf16 %v5479_v39, %v5467_v9  ;;  %v5514_v25 = vsub.f32 %v22630_v5, %v22721_v60  ;;  %v22722_v58 = vand.u32 4294901760, %v22631_v41  ;;  %v22724_v33 = vand.u32 4294901760, %v22632_v37  ;;  %v22726_v39 = vld [vmem:[#allocation49_spill] sm:$0xff] }
 0x829   :  { %13021 = vmatpush1.bf16.msra.mxu0 %v13020_v34  ;;  %13285 = vmatpush1.bf16.msra.mxu1 %v22715_v62  ;;  %v22720_v34 = vand.u32 4294901760, %v22629_v12  ;;  %v5491_v57 = vand.u32 4294901760, %v5490_v1  ;;  %v5503_v32 = vand.u32 4294901760, %v5502_v56  ;;  %v13030_v60 = vpack.c.bf16 %v5497_v59, %v5485_v50  ;;  %v22730_v50 = vld [vmem:[#allocation65_spill] sm:$0xff] }
 0x82a   :  { %13023 = vmatprep.subr.bf16.mxu0 %v13022_v24  ;;  %13287 = vmatprep.subr.bf16.mxu1 %v22718_v36  ;;  %v5526_v24 = vsub.f32 %v22631_v41, %v22722_v58  ;;  %v5532_v55 = vsub.f32 %v22632_v37, %v22724_v33  ;;  %v5509_v36 = vand.u32 4294901760, %v5508_v0  ;;  %v5515_v58 = vand.u32 4294901760, %v5514_v25  ;;  %v22731_v0 = vld [vmem:[#allocation57_spill] sm:$0xff] }
 0x82b   :  { %v5520_v17 = vsub.f32 %v22629_v12, %v22720_v34  ;;  %v22725_v34 = vand.u32 4294901760, %v22633_v7  ;;  %v22728_v56 = vand.u32 4294901760, %v22635_v54 }
 0x82d   :  { %13025 = vmatpush1.bf16.msra.mxu0 %v13024_v46  ;;  %13289 = vmatpush1.bf16.msra.mxu1 %v22723_v13  ;;  %v5544_v9 = vsub.f32 %v22633_v7, %v22725_v34  ;;  %v5521_v62 = vand.u32 4294901760, %v5520_v17  ;;  %v5527_v46 = vand.u32 4294901760, %v5526_v24  ;;  %v22727_v13 = vand.u32 4294901760, %v22634_v49  ;;  %v22733_v24 = vld [vmem:[#allocation64_spill] sm:$0xff] }
 0x82e   :  { %13027 = vmatprep.subr.bf16.mxu0 %v13026_v14  ;;  %13291 = vmatprep.subr.bf16.mxu1 %v22726_v39  ;;  %v5550_v33 = vsub.f32 %v22635_v54, %v22728_v56  ;;  %v13032_v34 = vpack.c.bf16 %v5503_v32, %v5491_v57  ;;  %v5533_v14 = vand.u32 4294901760, %v5532_v55  ;;  %v22732_v17 = vand.u32 4294901760, %v22731_v0  ;;  %v22736_v32 = vld [vmem:[#allocation66_spill] sm:$0xff] }
 0x82f   :  { %v5538_v1 = vsub.f32 %v22634_v49, %v22727_v13  ;;  %v5545_v7 = vand.u32 4294901760, %v5544_v9  ;;  %v13034_v59 = vpack.c.bf16 %v5521_v62, %v5509_v36  ;;  %v22734_v13 = vand.u32 4294901760, %v22733_v24  ;;  %v22738_v62 = vld [vmem:[#allocation67_spill] sm:$0xff] }
 0x830   :  { %v5556_v25 = vsub.f32 %v22731_v0, %v22732_v17  ;;  %v13036_v49 = vpack.c.bf16 %v5527_v46, %v5515_v58  ;;  %v22737_v55 = vand.u32 4294901760, %v22736_v32  ;;  %v22739_v36 = vand.u32 4294901760, %v22738_v62  ;;  %v22740_v17 = vld [vmem:[#allocation72_spill] sm:$0xff] }
 0x831   :  { %13029 = vmatpush1.bf16.msra.mxu0 %v13028_v6  ;;  %13293 = vmatpush1.bf16.msra.mxu1 %v22729_v30  ;;  %v5568_v39 = vsub.f32 %v22733_v24, %v22734_v13  ;;  %v5539_v56 = vand.u32 4294901760, %v5538_v1  ;;  %v5551_v6 = vand.u32 4294901760, %v5550_v33  ;;  %v22735_v30 = vld [vmem:[#allocation69_spill] sm:$0xff]  ;;  %v13038_v57 = vpack.c.bf16 %v5545_v7, %v5533_v14  ;;  %v22741_v58 = vld [vmem:[#allocation68_spill] sm:$0xff]  ;;  %v22743_v33 = vld [vmem:[#allocation70_spill] sm:$0xff] }
 0x832   :  { %13031 = vmatprep.subr.bf16.mxu0 %v13030_v60  ;;  %13295 = vmatprep.subr.bf16.mxu1 %v22730_v50  ;;  %v5562_v9 = vsub.f32 %v22736_v32, %v22737_v55  ;;  %v5574_v60 = vsub.f32 %v22738_v62, %v22739_v36  ;;  %v5557_v50 = vand.u32 4294901760, %v5556_v25  ;;  %v22742_v46 = vand.u32 4294901760, %v22741_v58  ;;  %v22747_v24 = vld [vmem:[#allocation73_spill] sm:$0xff]  ;;  %v22749_v25 = vld [vmem:[#allocation74_spill] sm:$0xff]  ;;  %v22750_v62 = vld [vmem:[#allocation75_spill] sm:$0xff] }
 0x833   :  { %v5569_v13 = vand.u32 4294901760, %v5568_v39  ;;  %v13040_v14 = vpack.c.bf16 %v5551_v6, %v5539_v56  ;;  %v22748_v36 = vand.u32 4294901760, %v22747_v24  ;;  %v22752_v0 = vld [vmem:[#allocation76_spill] sm:$0xff]  ;;  %v22754_v6 = vld [vmem:[#allocation78_spill] sm:$0xff] }
 0x834   :  { %v5580_v1 = vsub.f32 %v22741_v58, %v22742_v46  ;;  %v5563_v39 = vand.u32 4294901760, %v5562_v9  ;;  %v22751_v46 = vand.u32 4294901760, %v22750_v62 }
 0x835   :  { %13033 = vmatpush1.bf16.msra.mxu0 %v13032_v34  ;;  %13297 = vmatpush1.bf16.msra.mxu1 %v22735_v30  ;;  %v22744_v34 = vand.u32 4294901760, %v22743_v33  ;;  %v22745_v30 = vld [vmem:[#allocation71_spill] sm:$0xff] }
 0x836   :  { %13035 = vmatprep.subr.bf16.mxu0 %v13034_v59  ;;  %13299 = vmatprep.subr.bf16.mxu1 %v22740_v17  ;;  %v22746_v55 = vand.u32 4294901760, %v22745_v30  ;;  %v5598_v59 = vsub.f32 %v22747_v24, %v22748_v36  ;;  %v5575_v17 = vand.u32 4294901760, %v5574_v60  ;;  %v5604_v58 = vsub.f32 %v22750_v62, %v22751_v46  ;;  %v22755_v24 = vld [vmem:[#allocation77_spill] sm:$0xff]  ;;  %v22757_v60 = vld [vmem:[#allocation79_spill] sm:$0xff] }
 0x837   :  { %v5592_v7 = vsub.f32 %v22743_v33, %v22744_v34  ;;  %v22753_v34 = vand.u32 4294901760, %v22752_v0  ;;  %v22758_v54 = vand.u32 4294901760, %v22757_v60  ;;  %v22759_v62 = vld [vmem:[#allocation81_spill] sm:$0xff] }
 0x838   :  { %v5586_v32 = vsub.f32 %v22745_v30, %v22746_v55  ;;  %v13042_v55 = vpack.c.bf16 %v5569_v13, %v5557_v50  ;;  %v5581_v30 = vand.u32 4294901760, %v5580_v1  ;;  %v22760_v50 = vld [vmem:[#allocation83_spill] sm:$0xff] }
 0x839   :  { %13037 = vmatpush1.bf16.msra.mxu0 %v13036_v49  ;;  %13301 = vmatpush1.bf16.msra.mxu1 %v22749_v25  ;;  %v5616_v56 = vsub.f32 %v22752_v0, %v22753_v34  ;;  %v5593_v33 = vand.u32 4294901760, %v5592_v7  ;;  %v5599_v49 = vand.u32 4294901760, %v5598_v59  ;;  %v22756_v25 = vand.u32 4294901760, %v22755_v24  ;;  %v22763_v59 = vld [vmem:[#allocation82_spill] sm:$0xff] }
 0x83a   :  { %13039 = vmatprep.subr.bf16.mxu0 %v13038_v57  ;;  %13303 = vmatprep.subr.bf16.mxu1 %v22754_v6  ;;  %v5587_v36 = vand.u32 4294901760, %v5586_v32  ;;  %v5622_v46 = vsub.f32 %v22757_v60, %v22758_v54  ;;  %v13044_v34 = vpack.c.bf16 %v5575_v17, %v5563_v39  ;;  %v5605_v57 = vand.u32 4294901760, %v5604_v58  ;;  %v22761_v32 = vld [vmem:[#allocation80_spill] sm:$0xff] }
 0x83b   :  { %v5610_v9 = vsub.f32 %v22755_v24, %v22756_v25  ;;  %v5617_v0 = vand.u32 4294901760, %v5616_v56  ;;  %v13046_v13 = vpack.c.bf16 %v5593_v33, %v5581_v30  ;;  %v22762_v1 = vand.u32 4294901760, %v22761_v32  ;;  %v22766_v58 = vld [vmem:[#allocation84_spill] sm:$0xff]  ;;  %v22768_v30 = vld [vmem:[#allocation85_spill] sm:$0xff] }
 0x83c   :  { %v22764_v25 = vand.u32 4294901760, %v22763_v59  ;;  %v13048_v24 = vpack.c.bf16 %v5599_v49, %v5587_v36  ;;  %v22767_v39 = vand.u32 4294901760, %v22766_v58  ;;  %v22769_v33 = vand.u32 4294901760, %v22768_v30 }
 0x83d   :  { %13041 = vmatpush1.bf16.msra.mxu0 %v13040_v14  ;;  %13305 = vmatpush1.bf16.msra.mxu1 %v22759_v62  ;;  %v5628_v7 = vsub.f32 %v22761_v32, %v22762_v1  ;;  %v5611_v54 = vand.u32 4294901760, %v5610_v9  ;;  %v5623_v14 = vand.u32 4294901760, %v5622_v46  ;;  %v22765_v62 = vld [vmem:[#allocation87_spill] sm:$0xff]  ;;  %v13050_v17 = vpack.c.bf16 %v5617_v0, %v5605_v57  ;;  %v22770_v1 = vld [vmem:[#allocation90_spill] sm:$0xff] }
 0x83e   :  { %13043 = vmatprep.subr.bf16.mxu0 %v13042_v55  ;;  %13307 = vmatprep.subr.bf16.mxu1 %v22760_v50  ;;  %v5640_v6 = vsub.f32 %v22763_v59, %v22764_v25  ;;  %v5634_v56 = vsub.f32 %v22766_v58, %v22767_v39  ;;  %v5646_v55 = vsub.f32 %v22768_v30, %v22769_v33  ;;  %v22771_v36 = vand.u32 4294901760, %v22652_v8 }
 0x83f   :  { %v5629_v50 = vand.u32 4294901760, %v5628_v7  ;;  %v22772_v9 = vand.u32 4294901760, %v22653_v45  ;;  %v13052_v46 = vpack.c.bf16 %v5623_v14, %v5611_v54  ;;  %v22775_v33 = vand.u32 4294901760, %v22667_v23  ;;  %v22776_v7 = vld [vmem:[#allocation92_spill] sm:$0xff]  ;;  %v22779_v14 = vld [vmem:[#allocation93_spill] sm:$0xff] }
 0x840   :  { %v5641_v25 = vand.u32 4294901760, %v5640_v6  ;;  %v5652_v49 = vsub.f32 %v22652_v8, %v22771_v36  ;;  %v5635_v6 = vand.u32 4294901760, %v5634_v56  ;;  %v22777_v36 = vand.u32 4294901760, %v17515_v35 }
 0x841   :  { %13045 = vmatpush1.bf16.msra.mxu0 %v13044_v34  ;;  %13309 = vmatpush1.bf16.msra.mxu1 %v22765_v62  ;;  %v5664_v0 = vsub.f32 %v22653_v45, %v22772_v9  ;;  %v22773_v34 = vld [vmem:[#allocation89_spill] sm:$0xff]  ;;  %v22778_v9 = vand.u32 4294901760, %v17520_v29 }
 0x842   :  { %13047 = vmatprep.subr.bf16.mxu0 %v13046_v13  ;;  %13311 = vmatprep.subr.bf16.mxu1 %v22770_v1  ;;  %v22774_v57 = vand.u32 4294901760, %v22773_v34  ;;  %v5670_v13 = vsub.f32 %v22667_v23, %v22775_v33  ;;  %v5647_v1 = vand.u32 4294901760, %v5646_v55  ;;  %v5676_v62 = vsub.f32 %v17515_v35, %v22777_v36  ;;  %v22780_v23 = vld [vmem:[#allocation31_spill] sm:$0xff]  ;;  %v22782_v55 = vld [vmem:[#allocation32_spill] sm:$0xff]  ;;  %v22784_v35 = vld [vmem:[#allocation94_spill] sm:$0xff] }
 0x843   :  { %v5688_v54 = vsub.f32 %v17520_v29, %v22778_v9  ;;  %v5665_v45 = vand.u32 4294901760, %v5664_v0  ;;  %v22783_v8 = vand.u32 4294901760, %v22782_v55 }
 0x844   :  { %v5658_v39 = vsub.f32 %v22773_v34, %v22774_v57  ;;  %v13054_v57 = vpack.c.bf16 %v5641_v25, %v5629_v50  ;;  %v5653_v34 = vand.u32 4294901760, %v5652_v49  ;;  %v13056_v9 = vpack.c.bf16 %v5647_v1, %v5635_v6  ;;  %v22785_v25 = vld [vmem:[#allocation34_spill] sm:$0xff] }
 0x845   :  { %13049 = vmatpush1.bf16.msra.mxu0 %v13048_v24  ;;  %13313 = vmatpush1.bf16.msra.mxu1 %v22776_v7  ;;  %v5671_v24 = vand.u32 4294901760, %v5670_v13  ;;  %v22781_v7 = vand.u32 4294901760, %v22780_v23  ;;  %v5694_v36 = vsub.f32 %v22782_v55, %v22783_v8  ;;  %v5689_v29 = vand.u32 4294901760, %v5688_v54 }
 0x846   :  { %13051 = vmatprep.subr.bf16.mxu0 %v13050_v17  ;;  %13315 = vmatprep.subr.bf16.mxu1 %v22779_v14  ;;  %v5659_v33 = vand.u32 4294901760, %v5658_v39  ;;  %v5677_v17 = vand.u32 4294901760, %v5676_v62  ;;  %v13058_v50 = vpack.c.bf16 %v5665_v45, %v5653_v34  ;;  %v22786_v49 = vand.u32 4294901760, %v22785_v25  ;;  %v22787_v39 = vld [vmem:[#allocation35_spill] sm:$0xff]  ;;  %v22790_v45 = vld [vmem:[#allocation37_spill] sm:$0xff] }
 0x847   :  { %v5682_v56 = vsub.f32 %v22780_v23, %v22781_v7  ;;  %v22788_v13 = vand.u32 4294901760, %v22787_v39  ;;  %v22789_v1 = vand.u32 4294901760, %v17558_v19  ;;  %v22791_v34 = vand.u32 4294901760, %v22790_v45 }
 0x848   :  { %v5700_v0 = vsub.f32 %v22785_v25, %v22786_v49  ;;  %v13060_v14 = vpack.c.bf16 %v5671_v24, %v5659_v33  ;;  %v13062_v62 = vpack.c.bf16 %v5689_v29, %v5677_v17  ;;  %v22792_v33 = vand.u32 4294901760, %v17582_v21 }
 0x849   :  { %13053 = vmatpush1.bf16.msra.mxu0 %v13052_v46  ;;  %13317 = vmatpush1.bf16.msra.mxu1 %v22784_v35  ;;  %v5712_v7 = vsub.f32 %v22787_v39, %v22788_v13  ;;  %v5683_v8 = vand.u32 4294901760, %v5682_v56  ;;  %v5695_v46 = vand.u32 4294901760, %v5694_v36  ;;  %v5706_v6 = vsub.f32 %v17558_v19, %v22789_v1 }
 0x84a   :  { %13055 = vmatprep.subr.bf16.mxu0 %v13054_v57  ;;  %13319 = vmatprep.subr.bf16.mxu1 %v17598_v53  ;;  %v5718_v54 = vsub.f32 %v22790_v45, %v22791_v34  ;;  %v5701_v57 = vand.u32 4294901760, %v5700_v0  ;;  %v5724_v24 = vsub.f32 %v17582_v21, %v22792_v33  ;;  %v22793_v56 = vand.u32 4294901760, %v17584_v26 }
 0x84b   :  { %v5713_v49 = vand.u32 4294901760, %v5712_v7  ;;  %v13064_v36 = vpack.c.bf16 %v5695_v46, %v5683_v8  ;;  %v22795_v0 = vand.u32 4294901760, %v17588_v44 }
 0x84c   :  { %v5736_v29 = vsub.f32 %v17584_v26, %v22793_v56  ;;  %v5719_v17 = vand.u32 4294901760, %v5718_v54  ;;  %v5725_v34 = vand.u32 4294901760, %v5724_v24  ;;  %v22796_v54 = vld [vmem:[#allocation42_spill] sm:$0xff] }
 0x84d   :  { %13057 = vmatpush1.bf16.msra.mxu0 %v13056_v9  ;;  %13321 = vmatpush1.bf16.msra.mxu1 %v17604_v42  ;;  %v5707_v9 = vand.u32 4294901760, %v5706_v6  ;;  %v5742_v7 = vsub.f32 %v17588_v44, %v22795_v0  ;;  %v13066_v1 = vpack.c.bf16 %v5713_v49, %v5701_v57  ;;  %v22799_v57 = vld [vmem:[#allocation61_spill] sm:$0xff]  ;;  %v22800_v49 = vld [vmem:[#allocation62_spill] sm:$0xff] }
 0x84e   :  { %13059 = vmatprep.subr.bf16.mxu0 %v13058_v50  ;;  %13323 = vmatprep.subr.bf16.mxu1 %v17612_v4  ;;  %v22794_v50 = vand.u32 4294901760, %v17586_v10  ;;  %v5737_v33 = vand.u32 4294901760, %v5736_v29  ;;  %v13076_v24 = vpack.c.bf16 %v22800_v49, %v22799_v57  ;;  %v22801_v29 = vld [vmem:[#allocation40_spill] sm:$0xff]  ;;  %v22819_v57 = vld [vmem:[#allocation77_spill] sm:$0xff] }
 0x84f   :  { %v5743_v46 = vand.u32 4294901760, %v5742_v7  ;;  %v13116_v49 = vpack.c.bf16 %v22757_v60, %v22819_v57 }
 0x850   :  { %v5730_v13 = vsub.f32 %v17586_v10, %v22794_v50  ;;  %v13070_v6 = vpack.c.bf16 %v5737_v33, %v5725_v34  ;;  %v22797_v50 = vld [vmem:[#allocation59_spill] sm:$0xff]  ;;  %v13084_v33 = vpack.c.bf16 %v17133_v51, %v17131_v2  ;;  %v13094_v2 = vpack.c.bf16 %v22625_v22, %v17164_v31  ;;  %v22810_v31 = vld [vmem:[#allocation64_spill] sm:$0xff] }
 0x851   :  { %13061 = vmatpush1.bf16.msra.mxu0 %v13060_v14  ;;  %13325 = vmatpush1.bf16.msra.mxu1 %v17615_v16  ;;  %v13068_v14 = vpack.c.bf16 %v5719_v17, %v5707_v9  ;;  %v22803_v17 = vld [vmem:[#allocation43_spill] sm:$0xff]  ;;  %v13096_v51 = vpack.c.bf16 %v22627_v63, %v22626_v15  ;;  %v22811_v15 = vld [vmem:[#allocation66_spill] sm:$0xff] }
 0x852   :  { %13063 = vmatprep.subr.bf16.mxu0 %v13062_v62  ;;  %13327 = vmatprep.subr.bf16.mxu1 %v17619_v18  ;;  %v5731_v8 = vand.u32 4294901760, %v5730_v13  ;;  %v22798_v62 = vld [vmem:[#allocation60_spill] sm:$0xff]  ;;  %v22804_v13 = vld [vmem:[#allocation41_spill] sm:$0xff]  ;;  %v22812_v63 = vld [vmem:[#allocation67_spill] sm:$0xff] }
 0x853   :  { %v13074_v0 = vpack.c.bf16 %v22798_v62, %v22797_v50  ;;  %v13080_v7 = vpack.c.bf16 %v22804_v13, %v22803_v17  ;;  %v22817_v50 = vld [vmem:[#allocation75_spill] sm:$0xff]  ;;  %v22818_v62 = vld [vmem:[#allocation76_spill] sm:$0xff]  ;;  %v22822_v13 = vld [vmem:[#allocation89_spill] sm:$0xff] }
 0x854   :  { %v13072_v56 = vpack.c.bf16 %v5743_v46, %v5731_v8  ;;  %v13088_v8 = vpack.c.bf16 %v17147_v11, %v17142_v40  ;;  %v13090_v46 = vpack.c.bf16 %v17154_v61, %v17152_v3  ;;  %v22806_v40 = vld [vmem:[#allocation45_spill] sm:$0xff]  ;;  %v22807_v3 = vld [vmem:[#allocation58_spill] sm:$0xff]  ;;  %v22808_v61 = vld [vmem:[#allocation55_spill] sm:$0xff] }
 0x855   :  { %13065 = vmatpush1.bf16.msra.mxu0 %v13064_v36  ;;  %13329 = vmatpush1.bf16.msra.mxu1 %v17621_v27  ;;  %v22802_v36 = vld [vmem:[#allocation38_spill] sm:$0xff]  ;;  %v13102_v11 = vpack.c.bf16 %v22806_v40, %v22632_v37  ;;  %v22843_v40 = vld [vmem:[#allocation69_spill] sm:$0xff] }
 0x856   :  { %13067 = vmatprep.subr.bf16.mxu0 %v13066_v1  ;;  %v13078_v9 = vpack.c.bf16 %v22802_v36, %v22801_v29  ;;  %v22805_v1 = vld [vmem:[#allocation48_spill] sm:$0xff]  ;;  %v13120_v29 = vpack.c.bf16 %v22768_v30, %v22766_v58  ;;  %v22820_v36 = vld [vmem:[#allocation86_spill] sm:$0xff]  ;;  %v13132_v58 = vpack.c.bf16 %v22790_v45, %v17558_v19  ;;  %v13134_v30 = vpack.c.bf16 %v17584_v26, %v17582_v21  ;;  %v22831_v19 = vld [vmem:[#allocation51_spill] sm:$0xff] }
 0x857   :  { %v13082_v34 = vpack.c.bf16 %v22805_v1, %v17122_v48  ;;  %v13092_v48 = vpack.c.bf16 %v17161_v38, %v17156_v43  ;;  %v13104_v43 = vpack.c.bf16 %v22808_v61, %v22807_v3  ;;  %v22809_v38 = vld [vmem:[#allocation57_spill] sm:$0xff]  ;;  %v22832_v45 = vld [vmem:[#allocation50_spill] sm:$0xff]  ;;  %v22834_v26 = vld [vmem:[#allocation52_spill] sm:$0xff] }
 0x858   :  { %6494 = vmatmul.mubr.f32.vlgmr.msra.gmra.mrb[14].mxu1 %v22796_v54  ;;  %v13106_v22 = vpack.c.bf16 %v22810_v31, %v22809_v38  ;;  %v22833_v21 = vld [vmem:[#allocation53_spill] sm:$0xff]  ;;  %v22845_v3 = vld [vmem:[#allocation74_spill] sm:$0xff]  ;;  %v5073_v38 = vld [vmem:[#allocation12 + $0x38] sm:$0xff] }
 0x859   :  { %13069 = vmatpush1.bf16.msra.mxu0 %v13068_v14  ;;  %v13086_v14 = vpack.c.bf16 %v17140_v28, %v17136_v52  ;;  %v13098_v52 = vpack.c.bf16 %v22629_v12, %v22628_v20  ;;  %v13100_v28 = vpack.c.bf16 %v22631_v41, %v22630_v5  ;;  %v13108_v20 = vpack.c.bf16 %v22812_v63, %v22811_v15  ;;  %v22813_v12 = vld [vmem:[#allocation68_spill] sm:$0xff]  ;;  %v22815_v41 = vld [vmem:[#allocation71_spill] sm:$0xff]  ;;  %v22846_v61 = vld [vmem:[#allocation78_spill] sm:$0xff] }
 0x85a   :  { %13071 = vmatprep.subr.bf16.mxu0 %v13070_v6  ;;  %v22814_v6 = vld [vmem:[#allocation70_spill] sm:$0xff]  ;;  %v5077_v15 = vld [vmem:[#allocation12 + $0x58] sm:$0xff]  ;;  %v22847_v63 = vld [vmem:[#allocation81_spill] sm:$0xff] }
 0x85b   :  { %v13110_v5 = vpack.c.bf16 %v22814_v6, %v22813_v12  ;;  %v5068_v31 = vld [vmem:[#allocation12 + $0x10] sm:$0xff]  ;;  %v6504_v12 = vand.u32 4294901760, %v5073_v38  ;;  %v5081_v6 = vld [vmem:[#allocation12 + $0x78] sm:$0xff]  ;;  %v6508_v57 = vand.u32 4294901760, %v5077_v15 }
 0x85d   :  { %13073 = vmatpush1.bf16.msra.mxu0 %v13072_v56  ;;  %v22816_v56 = vld [vmem:[#allocation73_spill] sm:$0xff] }
 0x85e   :  { %13075 = vmatprep.subr.bf16.mxu0 %v13074_v0  ;;  %v13112_v37 = vpack.c.bf16 %v22816_v56, %v22815_v41  ;;  %v13114_v0 = vpack.c.bf16 %v22818_v62, %v22817_v50  ;;  %v5080_v41 = vld [vmem:[#allocation12 + $0x70] sm:$0xff]  ;;  %v5085_v62 = vld [vmem:[#allocation12 + $0x98] sm:$0xff] }
 0x85f   :  { %v22848_v56 = vld [vmem:[#allocation83_spill] sm:$0xff] }
 0x860   :  { %5748 = vmatmul.mubr.f32.vlgmr.msra.gmra.mrb[24].mxu0 %v22796_v54  ;;  %v5133_v54 = vld [vmem:[#allocation12 + $0x218] sm:$0xff] }
 0x861   :  { %13077 = vmatpush1.bf16.msra.mxu0 %v13076_v24  ;;  %5948 = vmatprep.mubr.f32.mxu0 %v17651_v47  ;;  %v13118_v24 = vpack.c.bf16 %v22763_v59, %v22761_v32  ;;  %v13128_v32 = vpack.c.bf16 %v22782_v55, %v22780_v23  ;;  %v13130_v59 = vpack.c.bf16 %v22787_v39, %v22785_v25  ;;  %v22827_v23 = vld [vmem:[#allocation96_spill] sm:$0xff]  ;;  %v22829_v25 = vld [vmem:[#allocation99_spill] sm:$0xff] }
 0x862   :  { %13079 = vmatprep.subr.bf16.mxu0 %v13078_v9  ;;  %v22821_v9 = vld [vmem:[#allocation88_spill] sm:$0xff]  ;;  %v22830_v39 = vld [vmem:[#allocation47_spill] sm:$0xff] }
 0x863   :  { %v13122_v17 = vpack.c.bf16 %v22821_v9, %v22820_v36  ;;  %v22828_v55 = vld [vmem:[#allocation44_spill] sm:$0xff]  ;;  %v5084_v36 = vld [vmem:[#allocation12 + $0x90] sm:$0xff] }
 0x864   :  { %v5088_v9 = vld [vmem:[#allocation12 + $0xb0] sm:$0xff] }
 0x865   :  { %13081 = vmatpush1.bf16.msra.mxu0 %v13080_v7  ;;  %v22823_v7 = vld [vmem:[#allocation91_spill] sm:$0xff] }
 0x866   :  { %13083 = vmatprep.subr.bf16.mxu0 %v13082_v34  ;;  %v13124_v1 = vpack.c.bf16 %v22823_v7, %v22822_v13  ;;  %v22824_v34 = vld [vmem:[#allocation54_spill] sm:$0xff] }
 0x867   :  { %v5128_v47 = vld [vmem:[#allocation12 + $0x1f0] sm:$0xff] }
 0x869   :  { %13085 = vmatpush1.bf16.msra.mxu0 %v13084_v33  ;;  %v22825_v33 = vld [vmem:[#allocation30_spill] sm:$0xff] }
 0x86a   :  { %13087 = vmatprep.subr.bf16.mxu0 %v13086_v14  ;;  %v13126_v60 = vpack.c.bf16 %v22825_v33, %v22824_v34  ;;  %v13136_v14 = vpack.c.bf16 %v17588_v44, %v17586_v10  ;;  %v22835_v44 = vld [vmem:[#allocation56_spill] sm:$0xff]  ;;  %v22836_v10 = vld [vmem:[#allocation29_spill] sm:$0xff]  ;;  %v22852_v34 = vld [vmem:[#allocation90_spill] sm:$0xff]  ;;  %v17974_v33 = vsub.f32 %v5073_v38, %v6504_v12 }
 0x86c   :  { %22853 = vst [vmem:[#allocation82_spill] sm:$0xff] %v17974_v33 }
 0x86d   :  { %13089 = vmatpush1.bf16.msra.mxu0 %v13088_v8  ;;  %v22826_v8 = vld [vmem:[#allocation46_spill] sm:$0xff] }
 0x86e   :  { %13091 = vmatprep.subr.bf16.mxu0 %v13090_v46  ;;  %v22837_v46 = vld [vmem:[#allocation33_spill] sm:$0xff] }
 0x871   :  { %13093 = vmatpush1.bf16.msra.mxu0 %v13092_v48  ;;  %v22838_v48 = vld [vmem:[#allocation36_spill] sm:$0xff] }
 0x872   :  { %13095 = vmatprep.subr.bf16.mxu0 %v13094_v2  ;;  %v22839_v2 = vld [vmem:[#allocation39_spill] sm:$0xff] }
 0x875   :  { %13097 = vmatpush1.bf16.msra.mxu0 %v13096_v51  ;;  %v22840_v51 = vld [vmem:[#allocation49_spill] sm:$0xff] }
 0x876   :  { %13099 = vmatprep.subr.bf16.mxu0 %v13098_v52  ;;  %v22841_v52 = vld [vmem:[#allocation63_spill] sm:$0xff] }
 0x879   :  { %13101 = vmatpush1.bf16.msra.mxu0 %v13100_v28  ;;  %v22842_v28 = vld [vmem:[#allocation65_spill] sm:$0xff] }
 0x87a   :  { %13103 = vmatprep.subr.bf16.mxu0 %v13102_v11  ;;  %v22844_v11 = vld [vmem:[#allocation72_spill] sm:$0xff] }
 0x87d   :  { %13105 = vmatpush1.bf16.msra.mxu0 %v13104_v43  ;;  %v5069_v43 = vld [vmem:[#allocation12 + $0x18] sm:$0xff] }
 0x87e   :  { %13107 = vmatprep.subr.bf16.mxu0 %v13106_v22  ;;  %v5072_v22 = vld [vmem:[#allocation12 + $0x30] sm:$0xff] }
 0x87f   :  { %v6506_v50 = vand.u32 4294901760, %v5072_v22 }
 0x881   :  { %13109 = vmatpush1.bf16.msra.mxu0 %v13108_v20  ;;  %v6500_v20 = vand.u32 4294901760, %v5069_v43 }
 0x882   :  { %13111 = vmatprep.subr.bf16.mxu0 %v13110_v5  ;;  %v5076_v5 = vld [vmem:[#allocation12 + $0x50] sm:$0xff] }
 0x883   :  { %v17969_v13 = vpack.c.bf16 %v6504_v12, %v6500_v20  ;;  %v17971_v7 = vsub.f32 %v5069_v43, %v6500_v20 }
 0x885   :  { %13113 = vmatpush1.bf16.msra.mxu0 %v13112_v37  ;;  %v6502_v37 = vand.u32 4294901760, %v5068_v31  ;;  %22850 = vst [vmem:[#allocation79_spill] sm:$0xff] %v17969_v13  ;;  %22851 = vst [vmem:[#allocation80_spill] sm:$0xff] %v17971_v7 }
 0x886   :  { %13115 = vmatprep.subr.bf16.mxu0 %v13114_v0  ;;  %v5089_v0 = vld [vmem:[#allocation12 + $0xb8] sm:$0xff] }
 0x889   :  { %13117 = vmatpush1.bf16.msra.mxu0 %v13116_v49  ;;  %v6512_v49 = vand.u32 4294901760, %v5081_v6 }
 0x88a   :  { %13119 = vmatprep.subr.bf16.mxu0 %v13118_v24  ;;  %v6510_v24 = vand.u32 4294901760, %v5076_v5 }
 0x88d   :  { %13121 = vmatpush1.bf16.msra.mxu0 %v13120_v29  ;;  %v6514_v29 = vand.u32 4294901760, %v5080_v41 }
 0x88e   :  { %13123 = vmatprep.subr.bf16.mxu0 %v13122_v17  ;;  %v22849_v17 = vld [vmem:[#allocation87_spill] sm:$0xff] }
 0x88f   :  { %v17994_v43 = vsub.f32 %v5080_v41, %v6514_v29 }
 0x891   :  { %13125 = vmatpush1.bf16.msra.mxu0 %v13124_v1  ;;  %v5093_v1 = vld [vmem:[#allocation12 + $0xd8] sm:$0xff]  ;;  %22864 = vst [vmem:[#allocation59_spill] sm:$0xff] %v17994_v43 }
 0x892   :  { %13127 = vmatprep.subr.bf16.mxu0 %v13126_v60  ;;  %v17976_v60 = vpack.c.bf16 %v6506_v50, %v6502_v37 }
 0x894   :  { %22854 = vst [vmem:[#allocation84_spill] sm:$0xff] %v17976_v60 }
 0x895   :  { %13129 = vmatpush1.bf16.msra.mxu0 %v13128_v32  ;;  %v6516_v32 = vand.u32 4294901760, %v5085_v62 }
 0x896   :  { %13131 = vmatprep.subr.bf16.mxu0 %v13130_v59  ;;  %v6520_v59 = vand.u32 4294901760, %v5089_v0 }
 0x898   :  { %v17996_v38 = vpack.c.bf16 %v6520_v59, %v6516_v32 }
 0x899   :  { %13133 = vmatpush1.bf16.msra.mxu0 %v13132_v58  ;;  %v5097_v58 = vld [vmem:[#allocation12 + $0xf8] sm:$0xff] }
 0x89a   :  { %13135 = vmatprep.subr.bf16.mxu0 %v13134_v30  ;;  %v5092_v30 = vld [vmem:[#allocation12 + $0xd0] sm:$0xff]  ;;  %22865 = vst [vmem:[#allocation60_spill] sm:$0xff] %v17996_v38 }
 0x89d   :  { %13137 = vmatpush1.bf16.msra.mxu0 %v13136_v14  ;;  %v5096_v14 = vld [vmem:[#allocation12 + $0xf0] sm:$0xff] }
 0x89e   :  { %13139 = vmatprep.subr.bf16.mxu0 %v22826_v8  ;;  %v17978_v8 = vsub.f32 %v5068_v31, %v6502_v37  ;;  %v17998_v31 = vsub.f32 %v5085_v62, %v6516_v32  ;;  %v5112_v37 = vld [vmem:[#allocation12 + $0x170] sm:$0xff] }
 0x89f   :  { %v6546_v32 = vand.u32 4294901760, %v5112_v37 }
 0x8a0   :  { %5951 = vmatmul.mubr.f32.vlgmr.msra.gmra.mrb[24].mxu0 %v22827_v23  ;;  %22855 = vst [vmem:[#allocation85_spill] sm:$0xff] %v17978_v8  ;;  %22866 = vst [vmem:[#allocation61_spill] sm:$0xff] %v17998_v31  ;;  %v5124_v23 = vld [vmem:[#allocation12 + $0x1d0] sm:$0xff] }
 0x8a1   :  { %13141 = vmatpush1.bf16.msra.mxu0 %v22828_v55  ;;  %6088 = vmatprep.mubr.f32.mxu0 %v22829_v25  ;;  %v17980_v55 = vsub.f32 %v5072_v22, %v6506_v50  ;;  %v5109_v22 = vld [vmem:[#allocation12 + $0x158] sm:$0xff] }
 0x8a2   :  { %13143 = vmatprep.subr.bf16.mxu0 %v22830_v39  ;;  %v6518_v39 = vand.u32 4294901760, %v5084_v36  ;;  %v5129_v25 = vld [vmem:[#allocation12 + $0x1f8] sm:$0xff] }
 0x8a3   :  { %22856 = vst [vmem:[#allocation31_spill] sm:$0xff] %v17980_v55 }
 0x8a4   :  { %v18004_v50 = vsub.f32 %v5084_v36, %v6518_v39  ;;  %v6540_v36 = vand.u32 4294901760, %v5109_v22 }
 0x8a5   :  { %13145 = vmatpush1.bf16.msra.mxu0 %v22831_v19  ;;  %v6522_v19 = vand.u32 4294901760, %v5088_v9 }
 0x8a6   :  { %13147 = vmatprep.subr.bf16.mxu0 %v22832_v45  ;;  %v17982_v45 = vpack.c.bf16 %v6512_v49, %v6508_v57  ;;  %22869 = vst [vmem:[#allocation38_spill] sm:$0xff] %v18004_v50 }
 0x8a8   :  { %22857 = vst [vmem:[#allocation32_spill] sm:$0xff] %v17982_v45 }
 0x8a9   :  { %13149 = vmatpush1.bf16.msra.mxu0 %v22833_v21  ;;  %v17984_v21 = vsub.f32 %v5077_v15, %v6508_v57  ;;  %v18000_v15 = vsub.f32 %v5089_v0, %v6520_v59  ;;  %v5116_v59 = vld [vmem:[#allocation12 + $0x190] sm:$0xff] }
 0x8aa   :  { %13151 = vmatprep.subr.bf16.mxu0 %v22834_v26  ;;  %v17986_v26 = vsub.f32 %v5081_v6, %v6512_v49  ;;  %v5113_v6 = vld [vmem:[#allocation12 + $0x178] sm:$0xff] }
 0x8ab   :  { %22858 = vst [vmem:[#allocation94_spill] sm:$0xff] %v17984_v21  ;;  %22867 = vst [vmem:[#allocation62_spill] sm:$0xff] %v18000_v15 }
 0x8ac   :  { %22859 = vst [vmem:[#allocation34_spill] sm:$0xff] %v17986_v26 }
 0x8ad   :  { %13153 = vmatpush1.bf16.msra.mxu0 %v22835_v44  ;;  %v17988_v44 = vpack.c.bf16 %v6514_v29, %v6510_v24  ;;  %v5117_v29 = vld [vmem:[#allocation12 + $0x198] sm:$0xff] }
 0x8ae   :  { %13155 = vmatprep.subr.bf16.mxu0 %v22836_v10  ;;  %v5101_v10 = vld [vmem:[#allocation12 + $0x118] sm:$0xff] }
 0x8af   :  { %22860 = vst [vmem:[#allocation35_spill] sm:$0xff] %v17988_v44  ;;  %v6532_v20 = vand.u32 4294901760, %v5101_v10 }
 0x8b1   :  { %13157 = vmatpush1.bf16.msra.mxu0 %v22837_v46  ;;  %v5105_v46 = vld [vmem:[#allocation12 + $0x138] sm:$0xff] }
 0x8b2   :  { %13159 = vmatprep.subr.bf16.mxu0 %v22838_v48  ;;  %v22861_v48 = vld [vmem:[#allocation92_spill] sm:$0xff]  ;;  %v6536_v12 = vand.u32 4294901760, %v5105_v46 }
 0x8b5   :  { %13161 = vmatpush1.bf16.msra.mxu0 %v22839_v2  ;;  %v6524_v2 = vand.u32 4294901760, %v5093_v1 }
 0x8b6   :  { %13163 = vmatprep.subr.bf16.mxu0 %v22840_v51  ;;  %v6528_v51 = vand.u32 4294901760, %v5097_v58 }
 0x8b7   :  { %v18011_v49 = vsub.f32 %v5093_v1, %v6524_v2  ;;  %v18022_v1 = vpack.c.bf16 %v6536_v12, %v6532_v20 }
 0x8b8   :  { %v18009_v62 = vpack.c.bf16 %v6528_v51, %v6524_v2  ;;  %v18013_v0 = vsub.f32 %v5097_v58, %v6528_v51  ;;  %v18024_v58 = vsub.f32 %v5101_v10, %v6532_v20  ;;  %v18026_v2 = vsub.f32 %v5105_v46, %v6536_v12 }
 0x8b9   :  { %13165 = vmatpush1.bf16.msra.mxu0 %v22841_v52  ;;  %v6526_v52 = vand.u32 4294901760, %v5092_v30  ;;  %22872 = vst [vmem:[#allocation48_spill] sm:$0xff] %v18011_v49  ;;  %22877 = vst [vmem:[#allocation64_spill] sm:$0xff] %v18022_v1  ;;  %v18038_v46 = vsub.f32 %v5109_v22, %v6540_v36 }
 0x8ba   :  { %13167 = vmatprep.subr.bf16.mxu0 %v22842_v28  ;;  %v6530_v28 = vand.u32 4294901760, %v5096_v14  ;;  %22871 = vst [vmem:[#allocation41_spill] sm:$0xff] %v18009_v62  ;;  %22873 = vst [vmem:[#allocation45_spill] sm:$0xff] %v18013_v0  ;;  %v5144_v0 = vld [vmem:[#allocation12 + $0x270] sm:$0xff] }
 0x8bb   :  { %22878 = vst [vmem:[#allocation66_spill] sm:$0xff] %v18024_v58  ;;  %22879 = vst [vmem:[#allocation67_spill] sm:$0xff] %v18026_v2  ;;  %v5137_v2 = vld [vmem:[#allocation12 + $0x238] sm:$0xff] }
 0x8bc   :  { %22884 = vst [vmem:[#allocation75_spill] sm:$0xff] %v18038_v46  ;;  %v6568_v46 = vand.u32 4294901760, %v5137_v2 }
 0x8bd   :  { %13169 = vmatpush1.bf16.msra.mxu0 %v22843_v40  ;;  %v5100_v40 = vld [vmem:[#allocation12 + $0x110] sm:$0xff] }
 0x8be   :  { %13171 = vmatprep.subr.bf16.mxu0 %v22844_v11  ;;  %v5104_v11 = vld [vmem:[#allocation12 + $0x130] sm:$0xff]  ;;  %v6534_v41 = vand.u32 4294901760, %v5100_v40 }
 0x8bf   :  { %v6538_v57 = vand.u32 4294901760, %v5104_v11 }
 0x8c1   :  { %13173 = vmatpush1.bf16.msra.mxu0 %v22845_v3  ;;  %v22862_v3 = vld [vmem:[#allocation93_spill] sm:$0xff]  ;;  %v18028_v51 = vpack.c.bf16 %v6538_v57, %v6534_v41 }
 0x8c2   :  { %13175 = vmatprep.subr.bf16.mxu0 %v22846_v61  ;;  %v17992_v61 = vsub.f32 %v5076_v5, %v6510_v24  ;;  %v18006_v5 = vsub.f32 %v5088_v9, %v6522_v19  ;;  %v18015_v24 = vpack.c.bf16 %v6530_v28, %v6526_v52 }
 0x8c3   :  { %22880 = vst [vmem:[#allocation68_spill] sm:$0xff] %v18028_v51 }
 0x8c4   :  { %22863 = vst [vmem:[#allocation37_spill] sm:$0xff] %v17992_v61  ;;  %22870 = vst [vmem:[#allocation43_spill] sm:$0xff] %v18006_v5 }
 0x8c5   :  { %13177 = vmatpush1.bf16.msra.mxu0 %v22847_v63  ;;  %v18002_v63 = vpack.c.bf16 %v6522_v19, %v6518_v39  ;;  %22874 = vst [vmem:[#allocation58_spill] sm:$0xff] %v18015_v24  ;;  %v5120_v39 = vld [vmem:[#allocation12 + $0x1b0] sm:$0xff]  ;;  %v18018_v19 = vsub.f32 %v5092_v30, %v6526_v52  ;;  %v18031_v30 = vsub.f32 %v5100_v40, %v6534_v41  ;;  %v6550_v52 = vand.u32 4294901760, %v5116_v59 }
 0x8c6   :  { %13179 = vmatprep.subr.bf16.mxu0 %v22848_v56  ;;  %v5108_v56 = vld [vmem:[#allocation12 + $0x150] sm:$0xff]  ;;  %v6558_v40 = vand.u32 4294901760, %v5124_v23  ;;  %v6562_v41 = vand.u32 4294901760, %v5128_v47 }
 0x8c7   :  { %22868 = vst [vmem:[#allocation40_spill] sm:$0xff] %v18002_v63  ;;  %v6542_v9 = vand.u32 4294901760, %v5108_v56  ;;  %22875 = vst [vmem:[#allocation55_spill] sm:$0xff] %v18018_v19  ;;  %v5140_v19 = vld [vmem:[#allocation12 + $0x250] sm:$0xff] }
 0x8c8   :  { %22881 = vst [vmem:[#allocation70_spill] sm:$0xff] %v18031_v30  ;;  %v18046_v30 = vsub.f32 %v5112_v37, %v6546_v32 }
 0x8c9   :  { %13181 = vmatpush1.bf16.msra.mxu0 %v22849_v17  ;;  %v5121_v17 = vld [vmem:[#allocation12 + $0x1b8] sm:$0xff]  ;;  %v18042_v12 = vpack.c.bf16 %v6546_v32, %v6542_v9 }
 0x8ca   :  { %13183 = vmatprep.subr.bf16.mxu0 %v22852_v34  ;;  %v6544_v34 = vand.u32 4294901760, %v5113_v6  ;;  %22888 = vst [vmem:[#allocation88_spill] sm:$0xff] %v18046_v30 }
 0x8cb   :  { %22886 = vst [vmem:[#allocation77_spill] sm:$0xff] %v18042_v12 }
 0x8cc   :  { %v18036_v10 = vpack.c.bf16 %v6544_v34, %v6540_v36  ;;  %v18040_v20 = vsub.f32 %v5113_v6, %v6544_v34  ;;  %v5141_v6 = vld [vmem:[#allocation12 + $0x258] sm:$0xff] }
 0x8cd   :  { %13185 = vmatpush1.bf16.msra.mxu0 %v22861_v48  ;;  %v5125_v48 = vld [vmem:[#allocation12 + $0x1d8] sm:$0xff] }
 0x8ce   :  { %13187 = vmatprep.subr.bf16.mxu0 %v22862_v3  ;;  %v6552_v3 = vand.u32 4294901760, %v5121_v17  ;;  %22883 = vst [vmem:[#allocation73_spill] sm:$0xff] %v18036_v10  ;;  %22885 = vst [vmem:[#allocation76_spill] sm:$0xff] %v18040_v20  ;;  %v6556_v58 = vand.u32 4294901760, %v5125_v48  ;;  %v6564_v20 = vand.u32 4294901760, %v5133_v54 }
 0x8d0   :  { %v18053_v36 = vsub.f32 %v5121_v17, %v6552_v3 }
 0x8d1   :  { %13189 = vmatpush1.bf16.msra.mxu0 %v22784_v35  ;;  %v18020_v35 = vsub.f32 %v5096_v14, %v6530_v28  ;;  %v18033_v14 = vsub.f32 %v5104_v11, %v6538_v57  ;;  %v6554_v28 = vand.u32 4294901760, %v5120_v39  ;;  %v5132_v11 = vld [vmem:[#allocation12 + $0x210] sm:$0xff] }
 0x8d2   :  { %13191 = vmatprep.subr.bf16.mxu0 %v17598_v53  ;;  %v6548_v53 = vand.u32 4294901760, %v5117_v29  ;;  %v5136_v57 = vld [vmem:[#allocation12 + $0x230] sm:$0xff]  ;;  %22891 = vst [vmem:[#allocation54_spill] sm:$0xff] %v18053_v36  ;;  %v5153_v36 = vld [vmem:[#allocation12 + $0x2b8] sm:$0xff] }
 0x8d3   :  { %22876 = vst [vmem:[#allocation57_spill] sm:$0xff] %v18020_v35  ;;  %22882 = vst [vmem:[#allocation71_spill] sm:$0xff] %v18033_v14  ;;  %v18044_v14 = vsub.f32 %v5108_v56, %v6542_v9  ;;  %v18055_v34 = vpack.c.bf16 %v6554_v28, %v6550_v52  ;;  %v5145_v35 = vld [vmem:[#allocation12 + $0x278] sm:$0xff]  ;;  %v18058_v56 = vsub.f32 %v5116_v59, %v6550_v52  ;;  %v6570_v9 = vand.u32 4294901760, %v5136_v57  ;;  %v5148_v59 = vld [vmem:[#allocation12 + $0x290] sm:$0xff] }
 0x8d4   :  { %v18050_v22 = vsub.f32 %v5117_v29, %v6548_v53  ;;  %v18060_v37 = vsub.f32 %v5120_v39, %v6554_v28  ;;  %v6566_v29 = vand.u32 4294901760, %v5132_v11  ;;  %v6576_v30 = vand.u32 4294901760, %v5145_v35  ;;  %v5152_v52 = vld [vmem:[#allocation12 + $0x2b0] sm:$0xff] }
 0x8d5   :  { %13193 = vmatpush1.bf16.msra.mxu0 %v17604_v42  ;;  %v6560_v42 = vand.u32 4294901760, %v5129_v25  ;;  %22887 = vst [vmem:[#allocation86_spill] sm:$0xff] %v18044_v14  ;;  %22892 = vst [vmem:[#allocation30_spill] sm:$0xff] %v18055_v34  ;;  %v6574_v14 = vand.u32 4294901760, %v5140_v19  ;;  %v18071_v39 = vsub.f32 %v5124_v23, %v6558_v40  ;;  %v18073_v28 = vsub.f32 %v5128_v47, %v6562_v41 }
 0x8d6   :  { %13195 = vmatprep.subr.bf16.mxu0 %v17612_v4  ;;  %v18048_v4 = vpack.c.bf16 %v6552_v3, %v6548_v53  ;;  %22890 = vst [vmem:[#allocation91_spill] sm:$0xff] %v18050_v22  ;;  %22893 = vst [vmem:[#allocation46_spill] sm:$0xff] %v18058_v56  ;;  %v18068_v53 = vpack.c.bf16 %v6562_v41, %v6558_v40  ;;  %v5149_v3 = vld [vmem:[#allocation12 + $0x298] sm:$0xff]  ;;  %v6572_v22 = vand.u32 4294901760, %v5141_v6  ;;  %v6582_v40 = vand.u32 4294901760, %v5148_v59 }
 0x8d7   :  { %22894 = vst [vmem:[#allocation44_spill] sm:$0xff] %v18060_v37  ;;  %v18062_v32 = vpack.c.bf16 %v6560_v42, %v6556_v58  ;;  %v18066_v17 = vsub.f32 %v5129_v25, %v6560_v42  ;;  %22899 = vst [vmem:[#allocation52_spill] sm:$0xff] %v18071_v39  ;;  %v18077_v25 = vsub.f32 %v5133_v54, %v6564_v20  ;;  %v6584_v37 = vand.u32 4294901760, %v5153_v36  ;;  %v5161_v56 = vld [vmem:[#allocation12 + $0x2f8] sm:$0xff]  ;;  %v22907_v54 = vld [vmem:[#allocation98_spill] sm:$0xff] }
 0x8d8   :  { %22889 = vst [vmem:[#allocation89_spill] sm:$0xff] %v18048_v4  ;;  %22898 = vst [vmem:[#allocation53_spill] sm:$0xff] %v18068_v53  ;;  %v18080_v42 = vsub.f32 %v5137_v2, %v6568_v46  ;;  %v5156_v53 = vld [vmem:[#allocation12 + $0x2d0] sm:$0xff]  ;;  %v18084_v23 = vsub.f32 %v5132_v11, %v6566_v29  ;;  %v18086_v47 = vsub.f32 %v5136_v57, %v6570_v9  ;;  %v6586_v41 = vand.u32 4294901760, %v5152_v52  ;;  %v22912_v11 = vld [vmem:[#allocation100_spill] sm:$0xff] }
 0x8d9   :  { %13197 = vmatpush1.bf16.msra.mxu0 %v17615_v16  ;;  %22895 = vst [vmem:[#allocation47_spill] sm:$0xff] %v18062_v32  ;;  %v18064_v16 = vsub.f32 %v5125_v48, %v6556_v58  ;;  %22897 = vst [vmem:[#allocation50_spill] sm:$0xff] %v18066_v17  ;;  %v18075_v58 = vpack.c.bf16 %v6568_v46, %v6564_v20  ;;  %v5157_v48 = vld [vmem:[#allocation12 + $0x2d8] sm:$0xff]  ;;  %v18082_v17 = vpack.c.bf16 %v6570_v9, %v6566_v29 }
 0x8da   :  { %13199 = vmatprep.subr.bf16.mxu0 %v17619_v18  ;;  %v6578_v18 = vand.u32 4294901760, %v5144_v0  ;;  %22900 = vst [vmem:[#allocation56_spill] sm:$0xff] %v18073_v28  ;;  %22902 = vst [vmem:[#allocation33_spill] sm:$0xff] %v18077_v25  ;;  %v18089_v20 = vpack.c.bf16 %v6576_v30, %v6572_v22  ;;  %v18093_v2 = vsub.f32 %v5145_v35, %v6576_v30  ;;  %v5169_v25 = vld [vmem:[#allocation12 + $0x338] sm:$0xff]  ;;  %v6588_v57 = vand.u32 4294901760, %v5157_v48 }
 0x8db   :  { %22896 = vst [vmem:[#allocation51_spill] sm:$0xff] %v18064_v16  ;;  %22901 = vst [vmem:[#allocation29_spill] sm:$0xff] %v18075_v58  ;;  %v6580_v16 = vand.u32 4294901760, %v5149_v3  ;;  %v6592_v29 = vand.u32 4294901760, %v5161_v56  ;;  %v6590_v9 = vand.u32 4294901760, %v5156_v53  ;;  %v6600_v28 = vand.u32 4294901760, %v5169_v25 }
 0x8dc   :  { %22903 = vst [vmem:[#allocation36_spill] sm:$0xff] %v18080_v42  ;;  %22904 = vst [vmem:[#allocation39_spill] sm:$0xff] %v18082_v17  ;;  %v18095_v46 = vpack.c.bf16 %v6578_v18, %v6574_v14  ;;  %v5165_v42 = vld [vmem:[#allocation12 + $0x318] sm:$0xff]  ;;  %v18102_v35 = vsub.f32 %v5144_v0, %v6578_v18  ;;  %v18112_v17 = vsub.f32 %v5148_v59, %v6582_v40 }
 0x8dd   :  { %13201 = vmatpush1.bf16.msra.mxu0 %v17621_v27  ;;  %v5160_v27 = vld [vmem:[#allocation12 + $0x2f0] sm:$0xff]  ;;  %22905 = vst [vmem:[#allocation49_spill] sm:$0xff] %v18084_v23  ;;  %22906 = vst [vmem:[#allocation63_spill] sm:$0xff] %v18086_v47  ;;  %v18104_v30 = vpack.c.bf16 %v6584_v37, %v6580_v16  ;;  %v5177_v39 = vld [vmem:[#allocation12 + $0x378] sm:$0xff] }
 0x8de   :  { %13331 = vmatprep.subr.bf16.mxu0 %v17969_v13  ;;  %22908 = vst [vmem:[#allocation65_spill] sm:$0xff] %v18089_v20  ;;  %v18091_v13 = vsub.f32 %v5141_v6, %v6572_v22  ;;  %22910 = vst [vmem:[#allocation72_spill] sm:$0xff] %v18093_v2  ;;  %v6594_v47 = vand.u32 4294901760, %v5160_v27  ;;  %v5164_v23 = vld [vmem:[#allocation12 + $0x310] sm:$0xff]  ;;  %v18100_v22 = vsub.f32 %v5140_v19, %v6574_v14  ;;  %v5173_v2 = vld [vmem:[#allocation12 + $0x358] sm:$0xff] }
 0x8df   :  { %22911 = vst [vmem:[#allocation74_spill] sm:$0xff] %v18095_v46  ;;  %22914 = vst [vmem:[#allocation81_spill] sm:$0xff] %v18102_v35  ;;  %v18106_v6 = vsub.f32 %v5149_v3, %v6580_v16  ;;  %v5172_v46 = vld [vmem:[#allocation12 + $0x350] sm:$0xff]  ;;  %v18114_v19 = vsub.f32 %v5152_v52, %v6586_v41  ;;  %v6598_v0 = vand.u32 4294901760, %v5164_v23  ;;  %v18117_v16 = vpack.c.bf16 %v6592_v29, %v6588_v57  ;;  %v5181_v18 = vld [vmem:[#allocation12 + $0x398] sm:$0xff] }
 0x8e0   :  { %6092 = vmatmul.mubr.f32.vlgmr.msra.gmra.mrb[24].mxu0 %v22907_v54  ;;  %22909 = vst [vmem:[#allocation69_spill] sm:$0xff] %v18091_v13  ;;  %v5168_v54 = vld [vmem:[#allocation12 + $0x330] sm:$0xff]  ;;  %22913 = vst [vmem:[#allocation78_spill] sm:$0xff] %v18100_v22  ;;  %v6596_v13 = vand.u32 4294901760, %v5165_v42  ;;  %v18119_v3 = vsub.f32 %v5157_v48, %v6588_v57  ;;  %v6604_v59 = vand.u32 4294901760, %v5173_v2  ;;  %v6606_v52 = vand.u32 4294901760, %v5172_v46 }
 0x8e1   :  { %13333 = vmatpush1.bf16.msra.mxu0 %v17976_v60  ;;  %6633 = vmatprep.mubr.f32.mxu0 %v22912_v11  ;;  %22915 = vst [vmem:[#allocation83_spill] sm:$0xff] %v18104_v30  ;;  %22916 = vst [vmem:[#allocation87_spill] sm:$0xff] %v18106_v6  ;;  %v18108_v60 = vsub.f32 %v5153_v36, %v6584_v37  ;;  %v18110_v11 = vpack.c.bf16 %v6586_v41, %v6582_v40  ;;  %v5176_v20 = vld [vmem:[#allocation12 + $0x370] sm:$0xff]  ;;  %v6602_v14 = vand.u32 4294901760, %v5168_v54 }
 0x8e2   :  { %13335 = vmatprep.subr.bf16.mxu0 %v17982_v45  ;;  %22919 = vst [vmem:[#allocation93_spill] sm:$0xff] %v18112_v17  ;;  %22920 = vst [vmem:[#allocation100_spill] sm:$0xff] %v18114_v19  ;;  %v18121_v36 = vsub.f32 %v5161_v56, %v6592_v29  ;;  %v18123_v37 = vpack.c.bf16 %v6594_v47, %v6590_v9  ;;  %v5185_v45 = vld [vmem:[#allocation12 + $0x3b8] sm:$0xff]  ;;  %v6608_v40 = vand.u32 4294901760, %v5177_v39  ;;  %v6610_v41 = vand.u32 4294901760, %v5176_v20 }
 0x8e3   :  { %22917 = vst [vmem:[#allocation90_spill] sm:$0xff] %v18108_v60  ;;  %22918 = vst [vmem:[#allocation92_spill] sm:$0xff] %v18110_v11  ;;  %v18126_v19 = vsub.f32 %v5156_v53, %v6590_v9  ;;  %v18128_v17 = vsub.f32 %v5160_v27, %v6594_v47  ;;  %v18132_v48 = vsub.f32 %v5165_v42, %v6596_v13  ;;  %v6612_v29 = vand.u32 4294901760, %v5181_v18  ;;  %v5189_v27 = vld [vmem:[#allocation12 + $0x3d8] sm:$0xff]  ;;  %v18158_v9 = vld [vmem:[#allocation12 + $0x3f0] sm:$0xff] }
 0x8e4   :  { %22921 = vst [vmem:[#allocation102_spill] sm:$0xff] %v18117_v16  ;;  %22922 = vst [vmem:[#allocation103_spill] sm:$0xff] %v18119_v3  ;;  %v18134_v56 = vsub.f32 %v5169_v25, %v6600_v28  ;;  %v18136_v57 = vpack.c.bf16 %v6602_v14, %v6598_v0  ;;  %v5180_v3 = vld [vmem:[#allocation12 + $0x390] sm:$0xff]  ;;  %v18139_v60 = vsub.f32 %v5164_v23, %v6598_v0  ;;  %v5193_v47 = vld [vmem:[#allocation12 + $0x3f8] sm:$0xff] }
 0x8e5   :  { %13337 = vmatpush1.bf16.msra.mxu0 %v17988_v44  ;;  %22923 = vst [vmem:[#allocation104_spill] sm:$0xff] %v18121_v36  ;;  %22924 = vst [vmem:[#allocation105_spill] sm:$0xff] %v18123_v37  ;;  %v18130_v44 = vpack.c.bf16 %v6600_v28, %v6596_v13  ;;  %v6616_v36 = vand.u32 4294901760, %v5185_v45  ;;  %v18141_v53 = vsub.f32 %v5168_v54, %v6602_v14  ;;  %v6614_v0 = vand.u32 4294901760, %v5180_v3 }
 0x8e6   :  { %13339 = vmatprep.subr.bf16.mxu0 %v17996_v38  ;;  %22925 = vst [vmem:[#allocation106_spill] sm:$0xff] %v18126_v19  ;;  %22926 = vst [vmem:[#allocation107_spill] sm:$0xff] %v18128_v17  ;;  %v5184_v38 = vld [vmem:[#allocation12 + $0x3b0] sm:$0xff]  ;;  %v18146_v28 = vpack.c.bf16 %v6608_v40, %v6604_v59  ;;  %v18148_v25 = vsub.f32 %v5173_v2, %v6604_v59  ;;  %v18150_v42 = vsub.f32 %v5177_v39, %v6608_v40 }
 0x8e7   :  { %22927 = vst [vmem:[#allocation108_spill] sm:$0xff] %v18130_v44  ;;  %22928 = vst [vmem:[#allocation109_spill] sm:$0xff] %v18132_v48  ;;  %v18154_v23 = vsub.f32 %v5172_v46, %v6606_v52  ;;  %v18156_v54 = vsub.f32 %v5176_v20, %v6610_v41  ;;  %v6618_v14 = vand.u32 4294901760, %v5184_v38  ;;  %v18160_v13 = vpack.c.bf16 %v6616_v36, %v6612_v29 }
 0x8e8   :  { %22929 = vst [vmem:[#allocation110_spill] sm:$0xff] %v18134_v56  ;;  %22930 = vst [vmem:[#allocation111_spill] sm:$0xff] %v18136_v57  ;;  %v18152_v56 = vpack.c.bf16 %v6610_v41, %v6606_v52  ;;  %v6624_v2 = vand.u32 4294901760, %v5193_v47  ;;  %v22941_v39 = vand.u32 4294901760, %v17971_v7  ;;  %v22942_v20 = vand.u32 4294901760, %v17974_v33 }
 0x8e9   :  { %13341 = vmatpush1.bf16.msra.mxu0 %v18002_v63  ;;  %22931 = vst [vmem:[#allocation112_spill] sm:$0xff] %v18139_v60  ;;  %22932 = vst [vmem:[#allocation113_spill] sm:$0xff] %v18141_v53  ;;  %v5188_v63 = vld [vmem:[#allocation12 + $0x3d0] sm:$0xff]  ;;  %v6620_v53 = vand.u32 4294901760, %v5189_v27  ;;  %v18184_v40 = vsub.f32 %v5184_v38, %v6618_v14 }
 0x8ea   :  { %13343 = vmatprep.subr.bf16.mxu0 %v18009_v62  ;;  %22933 = vst [vmem:[#allocation114_spill] sm:$0xff] %v18146_v28  ;;  %22934 = vst [vmem:[#allocation115_spill] sm:$0xff] %v18148_v25  ;;  %v18162_v62 = vsub.f32 %v5181_v18, %v6612_v29  ;;  %v6648_v46 = vsub.f32 %v17971_v7, %v22941_v39  ;;  %v6660_v59 = vsub.f32 %v17974_v33, %v22942_v20 }
 0x8eb   :  { %22935 = vst [vmem:[#allocation116_spill] sm:$0xff] %v18150_v42  ;;  %22936 = vst [vmem:[#allocation117_spill] sm:$0xff] %v18152_v56  ;;  %v6622_v18 = vand.u32 4294901760, %v5188_v63  ;;  %v18179_v39 = vpack.c.bf16 %v6618_v14, %v6614_v0  ;;  %v18181_v7 = vsub.f32 %v5180_v3, %v6614_v0  ;;  %v21802_v20 = vand.u32 4294901760, %v17992_v61 }
 0x8ec   :  { %22937 = vst [vmem:[#allocation118_spill] sm:$0xff] %v18154_v23  ;;  %22938 = vst [vmem:[#allocation119_spill] sm:$0xff] %v18156_v54  ;;  %v18186_v52 = vpack.c.bf16 %v6624_v2, %v6620_v53  ;;  %v6649_v29 = vand.u32 4294901760, %v6648_v46  ;;  %v22950_v3 = vand.u32 4294901760, %v17980_v55  ;;  %v18199_v38 = vsub.f32 %v5193_v47, %v6624_v2  ;;  %v22959_v2 = vld [vmem:[#allocation55_spill] sm:$0xff] }
 0x8ed   :  { %22939 = vst [vmem:[#allocation120_spill] sm:$0xff] %v18160_v13  ;;  %22940 = vst [vmem:[#allocation121_spill] sm:$0xff] %v18162_v62  ;;  %13345 = vmatpush1.bf16.msra.mxu0 %v18015_v24  ;;  %v18177_v62 = vsub.f32 %v5185_v45, %v6616_v36  ;;  %v6661_v24 = vand.u32 4294901760, %v6660_v59  ;;  %v22949_v45 = vand.u32 4294901760, %v17978_v8  ;;  %v22954_v14 = vand.u32 4294901760, %v17984_v21 }
 0x8ee   :  { %13347 = vmatprep.subr.bf16.mxu0 %v18022_v1  ;;  %22944 = vst [vmem:[#allocation123_spill] sm:$0xff] %v18179_v39  ;;  %22945 = vst [vmem:[#allocation124_spill] sm:$0xff] %v18181_v7  ;;  %v18188_v1 = vsub.f32 %v5189_v27, %v6620_v53  ;;  %v6666_v0 = vsub.f32 %v17980_v55, %v22950_v3  ;;  %v22952_v53 = vand.u32 4294901760, %v18158_v9  ;;  %v22955_v59 = vand.u32 4294901760, %v17986_v26  ;;  %v22960_v55 = vld [vmem:[#allocation57_spill] sm:$0xff] }
 0x8ef   :  { %22943 = vst [vmem:[#allocation122_spill] sm:$0xff] %v18177_v62  ;;  %22946 = vst [vmem:[#allocation125_spill] sm:$0xff] %v18184_v40  ;;  %v6654_v36 = vsub.f32 %v17978_v8, %v22949_v45  ;;  %v6672_v46 = vsub.f32 %v17984_v21, %v22954_v14  ;;  %v6678_v3 = vsub.f32 %v17992_v61, %v21802_v20  ;;  %v22958_v61 = vld [vmem:[#allocation45_spill] sm:$0xff]  ;;  %v22966_v21 = vld [vmem:[#allocation66_spill] sm:$0xff] }
 0x8f0   :  { %22947 = vst [vmem:[#allocation126_spill] sm:$0xff] %v18186_v52  ;;  %22948 = vst [vmem:[#allocation127_spill] sm:$0xff] %v18188_v1  ;;  %v18203_v27 = vpack.c.bf16 %v22952_v53, %v6622_v18  ;;  %v6684_v45 = vsub.f32 %v17986_v26, %v22955_v59  ;;  %v18217_v53 = vsub.f32 %v5188_v63, %v6622_v18  ;;  %v6667_v41 = vand.u32 4294901760, %v6666_v0  ;;  %v22974_v8 = vld [vmem:[#allocation76_spill] sm:$0xff]  ;;  %v22978_v40 = vld [vmem:[#allocation53_spill] sm:$0xff] }
 0x8f1   :  { %13349 = vmatpush1.bf16.msra.mxu0 %v18028_v51  ;;  %22951 = vst [vmem:[#allocation128_spill] sm:$0xff] %v18199_v38  ;;  %v18225_v26 = vpack.c.bf16 %v6661_v24, %v6649_v29  ;;  %v6655_v20 = vand.u32 4294901760, %v6654_v36  ;;  %v6673_v63 = vand.u32 4294901760, %v6672_v46  ;;  %v22961_v51 = vand.u32 4294901760, %v17998_v31 }
 0x8f2   :  { %13351 = vmatprep.subr.bf16.mxu0 %v18036_v10  ;;  %22953 = vst [vmem:[#allocation129_spill] sm:$0xff] %v18203_v27  ;;  %22956 = vst [vmem:[#allocation130_spill] sm:$0xff] %v18217_v53  ;;  %v22957_v10 = vand.u32 4294901760, %v17994_v43  ;;  %v6685_v18 = vand.u32 4294901760, %v6684_v45  ;;  %v22962_v24 = vand.u32 4294901760, %v18000_v15  ;;  %v22963_v36 = vand.u32 4294901760, %v18004_v50 }
 0x8f3   :  { %v6696_v59 = vsub.f32 %v17998_v31, %v22961_v51  ;;  %v22964_v46 = vand.u32 4294901760, %v18006_v5  ;;  %v22967_v51 = vand.u32 4294901760, %v22958_v61  ;;  %v22983_v53 = vand.u32 4294901760, %v22974_v8 }
 0x8f4   :  { %v6690_v14 = vsub.f32 %v17994_v43, %v22957_v10  ;;  %v6679_v43 = vand.u32 4294901760, %v6678_v3  ;;  %v6708_v29 = vsub.f32 %v18000_v15, %v22962_v24  ;;  %v6702_v0 = vsub.f32 %v18004_v50, %v22963_v36  ;;  %v22969_v36 = vld [vmem:[#allocation70_spill] sm:$0xff]  ;;  %v22970_v50 = vld [vmem:[#allocation71_spill] sm:$0xff] }
 0x8f5   :  { %13353 = vmatpush1.bf16.msra.mxu0 %v18042_v12  ;;  %v6714_v45 = vsub.f32 %v18006_v5, %v22964_v46  ;;  %v22965_v10 = vand.u32 4294901760, %v18011_v49  ;;  %v6732_v24 = vsub.f32 %v22958_v61, %v22967_v51  ;;  %v22968_v12 = vld [vmem:[#allocation67_spill] sm:$0xff]  ;;  %v22971_v46 = vand.u32 4294901760, %v22959_v2 }
 0x8f6   :  { %13355 = vmatprep.subr.bf16.mxu0 %v18048_v4  ;;  %v6691_v47 = vand.u32 4294901760, %v6690_v14  ;;  %v22972_v4 = vand.u32 4294901760, %v22960_v55  ;;  %v6697_v61 = vand.u32 4294901760, %v6696_v59  ;;  %v6709_v15 = vand.u32 4294901760, %v6708_v29  ;;  %v22975_v14 = vld [vmem:[#allocation86_spill] sm:$0xff] }
 0x8f7   :  { %v6720_v3 = vsub.f32 %v18011_v49, %v22965_v10  ;;  %v6726_v10 = vsub.f32 %v22959_v2, %v22971_v46  ;;  %v22973_v49 = vld [vmem:[#allocation75_spill] sm:$0xff]  ;;  %v6703_v33 = vand.u32 4294901760, %v6702_v0  ;;  %v6715_v31 = vand.u32 4294901760, %v6714_v45  ;;  %v22977_v46 = vld [vmem:[#allocation88_spill] sm:$0xff] }
 0x8f8   :  { %v22979_v5 = vand.u32 4294901760, %v22968_v12  ;;  %v22980_v59 = vand.u32 4294901760, %v22969_v36  ;;  %v22981_v0 = vand.u32 4294901760, %v22970_v50  ;;  %v22982_v2 = vand.u32 4294901760, %v22973_v49 }
 0x8f9   :  { %13357 = vmatpush1.bf16.msra.mxu0 %v18055_v34  ;;  %v6738_v34 = vsub.f32 %v22960_v55, %v22972_v4  ;;  %v6721_v38 = vand.u32 4294901760, %v6720_v3  ;;  %v6733_v4 = vand.u32 4294901760, %v6732_v24 }
 0x8fa   :  { %13359 = vmatprep.subr.bf16.mxu0 %v18062_v32  ;;  %v22976_v32 = vand.u32 4294901760, %v22966_v21  ;;  %v6756_v51 = vsub.f32 %v22968_v12, %v22979_v5  ;;  %v6750_v29 = vsub.f32 %v22969_v36, %v22980_v59  ;;  %v6762_v45 = vsub.f32 %v22970_v50, %v22981_v0 }
 0x8fb   :  { %v6739_v3 = vand.u32 4294901760, %v6738_v34  ;;  %v6768_v24 = vsub.f32 %v22973_v49, %v22982_v2  ;;  %v6780_v5 = vsub.f32 %v22974_v8, %v22983_v53  ;;  %v18287_v12 = vpack.c.bf16 %v6685_v18, %v6673_v63  ;;  %v22986_v53 = vld [vmem:[#allocation39_spill] sm:$0xff]  ;;  %v22988_v18 = vld [vmem:[#allocation65_spill] sm:$0xff] }
 0x8fc   :  { %v6744_v1 = vsub.f32 %v22966_v21, %v22976_v32  ;;  %v6727_v32 = vand.u32 4294901760, %v6726_v10  ;;  %v18289_v59 = vpack.c.bf16 %v6691_v47, %v6679_v43  ;;  %v22984_v0 = vand.u32 4294901760, %v22975_v14  ;;  %v22987_v43 = vld [vmem:[#allocation91_spill] sm:$0xff] }
 0x8fd   :  { %13361 = vmatpush1.bf16.msra.mxu0 %v22978_v40  ;;  %v18285_v40 = vpack.c.bf16 %v6667_v41, %v6655_v20  ;;  %v18294_v10 = vpack.c.bf16 %v6709_v15, %v6697_v61  ;;  %v18296_v34 = vpack.c.bf16 %v6715_v31, %v6703_v33  ;;  %v22985_v2 = vand.u32 4294901760, %v22977_v46  ;;  %v18308_v15 = vld [vmem:[#allocation15 + $0x8] sm:$0xff]  ;;  %v7790_v47 = vld [vmem:[#allocation15 + $0x10] sm:$0xff] }
 0x8fe   :  { %13363 = vmatprep.subr.bf16.mxu0 %v18075_v58  ;;  %v6774_v58 = vsub.f32 %v22975_v14, %v22984_v0  ;;  %v6745_v50 = vand.u32 4294901760, %v6744_v1  ;;  %v6757_v41 = vand.u32 4294901760, %v6756_v51  ;;  %v6751_v20 = vand.u32 4294901760, %v6750_v29  ;;  %v18310_v1 = vld [vmem:[#allocation15 + $0x18] sm:$0xff]  ;;  %v7794_v14 = vld [vmem:[#allocation15 + $0x30] sm:$0xff] }
 0x8ff   :  { %v6786_v49 = vsub.f32 %v22977_v46, %v22985_v2  ;;  %v6763_v63 = vand.u32 4294901760, %v6762_v45  ;;  %v18304_v8 = vpack.c.bf16 %v6733_v4, %v6721_v38  ;;  %v18306_v61 = vpack.c.bf16 %v6739_v3, %v6727_v32  ;;  %v22989_v2 = vld [vmem:[#allocation54_spill] sm:$0xff]  ;;  %v7788_v45 = vld [vmem:[#allocation15] sm:$0xff] }
 0x900   :  { %v6769_v33 = vand.u32 4294901760, %v6768_v24  ;;  %v6781_v31 = vand.u32 4294901760, %v6780_v5  ;;  %v6775_v0 = vand.u32 4294901760, %v6774_v58  ;;  %v21850_v51 = vand.u32 4294901760, %v18308_v15  ;;  %v22990_v38 = vld [vmem:[#allocation46_spill] sm:$0xff]  ;;  %v22994_v4 = vld [vmem:[#allocation44_spill] sm:$0xff] }
 0x901   :  { %13365 = vmatpush1.bf16.msra.mxu0 %v22986_v53  ;;  %v21849_v29 = vand.u32 4294901760, %v18310_v1  ;;  %v7930_v32 = vand.u32 4294901760, %v7788_v45  ;;  %v7934_v3 = vand.u32 4294901760, %v7790_v47  ;;  %v22991_v24 = vld [vmem:[#allocation74_spill] sm:$0xff]  ;;  %v18317_v5 = vpack.c.bf16 %v6757_v41, %v6745_v50 }
 0x902   :  { %13367 = vmatprep.subr.bf16.mxu0 %v22988_v18  ;;  %v6787_v18 = vand.u32 4294901760, %v6786_v49  ;;  %v18319_v46 = vpack.c.bf16 %v6763_v63, %v6751_v20  ;;  %v22992_v58 = vand.u32 4294901760, %v22987_v43  ;;  %v7793_v20 = vld [vmem:[#allocation15 + $0x28] sm:$0xff]  ;;  %v7795_v63 = vld [vmem:[#allocation15 + $0x38] sm:$0xff] }
 0x903   :  { %v18330_v49 = vpack.c.bf16 %v21849_v29, %v21850_v51  ;;  %v18336_v50 = vsub.f32 %v7788_v45, %v7930_v32  ;;  %v18338_v41 = vsub.f32 %v7790_v47, %v7934_v3  ;;  %v7936_v29 = vand.u32 4294901760, %v7793_v20 }
 0x904   :  { %v18324_v53 = vsub.f32 %v22987_v43, %v22992_v58  ;;  %v18340_v58 = vpack.c.bf16 %v6781_v31, %v6769_v33  ;;  %v22998_v43 = vand.u32 4294901760, %v22989_v2  ;;  %v7940_v51 = vand.u32 4294901760, %v7795_v63 }
 0x905   :  { %13369 = vmatpush1.bf16.msra.mxu0 %v22991_v24  ;;  %22993 = vst [vmem:[#allocation57_spill] sm:$0xff] %v18330_v49  ;;  %v18334_v24 = vpack.c.bf16 %v7934_v3, %v7930_v32  ;;  %22996 = vst [vmem:[#allocation132_spill] sm:$0xff] %v18336_v50  ;;  %13715 = vmatprep.subr.bf16.mxu1 %v18330_v49  ;;  %v18346_v21 = vpack.c.bf16 %v6787_v18, %v6775_v0  ;;  %v22999_v45 = vand.u32 4294901760, %v22990_v38 }
 0x906   :  { %13371 = vmatprep.subr.bf16.mxu0 %v18104_v30  ;;  %22997 = vst [vmem:[#allocation133_spill] sm:$0xff] %v18338_v41  ;;  %v6804_v36 = vsub.f32 %v22989_v2, %v22998_v43  ;;  %v7792_v30 = vld [vmem:[#allocation15 + $0x20] sm:$0xff]  ;;  %v7942_v31 = vand.u32 4294901760, %v7794_v14  ;;  %v6793_v43 = vand.u32 4294901760, %v18324_v53  ;;  %v18354_v32 = vpack.c.bf16 %v7940_v51, %v7936_v29  ;;  %v7799_v53 = vld [vmem:[#allocation15 + $0x58] sm:$0xff] }
 0x907   :  { %22995 = vst [vmem:[#allocation131_spill] sm:$0xff] %v18334_v24  ;;  %v6798_v47 = vsub.f32 %v22990_v38, %v22999_v45  ;;  %13717 = vmatpush1.bf16.msra.mxu1 %v18334_v24  ;;  %v7938_v33 = vand.u32 4294901760, %v7792_v30  ;;  %v18356_v3 = vsub.f32 %v7793_v20, %v7936_v29  ;;  %v18358_v49 = vsub.f32 %v7795_v63, %v7940_v51  ;;  %v23007_v38 = vld [vmem:[#allocation51_spill] sm:$0xff]  ;;  %v7796_v63 = vld [vmem:[#allocation15 + $0x40] sm:$0xff] }
 0x908   :  { %23000 = vst [vmem:[#allocation134_spill] sm:$0xff] %v18354_v32  ;;  %v23003_v18 = vand.u32 4294901760, %v22994_v4  ;;  %v18368_v41 = vsub.f32 %v7794_v14, %v7942_v31  ;;  %v6805_v50 = vand.u32 4294901760, %v6804_v36  ;;  %13719 = vmatprep.subr.bf16.mxu1 %v18354_v32  ;;  %v7948_v20 = vand.u32 4294901760, %v7799_v53  ;;  %v23009_v14 = vld [vmem:[#allocation52_spill] sm:$0xff] }
 0x909   :  { %13373 = vmatpush1.bf16.msra.mxu0 %v18110_v11  ;;  %23001 = vst [vmem:[#allocation135_spill] sm:$0xff] %v18356_v3  ;;  %23002 = vst [vmem:[#allocation136_spill] sm:$0xff] %v18358_v49  ;;  %v18364_v45 = vpack.c.bf16 %v7942_v31, %v7938_v33  ;;  %v18366_v24 = vsub.f32 %v7792_v30, %v7938_v33  ;;  %v7797_v11 = vld [vmem:[#allocation15 + $0x48] sm:$0xff]  ;;  %v6799_v49 = vand.u32 4294901760, %v6798_v47  ;;  %v7946_v30 = vand.u32 4294901760, %v7796_v63  ;;  %v23017_v2 = vld [vmem:[#allocation56_spill] sm:$0xff] }
 0x90a   :  { %13375 = vmatprep.subr.bf16.mxu0 %v18117_v16  ;;  %v6810_v0 = vsub.f32 %v22994_v4, %v23003_v18  ;;  %23006 = vst [vmem:[#allocation139_spill] sm:$0xff] %v18368_v41  ;;  %v7944_v51 = vand.u32 4294901760, %v7797_v11  ;;  %v7798_v16 = vld [vmem:[#allocation15 + $0x50] sm:$0xff]  ;;  %v18380_v32 = vsub.f32 %v7799_v53, %v7948_v20  ;;  %v7803_v4 = vld [vmem:[#allocation15 + $0x78] sm:$0xff] }
 0x90b   :  { %23004 = vst [vmem:[#allocation137_spill] sm:$0xff] %v18364_v45  ;;  %23005 = vst [vmem:[#allocation138_spill] sm:$0xff] %v18366_v24  ;;  %v23008_v3 = vld [vmem:[#allocation50_spill] sm:$0xff]  ;;  %13721 = vmatpush1.bf16.msra.mxu1 %v18364_v45  ;;  %v7950_v33 = vand.u32 4294901760, %v7798_v16  ;;  %v18385_v18 = vsub.f32 %v7796_v63, %v7946_v30 }
 0x90c   :  { %v18376_v36 = vpack.c.bf16 %v7948_v20, %v7944_v51  ;;  %v18378_v29 = vsub.f32 %v7797_v11, %v7944_v51  ;;  %23012 = vst [vmem:[#allocation142_spill] sm:$0xff] %v18380_v32  ;;  %v6811_v41 = vand.u32 4294901760, %v6810_v0  ;;  %v7801_v24 = vld [vmem:[#allocation15 + $0x68] sm:$0xff]  ;;  %v7956_v51 = vand.u32 4294901760, %v7803_v4  ;;  %v7800_v20 = vld [vmem:[#allocation15 + $0x60] sm:$0xff]  ;;  %v7802_v0 = vld [vmem:[#allocation15 + $0x70] sm:$0xff] }
 0x90d   :  { %13377 = vmatpush1.bf16.msra.mxu0 %v18123_v37  ;;  %v18383_v47 = vpack.c.bf16 %v7950_v33, %v7946_v30  ;;  %23014 = vst [vmem:[#allocation144_spill] sm:$0xff] %v18385_v18  ;;  %v18387_v45 = vsub.f32 %v7798_v16, %v7950_v33  ;;  %v23016_v37 = vand.u32 4294901760, %v23007_v38  ;;  %v7952_v53 = vand.u32 4294901760, %v7801_v24  ;;  %v7807_v32 = vld [vmem:[#allocation15 + $0x98] sm:$0xff] }
 0x90e   :  { %23010 = vst [vmem:[#allocation140_spill] sm:$0xff] %v18376_v36  ;;  %23011 = vst [vmem:[#allocation141_spill] sm:$0xff] %v18378_v29  ;;  %13379 = vmatprep.subr.bf16.mxu0 %v18130_v44  ;;  %13723 = vmatprep.subr.bf16.mxu1 %v18376_v36  ;;  %v18394_v44 = vpack.c.bf16 %v6805_v50, %v6793_v43  ;;  %v23018_v63 = vand.u32 4294901760, %v23008_v3  ;;  %v7954_v30 = vand.u32 4294901760, %v7800_v20  ;;  %v7958_v33 = vand.u32 4294901760, %v7802_v0 }
 0x90f   :  { %23013 = vst [vmem:[#allocation143_spill] sm:$0xff] %v18383_v47  ;;  %23015 = vst [vmem:[#allocation145_spill] sm:$0xff] %v18387_v45  ;;  %v6816_v31 = vsub.f32 %v23007_v38, %v23016_v37  ;;  %13725 = vmatpush1.bf16.msra.mxu1 %v18383_v47  ;;  %v23019_v37 = vand.u32 4294901760, %v23009_v14  ;;  %v18404_v36 = vpack.c.bf16 %v7956_v51, %v7952_v53 }
 0x910   :  { %v6828_v16 = vsub.f32 %v23008_v3, %v23018_v63  ;;  %v18406_v45 = vsub.f32 %v7801_v24, %v7952_v53  ;;  %v18408_v50 = vsub.f32 %v7803_v4, %v7956_v51  ;;  %v18411_v43 = vpack.c.bf16 %v6811_v41, %v6799_v49  ;;  %v7804_v51 = vld [vmem:[#allocation15 + $0x80] sm:$0xff]  ;;  %v7806_v49 = vld [vmem:[#allocation15 + $0x90] sm:$0xff] }
 0x911   :  { %13381 = vmatpush1.bf16.msra.mxu0 %v18136_v57  ;;  %v6822_v11 = vsub.f32 %v23009_v14, %v23019_v37  ;;  %23020 = vst [vmem:[#allocation146_spill] sm:$0xff] %v18404_v36  ;;  %v18413_v63 = vpack.c.bf16 %v7958_v33, %v7954_v30  ;;  %v18415_v47 = vsub.f32 %v7800_v20, %v7954_v30  ;;  %v7805_v57 = vld [vmem:[#allocation15 + $0x88] sm:$0xff]  ;;  %v6817_v29 = vand.u32 4294901760, %v6816_v31 }
 0x912   :  { %23021 = vst [vmem:[#allocation147_spill] sm:$0xff] %v18406_v45  ;;  %23022 = vst [vmem:[#allocation148_spill] sm:$0xff] %v18408_v50  ;;  %13383 = vmatprep.subr.bf16.mxu0 %v18146_v28  ;;  %v18417_v18 = vsub.f32 %v7802_v0, %v7958_v33  ;;  %v23026_v37 = vand.u32 4294901760, %v23017_v2  ;;  %13727 = vmatprep.subr.bf16.mxu1 %v18404_v36  ;;  %v7960_v4 = vand.u32 4294901760, %v7805_v57  ;;  %v7964_v53 = vand.u32 4294901760, %v7807_v32  ;;  %v23027_v28 = vld [vmem:[#allocation33_spill] sm:$0xff] }
 0x913   :  { %23023 = vst [vmem:[#allocation149_spill] sm:$0xff] %v18413_v63  ;;  %23024 = vst [vmem:[#allocation150_spill] sm:$0xff] %v18415_v47  ;;  %v6829_v41 = vand.u32 4294901760, %v6828_v16  ;;  %13729 = vmatpush1.bf16.msra.mxu1 %v18413_v63  ;;  %v7962_v20 = vand.u32 4294901760, %v7804_v51  ;;  %v7966_v0 = vand.u32 4294901760, %v7806_v49  ;;  %v6823_v31 = vand.u32 4294901760, %v6822_v11 }
 0x914   :  { %23025 = vst [vmem:[#allocation151_spill] sm:$0xff] %v18417_v18  ;;  %v6834_v24 = vsub.f32 %v23017_v2, %v23026_v37  ;;  %v18426_v30 = vpack.c.bf16 %v7964_v53, %v7960_v4  ;;  %v18428_v33 = vsub.f32 %v7805_v57, %v7960_v4  ;;  %v18430_v37 = vsub.f32 %v7807_v32, %v7964_v53  ;;  %v23031_v36 = vld [vmem:[#allocation36_spill] sm:$0xff]  ;;  %v7809_v47 = vld [vmem:[#allocation15 + $0xa8] sm:$0xff]  ;;  %v7810_v53 = vld [vmem:[#allocation15 + $0xb0] sm:$0xff] }
 0x915   :  { %13385 = vmatpush1.bf16.msra.mxu0 %v18152_v56  ;;  %v18434_v16 = vpack.c.bf16 %v7966_v0, %v7962_v20  ;;  %v18436_v50 = vsub.f32 %v7804_v51, %v7962_v20  ;;  %v18438_v63 = vsub.f32 %v7806_v49, %v7966_v0  ;;  %v7811_v45 = vld [vmem:[#allocation15 + $0xb8] sm:$0xff]  ;;  %v23035_v11 = vld [vmem:[#allocation49_spill] sm:$0xff]  ;;  %v7968_v57 = vand.u32 4294901760, %v7809_v47 }
 0x916   :  { %23028 = vst [vmem:[#allocation152_spill] sm:$0xff] %v18426_v30  ;;  %23029 = vst [vmem:[#allocation153_spill] sm:$0xff] %v18428_v33  ;;  %13387 = vmatprep.subr.bf16.mxu0 %v18160_v13  ;;  %v6835_v56 = vand.u32 4294901760, %v6834_v24  ;;  %13731 = vmatprep.subr.bf16.mxu1 %v18426_v30  ;;  %v7972_v32 = vand.u32 4294901760, %v7811_v45  ;;  %v7808_v4 = vld [vmem:[#allocation15 + $0xa0] sm:$0xff]  ;;  %v23036_v13 = vand.u32 4294901760, %v23027_v28  ;;  %v18450_v24 = vpack.c.bf16 %v6829_v41, %v6817_v29 }
 0x917   :  { %23030 = vst [vmem:[#allocation154_spill] sm:$0xff] %v18430_v37  ;;  %23032 = vst [vmem:[#allocation155_spill] sm:$0xff] %v18434_v16  ;;  %v23037_v51 = vld [vmem:[#allocation63_spill] sm:$0xff]  ;;  %13733 = vmatpush1.bf16.msra.mxu1 %v18434_v16  ;;  %v7970_v49 = vand.u32 4294901760, %v7808_v4  ;;  %v7974_v0 = vand.u32 4294901760, %v7810_v53  ;;  %v18454_v30 = vsub.f32 %v7809_v47, %v7968_v57  ;;  %v7813_v29 = vld [vmem:[#allocation15 + $0xc8] sm:$0xff] }
 0x918   :  { %23033 = vst [vmem:[#allocation156_spill] sm:$0xff] %v18436_v50  ;;  %23034 = vst [vmem:[#allocation157_spill] sm:$0xff] %v18438_v63  ;;  %v18445_v18 = vsub.f32 %v23027_v28, %v23036_v13  ;;  %v18452_v2 = vpack.c.bf16 %v7972_v32, %v7968_v57  ;;  %v18456_v63 = vsub.f32 %v7811_v45, %v7972_v32  ;;  %v23041_v13 = vand.u32 4294901760, %v23031_v36  ;;  %v7815_v41 = vld [vmem:[#allocation15 + $0xd8] sm:$0xff] }
 0x919   :  { %13389 = vmatpush1.bf16.msra.mxu0 %v18179_v39  ;;  %23039 = vst [vmem:[#allocation159_spill] sm:$0xff] %v18454_v30  ;;  %v18464_v16 = vpack.c.bf16 %v7974_v0, %v7970_v49  ;;  %v18466_v50 = vsub.f32 %v7808_v4, %v7970_v49  ;;  %v18468_v39 = vsub.f32 %v7810_v53, %v7974_v0  ;;  %v23045_v45 = vand.u32 4294901760, %v23035_v11  ;;  %v23046_v49 = vld [vmem:[#allocation69_spill] sm:$0xff]  ;;  %v7819_v30 = vld [vmem:[#allocation15 + $0xf8] sm:$0xff] }
 0x91a   :  { %23038 = vst [vmem:[#allocation158_spill] sm:$0xff] %v18452_v2  ;;  %23040 = vst [vmem:[#allocation160_spill] sm:$0xff] %v18456_v63  ;;  %13391 = vmatprep.subr.bf16.mxu0 %v18186_v52  ;;  %v18462_v20 = vsub.f32 %v23031_v36, %v23041_v13  ;;  %v18470_v37 = vpack.c.bf16 %v6835_v56, %v6823_v31  ;;  %13735 = vmatprep.subr.bf16.mxu1 %v18452_v2  ;;  %v7976_v57 = vand.u32 4294901760, %v7813_v29  ;;  %v7812_v13 = vld [vmem:[#allocation15 + $0xc0] sm:$0xff]  ;;  %v7814_v52 = vld [vmem:[#allocation15 + $0xd0] sm:$0xff] }
 0x91b   :  { %23042 = vst [vmem:[#allocation161_spill] sm:$0xff] %v18464_v16  ;;  %23043 = vst [vmem:[#allocation162_spill] sm:$0xff] %v18466_v50  ;;  %v18475_v47 = vsub.f32 %v23035_v11, %v23045_v45  ;;  %v7980_v32 = vand.u32 4294901760, %v7815_v41  ;;  %v6841_v4 = vand.u32 4294901760, %v18445_v18  ;;  %13737 = vmatpush1.bf16.msra.mxu1 %v18464_v16  ;;  %v7978_v0 = vand.u32 4294901760, %v7812_v13  ;;  %v7817_v63 = vld [vmem:[#allocation15 + $0xe8] sm:$0xff] }
 0x91c   :  { %23044 = vst [vmem:[#allocation163_spill] sm:$0xff] %v18468_v39  ;;  %v7982_v56 = vand.u32 4294901760, %v7814_v52  ;;  %v23047_v31 = vand.u32 4294901760, %v23037_v51  ;;  %v18489_v39 = vsub.f32 %v7813_v29, %v7976_v57  ;;  %v6853_v18 = vand.u32 4294901760, %v18462_v20 }
 0x91d   :  { %13393 = vmatpush1.bf16.msra.mxu0 %v18203_v27  ;;  %v18487_v2 = vpack.c.bf16 %v7980_v32, %v7976_v57  ;;  %v18491_v50 = vsub.f32 %v7815_v41, %v7980_v32  ;;  %v18497_v16 = vsub.f32 %v7812_v13, %v7978_v0  ;;  %v7984_v29 = vand.u32 4294901760, %v7817_v63  ;;  %v7816_v57 = vld [vmem:[#allocation15 + $0xe0] sm:$0xff] }
 0x91e   :  { %v18485_v45 = vsub.f32 %v23037_v51, %v23047_v31  ;;  %23049 = vst [vmem:[#allocation165_spill] sm:$0xff] %v18489_v39  ;;  %13395 = vmatprep.subr.bf16.mxu0 %v18225_v26  ;;  %v18495_v53 = vpack.c.bf16 %v7982_v56, %v7978_v0  ;;  %v18499_v27 = vsub.f32 %v7814_v52, %v7982_v56  ;;  %v23054_v31 = vld [vmem:[#allocation72_spill] sm:$0xff]  ;;  %v7988_v41 = vand.u32 4294901760, %v7819_v30  ;;  %v7818_v26 = vld [vmem:[#allocation15 + $0xf0] sm:$0xff]  ;;  %v23055_v32 = vld [vmem:[#allocation101_spill] sm:$0xff] }
 0x91f   :  { %23048 = vst [vmem:[#allocation164_spill] sm:$0xff] %v18487_v2  ;;  %23050 = vst [vmem:[#allocation166_spill] sm:$0xff] %v18491_v50  ;;  %13739 = vmatprep.subr.bf16.mxu1 %v18487_v2  ;;  %v23056_v13 = vand.u32 4294901760, %v23046_v49  ;;  %v7986_v0 = vand.u32 4294901760, %v7816_v57  ;;  %v7990_v56 = vand.u32 4294901760, %v7818_v26  ;;  %v23057_v51 = vld [vmem:[#allocation95_spill] sm:$0xff] }
 0x920   :  { %23051 = vst [vmem:[#allocation167_spill] sm:$0xff] %v18495_v53  ;;  %23052 = vst [vmem:[#allocation168_spill] sm:$0xff] %v18497_v16  ;;  %6639 = vmatmul.mubr.f32.vlgmr.msra.gmra.mrb[26].mxu0 %v23055_v32  ;;  %13741 = vmatpush1.bf16.msra.mxu1 %v18495_v53  ;;  %v18515_v2 = vpack.c.bf16 %v7988_v41, %v7984_v29  ;;  %v18517_v32 = vsub.f32 %v7817_v63, %v7984_v29  ;;  %v23064_v33 = vand.u32 4294901760, %v23054_v31  ;;  %v7820_v29 = vld [vmem:[#allocation15 + $0x100] sm:$0xff]  ;;  %v7835_v39 = vld [vmem:[#allocation15 + $0x178] sm:$0xff] }
 0x921   :  { %23053 = vst [vmem:[#allocation169_spill] sm:$0xff] %v18499_v27  ;;  %v18509_v52 = vsub.f32 %v23046_v49, %v23056_v13  ;;  %13397 = vmatpush1.bf16.msra.mxu0 %v18285_v40  ;;  %7030 = vmatprep.mubr.f32.mxu0 %v23057_v51  ;;  %v18519_v20 = vsub.f32 %v7819_v30, %v7988_v41  ;;  %v6859_v13 = vand.u32 4294901760, %v18485_v45  ;;  %v7821_v40 = vld [vmem:[#allocation15 + $0x108] sm:$0xff]  ;;  %v7823_v51 = vld [vmem:[#allocation15 + $0x118] sm:$0xff]  ;;  %v23065_v63 = vand.u32 4294901760, %v18100_v22  ;;  %v7822_v41 = vld [vmem:[#allocation15 + $0x110] sm:$0xff] }
 0x922   :  { %23058 = vst [vmem:[#allocation101_spill] sm:$0xff] %v18515_v2  ;;  %23059 = vst [vmem:[#allocation170_spill] sm:$0xff] %v18517_v32  ;;  %13399 = vmatprep.subr.bf16.mxu0 %v18287_v12  ;;  %v18523_v27 = vpack.c.bf16 %v7990_v56, %v7986_v0  ;;  %v18525_v53 = vsub.f32 %v7816_v57, %v7986_v0  ;;  %v18527_v16 = vsub.f32 %v7818_v26, %v7990_v56 }
 0x923   :  { %23060 = vst [vmem:[#allocation171_spill] sm:$0xff] %v18519_v20  ;;  %v6876_v50 = vsub.f32 %v23054_v31, %v23064_v33  ;;  %v18535_v30 = vsub.f32 %v18100_v22, %v23065_v63  ;;  %13743 = vmatprep.subr.bf16.mxu1 %v18515_v2  ;;  %v7992_v12 = vand.u32 4294901760, %v7821_v40  ;;  %v7996_v45 = vand.u32 4294901760, %v7823_v51  ;;  %v7827_v20 = vld [vmem:[#allocation15 + $0x138] sm:$0xff] }
 0x924   :  { %23061 = vst [vmem:[#allocation172_spill] sm:$0xff] %v18523_v27  ;;  %23062 = vst [vmem:[#allocation173_spill] sm:$0xff] %v18525_v53  ;;  %v18538_v57 = vpack.c.bf16 %v6853_v18, %v6841_v4  ;;  %v6865_v26 = vand.u32 4294901760, %v18509_v52  ;;  %13745 = vmatpush1.bf16.msra.mxu1 %v18523_v27  ;;  %v7994_v0 = vand.u32 4294901760, %v7820_v29  ;;  %v7998_v56 = vand.u32 4294901760, %v7822_v41  ;;  %v7825_v27 = vld [vmem:[#allocation15 + $0x128] sm:$0xff] }
 0x925   :  { %23063 = vst [vmem:[#allocation174_spill] sm:$0xff] %v18527_v16  ;;  %13401 = vmatpush1.bf16.msra.mxu0 %v18289_v59  ;;  %v23066_v33 = vand.u32 4294901760, %v18102_v35  ;;  %v18548_v2 = vpack.c.bf16 %v7996_v45, %v7992_v12  ;;  %v18550_v16 = vsub.f32 %v7821_v40, %v7992_v12  ;;  %v18552_v53 = vsub.f32 %v7823_v51, %v7996_v45  ;;  %v7824_v12 = vld [vmem:[#allocation15 + $0x120] sm:$0xff]  ;;  %v7826_v45 = vld [vmem:[#allocation15 + $0x130] sm:$0xff] }
 0x926   :  { %13403 = vmatprep.subr.bf16.mxu0 %v18294_v10  ;;  %v18556_v18 = vpack.c.bf16 %v7998_v56, %v7994_v0  ;;  %v18558_v52 = vsub.f32 %v7820_v29, %v7994_v0  ;;  %v18560_v59 = vsub.f32 %v7822_v41, %v7998_v56  ;;  %v8000_v40 = vand.u32 4294901760, %v7825_v27  ;;  %v23073_v10 = vld [vmem:[#allocation90_spill] sm:$0xff]  ;;  %v23074_v4 = vld [vmem:[#allocation93_spill] sm:$0xff] }
 0x927   :  { %v18546_v63 = vsub.f32 %v18102_v35, %v23066_v33  ;;  %23067 = vst [vmem:[#allocation175_spill] sm:$0xff] %v18548_v2  ;;  %23068 = vst [vmem:[#allocation176_spill] sm:$0xff] %v18550_v16  ;;  %v6877_v33 = vand.u32 4294901760, %v6876_v50  ;;  %13747 = vmatprep.subr.bf16.mxu1 %v18548_v2  ;;  %v8004_v51 = vand.u32 4294901760, %v7827_v20  ;;  %v8002_v29 = vand.u32 4294901760, %v7824_v12 }
 0x928   :  { %23069 = vst [vmem:[#allocation177_spill] sm:$0xff] %v18552_v53  ;;  %23070 = vst [vmem:[#allocation178_spill] sm:$0xff] %v18556_v18  ;;  %13749 = vmatpush1.bf16.msra.mxu1 %v18556_v18  ;;  %v8006_v41 = vand.u32 4294901760, %v7826_v45  ;;  %v18571_v56 = vsub.f32 %v7825_v27, %v8000_v40  ;;  %v23078_v53 = vand.u32 4294901760, %v18106_v6  ;;  %v23083_v27 = vand.u32 4294901760, %v18475_v47 }
 0x929   :  { %23071 = vst [vmem:[#allocation179_spill] sm:$0xff] %v18558_v52  ;;  %23072 = vst [vmem:[#allocation180_spill] sm:$0xff] %v18560_v59  ;;  %13405 = vmatpush1.bf16.msra.mxu0 %v18296_v34  ;;  %v6883_v50 = vand.u32 4294901760, %v18546_v63  ;;  %v18569_v0 = vpack.c.bf16 %v8004_v51, %v8000_v40  ;;  %v18573_v32 = vsub.f32 %v7827_v20, %v8004_v51  ;;  %v7829_v63 = vld [vmem:[#allocation15 + $0x148] sm:$0xff]  ;;  %v7831_v59 = vld [vmem:[#allocation15 + $0x158] sm:$0xff]  ;;  %v23122_v35 = vand.u32 4294901760, %v18310_v1 }
 0x92a   :  { %23076 = vst [vmem:[#allocation182_spill] sm:$0xff] %v18571_v56  ;;  %13407 = vmatprep.subr.bf16.mxu0 %v18304_v8  ;;  %v18579_v16 = vsub.f32 %v18106_v6, %v23078_v53  ;;  %v18581_v18 = vpack.c.bf16 %v8006_v41, %v8002_v29  ;;  %v18583_v2 = vsub.f32 %v7824_v12, %v8002_v29  ;;  %v23084_v8 = vld [vmem:[#allocation100_spill] sm:$0xff]  ;;  %v8008_v53 = vand.u32 4294901760, %v7829_v63  ;;  %v7830_v56 = vld [vmem:[#allocation15 + $0x150] sm:$0xff] }
 0x92b   :  { %23075 = vst [vmem:[#allocation181_spill] sm:$0xff] %v18569_v0  ;;  %23077 = vst [vmem:[#allocation183_spill] sm:$0xff] %v18573_v32  ;;  %v18585_v34 = vsub.f32 %v7826_v45, %v8006_v41  ;;  %v18587_v52 = vpop.f32.mrb[14].mxu1  ;;  %v18591_v20 = vpack.c.bf16 %v6859_v13, %v23083_v27  ;;  %13751 = vmatprep.subr.bf16.mxu1 %v18569_v0  ;;  %v8012_v51 = vand.u32 4294901760, %v7831_v59  ;;  %v7828_v32 = vld [vmem:[#allocation15 + $0x140] sm:$0xff]  ;;  %v23086_v29 = vand.u32 4294901760, %v23073_v10 }
 0x92c   :  { %23079 = vst [vmem:[#allocation184_spill] sm:$0xff] %v18581_v18  ;;  %23080 = vst [vmem:[#allocation185_spill] sm:$0xff] %v18583_v2  ;;  %v18595_v12 = vpop.f32.mrb[15].mxu1  ;;  %v18597_v45 = vpack.c.bf16 %v6877_v33, %v6865_v26  ;;  %13753 = vmatpush1.bf16.msra.mxu1 %v18581_v18  ;;  %v8010_v47 = vand.u32 4294901760, %v7828_v32  ;;  %v8014_v13 = vand.u32 4294901760, %v7830_v56  ;;  %v23087_v27 = vand.u32 4294901760, %v23074_v4 }
 0x92d   :  { %23081 = vst [vmem:[#allocation186_spill] sm:$0xff] %v18585_v34  ;;  %23082 = vst [vmem:[#allocation187_spill] sm:$0xff] %v18587_v52  ;;  %v6900_v41 = vsub.f32 %v23073_v10, %v23086_v29  ;;  %13409 = vmatpush1.bf16.msra.mxu0 %v18306_v61  ;;  %v18607_v0 = vpack.c.bf16 %v8012_v51, %v8008_v53  ;;  %v18609_v34 = vsub.f32 %v7829_v63, %v8008_v53  ;;  %v7833_v61 = vld [vmem:[#allocation15 + $0x168] sm:$0xff]  ;;  %v23095_v63 = vld [vmem:[#allocation103_spill] sm:$0xff] }
 0x92e   :  { %23085 = vst [vmem:[#allocation188_spill] sm:$0xff] %v18595_v12  ;;  %v6894_v40 = vsub.f32 %v23074_v4, %v23087_v27  ;;  %v18611_v26 = vsub.f32 %v7831_v59, %v8012_v51  ;;  %13411 = vmatprep.subr.bf16.mxu0 %v18317_v5  ;;  %v6889_v33 = vand.u32 4294901760, %v18579_v16  ;;  %v18615_v29 = vpack.c.bf16 %v8014_v13, %v8010_v47  ;;  %v7832_v51 = vld [vmem:[#allocation15 + $0x160] sm:$0xff]  ;;  %v7834_v16 = vld [vmem:[#allocation15 + $0x170] sm:$0xff] }
 0x92f   :  { %23088 = vst [vmem:[#allocation189_spill] sm:$0xff] %v18607_v0  ;;  %23089 = vst [vmem:[#allocation190_spill] sm:$0xff] %v18609_v34  ;;  %v18617_v18 = vsub.f32 %v7828_v32, %v8010_v47  ;;  %v18619_v2 = vsub.f32 %v7830_v56, %v8014_v13  ;;  %v23094_v27 = vand.u32 4294901760, %v23084_v8  ;;  %13755 = vmatprep.subr.bf16.mxu1 %v18607_v0  ;;  %v8016_v59 = vand.u32 4294901760, %v7833_v61  ;;  %v23096_v34 = vld [vmem:[#allocation104_spill] sm:$0xff]  ;;  %v7846_v4 = vld [vmem:[#allocation15 + $0x1d0] sm:$0xff] }
 0x930   :  { %23090 = vst [vmem:[#allocation191_spill] sm:$0xff] %v18611_v26  ;;  %23091 = vst [vmem:[#allocation192_spill] sm:$0xff] %v18615_v29  ;;  %v8020_v5 = vand.u32 4294901760, %v7835_v39  ;;  %v6901_v26 = vand.u32 4294901760, %v6900_v41  ;;  %13757 = vmatpush1.bf16.msra.mxu1 %v18615_v29  ;;  %v8018_v56 = vand.u32 4294901760, %v7832_v51  ;;  %v8022_v47 = vand.u32 4294901760, %v7834_v16 }
 0x931   :  { %23092 = vst [vmem:[#allocation193_spill] sm:$0xff] %v18617_v18  ;;  %23093 = vst [vmem:[#allocation194_spill] sm:$0xff] %v18619_v2  ;;  %v6906_v12 = vsub.f32 %v23084_v8, %v23094_v27  ;;  %13413 = vmatpush1.bf16.msra.mxu0 %v18319_v46  ;;  %v18632_v53 = vsub.f32 %v7833_v61, %v8016_v59  ;;  %v23100_v41 = vand.u32 4294901760, %v18535_v30  ;;  %v18647_v46 = vld [vmem:[#allocation15 + $0x188] sm:$0xff]  ;;  %v18649_v13 = vld [vmem:[#allocation15 + $0x198] sm:$0xff]  ;;  %v6895_v61 = vand.u32 4294901760, %v6894_v40 }
 0x932   :  { %v18630_v27 = vpack.c.bf16 %v8020_v5, %v8016_v59  ;;  %v18634_v0 = vsub.f32 %v7835_v39, %v8020_v5  ;;  %13415 = vmatprep.subr.bf16.mxu0 %v18340_v58  ;;  %v18641_v32 = vpack.c.bf16 %v8022_v47, %v8018_v56  ;;  %v18643_v29 = vsub.f32 %v7832_v51, %v8018_v56  ;;  %v18654_v30 = vld [vmem:[#allocation15 + $0x180] sm:$0xff] }
 0x933   :  { %23098 = vst [vmem:[#allocation196_spill] sm:$0xff] %v18632_v53  ;;  %v18639_v2 = vpack.c.bf16 %v6883_v50, %v23100_v41  ;;  %v18645_v18 = vsub.f32 %v7834_v16, %v8022_v47  ;;  %v6907_v59 = vand.u32 4294901760, %v6906_v12  ;;  %v21975_v39 = vand.u32 4294901760, %v18647_v46  ;;  %v18656_v50 = vld [vmem:[#allocation15 + $0x190] sm:$0xff]  ;;  %v7840_v52 = vld [vmem:[#allocation15 + $0x1a0] sm:$0xff] }
 0x934   :  { %23097 = vst [vmem:[#allocation195_spill] sm:$0xff] %v18630_v27  ;;  %23099 = vst [vmem:[#allocation197_spill] sm:$0xff] %v18634_v0  ;;  %13759 = vmatprep.subr.bf16.mxu1 %v18630_v27  ;;  %v23104_v5 = vand.u32 4294901760, %v23095_v63  ;;  %v8026_v40 = vand.u32 4294901760, %v18654_v30  ;;  %v8030_v12 = vand.u32 4294901760, %v18656_v50  ;;  %v18668_v56 = vpack.c.bf16 %v6901_v26, %v6889_v33  ;;  %v23109_v26 = vld [vmem:[#allocation110_spill] sm:$0xff] }
 0x935   :  { %23101 = vst [vmem:[#allocation198_spill] sm:$0xff] %v18641_v32  ;;  %23102 = vst [vmem:[#allocation199_spill] sm:$0xff] %v18643_v29  ;;  %13761 = vmatpush1.bf16.msra.mxu1 %v18641_v32  ;;  %13417 = vmatpush1.bf16.msra.mxu0 %v18346_v21  ;;  %v23105_v47 = vand.u32 4294901760, %v23096_v34  ;;  %v23107_v16 = vand.u32 4294901760, %v18649_v13  ;;  %v7843_v29 = vld [vmem:[#allocation15 + $0x1b8] sm:$0xff]  ;;  %v23111_v0 = vld [vmem:[#allocation113_spill] sm:$0xff] }
 0x936   :  { %23103 = vst [vmem:[#allocation200_spill] sm:$0xff] %v18645_v18  ;;  %v18661_v51 = vsub.f32 %v23095_v63, %v23104_v5  ;;  %v23106_v5 = vand.u32 4294901760, %v18126_v19  ;;  %13419 = vmatprep.subr.bf16.mxu0 %v18394_v44  ;;  %v18690_v27 = vpack.c.bf16 %v8030_v12, %v8026_v40  ;;  %v7841_v18 = vld [vmem:[#allocation15 + $0x1a8] sm:$0xff]  ;;  %v7842_v44 = vld [vmem:[#allocation15 + $0x1b0] sm:$0xff]  ;;  %v23112_v53 = vand.u32 4294901760, %v18128_v17  ;;  %v7847_v63 = vld [vmem:[#allocation15 + $0x1d8] sm:$0xff] }
 0x937   :  { %v18673_v41 = vsub.f32 %v23096_v34, %v23105_v47  ;;  %v18684_v32 = vpack.c.bf16 %v23107_v16, %v21975_v39  ;;  %v8032_v16 = vand.u32 4294901760, %v7841_v18  ;;  %v8036_v39 = vand.u32 4294901760, %v7843_v29 }
 0x938   :  { %v18678_v58 = vsub.f32 %v18126_v19, %v23106_v5  ;;  %23110 = vst [vmem:[#allocation202_spill] sm:$0xff] %v18690_v27  ;;  %v18692_v5 = vpack.c.bf16 %v6907_v59, %v6895_v61  ;;  %v8034_v47 = vand.u32 4294901760, %v7840_v52  ;;  %v8038_v19 = vand.u32 4294901760, %v7842_v44 }
 0x939   :  { %23108 = vst [vmem:[#allocation201_spill] sm:$0xff] %v18684_v32  ;;  %13763 = vmatprep.subr.bf16.mxu1 %v18684_v32  ;;  %13421 = vmatpush1.bf16.msra.mxu0 %v18411_v43  ;;  %v18705_v32 = vsub.f32 %v18128_v17, %v23112_v53  ;;  %v18707_v34 = vpack.c.bf16 %v8036_v39, %v8032_v16  ;;  %v23114_v21 = vand.u32 4294901760, %v18132_v48  ;;  %v23115_v43 = vand.u32 4294901760, %v23109_v26  ;;  %v7845_v17 = vld [vmem:[#allocation15 + $0x1c8] sm:$0xff] }
 0x93a   :  { %13765 = vmatpush1.bf16.msra.mxu1 %v18690_v27  ;;  %13423 = vmatprep.subr.bf16.mxu0 %v18450_v24  ;;  %v23116_v59 = vand.u32 4294901760, %v18139_v60  ;;  %v18725_v53 = vpack.c.bf16 %v8038_v19, %v8034_v47  ;;  %v23118_v24 = vand.u32 4294901760, %v23111_v0  ;;  %v23125_v10 = vand.u32 4294901760, %v18647_v46 }
 0x93b   :  { %23113 = vst [vmem:[#allocation203_spill] sm:$0xff] %v18707_v34  ;;  %v18713_v33 = vsub.f32 %v18132_v48, %v23114_v21  ;;  %v18718_v61 = vsub.f32 %v23109_v26, %v23115_v43  ;;  %13767 = vmatprep.subr.bf16.mxu1 %v18707_v34  ;;  %v8040_v43 = vand.u32 4294901760, %v7845_v17  ;;  %v8044_v26 = vand.u32 4294901760, %v7847_v63  ;;  %v7844_v48 = vld [vmem:[#allocation15 + $0x1c0] sm:$0xff] }
 0x93c   :  { %v18723_v27 = vsub.f32 %v18139_v60, %v23116_v59  ;;  %23117 = vst [vmem:[#allocation204_spill] sm:$0xff] %v18725_v53  ;;  %v18730_v8 = vsub.f32 %v23111_v0, %v23118_v24  ;;  %v23119_v59 = vand.u32 4294901760, %v18148_v25  ;;  %v8042_v6 = vand.u32 4294901760, %v7844_v48 }
 0x93d   :  { %v8046_v24 = vand.u32 4294901760, %v7846_v4  ;;  %13425 = vmatpush1.bf16.msra.mxu0 %v18470_v37  ;;  %v23120_v34 = vand.u32 4294901760, %v18308_v15  ;;  %v18759_v37 = vsub.f32 %v18647_v46, %v23125_v10  ;;  %v23126_v21 = vand.u32 4294901760, %v18649_v13  ;;  %v7850_v46 = vld [vmem:[#allocation15 + $0x1f0] sm:$0xff] }
 0x93e   :  { %v18737_v60 = vsub.f32 %v18148_v25, %v23119_v59  ;;  %13769 = vmatpush1.bf16.msra.mxu1 %v18725_v53  ;;  %v18751_v59 = vsub.f32 %v18310_v1, %v23122_v35  ;;  %v18753_v25 = vpack.c.bf16 %v8044_v26, %v8040_v43  ;;  %13427 = vmatprep.subr.bf16.mxu0 %v18538_v57  ;;  %v7849_v1 = vld [vmem:[#allocation15 + $0x1e8] sm:$0xff] }
 0x93f   :  { %v18746_v0 = vsub.f32 %v18308_v15, %v23120_v34  ;;  %v18764_v53 = vsub.f32 %v18649_v13, %v23126_v21  ;;  %v18767_v15 = vsub.f32 %v18654_v30, %v8026_v40  ;;  %v18770_v35 = vsub.f32 %v18656_v50, %v8030_v12  ;;  %v7851_v34 = vld [vmem:[#allocation15 + $0x1f8] sm:$0xff]  ;;  %v7848_v13 = vld [vmem:[#allocation15 + $0x1e0] sm:$0xff] }
 0x940   :  { %23123 = vst [vmem:[#allocation206_spill] sm:$0xff] %v18751_v59  ;;  %23124 = vst [vmem:[#allocation207_spill] sm:$0xff] %v18753_v25  ;;  %v18772_v22 = vsub.f32 %v7841_v18, %v8032_v16  ;;  %v18774_v57 = vsub.f32 %v7843_v29, %v8036_v39  ;;  %v18776_v31 = vsub.f32 %v7840_v52, %v8034_v47  ;;  %13771 = vmatprep.subr.bf16.mxu1 %v18753_v25 }
 0x941   :  { %23121 = vst [vmem:[#allocation205_spill] sm:$0xff] %v18746_v0  ;;  %v18778_v10 = vsub.f32 %v7842_v44, %v8038_v19  ;;  %v18781_v21 = vsub.f32 %v7845_v17, %v8040_v43  ;;  %v18783_v30 = vsub.f32 %v7847_v63, %v8044_v26  ;;  %v18785_v50 = vpack.c.bf16 %v8046_v24, %v8042_v6 }
 0x942   :  { %v18787_v40 = vsub.f32 %v7844_v48, %v8042_v6  ;;  %13429 = vmatpush1.bf16.msra.mxu0 %v18591_v20  ;;  %v18790_v18 = vsub.f32 %v7846_v4, %v8046_v24  ;;  %v8048_v52 = vand.u32 4294901760, %v7849_v1  ;;  %v8052_v29 = vand.u32 4294901760, %v7851_v34 }
 0x943   :  { %23127 = vst [vmem:[#allocation208_spill] sm:$0xff] %v18785_v50  ;;  %v8050_v19 = vand.u32 4294901760, %v7848_v13  ;;  %13431 = vmatprep.subr.bf16.mxu0 %v18597_v45  ;;  %v23130_v39 = vand.u32 4294901760, %v18150_v42  ;;  %13773 = vmatpush1.bf16.msra.mxu1 %v18785_v50  ;;  %v8054_v63 = vand.u32 4294901760, %v7850_v46  ;;  %v22009_v12 = vand.u32 4294901760, %v18746_v0  ;;  %v23170_v50 = vld [vmem:[#allocation71_spill] sm:$0xff] }
 0x944   :  { %23128 = vst [vmem:[#allocation209_spill] sm:$0xff] %v18787_v40  ;;  %23129 = vst [vmem:[#allocation210_spill] sm:$0xff] %v18790_v18  ;;  %v22008_v6 = vand.u32 4294901760, %v18751_v59  ;;  %v18799_v48 = vpack.c.bf16 %v8052_v29, %v8048_v52  ;;  %v18801_v4 = vsub.f32 %v7849_v1, %v8048_v52  ;;  %v18803_v20 = vsub.f32 %v7851_v34, %v8052_v29  ;;  %v23139_v52 = vld [vmem:[#allocation121_spill] sm:$0xff] }
 0x945   :  { %v6972_v17 = vsub.f32 %v18150_v42, %v23130_v39  ;;  %v18805_v26 = vsub.f32 %v7848_v13, %v8050_v19  ;;  %v18807_v45 = vpack.c.bf16 %v8054_v63, %v8050_v19  ;;  %v18809_v47 = vsub.f32 %v7850_v46, %v8054_v63 }
 0x946   :  { %23131 = vst [vmem:[#allocation211_spill] sm:$0xff] %v18799_v48  ;;  %23132 = vst [vmem:[#allocation212_spill] sm:$0xff] %v18801_v4  ;;  %v8076_v16 = vsub.f32 %v18746_v0, %v22009_v12  ;;  %v8088_v44 = vsub.f32 %v18751_v59, %v22008_v6  ;;  %13433 = vmatpush1.bf16.msra.mxu0 %v18639_v2  ;;  %v23137_v43 = vand.u32 4294901760, %v18661_v51  ;;  %v23138_v24 = vand.u32 4294901760, %v18673_v41  ;;  %v23145_v6 = vld [vmem:[#allocation125_spill] sm:$0xff]  ;;  %v23174_v0 = vld [vmem:[#allocation88_spill] sm:$0xff] }
 0x947   :  { %23133 = vst [vmem:[#allocation213_spill] sm:$0xff] %v18803_v20  ;;  %23134 = vst [vmem:[#allocation214_spill] sm:$0xff] %v18805_v26  ;;  %v6931_v34 = vand.u32 4294901760, %v18705_v32  ;;  %v6937_v13 = vand.u32 4294901760, %v18713_v33  ;;  %v6949_v46 = vand.u32 4294901760, %v18718_v61  ;;  %13775 = vmatprep.subr.bf16.mxu1 %v18799_v48  ;;  %13435 = vmatprep.subr.bf16.mxu0 %v18668_v56  ;;  %v22011_v29 = vand.u32 4294901760, %v23139_v52 }
 0x948   :  { %23135 = vst [vmem:[#allocation215_spill] sm:$0xff] %v18807_v45  ;;  %23136 = vst [vmem:[#allocation216_spill] sm:$0xff] %v18809_v47  ;;  %v13438_v1 = vpack.c.bf16 %v23138_v24, %v23137_v43  ;;  %v22010_v19 = vand.u32 4294901760, %v18177_v62  ;;  %13777 = vmatpush1.bf16.msra.mxu1 %v18807_v45  ;;  %v8077_v2 = vand.u32 4294901760, %v8076_v16  ;;  %v8089_v51 = vand.u32 4294901760, %v8088_v44  ;;  %v23153_v45 = vld [vmem:[#allocation31_spill] sm:$0xff] }
 0x949   :  { %v23140_v41 = vand.u32 4294901760, %v18158_v9  ;;  %v6943_v33 = vand.u32 4294901760, %v18723_v27  ;;  %v6955_v61 = vand.u32 4294901760, %v18730_v8  ;;  %v23142_v39 = vand.u32 4294901760, %v18154_v23  ;;  %v23176_v26 = vld [vmem:[#allocation54_spill] sm:$0xff]  ;;  %v23178_v4 = vld [vmem:[#allocation44_spill] sm:$0xff] }
 0x94a   :  { %v6961_v63 = vand.u32 4294901760, %v18737_v60  ;;  %v6973_v43 = vand.u32 4294901760, %v6972_v17  ;;  %v23143_v24 = vand.u32 4294901760, %v18156_v54  ;;  %v13778_v44 = vpack.c.bf16 %v8089_v51, %v8077_v2  ;;  %13437 = vmatpush1.bf16.msra.mxu0 %v18692_v5  ;;  %v23146_v2 = vld [vmem:[#allocation127_spill] sm:$0xff]  ;;  %v23147_v5 = vld [vmem:[#allocation128_spill] sm:$0xff] }
 0x94b   :  { %v18833_v32 = vsub.f32 %v18158_v9, %v23140_v41  ;;  %v6966_v56 = vsub.f32 %v18154_v23, %v23142_v39  ;;  %v23144_v9 = vand.u32 4294901760, %v18678_v58  ;;  %v13442_v27 = vpack.c.bf16 %v6949_v46, %v6937_v13  ;;  %13439 = vmatprep.subr.bf16.mxu0 %v13438_v1 }
 0x94c   :  { %v6978_v16 = vsub.f32 %v18156_v54, %v23143_v24  ;;  %v22014_v8 = vand.u32 4294901760, %v18181_v7  ;;  %v22013_v12 = vand.u32 4294901760, %v23145_v6  ;;  %v6984_v60 = vsub.f32 %v23139_v52, %v22011_v29  ;;  %13779 = vmatprep.subr.bf16.mxu1 %v13778_v44 }
 0x94d   :  { %23141 = vst [vmem:[#allocation217_spill] sm:$0xff] %v18833_v32  ;;  %v13440_v41 = vpack.c.bf16 %v6931_v34, %v23144_v9  ;;  %v6996_v17 = vsub.f32 %v18177_v62, %v22010_v19  ;;  %v22012_v51 = vand.u32 4294901760, %v23146_v2  ;;  %v13444_v58 = vpack.c.bf16 %v6955_v61, %v6943_v33  ;;  %v23148_v9 = vld [vmem:[#allocation130_spill] sm:$0xff] }
 0x94e   :  { %v13446_v34 = vpack.c.bf16 %v6973_v43, %v6961_v63  ;;  %v6967_v13 = vand.u32 4294901760, %v6966_v56  ;;  %v6979_v46 = vand.u32 4294901760, %v6978_v16  ;;  %v6990_v1 = vsub.f32 %v18181_v7, %v22014_v8 }
 0x94f   :  { %13441 = vmatpush1.bf16.msra.mxu0 %v13440_v41  ;;  %v7002_v24 = vsub.f32 %v23145_v6, %v22013_v12  ;;  %v22015_v19 = vand.u32 4294901760, %v23148_v9  ;;  %v22018_v29 = vand.u32 4294901760, %v18833_v32  ;;  %v6985_v39 = vand.u32 4294901760, %v6984_v60 }
 0x950   :  { %13443 = vmatprep.subr.bf16.mxu0 %v13442_v27  ;;  %v6997_v44 = vand.u32 4294901760, %v6996_v17  ;;  %v7008_v33 = vsub.f32 %v23146_v2, %v22012_v51  ;;  %v23149_v61 = vand.u32 4294901760, %v23147_v5  ;;  %v13448_v63 = vpack.c.bf16 %v6979_v46, %v6967_v13  ;;  %v23150_v46 = vld [vmem:[#allocation80_spill] sm:$0xff] }
 0x951   :  { %v6991_v43 = vand.u32 4294901760, %v6990_v1  ;;  %v7003_v16 = vand.u32 4294901760, %v7002_v24  ;;  %v7014_v41 = vsub.f32 %v23148_v9, %v22015_v19  ;;  %v7026_v27 = vsub.f32 %v18833_v32, %v22018_v29  ;;  %v23151_v1 = vld [vmem:[#allocation82_spill] sm:$0xff]  ;;  %v23152_v19 = vld [vmem:[#allocation85_spill] sm:$0xff] }
 0x952   :  { %v7020_v56 = vsub.f32 %v23147_v5, %v23149_v61  ;;  %v13450_v60 = vpack.c.bf16 %v6997_v44, %v6985_v39  ;;  %v7009_v17 = vand.u32 4294901760, %v7008_v33  ;;  %v13458_v24 = vpack.c.bf16 %v23151_v1, %v23150_v46  ;;  %v23154_v39 = vld [vmem:[#allocation94_spill] sm:$0xff] }
 0x953   :  { %13445 = vmatpush1.bf16.msra.mxu0 %v13444_v58  ;;  %v13452_v12 = vpack.c.bf16 %v7003_v16, %v6991_v43  ;;  %v7015_v8 = vand.u32 4294901760, %v7014_v41  ;;  %v7027_v61 = vand.u32 4294901760, %v7026_v27  ;;  %v13460_v29 = vpack.c.bf16 %v23153_v45, %v23152_v19  ;;  %v23156_v33 = vld [vmem:[#allocation42_spill] sm:$0xff]  ;;  %v23163_v27 = vld [vmem:[#allocation43_spill] sm:$0xff] }
 0x954   :  { %13447 = vmatprep.subr.bf16.mxu0 %v13446_v34  ;;  %v7021_v51 = vand.u32 4294901760, %v7020_v56  ;;  %v23155_v34 = vld [vmem:[#allocation34_spill] sm:$0xff]  ;;  %v23157_v56 = vld [vmem:[#allocation97_spill] sm:$0xff] }
 0x955   :  { %v13456_v13 = vpack.c.bf16 %v7027_v61, %v7015_v8  ;;  %v13462_v44 = vpack.c.bf16 %v23155_v34, %v23154_v39  ;;  %v23161_v43 = vld [vmem:[#allocation62_spill] sm:$0xff]  ;;  %v23165_v61 = vld [vmem:[#allocation45_spill] sm:$0xff] }
 0x956   :  { %v13454_v58 = vpack.c.bf16 %v7021_v51, %v7009_v17  ;;  %v23158_v51 = vld [vmem:[#allocation37_spill] sm:$0xff]  ;;  %v23162_v41 = vld [vmem:[#allocation38_spill] sm:$0xff]  ;;  %v23164_v17 = vld [vmem:[#allocation48_spill] sm:$0xff] }
 0x957   :  { %13449 = vmatpush1.bf16.msra.mxu0 %v13448_v63  ;;  %v23160_v63 = vld [vmem:[#allocation61_spill] sm:$0xff] }
 0x958   :  { %13451 = vmatprep.subr.bf16.mxu0 %v13450_v60  ;;  %v13466_v16 = vpack.c.bf16 %v23161_v43, %v23160_v63  ;;  %v13468_v60 = vpack.c.bf16 %v23163_v27, %v23162_v41 }
 0x95b   :  { %13453 = vmatpush1.bf16.msra.mxu0 %v13452_v12  ;;  %v23159_v12 = vld [vmem:[#allocation59_spill] sm:$0xff] }
 0x95c   :  { %13455 = vmatprep.subr.bf16.mxu0 %v13454_v58  ;;  %v13464_v8 = vpack.c.bf16 %v23159_v12, %v23158_v51  ;;  %v13470_v58 = vpack.c.bf16 %v23165_v61, %v23164_v17 }
 0x95f   :  { %13457 = vmatpush1.bf16.msra.mxu0 %v13456_v13  ;;  %v23166_v13 = vld [vmem:[#allocation55_spill] sm:$0xff] }
 0x960   :  { %13459 = vmatprep.subr.bf16.mxu0 %v13458_v24  ;;  %v23167_v24 = vld [vmem:[#allocation66_spill] sm:$0xff] }
 0x962   :  { %7032 = vmatmul.mubr.f32.vlgmr.msra.gmra.mrb[26].mxu0 %v23156_v33  ;;  %v23172_v33 = vld [vmem:[#allocation76_spill] sm:$0xff] }
 0x963   :  { %13461 = vmatpush1.bf16.msra.mxu0 %v13460_v29  ;;  %7232 = vmatprep.mubr.f32.mxu0 %v23157_v56  ;;  %v13472_v29 = vpack.c.bf16 %v22960_v55, %v23166_v13  ;;  %v23168_v56 = vld [vmem:[#allocation67_spill] sm:$0xff] }
 0x964   :  { %13463 = vmatprep.subr.bf16.mxu0 %v13462_v44  ;;  %v13474_v48 = vpack.c.bf16 %v23168_v56, %v23167_v24  ;;  %v23169_v44 = vld [vmem:[#allocation70_spill] sm:$0xff] }
 0x965   :  { %v13476_v25 = vpack.c.bf16 %v23170_v50, %v23169_v44 }
 0x967   :  { %13465 = vmatpush1.bf16.msra.mxu0 %v13464_v8  ;;  %v23171_v8 = vld [vmem:[#allocation75_spill] sm:$0xff] }
 0x968   :  { %13467 = vmatprep.subr.bf16.mxu0 %v13466_v16  ;;  %v13478_v59 = vpack.c.bf16 %v23172_v33, %v23171_v8  ;;  %v23173_v16 = vld [vmem:[#allocation86_spill] sm:$0xff]  ;;  %v23255_v33 = vld [vmem:[#allocation160_spill] sm:$0xff] }
 0x969   :  { %v13480_v47 = vpack.c.bf16 %v23174_v0, %v23173_v16 }
 0x96b   :  { %13469 = vmatpush1.bf16.msra.mxu0 %v13468_v60  ;;  %v23175_v60 = vld [vmem:[#allocation91_spill] sm:$0xff] }
 0x96c   :  { %13471 = vmatprep.subr.bf16.mxu0 %v13470_v58  ;;  %v13482_v20 = vpack.c.bf16 %v23176_v26, %v23175_v60  ;;  %v23177_v58 = vld [vmem:[#allocation46_spill] sm:$0xff] }
 0x96d   :  { %v13484_v18 = vpack.c.bf16 %v23178_v4, %v23177_v58  ;;  %v23183_v58 = vld [vmem:[#allocation81_spill] sm:$0xff]  ;;  %v23245_v60 = vld [vmem:[#allocation150_spill] sm:$0xff] }
 0x96f   :  { %13473 = vmatpush1.bf16.msra.mxu0 %v13472_v29  ;;  %v13486_v29 = vpack.c.bf16 %v23008_v3, %v23007_v38  ;;  %v23185_v38 = vld [vmem:[#allocation90_spill] sm:$0xff] }
 0x970   :  { %13475 = vmatprep.subr.bf16.mxu0 %v13474_v48  ;;  %v23179_v48 = vld [vmem:[#allocation56_spill] sm:$0xff] }
 0x971   :  { %v13488_v40 = vpack.c.bf16 %v23179_v48, %v23009_v14  ;;  %v23187_v14 = vld [vmem:[#allocation100_spill] sm:$0xff] }
 0x973   :  { %13477 = vmatpush1.bf16.msra.mxu0 %v13476_v25  ;;  %v13490_v25 = vpack.c.bf16 %v23031_v36, %v23027_v28  ;;  %v23189_v28 = vld [vmem:[#allocation104_spill] sm:$0xff] }
 0x974   :  { %13479 = vmatprep.subr.bf16.mxu0 %v13478_v59  ;;  %v23180_v59 = vld [vmem:[#allocation63_spill] sm:$0xff] }
 0x975   :  { %v13492_v26 = vpack.c.bf16 %v23180_v59, %v23035_v11  ;;  %v23191_v11 = vld [vmem:[#allocation107_spill] sm:$0xff] }
 0x977   :  { %13481 = vmatpush1.bf16.msra.mxu0 %v13480_v47  ;;  %v23181_v47 = vld [vmem:[#allocation72_spill] sm:$0xff] }
 0x978   :  { %13483 = vmatprep.subr.bf16.mxu0 %v13482_v20  ;;  %v13494_v4 = vpack.c.bf16 %v23181_v47, %v23046_v49  ;;  %v23182_v20 = vld [vmem:[#allocation78_spill] sm:$0xff] }
 0x979   :  { %v13496_v3 = vpack.c.bf16 %v23183_v58, %v23182_v20  ;;  %v23193_v49 = vld [vmem:[#allocation110_spill] sm:$0xff]  ;;  %v23195_v20 = vld [vmem:[#allocation113_spill] sm:$0xff] }
 0x97b   :  { %13485 = vmatpush1.bf16.msra.mxu0 %v13484_v18  ;;  %v23184_v18 = vld [vmem:[#allocation87_spill] sm:$0xff] }
 0x97c   :  { %13487 = vmatprep.subr.bf16.mxu0 %v13486_v29  ;;  %v13498_v48 = vpack.c.bf16 %v23185_v38, %v23184_v18  ;;  %v23186_v29 = vld [vmem:[#allocation93_spill] sm:$0xff] }
 0x97d   :  { %v13500_v36 = vpack.c.bf16 %v23187_v14, %v23186_v29 }
 0x97f   :  { %13489 = vmatpush1.bf16.msra.mxu0 %v13488_v40  ;;  %v23188_v40 = vld [vmem:[#allocation103_spill] sm:$0xff] }
 0x980   :  { %13491 = vmatprep.subr.bf16.mxu0 %v13490_v25  ;;  %v13502_v59 = vpack.c.bf16 %v23189_v28, %v23188_v40  ;;  %v23190_v25 = vld [vmem:[#allocation106_spill] sm:$0xff]  ;;  %v23234_v40 = vld [vmem:[#allocation145_spill] sm:$0xff] }
 0x981   :  { %v13504_v47 = vpack.c.bf16 %v23191_v11, %v23190_v25 }
 0x983   :  { %13493 = vmatpush1.bf16.msra.mxu0 %v13492_v26  ;;  %v23192_v26 = vld [vmem:[#allocation109_spill] sm:$0xff] }
 0x984   :  { %13495 = vmatprep.subr.bf16.mxu0 %v13494_v4  ;;  %v13506_v58 = vpack.c.bf16 %v23193_v49, %v23192_v26  ;;  %v23194_v4 = vld [vmem:[#allocation112_spill] sm:$0xff]  ;;  %v23222_v49 = vld [vmem:[#allocation30_spill] sm:$0xff]  ;;  %v23235_v26 = vld [vmem:[#allocation53_spill] sm:$0xff] }
 0x985   :  { %v13508_v38 = vpack.c.bf16 %v23195_v20, %v23194_v4  ;;  %v23217_v20 = vld [vmem:[#allocation187_spill] sm:$0xff]  ;;  %v23218_v4 = vld [vmem:[#allocation89_spill] sm:$0xff] }
 0x987   :  { %13497 = vmatpush1.bf16.msra.mxu0 %v13496_v3  ;;  %v23196_v3 = vld [vmem:[#allocation115_spill] sm:$0xff] }
 0x988   :  { %13499 = vmatprep.subr.bf16.mxu0 %v13498_v48  ;;  %v13510_v14 = vpack.c.bf16 %v18150_v42, %v23196_v3  ;;  %v13512_v48 = vpack.c.bf16 %v18156_v54, %v18154_v23  ;;  %v23199_v54 = vld [vmem:[#allocation84_spill] sm:$0xff]  ;;  %v23215_v42 = vld [vmem:[#allocation135_spill] sm:$0xff] }
 0x989   :  { %v23216_v3 = vld [vmem:[#allocation136_spill] sm:$0xff] }
 0x98b   :  { %13501 = vmatpush1.bf16.msra.mxu0 %v13500_v36  ;;  %v13514_v36 = vpack.c.bf16 %v18177_v62, %v23139_v52  ;;  %v23201_v62 = vld [vmem:[#allocation32_spill] sm:$0xff] }
 0x98c   :  { %13503 = vmatprep.subr.bf16.mxu0 %v13502_v59  ;;  %v13516_v59 = vpack.c.bf16 %v23145_v6, %v18181_v7  ;;  %v23203_v6 = vld [vmem:[#allocation60_spill] sm:$0xff] }
 0x98d   :  { %v23212_v7 = vld [vmem:[#allocation132_spill] sm:$0xff] }
 0x98f   :  { %13505 = vmatpush1.bf16.msra.mxu0 %v13504_v47  ;;  %v13518_v47 = vpack.c.bf16 %v23147_v5, %v23146_v2  ;;  %v23205_v5 = vld [vmem:[#allocation41_spill] sm:$0xff] }
 0x990   :  { %13507 = vmatprep.subr.bf16.mxu0 %v13506_v58  ;;  %v13520_v58 = vpack.c.bf16 %v18833_v32, %v23148_v9 }
 0x993   :  { %13509 = vmatpush1.bf16.msra.mxu0 %v13508_v38  ;;  %v23197_v38 = vld [vmem:[#allocation79_spill] sm:$0xff] }
 0x994   :  { %13511 = vmatprep.subr.bf16.mxu0 %v13510_v14  ;;  %v23198_v14 = vld [vmem:[#allocation96_spill] sm:$0xff] }
 0x997   :  { %13513 = vmatpush1.bf16.msra.mxu0 %v13512_v48  ;;  %v23200_v48 = vld [vmem:[#allocation99_spill] sm:$0xff] }
 0x998   :  { %13515 = vmatprep.subr.bf16.mxu0 %v13514_v36  ;;  %v23202_v36 = vld [vmem:[#allocation35_spill] sm:$0xff] }
 0x99b   :  { %13517 = vmatpush1.bf16.msra.mxu0 %v13516_v59  ;;  %v23204_v59 = vld [vmem:[#allocation40_spill] sm:$0xff] }
 0x99c   :  { %13519 = vmatprep.subr.bf16.mxu0 %v13518_v47  ;;  %v23206_v47 = vld [vmem:[#allocation58_spill] sm:$0xff] }
 0x99f   :  { %13521 = vmatpush1.bf16.msra.mxu0 %v13520_v58  ;;  %v5194_v58 = vld [vmem:[#allocation14] sm:$0xf] }
 0x9a0   :  { %13523 = vmatprep.subr.bf16.mxu0 %v23197_v38  ;;  %v23207_v38 = vld [vmem:[#allocation64_spill] sm:$0xff] }
 0x9a2   :  { %7235 = vmatmul.mubr.f32.vlgmr.msra.gmra.mrb[26].mxu0 %v23198_v14  ;;  %v23208_v14 = vld [vmem:[#allocation26_spill] sm:$0xff] }
 0x9a3   :  { %13525 = vmatpush1.bf16.msra.mxu0 %v23199_v54  ;;  %7372 = vmatprep.mubr.f32.mxu0 %v23200_v48  ;;  %v5199_v32 = vrot.slane %v5194_v58, %v23208_v14  ;;  %v23209_v54 = vld [vmem:[#allocation68_spill] sm:$0xff]  ;;  %v23210_v48 = vld [vmem:[#allocation27_spill] sm:$0xff] }
 0x9a4   :  { %13527 = vmatprep.subr.bf16.mxu0 %v23201_v62  ;;  %v5203_v9 = vrot.slane %v5194_v58, %v23210_v48  ;;  %v23211_v62 = vld [vmem:[#allocation73_spill] sm:$0xff]  ;;  %v23219_v58 = vld [vmem:[#allocation188_spill] sm:$0xff] }
 0x9a7   :  { %13529 = vmatpush1.bf16.msra.mxu0 %v23202_v36 }
 0x9a8   :  { %13531 = vmatprep.subr.bf16.mxu0 %v23203_v6 }
 0x9ab   :  { %13533 = vmatpush1.bf16.msra.mxu0 %v23204_v59  ;;  %v22053_v59 = vand.u32 4294901760, %v23212_v7 }
 0x9ac   :  { %13535 = vmatprep.subr.bf16.mxu0 %v23205_v5  ;;  %v23213_v5 = vld [vmem:[#allocation77_spill] sm:$0xff] }
 0x9af   :  { %13537 = vmatpush1.bf16.msra.mxu0 %v23206_v47  ;;  %v23214_v47 = vld [vmem:[#allocation133_spill] sm:$0xff] }
 0x9b0   :  { %13539 = vmatprep.subr.bf16.mxu0 %v23207_v38  ;;  %v22054_v38 = vand.u32 4294901760, %v23215_v42  ;;  %v23223_v14 = vand.u32 4294901760, %v23214_v47 }
 0x9b3   :  { %13541 = vmatpush1.bf16.msra.mxu0 %v23209_v54  ;;  %v6093_v36 = vpop.f32.mrb[24].mxu0 }
 0x9b4   :  { %13543 = vmatprep.subr.bf16.mxu0 %v23211_v62  ;;  %v14710_v2 = vadd.f32 %v6093_v36, %v5199_v32  ;;  %v6095_v6 = vpop.f32.mrb[25].mxu0  ;;  %v23220_v62 = vld [vmem:[#allocation138_spill] sm:$0xff] }
 0x9b5   :  { %v14712_v52 = vadd.f32 %v6095_v6, %v5203_v9  ;;  %v8082_v6 = vsub.f32 %v23212_v7, %v22053_v59  ;;  %v23221_v9 = vld [vmem:[#allocation139_spill] sm:$0xff]  ;;  %v23228_v32 = vld [vmem:[#allocation142_spill] sm:$0xff]  ;;  %v23244_v7 = vld [vmem:[#allocation65_spill] sm:$0xff] }
 0x9b6   :  { %v14711_v54 = vadd.f32 %v14710_v2, %v23217_v20  ;;  %v8094_v2 = vsub.f32 %v23214_v47, %v23223_v14  ;;  %v23224_v20 = vand.u32 4294901760, %v23216_v3  ;;  %v23226_v59 = vld [vmem:[#allocation47_spill] sm:$0xff]  ;;  %v23231_v14 = vand.u32 4294901760, %v23220_v62  ;;  %v23247_v47 = vld [vmem:[#allocation153_spill] sm:$0xff] }
 0x9b7   :  { %13545 = vmatpush1.bf16.msra.mxu0 %v23213_v5  ;;  %v14713_v48 = vadd.f32 %v14712_v52, %v23219_v58  ;;  %v8100_v52 = vsub.f32 %v23215_v42, %v22054_v38  ;;  %v23227_v5 = vld [vmem:[#allocation141_spill] sm:$0xff]  ;;  %v23233_v28 = vand.u32 4294901760, %v23221_v9 }
 0x9b8   :  { %13547 = vmatprep.subr.bf16.mxu0 %v23218_v4  ;;  %v7784_v36 = vmax.f32 %v14711_v54, 0.0  ;;  %v8112_v54 = vsub.f32 %v23216_v3, %v23224_v20  ;;  %v23229_v4 = vld [vmem:[#allocation144_spill] sm:$0xff]  ;;  %v8106_v38 = vsub.f32 %v23220_v62, %v23231_v14  ;;  %v8083_v20 = vand.u32 4294901760, %v8082_v6  ;;  %v23236_v62 = vld [vmem:[#allocation29_spill] sm:$0xff] }
 0x9b9   :  { %v7785_v23 = vmax.f32 %v14713_v48, 0.0  ;;  %v8095_v29 = vand.u32 4294901760, %v8094_v2  ;;  %v8101_v3 = vand.u32 4294901760, %v8100_v52 }
 0x9ba   :  { %v18981_v58 = vand.u32 4294901760, %v7784_v36  ;;  %v8113_v42 = vand.u32 4294901760, %v8112_v54  ;;  %v8107_v52 = vand.u32 4294901760, %v8106_v38 }
 0x9bb   :  { %13549 = vmatpush1.bf16.msra.mxu0 %v23222_v49  ;;  %v18987_v11 = vand.u32 4294901760, %v7785_v23 }
 0x9bc   :  { %23225 = vst [vmem:[#allocation80_spill] sm:$0xff] %v18981_v58  ;;  %13551 = vmatprep.subr.bf16.mxu0 %v23226_v59  ;;  %v18993_v25 = vsub.f32 %v7784_v36, %v18981_v58  ;;  %v8118_v59 = vsub.f32 %v23221_v9, %v23233_v28  ;;  %v23237_v36 = vand.u32 4294901760, %v23227_v5  ;;  %v23238_v28 = vand.u32 4294901760, %v23228_v32  ;;  %v23242_v58 = vld [vmem:[#allocation148_spill] sm:$0xff] }
 0x9bd   :  { %23230 = vst [vmem:[#allocation82_spill] sm:$0xff] %v18987_v11  ;;  %v19000_v49 = vsub.f32 %v7785_v23, %v18987_v11  ;;  %v23239_v23 = vand.u32 4294901760, %v23229_v4  ;;  %v13782_v38 = vpack.c.bf16 %v8113_v42, %v8101_v3  ;;  %v23250_v3 = vand.u32 4294901760, %v23242_v58 }
 0x9be   :  { %23232 = vst [vmem:[#allocation85_spill] sm:$0xff] %v18993_v25  ;;  %v22066_v14 = vand.u32 4294901760, %v18993_v25  ;;  %v8124_v6 = vsub.f32 %v23227_v5, %v23237_v36  ;;  %v8136_v48 = vsub.f32 %v23228_v32, %v23238_v28  ;;  %v23241_v36 = vld [vmem:[#allocation147_spill] sm:$0xff]  ;;  %v8119_v32 = vand.u32 4294901760, %v8118_v59 }
 0x9bf   :  { %13553 = vmatpush1.bf16.msra.mxu0 %v23235_v26  ;;  %v8130_v9 = vsub.f32 %v23229_v4, %v23239_v23  ;;  %v22070_v2 = vand.u32 4294901760, %v19000_v49  ;;  %v23243_v28 = vld [vmem:[#allocation39_spill] sm:$0xff]  ;;  %v13780_v4 = vpack.c.bf16 %v8095_v29, %v8083_v20  ;;  %v23249_v29 = vand.u32 4294901760, %v23241_v36 }
 0x9c0   :  { %13555 = vmatprep.subr.bf16.mxu0 %v23236_v62  ;;  %v8065_v54 = vsub.f32 %v18993_v25, %v22066_v14  ;;  %v23240_v62 = vand.u32 4294901760, %v23234_v40  ;;  %v8125_v14 = vand.u32 4294901760, %v8124_v6  ;;  %v8137_v25 = vand.u32 4294901760, %v8136_v48  ;;  %v23246_v5 = vld [vmem:[#allocation151_spill] sm:$0xff]  ;;  %v23252_v48 = vld [vmem:[#allocation156_spill] sm:$0xff]  ;;  %v23253_v6 = vld [vmem:[#allocation157_spill] sm:$0xff] }
 0x9c1   :  { %v8059_v23 = vsub.f32 %v19000_v49, %v22070_v2  ;;  %v8131_v18 = vand.u32 4294901760, %v8130_v9  ;;  %v8148_v42 = vsub.f32 %v23241_v36, %v23249_v29  ;;  %v8160_v59 = vsub.f32 %v23242_v58, %v23250_v3  ;;  %v23251_v9 = vld [vmem:[#allocation74_spill] sm:$0xff]  ;;  %v23254_v2 = vld [vmem:[#allocation159_spill] sm:$0xff] }
 0x9c2   :  { %v8142_v26 = vsub.f32 %v23234_v40, %v23240_v62  ;;  %v22071_v62 = vand.u32 4294901760, %v23245_v60  ;;  %v8066_v8 = vand.u32 4294901760, %v8065_v54  ;;  %v13784_v0 = vpack.c.bf16 %v8119_v32, %v8107_v52 }
 0x9c3   :  { %13557 = vmatpush1.bf16.msra.mxu0 %v23243_v28  ;;  %v8060_v40 = vand.u32 4294901760, %v8059_v23  ;;  %v23248_v28 = vld [vmem:[#allocation154_spill] sm:$0xff]  ;;  %v23258_v23 = vand.u32 4294901760, %v23247_v47  ;;  %v13786_v32 = vpack.c.bf16 %v8137_v25, %v8125_v14  ;;  %v8149_v20 = vand.u32 4294901760, %v8148_v42  ;;  %v23267_v42 = vld [vmem:[#allocation163_spill] sm:$0xff] }
 0x9c4   :  { %13559 = vmatprep.subr.bf16.mxu0 %v23244_v7  ;;  %v8143_v50 = vand.u32 4294901760, %v8142_v26  ;;  %v23256_v26 = vld [vmem:[#allocation83_spill] sm:$0xff]  ;;  %v8154_v29 = vsub.f32 %v23245_v60, %v22071_v62  ;;  %v8161_v62 = vand.u32 4294901760, %v8160_v59  ;;  %v23266_v25 = vld [vmem:[#allocation162_spill] sm:$0xff] }
 0x9c5   :  { %8061 = vmatprep.mubr.f32.mxu1 %v8060_v40  ;;  %v23257_v40 = vand.u32 4294901760, %v23246_v5  ;;  %v8172_v16 = vsub.f32 %v23247_v47, %v23258_v23  ;;  %v23263_v23 = vand.u32 4294901760, %v23254_v2 }
 0x9c6   :  { %8067 = vmatmul.mubr.f32.vlgmr.msra.gmra.mrb[16].mxu1 %v8066_v8  ;;  %v23259_v8 = vand.u32 4294901760, %v23248_v28  ;;  %v13788_v52 = vpack.c.bf16 %v8143_v50, %v8131_v18  ;;  %v23265_v18 = vld [vmem:[#allocation102_spill] sm:$0xff] }
 0x9c7   :  { %13561 = vmatpush1.bf16.msra.mxu0 %v23251_v9  ;;  %13781 = vmatpush1.bf16.msra.mxu1 %v13780_v4  ;;  %v8166_v3 = vsub.f32 %v23246_v5, %v23257_v40  ;;  %v23260_v4 = vld [vmem:[#allocation92_spill] sm:$0xff]  ;;  %v23262_v40 = vand.u32 4294901760, %v23253_v6  ;;  %v8196_v7 = vsub.f32 %v23254_v2, %v23263_v23  ;;  %v13790_v23 = vpack.c.bf16 %v8161_v62, %v8149_v20 }
 0x9c8   :  { %13563 = vmatprep.subr.bf16.mxu0 %v23256_v26  ;;  %8458 = vmatprep.mubr.f32.mxu1 %v18987_v11  ;;  %v8184_v54 = vsub.f32 %v23248_v28, %v23259_v8  ;;  %v23261_v11 = vand.u32 4294901760, %v23252_v48  ;;  %v23268_v8 = vld [vmem:[#allocation165_spill] sm:$0xff]  ;;  %v8173_v28 = vand.u32 4294901760, %v8172_v16  ;;  %v23270_v2 = vld [vmem:[#allocation168_spill] sm:$0xff]  ;;  %v23275_v16 = vand.u32 4294901760, %v23267_v42 }
 0x9c9   :  { %13783 = vmatprep.subr.bf16.mxu1 %v13782_v38  ;;  %v8190_v9 = vsub.f32 %v23253_v6, %v23262_v40  ;;  %v23264_v38 = vand.u32 4294901760, %v23255_v33  ;;  %v8155_v40 = vand.u32 4294901760, %v8154_v29  ;;  %v8167_v6 = vand.u32 4294901760, %v8166_v3 }
 0x9ca   :  { %v8178_v26 = vsub.f32 %v23252_v48, %v23261_v11  ;;  %v8185_v47 = vand.u32 4294901760, %v8184_v54  ;;  %v22084_v5 = vand.u32 4294901760, %v23270_v2  ;;  %v8197_v59 = vand.u32 4294901760, %v8196_v7  ;;  %v23273_v11 = vld [vmem:[#allocation108_spill] sm:$0xff] }
 0x9cb   :  { %13565 = vmatpush1.bf16.msra.mxu0 %v23260_v4  ;;  %v8208_v50 = vsub.f32 %v23255_v33, %v23264_v38  ;;  %v23269_v4 = vld [vmem:[#allocation166_spill] sm:$0xff]  ;;  %13785 = vmatpush1.bf16.msra.mxu1 %v13784_v0  ;;  %v23271_v38 = vld [vmem:[#allocation169_spill] sm:$0xff]  ;;  %v8191_v60 = vand.u32 4294901760, %v8190_v9  ;;  %v23274_v0 = vand.u32 4294901760, %v23266_v25  ;;  %v8214_v62 = vsub.f32 %v23267_v42, %v23275_v16  ;;  %v23278_v16 = vld [vmem:[#allocation171_spill] sm:$0xff] }
 0x9cc   :  { %13567 = vmatprep.subr.bf16.mxu0 %v23265_v18  ;;  %v22083_v48 = vand.u32 4294901760, %v23269_v4  ;;  %13787 = vmatprep.subr.bf16.mxu1 %v13786_v32  ;;  %v22087_v33 = vand.u32 4294901760, %v23271_v38  ;;  %v23272_v18 = vld [vmem:[#allocation105_spill] sm:$0xff]  ;;  %v8179_v14 = vand.u32 4294901760, %v8178_v26  ;;  %v23276_v20 = vand.u32 4294901760, %v23268_v8 }
 0x9cd   :  { %v8209_v58 = vand.u32 4294901760, %v8208_v50  ;;  %v8202_v29 = vsub.f32 %v23266_v25, %v23274_v0  ;;  %v13792_v7 = vpack.c.bf16 %v8167_v6, %v8155_v40  ;;  %v13794_v26 = vpack.c.bf16 %v8185_v47, %v8173_v28  ;;  %v23277_v50 = vld [vmem:[#allocation170_spill] sm:$0xff]  ;;  %v23284_v0 = vld [vmem:[#allocation177_spill] sm:$0xff] }
 0x9ce   :  { %v8220_v54 = vsub.f32 %v23268_v8, %v23276_v20  ;;  %v8232_v9 = vsub.f32 %v23269_v4, %v22083_v48  ;;  %v8226_v3 = vsub.f32 %v23270_v2, %v22084_v5  ;;  %v8238_v32 = vsub.f32 %v23271_v38, %v22087_v33  ;;  %v23282_v2 = vld [vmem:[#allocation174_spill] sm:$0xff]  ;;  %v23283_v33 = vld [vmem:[#allocation176_spill] sm:$0xff] }
 0x9cf   :  { %13569 = vmatpush1.bf16.msra.mxu0 %v23272_v18  ;;  %13789 = vmatpush1.bf16.msra.mxu1 %v13788_v52  ;;  %v13796_v18 = vpack.c.bf16 %v8191_v60, %v8179_v14  ;;  %v13798_v48 = vpack.c.bf16 %v8209_v58, %v8197_v59  ;;  %v23280_v52 = vld [vmem:[#allocation114_spill] sm:$0xff]  ;;  %v8203_v47 = vand.u32 4294901760, %v8202_v29  ;;  %v8215_v28 = vand.u32 4294901760, %v8214_v62  ;;  %v23287_v29 = vld [vmem:[#allocation117_spill] sm:$0xff]  ;;  %v23288_v62 = vld [vmem:[#allocation179_spill] sm:$0xff] }
 0x9d0   :  { %13571 = vmatprep.subr.bf16.mxu0 %v23273_v11  ;;  %13791 = vmatprep.subr.bf16.mxu1 %v13790_v23  ;;  %v23279_v11 = vld [vmem:[#allocation111_spill] sm:$0xff]  ;;  %v8221_v6 = vand.u32 4294901760, %v8220_v54  ;;  %v8233_v40 = vand.u32 4294901760, %v8232_v9  ;;  %v23281_v23 = vld [vmem:[#allocation173_spill] sm:$0xff]  ;;  %v8227_v20 = vand.u32 4294901760, %v8226_v3  ;;  %v23285_v60 = vand.u32 4294901760, %v23277_v50 }
 0x9d1   :  { %v22090_v5 = vand.u32 4294901760, %v23281_v23  ;;  %v23286_v14 = vand.u32 4294901760, %v23278_v16  ;;  %v23289_v9 = vld [vmem:[#allocation180_spill] sm:$0xff]  ;;  %v13800_v8 = vpack.c.bf16 %v8215_v28, %v8203_v47  ;;  %v23294_v54 = vand.u32 4294901760, %v23283_v33 }
 0x9d2   :  { %v8244_v58 = vsub.f32 %v23277_v50, %v23285_v60  ;;  %v23290_v38 = vld [vmem:[#allocation120_spill] sm:$0xff]  ;;  %v13802_v28 = vpack.c.bf16 %v8233_v40, %v8221_v6  ;;  %v23307_v6 = vld [vmem:[#allocation186_spill] sm:$0xff] }
 0x9d3   :  { %13573 = vmatpush1.bf16.msra.mxu0 %v23279_v11  ;;  %13793 = vmatpush1.bf16.msra.mxu1 %v13792_v7  ;;  %v8239_v11 = vand.u32 4294901760, %v8238_v32  ;;  %v8256_v59 = vsub.f32 %v23278_v16, %v23286_v14  ;;  %v23292_v32 = vld [vmem:[#allocation183_spill] sm:$0xff]  ;;  %v8250_v60 = vsub.f32 %v23281_v23, %v22090_v5  ;;  %v23293_v14 = vand.u32 4294901760, %v23282_v2 }
 0x9d4   :  { %13575 = vmatprep.subr.bf16.mxu0 %v23280_v52  ;;  %13795 = vmatprep.subr.bf16.mxu1 %v13794_v26  ;;  %v23291_v26 = vld [vmem:[#allocation182_spill] sm:$0xff]  ;;  %v8268_v7 = vsub.f32 %v23283_v33, %v23294_v54  ;;  %v23296_v52 = vld [vmem:[#allocation123_spill] sm:$0xff]  ;;  %v23297_v5 = vand.u32 4294901760, %v23150_v46  ;;  %v23298_v23 = vand.u32 4294901760, %v23151_v1  ;;  %v23300_v54 = vand.u32 4294901760, %v23153_v45  ;;  %v23306_v45 = vld [vmem:[#allocation185_spill] sm:$0xff] }
 0x9d5   :  { %v13804_v4 = vpack.c.bf16 %v8239_v11, %v8227_v20  ;;  %v8257_v3 = vand.u32 4294901760, %v8256_v59  ;;  %v23301_v16 = vand.u32 4294901760, %v23288_v62  ;;  %v23302_v11 = vand.u32 4294901760, %v23289_v9  ;;  %v23303_v20 = vld [vmem:[#allocation126_spill] sm:$0xff] }
 0x9d6   :  { %v23304_v46 = vand.u32 4294901760, %v23291_v26 }
 0x9d7   :  { %13577 = vmatpush1.bf16.msra.mxu0 %v23287_v29  ;;  %13797 = vmatpush1.bf16.msra.mxu1 %v13796_v18  ;;  %v8262_v29 = vsub.f32 %v23282_v2, %v23293_v14  ;;  %v8245_v18 = vand.u32 4294901760, %v8244_v58  ;;  %v13586_v14 = vpack.c.bf16 %v23298_v23, %v23297_v5  ;;  %v23299_v2 = vand.u32 4294901760, %v23152_v19 }
 0x9d8   :  { %13579 = vmatprep.subr.bf16.mxu0 %v23290_v38  ;;  %v23295_v38 = vand.u32 4294901760, %v23284_v0  ;;  %13799 = vmatprep.subr.bf16.mxu1 %v13798_v48  ;;  %v8274_v48 = vsub.f32 %v23288_v62, %v23301_v16  ;;  %v8292_v1 = vsub.f32 %v23291_v26, %v23304_v46  ;;  %v23305_v5 = vand.u32 4294901760, %v23292_v32 }
 0x9d9   :  { %v13588_v33 = vpack.c.bf16 %v23300_v54, %v23299_v2  ;;  %v8251_v16 = vand.u32 4294901760, %v8250_v60  ;;  %v8263_v23 = vand.u32 4294901760, %v8262_v29  ;;  %v8269_v58 = vand.u32 4294901760, %v8268_v7  ;;  %v23314_v29 = vld [vmem:[#allocation194_spill] sm:$0xff] }
 0x9da   :  { %v8280_v47 = vsub.f32 %v23284_v0, %v23295_v38  ;;  %v8286_v38 = vsub.f32 %v23289_v9, %v23302_v11  ;;  %v8304_v19 = vsub.f32 %v23292_v32, %v23305_v5  ;;  %v13806_v54 = vpack.c.bf16 %v8257_v3, %v8245_v18  ;;  %v23311_v9 = vld [vmem:[#allocation191_spill] sm:$0xff]  ;;  %v23312_v32 = vld [vmem:[#allocation129_spill] sm:$0xff]  ;;  %v23321_v7 = vld [vmem:[#allocation98_spill] sm:$0xff] }
 0x9db   :  { %13581 = vmatpush1.bf16.msra.mxu0 %v23296_v52  ;;  %13801 = vmatpush1.bf16.msra.mxu1 %v13800_v8  ;;  %v23308_v11 = vand.u32 4294901760, %v23154_v39  ;;  %v23310_v52 = vld [vmem:[#allocation190_spill] sm:$0xff]  ;;  %v22098_v5 = vand.u32 4294901760, %v23311_v9  ;;  %v8275_v2 = vand.u32 4294901760, %v8274_v48  ;;  %v23313_v8 = vld [vmem:[#allocation193_spill] sm:$0xff]  ;;  %v23315_v39 = vand.u32 4294901760, %v23306_v45 }
 0x9dc   :  { %13583 = vmatprep.subr.bf16.mxu0 %v23303_v20  ;;  %v8281_v59 = vand.u32 4294901760, %v8280_v47  ;;  %13803 = vmatprep.subr.bf16.mxu1 %v13802_v28  ;;  %v23309_v20 = vand.u32 4294901760, %v23155_v34  ;;  %v22099_v26 = vand.u32 4294901760, %v23310_v52  ;;  %v8287_v40 = vand.u32 4294901760, %v8286_v38 }
 0x9dd   :  { %v8293_v47 = vand.u32 4294901760, %v8292_v1  ;;  %v8305_v3 = vand.u32 4294901760, %v8304_v19  ;;  %v8298_v34 = vsub.f32 %v23306_v45, %v23315_v39  ;;  %v23316_v28 = vand.u32 4294901760, %v23307_v6 }
 0x9de   :  { %v13590_v46 = vpack.c.bf16 %v23309_v20, %v23308_v11  ;;  %v13808_v20 = vpack.c.bf16 %v8263_v23, %v8251_v16  ;;  %v23317_v48 = vand.u32 4294901760, %v23158_v51  ;;  %v23318_v38 = vand.u32 4294901760, %v23159_v12  ;;  %v23323_v16 = vld [vmem:[#allocation197_spill] sm:$0xff] }
 0x9df   :  { %13585 = vmatpush1.bf16.msra.mxu0 %v23312_v32  ;;  %v8310_v18 = vsub.f32 %v23307_v6, %v23316_v28  ;;  %13805 = vmatpush1.bf16.msra.mxu1 %v13804_v4  ;;  %v13810_v60 = vpack.c.bf16 %v8281_v59, %v8269_v58  ;;  %v23320_v1 = vand.u32 4294901760, %v23161_v43  ;;  %v8316_v39 = vsub.f32 %v23310_v52, %v22099_v26  ;;  %v23322_v4 = vld [vmem:[#allocation196_spill] sm:$0xff] }
 0x9e0   :  { %13587 = vmatprep.subr.bf16.mxu0 %v13586_v14  ;;  %v13592_v11 = vpack.c.bf16 %v23318_v38, %v23317_v48  ;;  %v23319_v14 = vand.u32 4294901760, %v23160_v63  ;;  %13807 = vmatprep.subr.bf16.mxu1 %v13806_v54  ;;  %v8328_v51 = vsub.f32 %v23311_v9, %v22098_v5  ;;  %v22100_v12 = vand.u32 4294901760, %v23322_v4  ;;  %v23324_v63 = vld [vmem:[#allocation95_spill] sm:$0xff] }
 0x9e1   :  { %v23325_v43 = vand.u32 4294901760, %v23162_v41  ;;  %v23326_v58 = vand.u32 4294901760, %v23163_v27  ;;  %v23327_v54 = vand.u32 4294901760, %v23313_v8  ;;  %v23328_v28 = vand.u32 4294901760, %v23314_v29  ;;  %v23329_v5 = vld [vmem:[#allocation199_spill] sm:$0xff]  ;;  %v23330_v41 = vld [vmem:[#allocation200_spill] sm:$0xff] }
 0x9e2   :  { %v13594_v19 = vpack.c.bf16 %v23320_v1, %v23319_v14  ;;  %7376 = vmatmul.mubr.f32.vlgmr.msra.gmra.mrb[26].mxu0 %v23321_v7  ;;  %v13812_v38 = vpack.c.bf16 %v8287_v40, %v8275_v2  ;;  %v13814_v14 = vpack.c.bf16 %v8305_v3, %v8293_v47  ;;  %v8299_v1 = vand.u32 4294901760, %v8298_v34 }
 0x9e3   :  { %13589 = vmatpush1.bf16.msra.mxu0 %v13588_v33  ;;  %7639 = vmatprep.mubr.f32.mxu0 %v23324_v63  ;;  %v13596_v59 = vpack.c.bf16 %v23326_v58, %v23325_v43  ;;  %v8322_v7 = vsub.f32 %v23313_v8, %v23327_v54  ;;  %v8334_v48 = vsub.f32 %v23314_v29, %v23328_v28  ;;  %v8311_v33 = vand.u32 4294901760, %v8310_v18 }
 0x9e4   :  { %13591 = vmatprep.subr.bf16.mxu0 %v13590_v46  ;;  %13809 = vmatpush1.bf16.msra.mxu1 %v13808_v20  ;;  %v22118_v26 = vand.u32 4294901760, %v23329_v5  ;;  %v22101_v23 = vand.u32 4294901760, %v23330_v41  ;;  %v22102_v27 = vand.u32 4294901760, %v18759_v37  ;;  %v22103_v43 = vand.u32 4294901760, %v18764_v53 }
 0x9e5   :  { %13811 = vmatprep.subr.bf16.mxu1 %v13810_v60  ;;  %v8317_v58 = vand.u32 4294901760, %v8316_v39  ;;  %v8329_v54 = vand.u32 4294901760, %v8328_v51  ;;  %v8340_v46 = vsub.f32 %v23322_v4, %v22100_v12  ;;  %v23331_v2 = vand.u32 4294901760, %v23323_v16 }
 0x9e6   :  { %v8323_v47 = vand.u32 4294901760, %v8322_v7  ;;  %v8335_v3 = vand.u32 4294901760, %v8334_v48  ;;  %v22110_v34 = vand.u32 4294901760, %v18767_v15  ;;  %v22109_v18 = vand.u32 4294901760, %v18770_v35 }
 0x9e7   :  { %v8352_v40 = vsub.f32 %v23323_v16, %v23331_v2  ;;  %13593 = vmatpush1.bf16.msra.mxu0 %v13592_v11  ;;  %v13816_v20 = vpack.c.bf16 %v8311_v33, %v8299_v1  ;;  %v23332_v60 = vand.u32 4294901760, %v23164_v17  ;;  %v23333_v39 = vand.u32 4294901760, %v23165_v61 }
 0x9e8   :  { %13595 = vmatprep.subr.bf16.mxu0 %v13594_v19  ;;  %v22105_v28 = vand.u32 4294901760, %v18772_v22  ;;  %v22104_v12 = vand.u32 4294901760, %v18774_v57  ;;  %13813 = vmatpush1.bf16.msra.mxu1 %v13812_v38  ;;  %v8346_v11 = vsub.f32 %v23329_v5, %v22118_v26  ;;  %v8358_v7 = vsub.f32 %v23330_v41, %v22101_v23 }
 0x9e9   :  { %v13598_v51 = vpack.c.bf16 %v23333_v39, %v23332_v60  ;;  %v8364_v17 = vsub.f32 %v18759_v37, %v22102_v27  ;;  %v8376_v61 = vsub.f32 %v18764_v53, %v22103_v43  ;;  %13815 = vmatprep.subr.bf16.mxu1 %v13814_v14  ;;  %v23334_v19 = vand.u32 4294901760, %v23166_v13 }
 0x9ea   :  { %v23335_v48 = vand.u32 4294901760, %v22960_v55  ;;  %v13818_v1 = vpack.c.bf16 %v8329_v54, %v8317_v58  ;;  %v8341_v33 = vand.u32 4294901760, %v8340_v46  ;;  %v8353_v2 = vand.u32 4294901760, %v8352_v40 }
 0x9eb   :  { %13597 = vmatpush1.bf16.msra.mxu0 %v13596_v59  ;;  %v13820_v60 = vpack.c.bf16 %v8335_v3, %v8323_v47  ;;  %v23336_v39 = vand.u32 4294901760, %v23167_v24  ;;  %v23337_v23 = vand.u32 4294901760, %v23168_v56  ;;  %v8370_v43 = vsub.f32 %v18767_v15, %v22110_v34 }
 0x9ec   :  { %v13600_v38 = vpack.c.bf16 %v23335_v48, %v23334_v19  ;;  %v8382_v13 = vsub.f32 %v18770_v35, %v22109_v18  ;;  %13599 = vmatprep.subr.bf16.mxu0 %v13598_v51  ;;  %v8388_v55 = vsub.f32 %v18772_v22, %v22105_v28  ;;  %v8400_v24 = vsub.f32 %v18774_v57, %v22104_v12  ;;  %v23339_v51 = vld [vmem:[#allocation71_spill] sm:$0xff]  ;;  %v23343_v28 = vld [vmem:[#allocation76_spill] sm:$0xff] }
 0x9ed   :  { %v13602_v27 = vpack.c.bf16 %v23337_v23, %v23336_v39  ;;  %v22107_v56 = vand.u32 4294901760, %v18776_v31  ;;  %v22106_v23 = vand.u32 4294901760, %v18778_v10  ;;  %13817 = vmatpush1.bf16.msra.mxu1 %v13816_v20  ;;  %v8347_v59 = vand.u32 4294901760, %v8346_v11  ;;  %v23341_v39 = vld [vmem:[#allocation75_spill] sm:$0xff] }
 0x9ee   :  { %v8359_v14 = vand.u32 4294901760, %v8358_v7  ;;  %v8365_v58 = vand.u32 4294901760, %v8364_v17  ;;  %v8377_v54 = vand.u32 4294901760, %v8376_v61  ;;  %13819 = vmatprep.subr.bf16.mxu1 %v13818_v1  ;;  %v13822_v46 = vpack.c.bf16 %v8353_v2, %v8341_v33 }
 0x9ef   :  { %v22108_v40 = vand.u32 4294901760, %v18781_v21  ;;  %v22111_v47 = vand.u32 4294901760, %v18783_v30  ;;  %13601 = vmatpush1.bf16.msra.mxu0 %v13600_v38  ;;  %v23338_v3 = vand.u32 4294901760, %v23169_v44  ;;  %v23340_v19 = vand.u32 4294901760, %v23339_v51 }
 0x9f0   :  { %v23342_v12 = vand.u32 4294901760, %v23341_v39  ;;  %v23344_v20 = vand.u32 4294901760, %v23343_v28  ;;  %v8371_v7 = vand.u32 4294901760, %v8370_v43  ;;  %v8383_v17 = vand.u32 4294901760, %v8382_v13  ;;  %13603 = vmatprep.subr.bf16.mxu0 %v13602_v27  ;;  %v23346_v28 = vld [vmem:[#allocation210_spill] sm:$0xff]  ;;  %v23347_v13 = vld [vmem:[#allocation212_spill] sm:$0xff] }
 0x9f1   :  { %v13604_v48 = vpack.c.bf16 %v23340_v19, %v23338_v3  ;;  %v8389_v61 = vand.u32 4294901760, %v8388_v55  ;;  %v8401_v1 = vand.u32 4294901760, %v8400_v24  ;;  %v8394_v33 = vsub.f32 %v18776_v31, %v22107_v56  ;;  %13821 = vmatpush1.bf16.msra.mxu1 %v13820_v60  ;;  %v23345_v3 = vld [vmem:[#allocation209_spill] sm:$0xff]  ;;  %v23349_v60 = vld [vmem:[#allocation86_spill] sm:$0xff]  ;;  %v23353_v39 = vld [vmem:[#allocation91_spill] sm:$0xff] }
 0x9f2   :  { %v13606_v11 = vpack.c.bf16 %v23344_v20, %v23342_v12  ;;  %v8406_v44 = vsub.f32 %v18778_v10, %v22106_v23  ;;  %v13824_v38 = vpack.c.bf16 %v8359_v14, %v8347_v59  ;;  %v13826_v2 = vpack.c.bf16 %v8377_v54, %v8365_v58  ;;  %13823 = vmatprep.subr.bf16.mxu1 %v13822_v46  ;;  %v23348_v24 = vld [vmem:[#allocation213_spill] sm:$0xff]  ;;  %v23351_v14 = vld [vmem:[#allocation88_spill] sm:$0xff]  ;;  %v23355_v20 = vld [vmem:[#allocation54_spill] sm:$0xff] }
 0x9f3   :  { %v22113_v51 = vand.u32 4294901760, %v23345_v3  ;;  %v22112_v12 = vand.u32 4294901760, %v23346_v28  ;;  %v8412_v27 = vsub.f32 %v18781_v21, %v22108_v40  ;;  %v8424_v43 = vsub.f32 %v18783_v30, %v22111_v47  ;;  %13605 = vmatpush1.bf16.msra.mxu0 %v13604_v48 }
 0x9f4   :  { %v22114_v55 = vand.u32 4294901760, %v23347_v13  ;;  %v22115_v19 = vand.u32 4294901760, %v23348_v24  ;;  %v23350_v59 = vand.u32 4294901760, %v23349_v60  ;;  %v23352_v58 = vand.u32 4294901760, %v23351_v14  ;;  %13607 = vmatprep.subr.bf16.mxu0 %v13606_v11 }
 0x9f5   :  { %v23354_v46 = vand.u32 4294901760, %v23353_v39  ;;  %v23356_v23 = vand.u32 4294901760, %v23355_v20  ;;  %v13828_v40 = vpack.c.bf16 %v8383_v17, %v8371_v7  ;;  %v13830_v18 = vpack.c.bf16 %v8401_v1, %v8389_v61  ;;  %13825 = vmatpush1.bf16.msra.mxu1 %v13824_v38  ;;  %v23359_v61 = vld [vmem:[#allocation46_spill] sm:$0xff]  ;;  %v23363_v20 = vld [vmem:[#allocation51_spill] sm:$0xff] }
 0x9f6   :  { %v13608_v54 = vpack.c.bf16 %v23352_v58, %v23350_v59  ;;  %v8395_v34 = vand.u32 4294901760, %v8394_v33  ;;  %v8407_v47 = vand.u32 4294901760, %v8406_v44  ;;  %v8418_v48 = vsub.f32 %v23345_v3, %v22113_v51  ;;  %v23357_v59 = vld [vmem:[#allocation214_spill] sm:$0xff]  ;;  %v23358_v58 = vld [vmem:[#allocation216_spill] sm:$0xff]  ;;  %13827 = vmatprep.subr.bf16.mxu1 %v13826_v2 }
 0x9f7   :  { %v13610_v56 = vpack.c.bf16 %v23356_v23, %v23354_v46  ;;  %v8430_v60 = vsub.f32 %v23346_v28, %v22112_v12  ;;  %v22116_v14 = vand.u32 4294901760, %v23357_v59  ;;  %v22117_v39 = vand.u32 4294901760, %v23358_v58  ;;  %v23361_v33 = vld [vmem:[#allocation44_spill] sm:$0xff] }
 0x9f8   :  { %v8413_v23 = vand.u32 4294901760, %v8412_v27  ;;  %v8425_v11 = vand.u32 4294901760, %v8424_v43  ;;  %v8436_v7 = vsub.f32 %v23347_v13, %v22114_v55  ;;  %v8448_v17 = vsub.f32 %v23348_v24, %v22115_v19  ;;  %13609 = vmatpush1.bf16.msra.mxu0 %v13608_v54  ;;  %v23365_v27 = vld [vmem:[#allocation50_spill] sm:$0xff] }
 0x9f9   :  { %v23360_v1 = vand.u32 4294901760, %v23359_v61  ;;  %v23362_v44 = vand.u32 4294901760, %v23361_v33  ;;  %13611 = vmatprep.subr.bf16.mxu0 %v13610_v56  ;;  %v13832_v46 = vpack.c.bf16 %v8407_v47, %v8395_v34  ;;  %v23364_v2 = vand.u32 4294901760, %v23363_v20  ;;  %13829 = vmatpush1.bf16.msra.mxu1 %v13828_v40  ;;  %v23367_v47 = vld [vmem:[#allocation52_spill] sm:$0xff] }
 0x9fa   :  { %v23366_v43 = vand.u32 4294901760, %v23365_v27  ;;  %v8419_v51 = vand.u32 4294901760, %v8418_v48  ;;  %v8431_v55 = vand.u32 4294901760, %v8430_v60  ;;  %v8442_v19 = vsub.f32 %v23357_v59, %v22116_v14  ;;  %13831 = vmatprep.subr.bf16.mxu1 %v13830_v18  ;;  %v23369_v33 = vld [vmem:[#allocation56_spill] sm:$0xff]  ;;  %v23371_v48 = vld [vmem:[#allocation33_spill] sm:$0xff] }
 0x9fb   :  { %v13612_v38 = vpack.c.bf16 %v23362_v44, %v23360_v1  ;;  %v8454_v54 = vsub.f32 %v23358_v58, %v22117_v39  ;;  %v13834_v61 = vpack.c.bf16 %v8425_v11, %v8413_v23  ;;  %v8437_v56 = vand.u32 4294901760, %v8436_v7  ;;  %v23373_v20 = vld [vmem:[#allocation36_spill] sm:$0xff]  ;;  %v23375_v23 = vld [vmem:[#allocation49_spill] sm:$0xff]  ;;  %v23377_v7 = vld [vmem:[#allocation63_spill] sm:$0xff] }
 0x9fc   :  { %v13614_v12 = vpack.c.bf16 %v23366_v43, %v23364_v2  ;;  %v8449_v34 = vand.u32 4294901760, %v8448_v17  ;;  %v23368_v1 = vand.u32 4294901760, %v23367_v47  ;;  %v23370_v44 = vand.u32 4294901760, %v23369_v33  ;;  %v23379_v47 = vld [vmem:[#allocation69_spill] sm:$0xff] }
 0x9fd   :  { %13613 = vmatpush1.bf16.msra.mxu0 %v13612_v38  ;;  %v23372_v60 = vand.u32 4294901760, %v23371_v48  ;;  %v23374_v2 = vand.u32 4294901760, %v23373_v20  ;;  %13833 = vmatpush1.bf16.msra.mxu1 %v13832_v46  ;;  %v13836_v43 = vpack.c.bf16 %v8431_v55, %v8419_v51  ;;  %v8443_v14 = vand.u32 4294901760, %v8442_v19  ;;  %v23383_v51 = vld [vmem:[#allocation205_spill] sm:$0xff]  ;;  %v23384_v55 = vld [vmem:[#allocation206_spill] sm:$0xff] }
 0x9fe   :  { %v13616_v40 = vpack.c.bf16 %v23370_v44, %v23368_v1  ;;  %13615 = vmatprep.subr.bf16.mxu0 %v13614_v12  ;;  %v8455_v39 = vand.u32 4294901760, %v8454_v54  ;;  %13835 = vmatprep.subr.bf16.mxu1 %v13834_v61  ;;  %v13838_v18 = vpack.c.bf16 %v8449_v34, %v8437_v56  ;;  %v23376_v11 = vand.u32 4294901760, %v23375_v23  ;;  %v23381_v1 = vld [vmem:[#allocation72_spill] sm:$0xff]  ;;  %v23385_v46 = vld [vmem:[#allocation78_spill] sm:$0xff]  ;;  %v23387_v61 = vld [vmem:[#allocation81_spill] sm:$0xff] }
 0x9ff   :  { %v13618_v27 = vpack.c.bf16 %v23374_v2, %v23372_v60  ;;  %v23378_v17 = vand.u32 4294901760, %v23377_v7  ;;  %v23380_v12 = vand.u32 4294901760, %v23379_v47  ;;  %v23382_v33 = vand.u32 4294901760, %v23381_v1  ;;  %v23391_v20 = vld [vmem:[#allocation90_spill] sm:$0xff]  ;;  %v23393_v23 = vld [vmem:[#allocation132_spill] sm:$0xff]  ;;  %v23397_v7 = vld [vmem:[#allocation93_spill] sm:$0xff] }
 0xa00   :  { %v13840_v48 = vpack.c.bf16 %v8455_v39, %v8443_v14  ;;  %v13842_v19 = vpack.c.bf16 %v23384_v55, %v23383_v51  ;;  %v23386_v54 = vand.u32 4294901760, %v23385_v46  ;;  %v23388_v56 = vand.u32 4294901760, %v23387_v61  ;;  %v23395_v39 = vld [vmem:[#allocation135_spill] sm:$0xff]  ;;  %v23401_v1 = vld [vmem:[#allocation80_spill] sm:$0xff] }
 0xa01   :  { %13617 = vmatpush1.bf16.msra.mxu0 %v13616_v40  ;;  %v13620_v38 = vpack.c.bf16 %v23378_v17, %v23376_v11  ;;  %v13622_v44 = vpack.c.bf16 %v23382_v33, %v23380_v12  ;;  %13837 = vmatpush1.bf16.msra.mxu1 %v13836_v43  ;;  %v23389_v40 = vld [vmem:[#allocation87_spill] sm:$0xff]  ;;  %v23392_v2 = vand.u32 4294901760, %v23391_v20  ;;  %v23394_v43 = vld [vmem:[#allocation133_spill] sm:$0xff]  ;;  %v23398_v17 = vand.u32 4294901760, %v23397_v7  ;;  %v23404_v46 = vld [vmem:[#allocation104_spill] sm:$0xff] }
 0xa02   :  { %13619 = vmatprep.subr.bf16.mxu0 %v13618_v27  ;;  %13839 = vmatprep.subr.bf16.mxu1 %v13838_v18  ;;  %v13624_v34 = vpack.c.bf16 %v23388_v56, %v23386_v54  ;;  %v23390_v60 = vand.u32 4294901760, %v23389_v40  ;;  %v13844_v14 = vpack.c.bf16 %v23394_v43, %v23393_v23  ;;  %v23396_v18 = vld [vmem:[#allocation136_spill] sm:$0xff]  ;;  %v23402_v33 = vld [vmem:[#allocation103_spill] sm:$0xff]  ;;  %v23409_v40 = vld [vmem:[#allocation142_spill] sm:$0xff] }
 0xa03   :  { %v13846_v11 = vpack.c.bf16 %v23396_v18, %v23395_v39  ;;  %v23407_v61 = vld [vmem:[#allocation139_spill] sm:$0xff]  ;;  %v23410_v20 = vld [vmem:[#allocation106_spill] sm:$0xff] }
 0xa04   :  { %v13626_v27 = vpack.c.bf16 %v23392_v2, %v23390_v60  ;;  %v23411_v2 = vand.u32 4294901760, %v23410_v20  ;;  %v23412_v7 = vld [vmem:[#allocation107_spill] sm:$0xff] }
 0xa05   :  { %13621 = vmatpush1.bf16.msra.mxu0 %v13620_v38  ;;  %13841 = vmatpush1.bf16.msra.mxu1 %v13840_v48  ;;  %v23399_v38 = vld [vmem:[#allocation100_spill] sm:$0xff]  ;;  %v23405_v48 = vand.u32 4294901760, %v23404_v46 }
 0xa06   :  { %13623 = vmatprep.subr.bf16.mxu0 %v13622_v44  ;;  %13843 = vmatprep.subr.bf16.mxu1 %v13842_v19  ;;  %v23400_v47 = vand.u32 4294901760, %v23399_v38  ;;  %v23403_v44 = vand.u32 4294901760, %v23402_v33  ;;  %v23406_v19 = vld [vmem:[#allocation138_spill] sm:$0xff]  ;;  %v23414_v38 = vld [vmem:[#allocation109_spill] sm:$0xff]  ;;  %v23418_v46 = vld [vmem:[#allocation144_spill] sm:$0xff] }
 0xa07   :  { %v13848_v56 = vpack.c.bf16 %v23407_v61, %v23406_v19  ;;  %v23416_v33 = vld [vmem:[#allocation110_spill] sm:$0xff] }
 0xa08   :  { %v13628_v12 = vpack.c.bf16 %v23400_v47, %v23398_v17  ;;  %8460 = vmatmul.mubr.f32.vlgmr.msra.gmra.mrb[16].mxu1 %v23401_v1  ;;  %v13630_v54 = vpack.c.bf16 %v23405_v48, %v23403_v44  ;;  %v23415_v47 = vand.u32 4294901760, %v23414_v38  ;;  %v23419_v48 = vld [vmem:[#allocation145_spill] sm:$0xff]  ;;  %v23427_v38 = vld [vmem:[#allocation116_spill] sm:$0xff] }
 0xa09   :  { %13625 = vmatpush1.bf16.msra.mxu0 %v13624_v34  ;;  %13845 = vmatpush1.bf16.msra.mxu1 %v13844_v14  ;;  %v23408_v34 = vld [vmem:[#allocation141_spill] sm:$0xff]  ;;  %v23417_v14 = vand.u32 4294901760, %v23416_v33  ;;  %v13852_v26 = vpack.c.bf16 %v23419_v48, %v23418_v46  ;;  %v23428_v33 = vand.u32 4294901760, %v23427_v38  ;;  %v23432_v46 = vld [vmem:[#allocation154_spill] sm:$0xff] }
 0xa0a   :  { %13627 = vmatprep.subr.bf16.mxu0 %v13626_v27  ;;  %8660 = vmatprep.mubr.f32.mxu1 %v19000_v49  ;;  %v13850_v60 = vpack.c.bf16 %v23409_v40, %v23408_v34  ;;  %v23413_v27 = vand.u32 4294901760, %v23412_v7  ;;  %v23423_v40 = vld [vmem:[#allocation113_spill] sm:$0xff] }
 0xa0b   :  { %13847 = vmatprep.subr.bf16.mxu1 %v13846_v11  ;;  %v13634_v44 = vpack.c.bf16 %v23417_v14, %v23415_v47  ;;  %v23420_v11 = vld [vmem:[#allocation148_spill] sm:$0xff]  ;;  %v23424_v7 = vand.u32 4294901760, %v23423_v40  ;;  %v23430_v14 = vld [vmem:[#allocation151_spill] sm:$0xff] }
 0xa0c   :  { %v13632_v17 = vpack.c.bf16 %v23413_v27, %v23411_v2  ;;  %v13854_v1 = vpack.c.bf16 %v23420_v11, %v23241_v36  ;;  %v23435_v36 = vld [vmem:[#allocation119_spill] sm:$0xff] }
 0xa0d   :  { %13629 = vmatpush1.bf16.msra.mxu0 %v13628_v12  ;;  %13849 = vmatpush1.bf16.msra.mxu1 %v13848_v56  ;;  %v23421_v12 = vld [vmem:[#allocation112_spill] sm:$0xff]  ;;  %v23429_v56 = vld [vmem:[#allocation150_spill] sm:$0xff]  ;;  %v23436_v40 = vand.u32 4294901760, %v23435_v36 }
 0xa0e   :  { %13631 = vmatprep.subr.bf16.mxu0 %v13630_v54  ;;  %13851 = vmatprep.subr.bf16.mxu1 %v13850_v60  ;;  %v23422_v20 = vand.u32 4294901760, %v23421_v12  ;;  %v23425_v54 = vld [vmem:[#allocation115_spill] sm:$0xff]  ;;  %v13856_v48 = vpack.c.bf16 %v23430_v14, %v23429_v56  ;;  %v23431_v60 = vld [vmem:[#allocation153_spill] sm:$0xff]  ;;  %v23444_v56 = vld [vmem:[#allocation160_spill] sm:$0xff] }
 0xa0f   :  { %v23426_v27 = vand.u32 4294901760, %v23425_v54  ;;  %v13858_v11 = vpack.c.bf16 %v23432_v46, %v23431_v60  ;;  %v23439_v54 = vld [vmem:[#allocation122_spill] sm:$0xff]  ;;  %v23447_v60 = vld [vmem:[#allocation125_spill] sm:$0xff] }
 0xa10   :  { %v13636_v2 = vpack.c.bf16 %v23424_v7, %v23422_v20  ;;  %v23440_v38 = vand.u32 4294901760, %v23439_v54  ;;  %v23448_v36 = vand.u32 4294901760, %v23447_v60 }
 0xa11   :  { %13633 = vmatpush1.bf16.msra.mxu0 %v13632_v17  ;;  %v13638_v47 = vpack.c.bf16 %v23428_v33, %v23426_v27  ;;  %13853 = vmatpush1.bf16.msra.mxu1 %v13852_v26  ;;  %v23433_v17 = vld [vmem:[#allocation118_spill] sm:$0xff]  ;;  %v23441_v26 = vld [vmem:[#allocation156_spill] sm:$0xff]  ;;  %v23442_v33 = vld [vmem:[#allocation157_spill] sm:$0xff] }
 0xa12   :  { %13635 = vmatprep.subr.bf16.mxu0 %v13634_v44  ;;  %13855 = vmatprep.subr.bf16.mxu1 %v13854_v1  ;;  %v23434_v12 = vand.u32 4294901760, %v23433_v17  ;;  %v23437_v44 = vld [vmem:[#allocation121_spill] sm:$0xff]  ;;  %v13860_v14 = vpack.c.bf16 %v23442_v33, %v23441_v26  ;;  %v23443_v1 = vld [vmem:[#allocation159_spill] sm:$0xff] }
 0xa13   :  { %v23438_v7 = vand.u32 4294901760, %v23437_v44  ;;  %v13862_v46 = vpack.c.bf16 %v23444_v56, %v23443_v1  ;;  %v23451_v44 = vld [vmem:[#allocation128_spill] sm:$0xff]  ;;  %v23457_v1 = vld [vmem:[#allocation217_spill] sm:$0xff] }
 0xa14   :  { %v13640_v20 = vpack.c.bf16 %v23436_v40, %v23434_v12  ;;  %v23452_v54 = vand.u32 4294901760, %v23451_v44  ;;  %v23458_v60 = vand.u32 4294901760, %v23457_v1  ;;  %v23463_v44 = vld [vmem:[#allocation173_spill] sm:$0xff]  ;;  %v23466_v1 = vld [vmem:[#allocation176_spill] sm:$0xff] }
 0xa15   :  { %13637 = vmatpush1.bf16.msra.mxu0 %v13636_v2  ;;  %v13642_v27 = vpack.c.bf16 %v23440_v38, %v23438_v7  ;;  %13857 = vmatpush1.bf16.msra.mxu1 %v13856_v48  ;;  %v23445_v2 = vld [vmem:[#allocation124_spill] sm:$0xff]  ;;  %v13864_v48 = vpack.c.bf16 %v23267_v42, %v23266_v25  ;;  %v23454_v38 = vld [vmem:[#allocation166_spill] sm:$0xff] }
 0xa16   :  { %13639 = vmatprep.subr.bf16.mxu0 %v13638_v47  ;;  %13859 = vmatprep.subr.bf16.mxu1 %v13858_v11  ;;  %v23446_v17 = vand.u32 4294901760, %v23445_v2  ;;  %v23449_v47 = vld [vmem:[#allocation127_spill] sm:$0xff]  ;;  %v23453_v11 = vld [vmem:[#allocation165_spill] sm:$0xff] }
 0xa17   :  { %v23450_v40 = vand.u32 4294901760, %v23449_v47  ;;  %v13866_v56 = vpack.c.bf16 %v23454_v38, %v23453_v11 }
 0xa18   :  { %v13644_v12 = vpack.c.bf16 %v23448_v36, %v23446_v17  ;;  %v23460_v36 = vld [vmem:[#allocation169_spill] sm:$0xff] }
 0xa19   :  { %13641 = vmatpush1.bf16.msra.mxu0 %v13640_v20  ;;  %v13646_v7 = vpack.c.bf16 %v23452_v54, %v23450_v40  ;;  %13861 = vmatpush1.bf16.msra.mxu1 %v13860_v14  ;;  %v23455_v20 = vld [vmem:[#allocation130_spill] sm:$0xff]  ;;  %v23461_v14 = vld [vmem:[#allocation171_spill] sm:$0xff] }
 0xa1a   :  { %13643 = vmatprep.subr.bf16.mxu0 %v13642_v27  ;;  %13863 = vmatprep.subr.bf16.mxu1 %v13862_v46  ;;  %v23456_v2 = vand.u32 4294901760, %v23455_v20  ;;  %v23459_v27 = vld [vmem:[#allocation168_spill] sm:$0xff]  ;;  %v13870_v40 = vpack.c.bf16 %v23461_v14, %v23277_v50  ;;  %v23462_v46 = vld [vmem:[#allocation79_spill] sm:$0xff]  ;;  %v23465_v20 = vld [vmem:[#allocation42_spill] sm:$0xff] }
 0xa1b   :  { %v13868_v47 = vpack.c.bf16 %v23460_v36, %v23459_v27 }
 0xa1c   :  { %v13648_v17 = vpack.c.bf16 %v23458_v60, %v23456_v2  ;;  %v23469_v2 = vld [vmem:[#allocation180_spill] sm:$0xff] }
 0xa1d   :  { %13645 = vmatpush1.bf16.msra.mxu0 %v13644_v12  ;;  %13865 = vmatpush1.bf16.msra.mxu1 %v13864_v48  ;;  %v23464_v12 = vld [vmem:[#allocation174_spill] sm:$0xff]  ;;  %v23467_v48 = vld [vmem:[#allocation84_spill] sm:$0xff]  ;;  %v13876_v60 = vpack.c.bf16 %v23469_v2, %v23288_v62 }
 0xa1e   :  { %13647 = vmatprep.subr.bf16.mxu0 %v13646_v7  ;;  %13867 = vmatprep.subr.bf16.mxu1 %v13866_v56  ;;  %v13872_v54 = vpack.c.bf16 %v23464_v12, %v23463_v44  ;;  %v13874_v7 = vpack.c.bf16 %v23284_v0, %v23466_v1  ;;  %v23468_v56 = vld [vmem:[#allocation32_spill] sm:$0xff]  ;;  %v23472_v12 = vld [vmem:[#allocation35_spill] sm:$0xff] }
 0xa21   :  { %13649 = vmatpush1.bf16.msra.mxu0 %v13648_v17  ;;  %13869 = vmatpush1.bf16.msra.mxu1 %v13868_v47  ;;  %v23470_v17 = vld [vmem:[#allocation182_spill] sm:$0xff]  ;;  %v23471_v47 = vld [vmem:[#allocation183_spill] sm:$0xff] }
 0xa22   :  { %13651 = vmatprep.subr.bf16.mxu0 %v23462_v46  ;;  %13871 = vmatprep.subr.bf16.mxu1 %v13870_v40  ;;  %v13878_v46 = vpack.c.bf16 %v23471_v47, %v23470_v17  ;;  %v23473_v40 = vld [vmem:[#allocation60_spill] sm:$0xff] }
 0xa24   :  { %7641 = vmatmul.mubr.f32.vlgmr.msra.gmra.mrb[26].mxu0 %v23465_v20 }
 0xa25   :  { %13653 = vmatpush1.bf16.msra.mxu0 %v23467_v48  ;;  %7776 = vmatprep.mubr.f32.mxu0 %v23324_v63  ;;  %v13880_v48 = vpack.c.bf16 %v23307_v6, %v23306_v45  ;;  %v13882_v63 = vpack.c.bf16 %v23311_v9, %v23310_v52 }
 0xa26   :  { %13655 = vmatprep.subr.bf16.mxu0 %v23468_v56  ;;  %13873 = vmatpush1.bf16.msra.mxu1 %v13872_v54  ;;  %v23474_v54 = vld [vmem:[#allocation40_spill] sm:$0xff]  ;;  %v23475_v56 = vld [vmem:[#allocation41_spill] sm:$0xff] }
 0xa27   :  { %13875 = vmatprep.subr.bf16.mxu1 %v13874_v7  ;;  %v13884_v7 = vpack.c.bf16 %v23314_v29, %v23313_v8 }
 0xa29   :  { %13657 = vmatpush1.bf16.msra.mxu0 %v23472_v12  ;;  %v13886_v12 = vpack.c.bf16 %v23323_v16, %v23322_v4 }
 0xa2a   :  { %13659 = vmatprep.subr.bf16.mxu0 %v23473_v40  ;;  %13877 = vmatpush1.bf16.msra.mxu1 %v13876_v60  ;;  %v23476_v60 = vld [vmem:[#allocation58_spill] sm:$0xff]  ;;  %v23477_v40 = vld [vmem:[#allocation64_spill] sm:$0xff] }
 0xa2b   :  { %13879 = vmatprep.subr.bf16.mxu1 %v13878_v46  ;;  %v13888_v46 = vpack.c.bf16 %v23330_v41, %v23329_v5 }
 0xa2d   :  { %13661 = vmatpush1.bf16.msra.mxu0 %v23474_v54  ;;  %v13890_v54 = vpack.c.bf16 %v18764_v53, %v18759_v37 }
 0xa2e   :  { %13663 = vmatprep.subr.bf16.mxu0 %v23475_v56  ;;  %13881 = vmatpush1.bf16.msra.mxu1 %v13880_v48  ;;  %v23478_v48 = vld [vmem:[#allocation68_spill] sm:$0xff]  ;;  %v23479_v56 = vld [vmem:[#allocation73_spill] sm:$0xff] }
 0xa2f   :  { %13883 = vmatprep.subr.bf16.mxu1 %v13882_v63  ;;  %v13892_v63 = vpack.c.bf16 %v18770_v35, %v18767_v15 }
 0xa31   :  { %13665 = vmatpush1.bf16.msra.mxu0 %v23476_v60  ;;  %v13894_v60 = vpack.c.bf16 %v18774_v57, %v18772_v22 }
 0xa32   :  { %13667 = vmatprep.subr.bf16.mxu0 %v23477_v40  ;;  %13885 = vmatpush1.bf16.msra.mxu1 %v13884_v7  ;;  %v23480_v7 = vld [vmem:[#allocation77_spill] sm:$0xff] }
 0xa33   :  { %13887 = vmatprep.subr.bf16.mxu1 %v13886_v12  ;;  %v23481_v40 = vld [vmem:[#allocation89_spill] sm:$0xff]  ;;  %v13896_v12 = vpack.c.bf16 %v18778_v10, %v18776_v31 }
 0xa35   :  { %13669 = vmatpush1.bf16.msra.mxu0 %v23478_v48  ;;  %v13898_v48 = vpack.c.bf16 %v18783_v30, %v18781_v21 }
 0xa36   :  { %13671 = vmatprep.subr.bf16.mxu0 %v23479_v56  ;;  %13889 = vmatpush1.bf16.msra.mxu1 %v13888_v46  ;;  %v23482_v46 = vld [vmem:[#allocation30_spill] sm:$0xff]  ;;  %v23483_v56 = vld [vmem:[#allocation47_spill] sm:$0xff] }
 0xa37   :  { %13891 = vmatprep.subr.bf16.mxu1 %v13890_v54  ;;  %v13900_v54 = vpack.c.bf16 %v23346_v28, %v23345_v3  ;;  %v23490_v28 = vld [vmem:[#allocation85_spill] sm:$0xff] }
 0xa39   :  { %13673 = vmatpush1.bf16.msra.mxu0 %v23480_v7  ;;  %v13902_v7 = vpack.c.bf16 %v23348_v24, %v23347_v13  ;;  %v23491_v24 = vld [vmem:[#allocation83_spill] sm:$0xff] }
 0xa3a   :  { %13675 = vmatprep.subr.bf16.mxu0 %v23481_v40  ;;  %13893 = vmatpush1.bf16.msra.mxu1 %v13892_v63  ;;  %v23484_v63 = vld [vmem:[#allocation53_spill] sm:$0xff] }
 0xa3b   :  { %13895 = vmatprep.subr.bf16.mxu1 %v13894_v60  ;;  %v23485_v40 = vld [vmem:[#allocation29_spill] sm:$0xff]  ;;  %v13904_v60 = vpack.c.bf16 %v23358_v58, %v23357_v59 }
 0xa3d   :  { %13677 = vmatpush1.bf16.msra.mxu0 %v23482_v46  ;;  %v23486_v46 = vld [vmem:[#allocation39_spill] sm:$0xff] }
 0xa3e   :  { %13679 = vmatprep.subr.bf16.mxu0 %v23483_v56  ;;  %13897 = vmatpush1.bf16.msra.mxu1 %v13896_v12  ;;  %v23487_v56 = vld [vmem:[#allocation65_spill] sm:$0xff] }
 0xa3f   :  { %13899 = vmatprep.subr.bf16.mxu1 %v13898_v48  ;;  %v23488_v12 = vld [vmem:[#allocation57_spill] sm:$0xff]  ;;  %v23489_v48 = vld [vmem:[#allocation74_spill] sm:$0xff] }
 0xa41   :  { %13681 = vmatpush1.bf16.msra.mxu0 %v23484_v63  ;;  %v23492_v63 = vld [vmem:[#allocation131_spill] sm:$0xff] }
 0xa42   :  { %13683 = vmatprep.subr.bf16.mxu0 %v23485_v40  ;;  %13901 = vmatpush1.bf16.msra.mxu1 %v13900_v54  ;;  %v23493_v54 = vand.u32 4294901760, %v19000_v49  ;;  %v23494_v40 = vld [vmem:[#allocation134_spill] sm:$0xff]  ;;  %v23503_v49 = vld [vmem:[#allocation111_spill] sm:$0xff] }
 0xa43   :  { %13903 = vmatprep.subr.bf16.mxu1 %v13902_v7  ;;  %v23495_v7 = vld [vmem:[#allocation92_spill] sm:$0xff] }
 0xa45   :  { %13685 = vmatpush1.bf16.msra.mxu0 %v23486_v46  ;;  %v23496_v46 = vld [vmem:[#allocation102_spill] sm:$0xff] }
 0xa46   :  { %13687 = vmatprep.subr.bf16.mxu0 %v23487_v56  ;;  %13905 = vmatpush1.bf16.msra.mxu1 %v13904_v60  ;;  %v23497_v60 = vld [vmem:[#allocation137_spill] sm:$0xff]  ;;  %v23498_v56 = vld [vmem:[#allocation140_spill] sm:$0xff] }
 0xa47   :  { %13907 = vmatprep.subr.bf16.mxu1 %v23488_v12  ;;  %v23500_v12 = vld [vmem:[#allocation108_spill] sm:$0xff] }
 0xa49   :  { %13689 = vmatpush1.bf16.msra.mxu0 %v23489_v48  ;;  %8663 = vmatmul.mubr.f32.vlgmr.msra.gmra.mrb[16].mxu1 %v23490_v28  ;;  %v23499_v48 = vld [vmem:[#allocation105_spill] sm:$0xff] }
 0xa4a   :  { %13691 = vmatprep.subr.bf16.mxu0 %v23491_v24  ;;  %13909 = vmatpush1.bf16.msra.mxu1 %v23492_v63  ;;  %v23501_v24 = vld [vmem:[#allocation143_spill] sm:$0xff]  ;;  %v23502_v63 = vld [vmem:[#allocation146_spill] sm:$0xff] }
 0xa4b   :  { %8800 = vmatprep.mubr.f32.mxu1 %v23493_v54  ;;  %13911 = vmatprep.subr.bf16.mxu1 %v23494_v40  ;;  %v23504_v54 = vld [vmem:[#allocation114_spill] sm:$0xff]  ;;  %v23505_v40 = vld [vmem:[#allocation149_spill] sm:$0xff] }
 0xa4d   :  { %13693 = vmatpush1.bf16.msra.mxu0 %v23495_v7  ;;  %v23506_v7 = vld [vmem:[#allocation152_spill] sm:$0xff] }
 0xa4e   :  { %13695 = vmatprep.subr.bf16.mxu0 %v23496_v46  ;;  %13913 = vmatpush1.bf16.msra.mxu1 %v23497_v60  ;;  %v23507_v46 = vld [vmem:[#allocation117_spill] sm:$0xff]  ;;  %v23508_v60 = vld [vmem:[#allocation120_spill] sm:$0xff] }
 0xa4f   :  { %13915 = vmatprep.subr.bf16.mxu1 %v23498_v56  ;;  %v23509_v56 = vld [vmem:[#allocation155_spill] sm:$0xff] }
 0xa51   :  { %13697 = vmatpush1.bf16.msra.mxu0 %v23499_v48  ;;  %v23510_v48 = vld [vmem:[#allocation158_spill] sm:$0xff] }
 0xa52   :  { %13699 = vmatprep.subr.bf16.mxu0 %v23500_v12  ;;  %13917 = vmatpush1.bf16.msra.mxu1 %v23501_v24  ;;  %v23511_v12 = vld [vmem:[#allocation123_spill] sm:$0xff]  ;;  %v23512_v24 = vld [vmem:[#allocation126_spill] sm:$0xff] }
 0xa53   :  { %13919 = vmatprep.subr.bf16.mxu1 %v23502_v63  ;;  %v23513_v63 = vld [vmem:[#allocation161_spill] sm:$0xff] }
 0xa55   :  { %13701 = vmatpush1.bf16.msra.mxu0 %v23503_v49  ;;  %v23514_v49 = vld [vmem:[#allocation164_spill] sm:$0xff] }
 0xa56   :  { %13703 = vmatprep.subr.bf16.mxu0 %v23504_v54  ;;  %13921 = vmatpush1.bf16.msra.mxu1 %v23505_v40  ;;  %v23515_v54 = vld [vmem:[#allocation167_spill] sm:$0xff] }
 0xa57   :  { %13923 = vmatprep.subr.bf16.mxu1 %v23506_v7 }
 0xa59   :  { %13705 = vmatpush1.bf16.msra.mxu0 %v23507_v46  ;;  %v23516_v46 = vld [vmem:[#allocation101_spill] sm:$0xff] }
 0xa5a   :  { %13707 = vmatprep.subr.bf16.mxu0 %v23508_v60  ;;  %13925 = vmatpush1.bf16.msra.mxu1 %v23509_v56  ;;  %v23517_v60 = vld [vmem:[#allocation172_spill] sm:$0xff]  ;;  %v23518_v56 = vld [vmem:[#allocation175_spill] sm:$0xff] }
 0xa5b   :  { %13927 = vmatprep.subr.bf16.mxu1 %v23510_v48  ;;  %v23519_v48 = vld [vmem:[#allocation178_spill] sm:$0xff] }
 0xa5d   :  { %13709 = vmatpush1.bf16.msra.mxu0 %v23511_v12  ;;  %v23520_v12 = vld [vmem:[#allocation181_spill] sm:$0xff] }
 0xa5e   :  { %13711 = vmatprep.subr.bf16.mxu0 %v23512_v24  ;;  %13929 = vmatpush1.bf16.msra.mxu1 %v23513_v63  ;;  %v23521_v24 = vld [vmem:[#allocation184_spill] sm:$0xff]  ;;  %v23522_v63 = vld [vmem:[#allocation189_spill] sm:$0xff] }
 0xa5f   :  { %13931 = vmatprep.subr.bf16.mxu1 %v23514_v49  ;;  %v23523_v49 = vld [vmem:[#allocation192_spill] sm:$0xff] }
 0xa61   :  { %13713 = vmatpush1.bf16.msra.mxu0 %v23312_v32  ;;  %v23524_v32 = vld [vmem:[#allocation195_spill] sm:$0xff] }
 0xa62   :  { %13933 = vmatpush1.bf16.msra.mxu1 %v23515_v54  ;;  %v23525_v54 = vld [vmem:[#allocation198_spill] sm:$0xff] }
 0xa63   :  { %13935 = vmatprep.subr.bf16.mxu1 %v23516_v46  ;;  %v23527_v46 = vld [vmem:[#allocation202_spill] sm:$0xff] }
 0xa64   :  { %7778 = vmatmul.mubr.f32.vlgmr.msra.gmra.mrb[26].mxu0 %v23465_v20  ;;  %v23526_v20 = vld [vmem:[#allocation201_spill] sm:$0xff] }
 0xa66   :  { %13937 = vmatpush1.bf16.msra.mxu1 %v23517_v60  ;;  %v23528_v60 = vld [vmem:[#allocation203_spill] sm:$0xff] }
 0xa67   :  { %13939 = vmatprep.subr.bf16.mxu1 %v23518_v56  ;;  %v23529_v56 = vld [vmem:[#allocation204_spill] sm:$0xff] }
 0xa6a   :  { %13941 = vmatpush1.bf16.msra.mxu1 %v23519_v48  ;;  %v23530_v48 = vld [vmem:[#allocation207_spill] sm:$0xff] }
 0xa6b   :  { %13943 = vmatprep.subr.bf16.mxu1 %v23520_v12  ;;  %v23531_v12 = vld [vmem:[#allocation208_spill] sm:$0xff] }
 0xa6e   :  { %13945 = vmatpush1.bf16.msra.mxu1 %v23521_v24  ;;  %v23532_v24 = vld [vmem:[#allocation211_spill] sm:$0xff] }
 0xa6f   :  { %13947 = vmatprep.subr.bf16.mxu1 %v23522_v63 }
 0xa72   :  { %13949 = vmatpush1.bf16.msra.mxu1 %v23523_v49  ;;  %v23533_v49 = vand.u32 4294901760, %v23383_v51  ;;  %v23541_v51 = vld [vmem:[#allocation82_spill] sm:$0xff] }
 0xa73   :  { %13951 = vmatprep.subr.bf16.mxu1 %v23524_v32  ;;  %v23534_v32 = vand.u32 4294901760, %v23384_v55  ;;  %v23542_v55 = vand.u32 4294901760, %v23406_v19 }
 0xa75   :  { %v13970_v63 = vpack.c.bf16 %v23534_v32, %v23533_v49  ;;  %v23543_v49 = vand.u32 4294901760, %v23407_v61  ;;  %v23555_v61 = vld [vmem:[#allocation150_spill] sm:$0xff] }
 0xa76   :  { %13953 = vmatpush1.bf16.msra.mxu1 %v23525_v54  ;;  %v23535_v54 = vld [vmem:[#allocation215_spill] sm:$0xff] }
 0xa77   :  { %13955 = vmatprep.subr.bf16.mxu1 %v23526_v20  ;;  %v23536_v20 = vand.u32 4294901760, %v23393_v23  ;;  %v13976_v23 = vpack.c.bf16 %v23543_v49, %v23542_v55  ;;  %v23557_v55 = vld [vmem:[#allocation151_spill] sm:$0xff] }
 0xa7a   :  { %13957 = vmatpush1.bf16.msra.mxu1 %v23527_v46  ;;  %v23537_v46 = vand.u32 4294901760, %v23394_v43  ;;  %v23544_v43 = vand.u32 4294901760, %v23408_v34  ;;  %v23558_v34 = vand.u32 4294901760, %v23557_v55 }
 0xa7b   :  { %13959 = vmatprep.subr.bf16.mxu1 %v23528_v60 }
 0xa7c   :  { %v13972_v60 = vpack.c.bf16 %v23537_v46, %v23536_v20  ;;  %v23553_v20 = vld [vmem:[#allocation148_spill] sm:$0xff] }
 0xa7d   :  { %v23554_v19 = vand.u32 4294901760, %v23553_v20 }
 0xa7e   :  { %13961 = vmatpush1.bf16.msra.mxu1 %v23529_v56  ;;  %v23538_v56 = vand.u32 4294901760, %v23395_v39 }
 0xa7f   :  { %13963 = vmatprep.subr.bf16.mxu1 %v23530_v48  ;;  %v23539_v48 = vand.u32 4294901760, %v23396_v18  ;;  %v23547_v18 = vld [vmem:[#allocation144_spill] sm:$0xff] }
 0xa82   :  { %13965 = vmatpush1.bf16.msra.mxu1 %v23531_v12  ;;  %v13974_v12 = vpack.c.bf16 %v23539_v48, %v23538_v56  ;;  %v23548_v56 = vand.u32 4294901760, %v23547_v18  ;;  %v23549_v48 = vld [vmem:[#allocation145_spill] sm:$0xff] }
 0xa83   :  { %13967 = vmatprep.subr.bf16.mxu1 %v23532_v24  ;;  %v23540_v24 = vand.u32 4294901760, %v23490_v28  ;;  %v23550_v28 = vand.u32 4294901760, %v23549_v48 }
 0xa86   :  { %13969 = vmatpush1.bf16.msra.mxu1 %v23535_v54 }
 0xa87   :  { %13971 = vmatprep.subr.bf16.mxu1 %v13970_v63  ;;  %v23545_v63 = vld [vmem:[#allocation142_spill] sm:$0xff] }
 0xa88   :  { %v23546_v46 = vand.u32 4294901760, %v23545_v63  ;;  %v23561_v63 = vld [vmem:[#allocation154_spill] sm:$0xff] }
 0xa89   :  { %8804 = vmatmul.mubr.f32.vlgmr.msra.gmra.mrb[16].mxu1 %v23540_v24  ;;  %v13980_v24 = vpack.c.bf16 %v23550_v28, %v23548_v56  ;;  %v23564_v56 = vand.u32 4294901760, %v23442_v33  ;;  %v23565_v28 = vld [vmem:[#allocation159_spill] sm:$0xff]  ;;  %v23573_v33 = vand.u32 4294901760, %v23459_v27  ;;  %v23581_v27 = vand.u32 4294901760, %v23284_v0 }
 0xa8a   :  { %13973 = vmatpush1.bf16.msra.mxu1 %v13972_v60  ;;  %9067 = vmatprep.mubr.f32.mxu1 %v23541_v51  ;;  %v13978_v39 = vpack.c.bf16 %v23546_v46, %v23544_v43  ;;  %v23551_v60 = vld [vmem:[#allocation147_spill] sm:$0xff]  ;;  %v23559_v43 = vld [vmem:[#allocation153_spill] sm:$0xff]  ;;  %v23562_v46 = vand.u32 4294901760, %v23561_v63  ;;  %v23578_v63 = vld [vmem:[#allocation174_spill] sm:$0xff]  ;;  %v23588_v0 = vand.u32 4294901760, %v23310_v52  ;;  %v23595_v52 = vand.u32 4294901760, %v23330_v41 }
 0xa8b   :  { %13975 = vmatprep.subr.bf16.mxu1 %v13974_v12  ;;  %v23552_v32 = vand.u32 4294901760, %v23551_v60  ;;  %v23556_v12 = vand.u32 4294901760, %v23555_v61  ;;  %v23567_v60 = vld [vmem:[#allocation160_spill] sm:$0xff]  ;;  %v23602_v41 = vand.u32 4294901760, %v18776_v31 }
 0xa8d   :  { %v13982_v54 = vpack.c.bf16 %v23554_v19, %v23552_v32  ;;  %v13984_v49 = vpack.c.bf16 %v23558_v34, %v23556_v12  ;;  %v23568_v32 = vand.u32 4294901760, %v23567_v60  ;;  %v23570_v19 = vand.u32 4294901760, %v23267_v42 }
 0xa8e   :  { %13977 = vmatpush1.bf16.msra.mxu1 %v13976_v23  ;;  %v23560_v23 = vand.u32 4294901760, %v23559_v43  ;;  %v23571_v12 = vand.u32 4294901760, %v23453_v11  ;;  %v23574_v34 = vand.u32 4294901760, %v23460_v36  ;;  %v23575_v43 = vand.u32 4294901760, %v23277_v50 }
 0xa8f   :  { %13979 = vmatprep.subr.bf16.mxu1 %v13978_v39  ;;  %v23563_v39 = vand.u32 4294901760, %v23441_v26  ;;  %v23572_v26 = vand.u32 4294901760, %v23454_v38  ;;  %v23577_v42 = vand.u32 4294901760, %v23463_v44  ;;  %v23579_v11 = vand.u32 4294901760, %v23578_v63  ;;  %v23622_v63 = vld [vmem:[#allocation155_spill] sm:$0xff] }
 0xa90   :  { %v13986_v18 = vpack.c.bf16 %v23562_v46, %v23560_v23  ;;  %v23580_v38 = vand.u32 4294901760, %v23466_v1  ;;  %v23582_v36 = vand.u32 4294901760, %v23288_v62  ;;  %v23583_v50 = vand.u32 4294901760, %v23469_v2 }
 0xa91   :  { %v13988_v48 = vpack.c.bf16 %v23564_v56, %v23563_v39  ;;  %v13994_v55 = vpack.c.bf16 %v23572_v26, %v23571_v12  ;;  %v14000_v46 = vpack.c.bf16 %v23579_v11, %v23577_v42  ;;  %v23585_v44 = vand.u32 4294901760, %v23471_v47  ;;  %v23619_v42 = vld [vmem:[#allocation140_spill] sm:$0xff]  ;;  %v23623_v11 = vld [vmem:[#allocation158_spill] sm:$0xff] }
 0xa92   :  { %13981 = vmatpush1.bf16.msra.mxu1 %v13980_v24  ;;  %v23566_v24 = vand.u32 4294901760, %v23565_v28  ;;  %v14004_v39 = vpack.c.bf16 %v23583_v50, %v23582_v36  ;;  %v23587_v1 = vand.u32 4294901760, %v23307_v6  ;;  %v23589_v62 = vand.u32 4294901760, %v23311_v9  ;;  %v23629_v36 = vld [vmem:[#allocation175_spill] sm:$0xff]  ;;  %v23630_v50 = vld [vmem:[#allocation178_spill] sm:$0xff] }
 0xa93   :  { %13983 = vmatprep.subr.bf16.mxu1 %v13982_v54  ;;  %v23569_v54 = vand.u32 4294901760, %v23266_v25  ;;  %v23576_v25 = vand.u32 4294901760, %v23461_v14  ;;  %v23584_v14 = vand.u32 4294901760, %v23470_v17  ;;  %v23590_v2 = vand.u32 4294901760, %v23313_v8 }
 0xa94   :  { %v13990_v20 = vpack.c.bf16 %v23568_v32, %v23566_v24  ;;  %v14010_v24 = vpack.c.bf16 %v23589_v62, %v23588_v0  ;;  %v23591_v17 = vand.u32 4294901760, %v23314_v29  ;;  %v23592_v47 = vand.u32 4294901760, %v23322_v4  ;;  %v19674_v0 = vld [vmem:[#allocation15 + $0x208] sm:$0xff]  ;;  %v19676_v62 = vld [vmem:[#allocation15 + $0x218] sm:$0xff] }
 0xa95   :  { %v13992_v61 = vpack.c.bf16 %v23570_v19, %v23569_v54  ;;  %v13998_v23 = vpack.c.bf16 %v23576_v25, %v23575_v43  ;;  %v14006_v56 = vpack.c.bf16 %v23585_v44, %v23584_v14  ;;  %v23594_v6 = vand.u32 4294901760, %v23329_v5  ;;  %v23616_v25 = vld [vmem:[#allocation131_spill] sm:$0xff]  ;;  %v23634_v14 = vld [vmem:[#allocation192_spill] sm:$0xff] }
 0xa96   :  { %13985 = vmatpush1.bf16.msra.mxu1 %v13984_v49  ;;  %v13996_v49 = vpack.c.bf16 %v23574_v34, %v23573_v33  ;;  %v14012_v60 = vpack.c.bf16 %v23591_v17, %v23590_v2  ;;  %v23596_v9 = vand.u32 4294901760, %v18759_v37  ;;  %v23597_v8 = vand.u32 4294901760, %v18764_v53  ;;  %v23610_v34 = vld [vmem:[#allocation213_spill] sm:$0xff]  ;;  %v23635_v44 = vld [vmem:[#allocation195_spill] sm:$0xff] }
 0xa97   :  { %13987 = vmatprep.subr.bf16.mxu1 %v13986_v18  ;;  %v14002_v18 = vpack.c.bf16 %v23581_v27, %v23580_v38  ;;  %v23598_v29 = vand.u32 4294901760, %v18767_v15  ;;  %v23599_v4 = vand.u32 4294901760, %v18770_v35  ;;  %v23601_v5 = vand.u32 4294901760, %v18774_v57  ;;  %v23626_v38 = vld [vmem:[#allocation167_spill] sm:$0xff]  ;;  %v23627_v27 = vld [vmem:[#allocation101_spill] sm:$0xff] }
 0xa98   :  { %v14018_v54 = vpack.c.bf16 %v23597_v8, %v23596_v9  ;;  %v23603_v37 = vand.u32 4294901760, %v18778_v10  ;;  %v23604_v53 = vand.u32 4294901760, %v18781_v21  ;;  %v23605_v15 = vand.u32 4294901760, %v18783_v30  ;;  %v23614_v30 = vld [vmem:[#allocation57_spill] sm:$0xff]  ;;  %v23641_v2 = vld [vmem:[#allocation207_spill] sm:$0xff] }
 0xa99   :  { %v14020_v19 = vpack.c.bf16 %v23599_v4, %v23598_v29  ;;  %v23606_v35 = vand.u32 4294901760, %v23345_v3  ;;  %v23609_v57 = vand.u32 4294901760, %v23347_v13  ;;  %v23611_v31 = vand.u32 4294901760, %v23610_v34  ;;  %v23615_v3 = vld [vmem:[#allocation80_spill] sm:$0xff]  ;;  %v23617_v13 = vld [vmem:[#allocation134_spill] sm:$0xff]  ;;  %v23643_v8 = vld [vmem:[#allocation211_spill] sm:$0xff] }
 0xa9a   :  { %13989 = vmatpush1.bf16.msra.mxu1 %v13988_v48  ;;  %v23586_v48 = vand.u32 4294901760, %v23306_v45  ;;  %v23593_v45 = vand.u32 4294901760, %v23323_v16  ;;  %v23600_v16 = vand.u32 4294901760, %v18772_v22  ;;  %v14024_v12 = vpack.c.bf16 %v23603_v37, %v23602_v41  ;;  %v23645_v41 = vld [vmem:[#allocation215_spill] sm:$0xff] }
 0xa9b   :  { %13991 = vmatprep.subr.bf16.mxu1 %v13990_v20  ;;  %v14016_v20 = vpack.c.bf16 %v23595_v52, %v23594_v6  ;;  %v14026_v26 = vpack.c.bf16 %v23605_v15, %v23604_v53  ;;  %v23612_v10 = vand.u32 4294901760, %v23357_v59  ;;  %v23613_v21 = vand.u32 4294901760, %v23358_v58  ;;  %v23620_v59 = vld [vmem:[#allocation143_spill] sm:$0xff]  ;;  %v23621_v58 = vld [vmem:[#allocation146_spill] sm:$0xff]  ;;  %v23642_v52 = vld [vmem:[#allocation208_spill] sm:$0xff] }
 0xa9c   :  { %v14008_v28 = vpack.c.bf16 %v23587_v1, %v23586_v48  ;;  %v14014_v32 = vpack.c.bf16 %v23593_v45, %v23592_v47  ;;  %v23637_v48 = vld [vmem:[#allocation201_spill] sm:$0xff]  ;;  %v23638_v1 = vld [vmem:[#allocation202_spill] sm:$0xff]  ;;  %v9212_v17 = vand.u32 4294901760, %v19674_v0  ;;  %v19688_v6 = vld [vmem:[#allocation15 + $0x238] sm:$0xff] }
 0xa9d   :  { %v14032_v43 = vpack.c.bf16 %v23613_v21, %v23612_v10  ;;  %v19682_v47 = vld [vmem:[#allocation15 + $0x200] sm:$0xff]  ;;  %v19684_v45 = vld [vmem:[#allocation15 + $0x210] sm:$0xff]  ;;  %v22144_v4 = vand.u32 4294901760, %v19688_v6 }
 0xa9e   :  { %13993 = vmatpush1.bf16.msra.mxu1 %v13992_v61  ;;  %v14022_v61 = vpack.c.bf16 %v23601_v5, %v23600_v16  ;;  %v22148_v9 = vand.u32 4294901760, %v19684_v45  ;;  %v19704_v16 = vld [vmem:[#allocation15 + $0x230] sm:$0xff]  ;;  %v19706_v5 = vld [vmem:[#allocation15 + $0x248] sm:$0xff] }
 0xa9f   :  { %13995 = vmatprep.subr.bf16.mxu1 %v13994_v55  ;;  %v23607_v55 = vld [vmem:[#allocation210_spill] sm:$0xff]  ;;  %v22140_v53 = vand.u32 4294901760, %v19704_v16 }
 0xaa0   :  { %v23608_v22 = vand.u32 4294901760, %v23607_v55  ;;  %v19728_v55 = vld [vmem:[#allocation15 + $0x240] sm:$0xff] }
 0xaa2   :  { %13997 = vmatpush1.bf16.msra.mxu1 %v13996_v49  ;;  %v14028_v33 = vpack.c.bf16 %v23608_v22, %v23606_v35  ;;  %v14030_v49 = vpack.c.bf16 %v23611_v31, %v23609_v57  ;;  %v19730_v22 = vld [vmem:[#allocation15 + $0x250] sm:$0xff]  ;;  %v19734_v57 = vld [vmem:[#allocation15 + $0x278] sm:$0xff]  ;;  %v22137_v31 = vand.u32 4294901760, %v19728_v55 }
 0xaa3   :  { %13999 = vmatprep.subr.bf16.mxu1 %v13998_v23  ;;  %v23618_v23 = vld [vmem:[#allocation137_spill] sm:$0xff] }
 0xaa6   :  { %14001 = vmatpush1.bf16.msra.mxu1 %v14000_v46  ;;  %v23624_v46 = vld [vmem:[#allocation161_spill] sm:$0xff] }
 0xaa7   :  { %14003 = vmatprep.subr.bf16.mxu1 %v14002_v18  ;;  %v23628_v18 = vld [vmem:[#allocation172_spill] sm:$0xff] }
 0xaaa   :  { %14005 = vmatpush1.bf16.msra.mxu1 %v14004_v39  ;;  %v23633_v39 = vld [vmem:[#allocation189_spill] sm:$0xff] }
 0xaab   :  { %14007 = vmatprep.subr.bf16.mxu1 %v14006_v56  ;;  %v23636_v56 = vld [vmem:[#allocation198_spill] sm:$0xff] }
 0xaae   :  { %14009 = vmatpush1.bf16.msra.mxu1 %v14008_v28  ;;  %v23639_v28 = vld [vmem:[#allocation203_spill] sm:$0xff] }
 0xaaf   :  { %14011 = vmatprep.subr.bf16.mxu1 %v14010_v24  ;;  %v23640_v24 = vld [vmem:[#allocation204_spill] sm:$0xff] }
 0xab2   :  { %14013 = vmatpush1.bf16.msra.mxu1 %v14012_v60  ;;  %v9216_v60 = vand.u32 4294901760, %v19676_v62 }
 0xab3   :  { %14015 = vmatprep.subr.bf16.mxu1 %v14014_v32  ;;  %v19686_v32 = vld [vmem:[#allocation15 + $0x228] sm:$0xff] }
 0xab4   :  { %v22145_v29 = vand.u32 4294901760, %v19686_v32 }
 0xab6   :  { %14017 = vmatpush1.bf16.msra.mxu1 %v14016_v20  ;;  %v22149_v20 = vand.u32 4294901760, %v19682_v47  ;;  %v19724_v15 = vpack.c.bf16 %v22144_v4, %v22145_v29  ;;  %v19891_v4 = vld [vmem:[#allocation15 + $0x338] sm:$0xff]  ;;  %v19896_v29 = vsub.f32 %v19674_v0, %v9212_v17 }
 0xab7   :  { %14019 = vmatprep.subr.bf16.mxu1 %v14018_v54  ;;  %v19698_v54 = vpack.c.bf16 %v9216_v60, %v9212_v17 }
 0xab8   :  { %v19715_v37 = vpack.c.bf16 %v22148_v9, %v22149_v20  ;;  %23647 = vst [vmem:[#allocation34_spill] sm:$0xff] %v19724_v15  ;;  %23660 = vst [vmem:[#allocation70_spill] sm:$0xff] %v19896_v29  ;;  %v19910_v20 = vsub.f32 %v19676_v62, %v9216_v60  ;;  %v19923_v9 = vld [vmem:[#allocation15 + $0x330] sm:$0xff]  ;;  %v23666_v60 = vand.u32 4294901760, %v19684_v45 }
 0xab9   :  { %23644 = vst [vmem:[#allocation31_spill] sm:$0xff] %v19698_v54 }
 0xaba   :  { %14021 = vmatpush1.bf16.msra.mxu1 %v14020_v19  ;;  %v19702_v19 = vld [vmem:[#allocation15 + $0x220] sm:$0xff]  ;;  %23646 = vst [vmem:[#allocation94_spill] sm:$0xff] %v19715_v37  ;;  %23662 = vst [vmem:[#allocation99_spill] sm:$0xff] %v19910_v20 }
 0xabb   :  { %14023 = vmatprep.subr.bf16.mxu1 %v14022_v61  ;;  %v19708_v61 = vld [vmem:[#allocation15 + $0x258] sm:$0xff] }
 0xabc   :  { %v22138_v35 = vand.u32 4294901760, %v19708_v61 }
 0xabe   :  { %14025 = vmatpush1.bf16.msra.mxu1 %v14024_v12  ;;  %v22141_v12 = vand.u32 4294901760, %v19702_v19 }
 0xabf   :  { %14027 = vmatprep.subr.bf16.mxu1 %v14026_v26  ;;  %v22139_v26 = vand.u32 4294901760, %v19706_v5 }
 0xac0   :  { %v19742_v34 = vpack.c.bf16 %v22140_v53, %v22141_v12  ;;  %v19885_v12 = vld [vmem:[#allocation15 + $0x300] sm:$0xff] }
 0xac1   :  { %v19751_v10 = vpack.c.bf16 %v22138_v35, %v22139_v26 }
 0xac2   :  { %14029 = vmatpush1.bf16.msra.mxu1 %v14028_v33  ;;  %v19732_v33 = vld [vmem:[#allocation15 + $0x268] sm:$0xff]  ;;  %23648 = vst [vmem:[#allocation97_spill] sm:$0xff] %v19742_v34 }
 0xac3   :  { %14031 = vmatprep.subr.bf16.mxu1 %v14030_v49  ;;  %v22134_v49 = vand.u32 4294901760, %v19730_v22  ;;  %23649 = vst [vmem:[#allocation37_spill] sm:$0xff] %v19751_v10  ;;  %v22131_v21 = vand.u32 4294901760, %v19732_v33 }
 0xac6   :  { %14033 = vmatpush1.bf16.msra.mxu1 %v14032_v43  ;;  %v22130_v43 = vand.u32 4294901760, %v19734_v57 }
 0xac7   :  { %14035 = vmatprep.subr.bf16.mxu1 %v23614_v30  ;;  %v19755_v30 = vld [vmem:[#allocation15 + $0x260] sm:$0xff] }
 0xac9   :  { %9069 = vmatmul.mubr.f32.vlgmr.msra.gmra.mrb[16].mxu1 %v23615_v3 }
 0xaca   :  { %14037 = vmatpush1.bf16.msra.mxu1 %v23616_v25  ;;  %9204 = vmatprep.mubr.f32.mxu1 %v23541_v51  ;;  %v23625_v51 = vld [vmem:[#allocation164_spill] sm:$0xff]  ;;  %v19759_v25 = vld [vmem:[#allocation15 + $0x288] sm:$0xff] }
 0xacb   :  { %14039 = vmatprep.subr.bf16.mxu1 %v23617_v13  ;;  %v19761_v13 = vld [vmem:[#allocation15 + $0x298] sm:$0xff] }
 0xace   :  { %14041 = vmatpush1.bf16.msra.mxu1 %v23618_v23  ;;  %v19768_v23 = vpack.c.bf16 %v22134_v49, %v22137_v31  ;;  %v19865_v49 = vld [vmem:[#allocation15 + $0x318] sm:$0xff] }
 0xacf   :  { %14043 = vmatprep.subr.bf16.mxu1 %v23619_v42  ;;  %v22129_v42 = vand.u32 4294901760, %v19755_v30  ;;  %v22154_v53 = vand.u32 4294901760, %v19865_v49 }
 0xad0   :  { %23650 = vst [vmem:[#allocation59_spill] sm:$0xff] %v19768_v23 }
 0xad2   :  { %14045 = vmatpush1.bf16.msra.mxu1 %v23620_v59 }
 0xad3   :  { %14047 = vmatprep.subr.bf16.mxu1 %v23621_v58  ;;  %v19777_v58 = vpack.c.bf16 %v22130_v43, %v22131_v21  ;;  %v19859_v21 = vld [vmem:[#allocation15 + $0x2e0] sm:$0xff] }
 0xad5   :  { %23651 = vst [vmem:[#allocation61_spill] sm:$0xff] %v19777_v58 }
 0xad6   :  { %14049 = vmatpush1.bf16.msra.mxu1 %v23505_v40  ;;  %v23631_v40 = vld [vmem:[#allocation181_spill] sm:$0xff] }
 0xad7   :  { %14051 = vmatprep.subr.bf16.mxu1 %v23506_v7  ;;  %v23632_v7 = vld [vmem:[#allocation184_spill] sm:$0xff] }
 0xada   :  { %14053 = vmatpush1.bf16.msra.mxu1 %v23622_v63  ;;  %v22127_v63 = vand.u32 4294901760, %v19759_v25 }
 0xadb   :  { %14055 = vmatprep.subr.bf16.mxu1 %v23623_v11  ;;  %v22124_v11 = vand.u32 4294901760, %v19761_v13 }
 0xade   :  { %14057 = vmatpush1.bf16.msra.mxu1 %v23624_v46  ;;  %v19781_v46 = vld [vmem:[#allocation15 + $0x280] sm:$0xff] }
 0xadf   :  { %14059 = vmatprep.subr.bf16.mxu1 %v23625_v51  ;;  %v19783_v51 = vld [vmem:[#allocation15 + $0x290] sm:$0xff] }
 0xae2   :  { %14061 = vmatpush1.bf16.msra.mxu1 %v23626_v38  ;;  %v19785_v38 = vld [vmem:[#allocation15 + $0x2a8] sm:$0xff] }
 0xae3   :  { %14063 = vmatprep.subr.bf16.mxu1 %v23627_v27  ;;  %v19787_v27 = vld [vmem:[#allocation15 + $0x2b8] sm:$0xff] }
 0xae6   :  { %14065 = vmatpush1.bf16.msra.mxu1 %v23628_v18 }
 0xae7   :  { %14067 = vmatprep.subr.bf16.mxu1 %v23629_v36  ;;  %v22123_v36 = vand.u32 4294901760, %v19781_v46 }
 0xaea   :  { %14069 = vmatpush1.bf16.msra.mxu1 %v23630_v50  ;;  %v22122_v50 = vand.u32 4294901760, %v19783_v51 }
 0xaeb   :  { %14071 = vmatprep.subr.bf16.mxu1 %v23631_v40  ;;  %v19803_v40 = vpack.c.bf16 %v22124_v11, %v22127_v63  ;;  %v19839_v11 = vld [vmem:[#allocation15 + $0x2f8] sm:$0xff] }
 0xaec   :  { %v22146_v43 = vand.u32 4294901760, %v19839_v11 }
 0xaed   :  { %23653 = vst [vmem:[#allocation38_spill] sm:$0xff] %v19803_v40 }
 0xaee   :  { %14073 = vmatpush1.bf16.msra.mxu1 %v23632_v7  ;;  %v22126_v7 = vand.u32 4294901760, %v19785_v38 }
 0xaef   :  { %14075 = vmatprep.subr.bf16.mxu1 %v23633_v39  ;;  %v22125_v39 = vand.u32 4294901760, %v19787_v27 }
 0xaf2   :  { %14077 = vmatpush1.bf16.msra.mxu1 %v23634_v14  ;;  %v19807_v14 = vld [vmem:[#allocation15 + $0x2a0] sm:$0xff] }
 0xaf3   :  { %14079 = vmatprep.subr.bf16.mxu1 %v23635_v44  ;;  %v19809_v44 = vld [vmem:[#allocation15 + $0x2b0] sm:$0xff] }
 0xaf6   :  { %14081 = vmatpush1.bf16.msra.mxu1 %v23636_v56  ;;  %v19811_v56 = vld [vmem:[#allocation15 + $0x2c8] sm:$0xff] }
 0xaf7   :  { %14083 = vmatprep.subr.bf16.mxu1 %v23637_v48  ;;  %v19813_v48 = vld [vmem:[#allocation15 + $0x2d8] sm:$0xff] }
 0xafa   :  { %14085 = vmatpush1.bf16.msra.mxu1 %v23638_v1  ;;  %v19820_v1 = vpack.c.bf16 %v22122_v50, %v22123_v36  ;;  %v19835_v50 = vld [vmem:[#allocation15 + $0x2d0] sm:$0xff]  ;;  %v19837_v36 = vld [vmem:[#allocation15 + $0x2e8] sm:$0xff] }
 0xafb   :  { %14087 = vmatprep.subr.bf16.mxu1 %v23639_v28  ;;  %v22133_v28 = vand.u32 4294901760, %v19807_v14  ;;  %v22142_v63 = vand.u32 4294901760, %v19835_v50 }
 0xafc   :  { %23654 = vst [vmem:[#allocation43_spill] sm:$0xff] %v19820_v1 }
 0xafe   :  { %14089 = vmatpush1.bf16.msra.mxu1 %v23640_v24  ;;  %v22132_v24 = vand.u32 4294901760, %v19809_v44 }
 0xaff   :  { %14091 = vmatprep.subr.bf16.mxu1 %v23641_v2  ;;  %v19829_v2 = vpack.c.bf16 %v22125_v39, %v22126_v7 }
 0xb00   :  { %v19846_v39 = vpack.c.bf16 %v22132_v24, %v22133_v28  ;;  %v19861_v24 = vld [vmem:[#allocation15 + $0x2f0] sm:$0xff]  ;;  %v19863_v28 = vld [vmem:[#allocation15 + $0x308] sm:$0xff] }
 0xb01   :  { %23655 = vst [vmem:[#allocation48_spill] sm:$0xff] %v19829_v2  ;;  %v22150_v31 = vand.u32 4294901760, %v19861_v24  ;;  %v22155_v26 = vand.u32 4294901760, %v19863_v28 }
 0xb02   :  { %14093 = vmatpush1.bf16.msra.mxu1 %v23642_v52  ;;  %v22136_v52 = vand.u32 4294901760, %v19811_v56  ;;  %23656 = vst [vmem:[#allocation45_spill] sm:$0xff] %v19846_v39 }
 0xb03   :  { %14095 = vmatprep.subr.bf16.mxu1 %v23643_v8  ;;  %v22135_v8 = vand.u32 4294901760, %v19813_v48  ;;  %v19917_v0 = vpack.c.bf16 %v22154_v53, %v22155_v26  ;;  %v23668_v53 = vand.u32 4294901760, %v19686_v32 }
 0xb05   :  { %23663 = vst [vmem:[#allocation187_spill] sm:$0xff] %v19917_v0  ;;  %v19938_v26 = vsub.f32 %v19686_v32, %v23668_v53  ;;  %v23676_v32 = vand.u32 4294901760, %v19706_v5 }
 0xb06   :  { %14097 = vmatpush1.bf16.msra.mxu1 %v23645_v41  ;;  %v19833_v41 = vld [vmem:[#allocation15 + $0x2c0] sm:$0xff] }
 0xb07   :  { %14099 = vmatprep.subr.bf16.mxu1 %v19698_v54  ;;  %v22143_v7 = vand.u32 4294901760, %v19833_v41  ;;  %23669 = vst [vmem:[#allocation163_spill] sm:$0xff] %v19938_v26  ;;  %v19962_v53 = vsub.f32 %v19706_v5, %v23676_v32  ;;  %v19997_v5 = vld [vmem:[#allocation15 + $0x340] sm:$0xff]  ;;  %v19999_v32 = vld [vmem:[#allocation15 + $0x350] sm:$0xff]  ;;  %v20151_v54 = vld [vmem:[#allocation15 + $0x3b8] sm:$0xff] }
 0xb09   :  { %9206 = vmatmul.mubr.f32.vlgmr.msra.gmra.mrb[16].mxu1 %v23615_v3  ;;  %v19757_v3 = vld [vmem:[#allocation15 + $0x270] sm:$0xff]  ;;  %23677 = vst [vmem:[#allocation185_spill] sm:$0xff] %v19962_v53 }
 0xb0a   :  { %14101 = vmatpush1.bf16.msra.mxu1 %v19715_v37  ;;  %v22128_v59 = vand.u32 4294901760, %v19757_v3 }
 0xb0b   :  { %14103 = vmatprep.subr.bf16.mxu1 %v19724_v15  ;;  %v23720_v15 = vld [vmem:[#allocation25_spill] sm:$0xff] }
 0xb0c   :  { %v19794_v18 = vpack.c.bf16 %v22128_v59, %v22129_v42  ;;  %v19855_v59 = vpack.c.bf16 %v22135_v8, %v22136_v52  ;;  %v22147_v42 = vand.u32 4294901760, %v19837_v36  ;;  %v19872_v8 = vpack.c.bf16 %v22142_v63, %v22143_v7  ;;  %v19887_v63 = vld [vmem:[#allocation15 + $0x310] sm:$0xff]  ;;  %v19889_v7 = vld [vmem:[#allocation15 + $0x328] sm:$0xff] }
 0xb0d   :  { %v22151_v52 = vand.u32 4294901760, %v19859_v21 }
 0xb0e   :  { %14105 = vmatpush1.bf16.msra.mxu1 %v19742_v34  ;;  %23652 = vst [vmem:[#allocation62_spill] sm:$0xff] %v19794_v18  ;;  %23657 = vst [vmem:[#allocation55_spill] sm:$0xff] %v19855_v59  ;;  %v19881_v35 = vpack.c.bf16 %v22146_v43, %v22147_v42  ;;  %v23664_v42 = vand.u32 4294901760, %v19682_v47  ;;  %v23713_v34 = vand.u32 4294901760, %v19833_v41 }
 0xb0f   :  { %14107 = vmatprep.subr.bf16.mxu1 %v19751_v10  ;;  %23658 = vst [vmem:[#allocation66_spill] sm:$0xff] %v19872_v8  ;;  %v19903_v43 = vpack.c.bf16 %v22150_v31, %v22151_v52  ;;  %v19921_v52 = vld [vmem:[#allocation15 + $0x320] sm:$0xff]  ;;  %v23670_v31 = vand.u32 4294901760, %v19688_v6  ;;  %v23705_v10 = vand.u32 4294901760, %v19807_v14 }
 0xb10   :  { %23659 = vst [vmem:[#allocation67_spill] sm:$0xff] %v19881_v35  ;;  %v19928_v62 = vsub.f32 %v19682_v47, %v23664_v42  ;;  %v23672_v47 = vand.u32 4294901760, %v19702_v19 }
 0xb11   :  { %23661 = vst [vmem:[#allocation96_spill] sm:$0xff] %v19903_v43  ;;  %v19943_v17 = vsub.f32 %v19688_v6, %v23670_v31  ;;  %v23678_v6 = vand.u32 4294901760, %v19708_v61 }
 0xb12   :  { %14109 = vmatpush1.bf16.msra.mxu1 %v19768_v23  ;;  %23665 = vst [vmem:[#allocation188_spill] sm:$0xff] %v19928_v62  ;;  %v19952_v42 = vsub.f32 %v19702_v19, %v23672_v47  ;;  %v23681_v47 = vand.u32 4294901760, %v19887_v63  ;;  %v20079_v23 = vld [vmem:[#allocation15 + $0x398] sm:$0xff] }
 0xb13   :  { %14111 = vmatprep.subr.bf16.mxu1 %v19777_v58  ;;  %23671 = vst [vmem:[#allocation170_spill] sm:$0xff] %v19943_v17  ;;  %v19967_v31 = vsub.f32 %v19708_v61, %v23678_v6  ;;  %v23683_v61 = vand.u32 4294901760, %v19730_v22  ;;  %v20059_v58 = vld [vmem:[#allocation15 + $0x360] sm:$0xff] }
 0xb14   :  { %23673 = vst [vmem:[#allocation177_spill] sm:$0xff] %v19952_v42 }
 0xb15   :  { %v19986_v6 = vsub.f32 %v19730_v22, %v23683_v61  ;;  %v23688_v61 = vand.u32 4294901760, %v19734_v57 }
 0xb16   :  { %14113 = vmatpush1.bf16.msra.mxu1 %v19794_v18  ;;  %v23695_v18 = vand.u32 4294901760, %v19785_v38 }
 0xb17   :  { %14115 = vmatprep.subr.bf16.mxu1 %v19803_v40  ;;  %v20023_v40 = vld [vmem:[#allocation15 + $0x378] sm:$0xff] }
 0xb18   :  { %v23728_v37 = vand.u32 4294901760, %v20023_v40 }
 0xb1a   :  { %14117 = vmatpush1.bf16.msra.mxu1 %v19820_v1  ;;  %v20021_v1 = vld [vmem:[#allocation15 + $0x368] sm:$0xff] }
 0xb1b   :  { %14119 = vmatprep.subr.bf16.mxu1 %v19829_v2  ;;  %v23687_v2 = vand.u32 4294901760, %v19732_v33 }
 0xb1d   :  { %v20004_v22 = vsub.f32 %v19732_v33, %v23687_v2  ;;  %v23691_v33 = vand.u32 4294901760, %v19759_v25 }
 0xb1e   :  { %14121 = vmatpush1.bf16.msra.mxu1 %v19846_v39  ;;  %v23679_v39 = vand.u32 4294901760, %v19728_v55 }
 0xb1f   :  { %14123 = vmatprep.subr.bf16.mxu1 %v19855_v59  ;;  %v19947_v59 = vld [vmem:[#allocation15 + $0x358] sm:$0xff]  ;;  %v20028_v2 = vsub.f32 %v19759_v25, %v23691_v33  ;;  %v20048_v25 = vsub.f32 %v19785_v38, %v23695_v18  ;;  %v23697_v33 = vand.u32 4294901760, %v19923_v9 }
 0xb20   :  { %v19972_v19 = vsub.f32 %v19728_v55, %v23679_v39  ;;  %v23684_v55 = vand.u32 4294901760, %v19889_v7  ;;  %v23685_v39 = vand.u32 4294901760, %v19891_v4 }
 0xb22   :  { %14125 = vmatpush1.bf16.msra.mxu1 %v19872_v8  ;;  %v19945_v8 = vld [vmem:[#allocation15 + $0x348] sm:$0xff] }
 0xb23   :  { %14127 = vmatprep.subr.bf16.mxu1 %v19881_v35  ;;  %v19933_v35 = vsub.f32 %v19684_v45, %v23666_v60  ;;  %v23674_v45 = vand.u32 4294901760, %v19704_v16  ;;  %v23702_v18 = vand.u32 4294901760, %v19945_v8 }
 0xb25   :  { %23667 = vst [vmem:[#allocation162_spill] sm:$0xff] %v19933_v35  ;;  %v19957_v60 = vsub.f32 %v19704_v16, %v23674_v45  ;;  %v23680_v16 = vand.u32 4294901760, %v19885_v12 }
 0xb26   :  { %14129 = vmatpush1.bf16.msra.mxu1 %v19903_v43  ;;  %v19993_v43 = vpack.c.bf16 %v23685_v39, %v23684_v55  ;;  %v23689_v55 = vand.u32 4294901760, %v19755_v30 }
 0xb27   :  { %23675 = vst [vmem:[#allocation179_spill] sm:$0xff] %v19957_v60  ;;  %v19979_v45 = vpack.c.bf16 %v23681_v47, %v23680_v16  ;;  %14131 = vmatprep.subr.bf16.mxu1 %v19917_v0  ;;  %v20009_v0 = vsub.f32 %v19734_v57, %v23688_v61  ;;  %v23690_v47 = vand.u32 4294901760, %v19757_v3  ;;  %v23692_v57 = vand.u32 4294901760, %v19761_v13 }
 0xb28   :  { %23686 = vst [vmem:[#allocation190_spill] sm:$0xff] %v19993_v43  ;;  %v20014_v39 = vsub.f32 %v19755_v30, %v23689_v55  ;;  %v23693_v30 = vand.u32 4294901760, %v19781_v46 }
 0xb29   :  { %23682 = vst [vmem:[#allocation186_spill] sm:$0xff] %v19979_v45  ;;  %v20019_v16 = vsub.f32 %v19757_v3, %v23690_v47  ;;  %v20033_v61 = vsub.f32 %v19761_v13, %v23692_v57  ;;  %v23694_v3 = vand.u32 4294901760, %v19783_v51  ;;  %v23696_v13 = vand.u32 4294901760, %v19921_v52 }
 0xb2a   :  { %v20038_v55 = vsub.f32 %v19781_v46, %v23693_v30  ;;  %14133 = vmatpush1.bf16.msra.mxu1 %v19979_v45  ;;  %v20077_v45 = vld [vmem:[#allocation15 + $0x388] sm:$0xff]  ;;  %v23711_v30 = vand.u32 4294901760, %v19813_v48 }
 0xb2b   :  { %v20043_v47 = vsub.f32 %v19783_v51, %v23694_v3  ;;  %v20055_v57 = vpack.c.bf16 %v23697_v33, %v23696_v13  ;;  %v20061_v51 = vld [vmem:[#allocation15 + $0x370] sm:$0xff]  ;;  %v23700_v3 = vand.u32 4294901760, %v19787_v27  ;;  %14135 = vmatprep.subr.bf16.mxu1 %v19993_v43  ;;  %v23703_v13 = vand.u32 4294901760, %v19947_v59 }
 0xb2c   :  { %23699 = vst [vmem:[#allocation129_spill] sm:$0xff] %v20061_v51  ;;  %v20099_v46 = vsub.f32 %v19813_v48, %v23711_v30  ;;  %v23718_v48 = vand.u32 4294901760, %v19999_v32 }
 0xb2d   :  { %23698 = vst [vmem:[#allocation191_spill] sm:$0xff] %v20055_v57  ;;  %v20066_v38 = vsub.f32 %v19787_v27, %v23700_v3  ;;  %v20073_v33 = vpack.c.bf16 %v23703_v13, %v23702_v18  ;;  %v20084_v27 = vsub.f32 %v19807_v14, %v23705_v10  ;;  %v23707_v3 = vand.u32 4294901760, %v19809_v44 }
 0xb2e   :  { %v23709_v18 = vand.u32 4294901760, %v19811_v56  ;;  %23712 = vst [vmem:[#allocation95_spill] sm:$0xff] %v20099_v46  ;;  %v20104_v10 = vsub.f32 %v19833_v41, %v23713_v34  ;;  %v23715_v14 = vand.u32 4294901760, %v19835_v50  ;;  %14137 = vmatpush1.bf16.msra.mxu1 %v20055_v57  ;;  %v5210_v34 = vsub.s32 3, %v23720_v15 }
 0xb2f   :  { %23701 = vst [vmem:[#allocation193_spill] sm:$0xff] %v20066_v38  ;;  %23704 = vst [vmem:[#allocation194_spill] sm:$0xff] %v20073_v33  ;;  %v20089_v43 = vsub.f32 %v19809_v44, %v23707_v3  ;;  %v23723_v3 = vand.u32 4294901760, %v19839_v11  ;;  %14139 = vmatprep.subr.bf16.mxu1 %v20073_v33  ;;  %v23734_v33 = vand.u32 4294901760, %v19865_v49 }
 0xb30   :  { %23706 = vst [vmem:[#allocation98_spill] sm:$0xff] %v20084_v27  ;;  %v20094_v13 = vsub.f32 %v19811_v56, %v23709_v18  ;;  %23714 = vst [vmem:[#allocation199_spill] sm:$0xff] %v20104_v10  ;;  %v20109_v44 = vsub.f32 %v19835_v50, %v23715_v14  ;;  %v23717_v18 = vand.u32 4294901760, %v19997_v5  ;;  %v20123_v50 = vld [vmem:[#allocation15 + $0x380] sm:$0xff]  ;;  %v23721_v14 = vand.u32 4294901760, %v19837_v36 }
 0xb31   :  { %23708 = vst [vmem:[#allocation196_spill] sm:$0xff] %v20089_v43  ;;  %v20133_v57 = vsub.f32 %v19839_v11, %v23723_v3  ;;  %v23730_v11 = vand.u32 4294901760, %v19861_v24 }
 0xb32   :  { %23710 = vst [vmem:[#allocation197_spill] sm:$0xff] %v20094_v13  ;;  %23716 = vst [vmem:[#allocation200_spill] sm:$0xff] %v20109_v44  ;;  %v20118_v30 = vpack.c.bf16 %v23718_v48, %v23717_v18  ;;  %v20128_v56 = vsub.f32 %v19837_v36, %v23721_v14  ;;  %v23725_v18 = vand.u32 4294901760, %v19859_v21  ;;  %v23727_v48 = vand.u32 4294901760, %v20021_v1  ;;  %v20147_v36 = vld [vmem:[#allocation15 + $0x390] sm:$0xff]  ;;  %v20149_v14 = vld [vmem:[#allocation15 + $0x3a8] sm:$0xff] }
 0xb33   :  { %23724 = vst [vmem:[#allocation76_spill] sm:$0xff] %v20133_v57  ;;  %v20156_v3 = vsub.f32 %v19861_v24, %v23730_v11  ;;  %v20173_v57 = vld [vmem:[#allocation15 + $0x3a0] sm:$0xff]  ;;  %v20177_v24 = vld [vmem:[#allocation15 + $0x3c8] sm:$0xff]  ;;  %v23739_v11 = vand.u32 4294901760, %v19887_v63 }
 0xb34   :  { %23719 = vst [vmem:[#allocation71_spill] sm:$0xff] %v20118_v30  ;;  %23722 = vst [vmem:[#allocation75_spill] sm:$0xff] %v20128_v56  ;;  %v20138_v15 = vsub.f32 %v19859_v21, %v23725_v18  ;;  %v20145_v41 = vpack.c.bf16 %v23728_v37, %v23727_v48  ;;  %v23732_v21 = vand.u32 4294901760, %v19863_v28  ;;  %v20166_v37 = vsub.f32 %v19865_v49, %v23734_v33  ;;  %v20175_v56 = vld [vmem:[#allocation15 + $0x3b0] sm:$0xff]  ;;  %v20198_v44 = vld [vmem:[#allocation15 + $0x3c0] sm:$0xff] }
 0xb35   :  { %23731 = vst [vmem:[#allocation86_spill] sm:$0xff] %v20156_v3  ;;  %v23736_v48 = vand.u32 4294901760, %v19885_v12  ;;  %23738 = vst [vmem:[#allocation214_spill] sm:$0xff] %v20175_v56  ;;  %v23743_v33 = vand.u32 4294901760, %v20059_v58  ;;  %v20196_v3 = vld [vmem:[#allocation15 + $0x3d8] sm:$0xff]  ;;  %14141 = vmatpush1.bf16.msra.mxu1 %v20118_v30  ;;  %v23758_v30 = vand.u32 4294901760, %v19945_v8 }
 0xb36   :  { %23726 = vst [vmem:[#allocation209_spill] sm:$0xff] %v20138_v15  ;;  %23729 = vst [vmem:[#allocation212_spill] sm:$0xff] %v20145_v41  ;;  %v20161_v18 = vsub.f32 %v19863_v28, %v23732_v21  ;;  %v20182_v28 = vsub.f32 %v19887_v63, %v23739_v11  ;;  %v23741_v21 = vand.u32 4294901760, %v19889_v7  ;;  %v20200_v63 = vld [vmem:[#allocation15 + $0x3d0] sm:$0xff]  ;;  %14143 = vmatprep.subr.bf16.mxu1 %v20145_v41  ;;  %v23767_v41 = vand.u32 4294901760, %v20151_v54 }
 0xb37   :  { %23735 = vst [vmem:[#allocation91_spill] sm:$0xff] %v20166_v37  ;;  %v20171_v15 = vsub.f32 %v19885_v12, %v23736_v48  ;;  %v23744_v12 = vand.u32 4294901760, %v20061_v51  ;;  %v23746_v37 = vld [vmem:[#allocation28_spill] sm:$0xff]  ;;  %23747 = vst [vmem:[#allocation51_spill] sm:$0xff] %v20196_v3 }
 0xb38   :  { %23733 = vst [vmem:[#allocation88_spill] sm:$0xff] %v20161_v18  ;;  %23740 = vst [vmem:[#allocation216_spill] sm:$0xff] %v20182_v28  ;;  %v20187_v49 = vsub.f32 %v19889_v7, %v23741_v21  ;;  %v23750_v7 = vand.u32 4294901760, %v20077_v45  ;;  %v23751_v21 = vand.u32 4294901760, %v20079_v23 }
 0xb39   :  { %23737 = vst [vmem:[#allocation54_spill] sm:$0xff] %v20171_v15  ;;  %v20193_v48 = vpack.c.bf16 %v23744_v12, %v23743_v33  ;;  %v14965_v15 = vld [vmem:[#allocation14] sm:$0xf]  ;;  %23748 = vst [vmem:[#allocation50_spill] sm:$0xff] %v20198_v44  ;;  %v23753_v12 = vand.u32 4294901760, %v19891_v4 }
 0xb3a   :  { %23742 = vst [vmem:[#allocation46_spill] sm:$0xff] %v20187_v49  ;;  %v5207_v18 = vrot.slane %v14965_v15, %v23746_v37  ;;  %23749 = vst [vmem:[#allocation52_spill] sm:$0xff] %v20200_v63  ;;  %v5211_v11 = vrot.slane %v14965_v15, %v5210_v34  ;;  %v20207_v49 = vpack.c.bf16 %v23751_v21, %v23750_v7  ;;  %v23755_v37 = vand.u32 4294901760, %v19921_v52 }
 0xb3b   :  { %23745 = vst [vmem:[#allocation44_spill] sm:$0xff] %v20193_v48  ;;  %v20223_v33 = vsub.f32 %v19891_v4, %v23753_v12  ;;  %v23756_v34 = vand.u32 4294901760, %v19923_v9  ;;  %v20238_v7 = vsub.f32 %v19945_v8, %v23758_v30  ;;  %v23759_v21 = vand.u32 4294901760, %v19947_v59  ;;  %14145 = vmatpush1.bf16.msra.mxu1 %v20193_v48  ;;  %v7779_v12 = vpop.f32.mrb[26].mxu0 }
 0xb3c   :  { %23752 = vst [vmem:[#allocation56_spill] sm:$0xff] %v20207_v49  ;;  %v20228_v28 = vsub.f32 %v19921_v52, %v23755_v37  ;;  %v23761_v52 = vand.u32 4294901760, %v20123_v50  ;;  %v23762_v37 = vand.u32 4294901760, %v20147_v36  ;;  %v23764_v8 = vand.u32 4294901760, %v19997_v5  ;;  %14147 = vmatprep.subr.bf16.mxu1 %v20207_v49 }
 0xb3d   :  { %23754 = vst [vmem:[#allocation33_spill] sm:$0xff] %v20223_v33  ;;  %v20233_v15 = vsub.f32 %v19923_v9, %v23756_v34  ;;  %v20243_v4 = vsub.f32 %v19947_v59, %v23759_v21  ;;  %v14714_v59 = vadd.f32 %v7779_v12, %v5207_v18  ;;  %v7781_v21 = vpop.f32.mrb[27].mxu0  ;;  %v23766_v48 = vand.u32 4294901760, %v20149_v14 }
 0xb3e   :  { %v20250_v51 = vpack.c.bf16 %v23762_v37, %v23761_v52  ;;  %v20257_v30 = vsub.f32 %v19997_v5, %v23764_v8  ;;  %v20266_v52 = vld [vmem:[#allocation15 + $0x3e8] sm:$0xff]  ;;  %v14715_v34 = vadd.f32 %v7781_v21, %v5211_v11  ;;  %v23769_v9 = vand.u32 4294901760, %v20173_v57  ;;  %v20287_v37 = vld [vmem:[#allocation15 + $0x3f8] sm:$0xff]  ;;  %v20289_v11 = vld [vmem:[#allocation15 + $0x3e0] sm:$0xff] }
 0xb3f   :  { %23757 = vst [vmem:[#allocation36_spill] sm:$0xff] %v20233_v15  ;;  %23760 = vst [vmem:[#allocation49_spill] sm:$0xff] %v20243_v4  ;;  %v20264_v4 = vpack.c.bf16 %v23767_v41, %v23766_v48  ;;  %v23770_v5 = vand.u32 4294901760, %v20175_v56  ;;  %v23772_v18 = vand.u32 4294901760, %v20177_v24  ;;  %v23773_v12 = vand.u32 4294901760, %v20196_v3  ;;  %v20291_v56 = vld [vmem:[#allocation15 + $0x3f0] sm:$0xff] }
 0xb40   :  { %23763 = vst [vmem:[#allocation63_spill] sm:$0xff] %v20250_v51  ;;  %23765 = vst [vmem:[#allocation69_spill] sm:$0xff] %v20257_v30  ;;  %v23775_v41 = vand.u32 4294901760, %v20198_v44  ;;  %v23776_v48 = vand.u32 4294901760, %v20200_v63  ;;  %v7786_v21 = vmax.f32 %v14714_v59, 0.0  ;;  %14149 = vmatpush1.bf16.msra.mxu1 %v20250_v51  ;;  %v23780_v44 = vand.u32 4294901760, %v19910_v20 }
 0xb41   :  { %23768 = vst [vmem:[#allocation72_spill] sm:$0xff] %v20264_v4  ;;  %v20273_v8 = vpack.c.bf16 %v23770_v5, %v23769_v9  ;;  %v20279_v49 = vpack.c.bf16 %v23773_v12, %v23772_v18  ;;  %23778 = vst [vmem:[#allocation81_spill] sm:$0xff] %v20287_v37  ;;  %v7787_v12 = vmax.f32 %v14715_v34, 0.0  ;;  %14151 = vmatprep.subr.bf16.mxu1 %v20264_v4  ;;  %v23782_v18 = vand.u32 4294901760, %v19928_v62 }
 0xb42   :  { %v20285_v30 = vpack.c.bf16 %v23776_v48, %v23775_v41  ;;  %v23779_v41 = vand.u32 4294901760, %v19896_v29  ;;  %v9372_v59 = vsub.f32 %v19910_v20, %v23780_v44  ;;  %v20304_v3 = vand.u32 4294901760, %v7786_v21 }
 0xb43   :  { %23771 = vst [vmem:[#allocation205_spill] sm:$0xff] %v20273_v8  ;;  %23774 = vst [vmem:[#allocation206_spill] sm:$0xff] %v20279_v49  ;;  %v9366_v63 = vsub.f32 %v19928_v62, %v23782_v18  ;;  %v20312_v9 = vand.u32 4294901760, %v7787_v12  ;;  %v23785_v4 = vand.u32 4294901760, %v19933_v35  ;;  %v23786_v34 = vand.u32 4294901760, %v19938_v26 }
 0xb44   :  { %23777 = vst [vmem:[#allocation78_spill] sm:$0xff] %v20285_v30  ;;  %v9360_v48 = vsub.f32 %v19896_v29, %v23779_v41  ;;  %23781 = vst [vmem:[#allocation87_spill] sm:$0xff] %v20304_v3  ;;  %v20318_v20 = vsub.f32 %v7786_v21, %v20304_v3  ;;  %v23787_v18 = vand.u32 4294901760, %v19943_v17  ;;  %14153 = vmatpush1.bf16.msra.mxu1 %v20273_v8  ;;  %v9373_v21 = vand.u32 4294901760, %v9372_v59 }
 0xb45   :  { %23783 = vst [vmem:[#allocation90_spill] sm:$0xff] %v20312_v9  ;;  %v9378_v5 = vsub.f32 %v19933_v35, %v23785_v4  ;;  %v9384_v29 = vsub.f32 %v19938_v26, %v23786_v34  ;;  %v20330_v41 = vsub.f32 %v7787_v12, %v20312_v9  ;;  %14155 = vmatprep.subr.bf16.mxu1 %v20279_v49  ;;  %v23788_v4 = vand.u32 4294901760, %v20266_v52 }
 0xb46   :  { %23784 = vst [vmem:[#allocation132_spill] sm:$0xff] %v20318_v20  ;;  %v9396_v62 = vsub.f32 %v19943_v17, %v23787_v18  ;;  %v9361_v44 = vand.u32 4294901760, %v9360_v48  ;;  %v23789_v34 = vand.u32 4294901760, %v20287_v37  ;;  %v9367_v18 = vand.u32 4294901760, %v9366_v63 }
 0xb47   :  { %v22252_v17 = vand.u32 4294901760, %v20330_v41  ;;  %v23791_v48 = vand.u32 4294901760, %v19952_v42  ;;  %v9379_v49 = vand.u32 4294901760, %v9378_v5  ;;  %v9385_v8 = vand.u32 4294901760, %v9384_v29 }
 0xb48   :  { %v20340_v26 = vpack.c.bf16 %v23789_v34, %v23788_v4  ;;  %v9397_v35 = vand.u32 4294901760, %v9396_v62  ;;  %v23792_v37 = vand.u32 4294901760, %v19957_v60  ;;  %14157 = vmatpush1.bf16.msra.mxu1 %v20285_v30  ;;  %v23793_v63 = vand.u32 4294901760, %v20289_v11 }
 0xb49   :  { %v9390_v59 = vsub.f32 %v19952_v42, %v23791_v48  ;;  %v23794_v34 = vand.u32 4294901760, %v20291_v56  ;;  %v9343_v48 = vsub.f32 %v20330_v41, %v22252_v17  ;;  %v14162_v3 = vpack.c.bf16 %v9373_v21, %v9361_v44 }
 0xb4a   :  { %23790 = vst [vmem:[#allocation133_spill] sm:$0xff] %v20340_v26  ;;  %v9402_v4 = vsub.f32 %v19957_v60, %v23792_v37  ;;  %v23796_v29 = vand.u32 4294901760, %v19962_v53  ;;  %v23797_v5 = vand.u32 4294901760, %v20318_v20  ;;  %14159 = vmatprep.subr.bf16.mxu1 %v20340_v26  ;;  %v23798_v51 = vand.u32 4294901760, %v19967_v31 }
 0xb4b   :  { %v20357_v12 = vpack.c.bf16 %v23794_v34, %v23793_v63  ;;  %v9344_v17 = vand.u32 4294901760, %v9343_v48  ;;  %v9391_v44 = vand.u32 4294901760, %v9390_v59  ;;  %v23799_v21 = vand.u32 4294901760, %v19972_v19 }
 0xb4c   :  { %v9408_v62 = vsub.f32 %v19962_v53, %v23796_v29  ;;  %v9349_v37 = vsub.f32 %v20318_v20, %v23797_v5  ;;  %v9420_v63 = vsub.f32 %v19967_v31, %v23798_v51  ;;  %v23800_v53 = vand.u32 4294901760, %v19986_v6 }
 0xb4d   :  { %23795 = vst [vmem:[#allocation135_spill] sm:$0xff] %v20357_v12  ;;  %v9414_v29 = vsub.f32 %v19972_v19, %v23799_v21  ;;  %v14164_v20 = vpack.c.bf16 %v9379_v49, %v9367_v18  ;;  %v14166_v26 = vpack.c.bf16 %v9397_v35, %v9385_v8  ;;  %v9403_v60 = vand.u32 4294901760, %v9402_v4  ;;  %14161 = vmatpush1.bf16.msra.mxu1 %v20357_v12 }
 0xb4e   :  { %v9426_v5 = vsub.f32 %v19986_v6, %v23800_v53  ;;  %v22263_v42 = vand.u32 4294901760, %v20014_v39  ;;  %9345 = vmatprep.mubr.f32.mxu1 %v9344_v17  ;;  %v9409_v51 = vand.u32 4294901760, %v9408_v62  ;;  %v22264_v48 = vand.u32 4294901760, %v20019_v16  ;;  %14163 = vmatprep.subr.bf16.mxu1 %v14162_v3 }
 0xb4f   :  { %v22265_v30 = vand.u32 4294901760, %v20033_v61  ;;  %v9350_v21 = vand.u32 4294901760, %v9349_v37  ;;  %v9421_v34 = vand.u32 4294901760, %v9420_v63  ;;  %v23801_v53 = vand.u32 4294901760, %v20004_v22 }
 0xb50   :  { %v23802_v49 = vand.u32 4294901760, %v20009_v0  ;;  %v9415_v18 = vand.u32 4294901760, %v9414_v29  ;;  %v9427_v17 = vand.u32 4294901760, %v9426_v5  ;;  %v22267_v4 = vand.u32 4294901760, %v20038_v55 }
 0xb51   :  { %v9432_v35 = vsub.f32 %v20004_v22, %v23801_v53  ;;  %v22266_v62 = vand.u32 4294901760, %v20043_v47  ;;  %9351 = vmatmul.mubr.f32.vlgmr.msra.gmra.mrb[16].mxu1 %v9350_v21  ;;  %v14168_v59 = vpack.c.bf16 %v9403_v60, %v9391_v44  ;;  %v9438_v3 = vsub.f32 %v20014_v39, %v22263_v42 }
 0xb52   :  { %v9444_v8 = vsub.f32 %v20009_v0, %v23802_v49  ;;  %14165 = vmatpush1.bf16.msra.mxu1 %v14164_v20  ;;  %9742 = vmatprep.mubr.f32.mxu1 %v20312_v9  ;;  %v9450_v29 = vsub.f32 %v20019_v16, %v22264_v48  ;;  %v23803_v5 = vand.u32 4294901760, %v20028_v2  ;;  %v9468_v60 = vsub.f32 %v20033_v61, %v22265_v30 }
 0xb53   :  { %v23804_v44 = vand.u32 4294901760, %v19999_v32  ;;  %14167 = vmatprep.subr.bf16.mxu1 %v14166_v26  ;;  %v14170_v20 = vpack.c.bf16 %v9421_v34, %v9409_v51  ;;  %v9433_v49 = vand.u32 4294901760, %v9432_v35  ;;  %v23806_v63 = vand.u32 4294901760, %v20021_v1 }
 0xb54   :  { %v9456_v21 = vsub.f32 %v20028_v2, %v23803_v5  ;;  %v9445_v42 = vand.u32 4294901760, %v9444_v8  ;;  %v14172_v37 = vpack.c.bf16 %v9427_v17, %v9415_v18  ;;  %v9462_v5 = vsub.f32 %v20038_v55, %v22267_v4 }
 0xb55   :  { %v20411_v53 = vsub.f32 %v19999_v32, %v23804_v44  ;;  %v20416_v48 = vsub.f32 %v20021_v1, %v23806_v63  ;;  %v9474_v30 = vsub.f32 %v20043_v47, %v22266_v62  ;;  %v23807_v32 = vand.u32 4294901760, %v20048_v25 }
 0xb56   :  { %v23808_v34 = vand.u32 4294901760, %v20066_v38  ;;  %14169 = vmatpush1.bf16.msra.mxu1 %v14168_v59  ;;  %v9439_v8 = vand.u32 4294901760, %v9438_v3  ;;  %v9451_v18 = vand.u32 4294901760, %v9450_v29  ;;  %v9457_v17 = vand.u32 4294901760, %v9456_v21  ;;  %v23810_v59 = vld [vmem:[#allocation200_spill] sm:$0xff]  ;;  %v23816_v3 = vld [vmem:[#allocation75_spill] sm:$0xff] }
 0xb57   :  { %23805 = vst [vmem:[#allocation136_spill] sm:$0xff] %v20411_v53  ;;  %v9480_v26 = vsub.f32 %v20048_v25, %v23807_v32  ;;  %v9469_v63 = vand.u32 4294901760, %v9468_v60  ;;  %v23809_v44 = vand.u32 4294901760, %v20023_v40  ;;  %14171 = vmatprep.subr.bf16.mxu1 %v14170_v20  ;;  %v14174_v32 = vpack.c.bf16 %v9445_v42, %v9433_v49 }
 0xb58   :  { %v9492_v51 = vsub.f32 %v20066_v38, %v23808_v34  ;;  %v22275_v4 = vand.u32 4294901760, %v20094_v13  ;;  %v22274_v34 = vand.u32 4294901760, %v20099_v46  ;;  %v9463_v9 = vand.u32 4294901760, %v9462_v5 }
 0xb59   :  { %v20435_v62 = vsub.f32 %v20023_v40, %v23809_v44  ;;  %v9475_v1 = vand.u32 4294901760, %v9474_v30  ;;  %v9481_v29 = vand.u32 4294901760, %v9480_v26  ;;  %v23811_v60 = vand.u32 4294901760, %v20084_v27  ;;  %v23814_v30 = vld [vmem:[#allocation129_spill] sm:$0xff] }
 0xb5a   :  { %v9493_v21 = vand.u32 4294901760, %v9492_v51  ;;  %v23812_v40 = vand.u32 4294901760, %v20089_v43  ;;  %v23813_v20 = vand.u32 4294901760, %v20059_v58  ;;  %v23815_v5 = vand.u32 4294901760, %v23814_v30  ;;  %14173 = vmatpush1.bf16.msra.mxu1 %v14172_v37 }
 0xb5b   :  { %v9486_v12 = vsub.f32 %v20084_v27, %v23811_v60  ;;  %v14176_v26 = vpack.c.bf16 %v9451_v18, %v9439_v8  ;;  %v14178_v51 = vpack.c.bf16 %v9469_v63, %v9457_v17  ;;  %14175 = vmatprep.subr.bf16.mxu1 %v14174_v32  ;;  %v9504_v60 = vsub.f32 %v20094_v13, %v22275_v4  ;;  %v23826_v13 = vld [vmem:[#allocation88_spill] sm:$0xff] }
 0xb5c   :  { %v9498_v42 = vsub.f32 %v20089_v43, %v23812_v40  ;;  %v20450_v49 = vsub.f32 %v20059_v58, %v23813_v20  ;;  %v20455_v44 = vsub.f32 %v23814_v30, %v23815_v5  ;;  %v9516_v40 = vsub.f32 %v20099_v46, %v22274_v34  ;;  %v23817_v20 = vld [vmem:[#allocation76_spill] sm:$0xff]  ;;  %v23825_v58 = vld [vmem:[#allocation86_spill] sm:$0xff] }
 0xb5d   :  { %v23818_v43 = vand.u32 4294901760, %v20077_v45  ;;  %v23820_v37 = vand.u32 4294901760, %v20079_v23  ;;  %v23822_v18 = vand.u32 4294901760, %v20104_v10  ;;  %v23823_v63 = vand.u32 4294901760, %v23810_v59 }
 0xb5e   :  { %v14180_v5 = vpack.c.bf16 %v9475_v1, %v9463_v9  ;;  %v14182_v34 = vpack.c.bf16 %v9493_v21, %v9481_v29  ;;  %v9487_v4 = vand.u32 4294901760, %v9486_v12  ;;  %v9499_v35 = vand.u32 4294901760, %v9498_v42  ;;  %14177 = vmatpush1.bf16.msra.mxu1 %v14176_v26  ;;  %v23830_v21 = vld [vmem:[#allocation54_spill] sm:$0xff]  ;;  %v23831_v26 = vld [vmem:[#allocation216_spill] sm:$0xff] }
 0xb5f   :  { %v20468_v30 = vsub.f32 %v20077_v45, %v23818_v43  ;;  %v20473_v8 = vsub.f32 %v20079_v23, %v23820_v37  ;;  %v9510_v17 = vsub.f32 %v20104_v10, %v23822_v18  ;;  %v9522_v32 = vsub.f32 %v23810_v59, %v23823_v63  ;;  %v23824_v43 = vld [vmem:[#allocation209_spill] sm:$0xff]  ;;  %v23827_v37 = vld [vmem:[#allocation91_spill] sm:$0xff]  ;;  %14179 = vmatprep.subr.bf16.mxu1 %v14178_v51 }
 0xb60   :  { %v22286_v45 = vand.u32 4294901760, %v23824_v43  ;;  %v9505_v38 = vand.u32 4294901760, %v9504_v60  ;;  %v9517_v18 = vand.u32 4294901760, %v9516_v40  ;;  %v23828_v10 = vand.u32 4294901760, %v23816_v3  ;;  %v23833_v40 = vld [vmem:[#allocation46_spill] sm:$0xff] }
 0xb61   :  { %23819 = vst [vmem:[#allocation93_spill] sm:$0xff] %v20468_v30  ;;  %23821 = vst [vmem:[#allocation100_spill] sm:$0xff] %v20473_v8  ;;  %v23829_v9 = vand.u32 4294901760, %v23817_v20  ;;  %v9511_v1 = vand.u32 4294901760, %v9510_v17  ;;  %v9523_v29 = vand.u32 4294901760, %v9522_v32  ;;  %v23832_v23 = vand.u32 4294901760, %v20123_v50 }
 0xb62   :  { %v9528_v63 = vsub.f32 %v23816_v3, %v23828_v10  ;;  %v14184_v60 = vpack.c.bf16 %v9499_v35, %v9487_v4  ;;  %14181 = vmatpush1.bf16.msra.mxu1 %v14180_v5  ;;  %v9534_v17 = vsub.f32 %v23824_v43, %v22286_v45  ;;  %v23834_v32 = vand.u32 4294901760, %v23825_v58 }
 0xb63   :  { %v9540_v12 = vsub.f32 %v23817_v20, %v23829_v9  ;;  %v20496_v51 = vsub.f32 %v20123_v50, %v23832_v23  ;;  %v23835_v46 = vand.u32 4294901760, %v23826_v13  ;;  %v23836_v50 = vand.u32 4294901760, %v23827_v37  ;;  %14183 = vmatprep.subr.bf16.mxu1 %v14182_v34 }
 0xb64   :  { %v9546_v9 = vsub.f32 %v23825_v58, %v23834_v32  ;;  %v23837_v35 = vand.u32 4294901760, %v20147_v36  ;;  %v14186_v23 = vpack.c.bf16 %v9517_v18, %v9505_v38  ;;  %v9529_v45 = vand.u32 4294901760, %v9528_v63 }
 0xb65   :  { %v9552_v42 = vsub.f32 %v23826_v13, %v23835_v46  ;;  %v9564_v4 = vsub.f32 %v23827_v37, %v23836_v50  ;;  %v9541_v10 = vand.u32 4294901760, %v9540_v12  ;;  %v23838_v27 = vand.u32 4294901760, %v20149_v14 }
 0xb66   :  { %v20515_v5 = vsub.f32 %v20147_v36, %v23837_v35  ;;  %v14188_v58 = vpack.c.bf16 %v9523_v29, %v9511_v1  ;;  %v23840_v46 = vand.u32 4294901760, %v23830_v21  ;;  %v23841_v50 = vand.u32 4294901760, %v23831_v26  ;;  %14185 = vmatpush1.bf16.msra.mxu1 %v14184_v60 }
 0xb67   :  { %v20520_v32 = vsub.f32 %v20149_v14, %v23838_v27  ;;  %v23842_v36 = vand.u32 4294901760, %v23833_v40  ;;  %v23843_v34 = vand.u32 4294901760, %v20223_v33  ;;  %v9535_v63 = vand.u32 4294901760, %v9534_v17  ;;  %14187 = vmatprep.subr.bf16.mxu1 %v14186_v23 }
 0xb68   :  { %v9558_v13 = vsub.f32 %v23830_v21, %v23840_v46  ;;  %v9570_v37 = vsub.f32 %v23831_v26, %v23841_v50  ;;  %v9547_v12 = vand.u32 4294901760, %v9546_v9  ;;  %v9553_v1 = vand.u32 4294901760, %v9552_v42  ;;  %v23846_v26 = vld [vmem:[#allocation69_spill] sm:$0xff] }
 0xb69   :  { %23839 = vst [vmem:[#allocation103_spill] sm:$0xff] %v20520_v32  ;;  %v9576_v38 = vsub.f32 %v23833_v40, %v23842_v36  ;;  %v9588_v18 = vsub.f32 %v20223_v33, %v23843_v34  ;;  %v9565_v29 = vand.u32 4294901760, %v9564_v4  ;;  %v23844_v35 = vand.u32 4294901760, %v20151_v54  ;;  %v23845_v40 = vld [vmem:[#allocation49_spill] sm:$0xff] }
 0xb6a   :  { %v14190_v50 = vpack.c.bf16 %v9541_v10, %v9529_v45  ;;  %v22295_v36 = vand.u32 4294901760, %v20238_v7  ;;  %v22294_v34 = vand.u32 4294901760, %v23845_v40  ;;  %v9559_v33 = vand.u32 4294901760, %v9558_v13  ;;  %v23850_v13 = vld [vmem:[#allocation214_spill] sm:$0xff]  ;;  %14189 = vmatpush1.bf16.msra.mxu1 %v14188_v58  ;;  %v23855_v58 = vld [vmem:[#allocation51_spill] sm:$0xff] }
 0xb6b   :  { %v20539_v46 = vsub.f32 %v20151_v54, %v23844_v35  ;;  %v9571_v27 = vand.u32 4294901760, %v9570_v37  ;;  %v22296_v14 = vand.u32 4294901760, %v23846_v26  ;;  %v9577_v17 = vand.u32 4294901760, %v9576_v38 }
 0xb6c   :  { %v9589_v42 = vand.u32 4294901760, %v9588_v18  ;;  %v23847_v9 = vand.u32 4294901760, %v20228_v28  ;;  %v23848_v54 = vand.u32 4294901760, %v20233_v15  ;;  %v23849_v10 = vand.u32 4294901760, %v20173_v57  ;;  %14191 = vmatprep.subr.bf16.mxu1 %v14190_v50 }
 0xb6d   :  { %v23851_v37 = vand.u32 4294901760, %v23850_v13  ;;  %v14192_v38 = vpack.c.bf16 %v9547_v12, %v9535_v63  ;;  %v14194_v18 = vpack.c.bf16 %v9565_v29, %v9553_v1  ;;  %v23853_v60 = vand.u32 4294901760, %v20177_v24 }
 0xb6e   :  { %v9582_v4 = vsub.f32 %v20228_v28, %v23847_v9  ;;  %v9594_v45 = vsub.f32 %v20233_v15, %v23848_v54  ;;  %v20554_v23 = vsub.f32 %v20173_v57, %v23849_v10  ;;  %v9600_v9 = vsub.f32 %v20238_v7, %v22295_v36 }
 0xb6f   :  { %v20559_v35 = vsub.f32 %v23850_v13, %v23851_v37  ;;  %v9612_v54 = vsub.f32 %v23845_v40, %v22294_v34  ;;  %v20572_v13 = vsub.f32 %v20177_v24, %v23853_v60  ;;  %v23856_v63 = vand.u32 4294901760, %v23855_v58  ;;  %14193 = vmatpush1.bf16.msra.mxu1 %v14192_v38  ;;  %v23861_v38 = vld [vmem:[#allocation50_spill] sm:$0xff] }
 0xb70   :  { %v9606_v1 = vsub.f32 %v23846_v26, %v22296_v14  ;;  %v23858_v29 = vand.u32 4294901760, %v20411_v53  ;;  %v14196_v37 = vpack.c.bf16 %v9571_v27, %v9559_v33  ;;  %v14198_v34 = vpack.c.bf16 %v9589_v42, %v9577_v17  ;;  %14195 = vmatprep.subr.bf16.mxu1 %v14194_v18 }
 0xb71   :  { %23852 = vst [vmem:[#allocation104_spill] sm:$0xff] %v20559_v35  ;;  %23854 = vst [vmem:[#allocation138_spill] sm:$0xff] %v20572_v13  ;;  %v20577_v12 = vsub.f32 %v23855_v58, %v23856_v63  ;;  %v9583_v36 = vand.u32 4294901760, %v9582_v4  ;;  %v9595_v10 = vand.u32 4294901760, %v9594_v45  ;;  %v22298_v24 = vand.u32 4294901760, %v20450_v49 }
 0xb72   :  { %v9618_v50 = vsub.f32 %v20411_v53, %v23858_v29  ;;  %v22299_v60 = vand.u32 4294901760, %v20455_v44  ;;  %v22302_v63 = vand.u32 4294901760, %v20473_v8  ;;  %v9601_v57 = vand.u32 4294901760, %v9600_v9 }
 0xb73   :  { %23857 = vst [vmem:[#allocation139_spill] sm:$0xff] %v20577_v12  ;;  %v9613_v14 = vand.u32 4294901760, %v9612_v54  ;;  %v23859_v26 = vand.u32 4294901760, %v20416_v48  ;;  %v23860_v33 = vand.u32 4294901760, %v20435_v62  ;;  %v9607_v17 = vand.u32 4294901760, %v9606_v1  ;;  %14197 = vmatpush1.bf16.msra.mxu1 %v14196_v37 }
 0xb74   :  { %v9619_v42 = vand.u32 4294901760, %v9618_v50  ;;  %v23862_v58 = vand.u32 4294901760, %v23861_v38  ;;  %v14200_v9 = vpack.c.bf16 %v9595_v10, %v9583_v36  ;;  %v9630_v1 = vsub.f32 %v20450_v49, %v22298_v24  ;;  %v23865_v10 = vld [vmem:[#allocation52_spill] sm:$0xff]  ;;  %14199 = vmatprep.subr.bf16.mxu1 %v14198_v34 }
 0xb75   :  { %v9624_v29 = vsub.f32 %v20416_v48, %v23859_v26  ;;  %v9636_v27 = vsub.f32 %v20435_v62, %v23860_v33  ;;  %v9642_v50 = vsub.f32 %v20455_v44, %v22299_v60  ;;  %v23864_v33 = vand.u32 4294901760, %v20468_v30 }
 0xb76   :  { %v20600_v18 = vsub.f32 %v23861_v38, %v23862_v58  ;;  %v9660_v36 = vsub.f32 %v20473_v8, %v22302_v63  ;;  %v23866_v58 = vand.u32 4294901760, %v23865_v10  ;;  %v14202_v38 = vpack.c.bf16 %v9613_v14, %v9601_v57 }
 0xb77   :  { %v9648_v45 = vsub.f32 %v20468_v30, %v23864_v33  ;;  %v9625_v24 = vand.u32 4294901760, %v9624_v29  ;;  %v9637_v26 = vand.u32 4294901760, %v9636_v27  ;;  %v23868_v54 = vand.u32 4294901760, %v20266_v52  ;;  %14201 = vmatpush1.bf16.msra.mxu1 %v14200_v9 }
 0xb78   :  { %23863 = vst [vmem:[#allocation141_spill] sm:$0xff] %v20600_v18  ;;  %v20619_v37 = vsub.f32 %v23865_v10, %v23866_v58  ;;  %v14204_v4 = vpack.c.bf16 %v9619_v42, %v9607_v17  ;;  %v23870_v33 = vand.u32 4294901760, %v20496_v51  ;;  %v23871_v63 = vand.u32 4294901760, %v20515_v5  ;;  %v23874_v58 = vld [vmem:[#allocation81_spill] sm:$0xff]  ;;  %14203 = vmatprep.subr.bf16.mxu1 %v14202_v38 }
 0xb79   :  { %v20624_v60 = vsub.f32 %v20266_v52, %v23868_v54  ;;  %v23872_v10 = vand.u32 4294901760, %v20520_v32  ;;  %v23873_v34 = vand.u32 4294901760, %v20539_v46  ;;  %v9631_v27 = vand.u32 4294901760, %v9630_v1 }
 0xb7a   :  { %23867 = vst [vmem:[#allocation106_spill] sm:$0xff] %v20619_v37  ;;  %v9654_v30 = vsub.f32 %v20496_v51, %v23870_v33  ;;  %v9666_v8 = vsub.f32 %v20515_v5, %v23871_v63  ;;  %v9643_v17 = vand.u32 4294901760, %v9642_v50  ;;  %v9649_v42 = vand.u32 4294901760, %v9648_v45 }
 0xb7b   :  { %23869 = vst [vmem:[#allocation107_spill] sm:$0xff] %v20624_v60  ;;  %v9672_v14 = vsub.f32 %v20520_v32, %v23872_v10  ;;  %v9684_v57 = vsub.f32 %v20539_v46, %v23873_v34  ;;  %v9661_v54 = vand.u32 4294901760, %v9660_v36  ;;  %v23875_v33 = vand.u32 4294901760, %v23874_v58  ;;  %14205 = vmatpush1.bf16.msra.mxu1 %v14204_v4 }
 0xb7c   :  { %v14206_v10 = vpack.c.bf16 %v9637_v26, %v9625_v24  ;;  %v22307_v32 = vand.u32 4294901760, %v20572_v13  ;;  %v23877_v52 = vand.u32 4294901760, %v20289_v11  ;;  %v23879_v9 = vand.u32 4294901760, %v20291_v56 }
 0xb7d   :  { %v20643_v63 = vsub.f32 %v23874_v58, %v23875_v33  ;;  %v9655_v1 = vand.u32 4294901760, %v9654_v30  ;;  %v9667_v50 = vand.u32 4294901760, %v9666_v8  ;;  %v9673_v36 = vand.u32 4294901760, %v9672_v14 }
 0xb7e   :  { %v20650_v29 = vsub.f32 %v20289_v11, %v23877_v52  ;;  %v20655_v45 = vsub.f32 %v20291_v56, %v23879_v9  ;;  %v9685_v58 = vand.u32 4294901760, %v9684_v57  ;;  %v23881_v24 = vand.u32 4294901760, %v20554_v23  ;;  %14207 = vmatprep.subr.bf16.mxu1 %v14206_v10 }
 0xb7f   :  { %23876 = vst [vmem:[#allocation109_spill] sm:$0xff] %v20643_v63  ;;  %v23882_v38 = vand.u32 4294901760, %v20559_v35  ;;  %v14208_v11 = vpack.c.bf16 %v9643_v17, %v9631_v27  ;;  %v14210_v52 = vpack.c.bf16 %v9661_v54, %v9649_v42  ;;  %v22312_v34 = vand.u32 4294901760, %v20600_v18 }
 0xb80   :  { %23878 = vst [vmem:[#allocation110_spill] sm:$0xff] %v20650_v29  ;;  %23880 = vst [vmem:[#allocation112_spill] sm:$0xff] %v20655_v45  ;;  %v9678_v26 = vsub.f32 %v20554_v23, %v23881_v24  ;;  %v22309_v56 = vand.u32 4294901760, %v20619_v37  ;;  %v9696_v30 = vsub.f32 %v20572_v13, %v22307_v32  ;;  %v23883_v8 = vand.u32 4294901760, %v20577_v12 }
 0xb81   :  { %v9690_v33 = vsub.f32 %v20559_v35, %v23882_v38  ;;  %v22308_v57 = vand.u32 4294901760, %v20624_v60  ;;  %v22310_v9 = vand.u32 4294901760, %v20643_v63  ;;  %v14212_v4 = vpack.c.bf16 %v9667_v50, %v9655_v1  ;;  %14209 = vmatpush1.bf16.msra.mxu1 %v14208_v11 }
 0xb82   :  { %v9708_v14 = vsub.f32 %v20577_v12, %v23883_v8  ;;  %v14214_v27 = vpack.c.bf16 %v9685_v58, %v9673_v36  ;;  %v9679_v17 = vand.u32 4294901760, %v9678_v26  ;;  %v9702_v54 = vsub.f32 %v20600_v18, %v22312_v34  ;;  %14211 = vmatprep.subr.bf16.mxu1 %v14210_v52  ;;  %v23887_v34 = vld [vmem:[#allocation162_spill] sm:$0xff] }
 0xb83   :  { %v9691_v42 = vand.u32 4294901760, %v9690_v33  ;;  %v9714_v10 = vsub.f32 %v20619_v37, %v22309_v56  ;;  %v22311_v24 = vand.u32 4294901760, %v20650_v29  ;;  %v22313_v38 = vand.u32 4294901760, %v20655_v45 }
 0xb84   :  { %v9697_v8 = vand.u32 4294901760, %v9696_v30  ;;  %v9709_v32 = vand.u32 4294901760, %v9708_v14  ;;  %v9720_v1 = vsub.f32 %v20624_v60, %v22308_v57  ;;  %v9732_v50 = vsub.f32 %v20643_v63, %v22310_v9 }
 0xb85   :  { %v14216_v36 = vpack.c.bf16 %v9691_v42, %v9679_v17  ;;  %14213 = vmatpush1.bf16.msra.mxu1 %v14212_v4  ;;  %v9703_v58 = vand.u32 4294901760, %v9702_v54  ;;  %v9715_v26 = vand.u32 4294901760, %v9714_v10  ;;  %v9726_v33 = vsub.f32 %v20650_v29, %v22311_v24  ;;  %v23884_v42 = vld [vmem:[#allocation70_spill] sm:$0xff]  ;;  %v23885_v54 = vld [vmem:[#allocation99_spill] sm:$0xff]  ;;  %v23886_v24 = vld [vmem:[#allocation188_spill] sm:$0xff] }
 0xb86   :  { %v9738_v11 = vsub.f32 %v20655_v45, %v22313_v38  ;;  %14215 = vmatprep.subr.bf16.mxu1 %v14214_v27  ;;  %v14218_v52 = vpack.c.bf16 %v9709_v32, %v9697_v8  ;;  %v9721_v30 = vand.u32 4294901760, %v9720_v1  ;;  %v9733_v14 = vand.u32 4294901760, %v9732_v50  ;;  %v23888_v32 = vld [vmem:[#allocation163_spill] sm:$0xff]  ;;  %v23889_v27 = vld [vmem:[#allocation170_spill] sm:$0xff]  ;;  %v23891_v50 = vld [vmem:[#allocation177_spill] sm:$0xff] }
 0xb87   :  { %v14220_v57 = vpack.c.bf16 %v9715_v26, %v9703_v58  ;;  %v9727_v56 = vand.u32 4294901760, %v9726_v33  ;;  %v14226_v10 = vpack.c.bf16 %v23885_v54, %v23884_v42  ;;  %v14228_v38 = vpack.c.bf16 %v23887_v34, %v23886_v24  ;;  %v23890_v1 = vld [vmem:[#allocation87_spill] sm:$0xff] }
 0xb88   :  { %v9739_v9 = vand.u32 4294901760, %v9738_v11  ;;  %v14222_v4 = vpack.c.bf16 %v9733_v14, %v9721_v30  ;;  %v14230_v8 = vpack.c.bf16 %v23889_v27, %v23888_v32  ;;  %v14236_v58 = vpack.c.bf16 %v19986_v6, %v19972_v19  ;;  %v23895_v14 = vld [vmem:[#allocation98_spill] sm:$0xff] }
 0xb89   :  { %14217 = vmatpush1.bf16.msra.mxu1 %v14216_v36  ;;  %v14238_v26 = vpack.c.bf16 %v20009_v0, %v20004_v22  ;;  %v14242_v33 = vpack.c.bf16 %v20033_v61, %v20028_v2  ;;  %v14244_v11 = vpack.c.bf16 %v20043_v47, %v20038_v55 }
 0xb8a   :  { %14219 = vmatprep.subr.bf16.mxu1 %v14218_v52  ;;  %v14224_v17 = vpack.c.bf16 %v9739_v9, %v9727_v56  ;;  %v23893_v9 = vld [vmem:[#allocation185_spill] sm:$0xff] }
 0xb8b   :  { %v14234_v36 = vpack.c.bf16 %v19967_v31, %v23893_v9  ;;  %v23894_v52 = vld [vmem:[#allocation193_spill] sm:$0xff] }
 0xb8c   :  { %v14246_v30 = vpack.c.bf16 %v23894_v52, %v20048_v25 }
 0xb8d   :  { %14221 = vmatpush1.bf16.msra.mxu1 %v14220_v57  ;;  %v23892_v57 = vld [vmem:[#allocation179_spill] sm:$0xff] }
 0xb8e   :  { %14223 = vmatprep.subr.bf16.mxu1 %v14222_v4  ;;  %v14232_v56 = vpack.c.bf16 %v23892_v57, %v23891_v50  ;;  %v23896_v4 = vld [vmem:[#allocation196_spill] sm:$0xff] }
 0xb91   :  { %14225 = vmatpush1.bf16.msra.mxu1 %v14224_v17  ;;  %v14248_v17 = vpack.c.bf16 %v23896_v4, %v23895_v14 }
 0xb92   :  { %14227 = vmatprep.subr.bf16.mxu1 %v14226_v10  ;;  %v23897_v10 = vld [vmem:[#allocation197_spill] sm:$0xff] }
 0xb94   :  { %9744 = vmatmul.mubr.f32.vlgmr.msra.gmra.mrb[16].mxu1 %v23890_v1  ;;  %v23902_v1 = vld [vmem:[#allocation91_spill] sm:$0xff] }
 0xb95   :  { %14229 = vmatpush1.bf16.msra.mxu1 %v14228_v38  ;;  %9944 = vmatprep.mubr.f32.mxu1 %v20330_v41  ;;  %v14240_v38 = vpack.c.bf16 %v20019_v16, %v20014_v39 }
 0xb96   :  { %14231 = vmatprep.subr.bf16.mxu1 %v14230_v8  ;;  %v23898_v8 = vld [vmem:[#allocation95_spill] sm:$0xff] }
 0xb99   :  { %14233 = vmatpush1.bf16.msra.mxu1 %v14232_v56  ;;  %v14250_v56 = vpack.c.bf16 %v23898_v8, %v23897_v10  ;;  %v23905_v10 = vld [vmem:[#allocation33_spill] sm:$0xff] }
 0xb9a   :  { %14235 = vmatprep.subr.bf16.mxu1 %v14234_v36  ;;  %v23899_v36 = vld [vmem:[#allocation199_spill] sm:$0xff] }
 0xb9d   :  { %14237 = vmatpush1.bf16.msra.mxu1 %v14236_v58  ;;  %v14252_v58 = vpack.c.bf16 %v23810_v59, %v23899_v36 }
 0xb9e   :  { %14239 = vmatprep.subr.bf16.mxu1 %v14238_v26  ;;  %v14254_v26 = vpack.c.bf16 %v23817_v20, %v23816_v3 }
 0xba1   :  { %14241 = vmatpush1.bf16.msra.mxu1 %v14240_v38  ;;  %v23900_v38 = vld [vmem:[#allocation86_spill] sm:$0xff] }
 0xba2   :  { %14243 = vmatprep.subr.bf16.mxu1 %v14242_v33  ;;  %v14256_v33 = vpack.c.bf16 %v23900_v38, %v23824_v43 }
 0xba5   :  { %14245 = vmatpush1.bf16.msra.mxu1 %v14244_v11  ;;  %v23901_v11 = vld [vmem:[#allocation88_spill] sm:$0xff] }
 0xba6   :  { %14247 = vmatprep.subr.bf16.mxu1 %v14246_v30  ;;  %v14258_v4 = vpack.c.bf16 %v23902_v1, %v23901_v11  ;;  %v23903_v30 = vld [vmem:[#allocation216_spill] sm:$0xff] }
 0xba7   :  { %v14260_v8 = vpack.c.bf16 %v23903_v30, %v23830_v21 }
 0xba9   :  { %14249 = vmatpush1.bf16.msra.mxu1 %v14248_v17  ;;  %v23904_v17 = vld [vmem:[#allocation46_spill] sm:$0xff] }
 0xbaa   :  { %14251 = vmatprep.subr.bf16.mxu1 %v14250_v56  ;;  %v14262_v59 = vpack.c.bf16 %v23905_v10, %v23904_v17  ;;  %v14264_v56 = vpack.c.bf16 %v20233_v15, %v20228_v28  ;;  %v23908_v10 = vld [vmem:[#allocation100_spill] sm:$0xff] }
 0xbad   :  { %14253 = vmatpush1.bf16.msra.mxu1 %v14252_v58  ;;  %v14266_v58 = vpack.c.bf16 %v23845_v40, %v20238_v7 }
 0xbae   :  { %14255 = vmatprep.subr.bf16.mxu1 %v14254_v26  ;;  %v23906_v26 = vld [vmem:[#allocation69_spill] sm:$0xff] }
 0xbaf   :  { %v14268_v1 = vpack.c.bf16 %v20411_v53, %v23906_v26 }
 0xbb1   :  { %14257 = vmatpush1.bf16.msra.mxu1 %v14256_v33  ;;  %v14270_v33 = vpack.c.bf16 %v20435_v62, %v20416_v48 }
 0xbb2   :  { %14259 = vmatprep.subr.bf16.mxu1 %v14258_v4  ;;  %v14272_v4 = vpack.c.bf16 %v20455_v44, %v20450_v49 }
 0xbb5   :  { %14261 = vmatpush1.bf16.msra.mxu1 %v14260_v8  ;;  %v23907_v8 = vld [vmem:[#allocation93_spill] sm:$0xff] }
 0xbb6   :  { %14263 = vmatprep.subr.bf16.mxu1 %v14262_v59  ;;  %v14274_v15 = vpack.c.bf16 %v23908_v10, %v23907_v8  ;;  %v14276_v59 = vpack.c.bf16 %v20515_v5, %v20496_v51 }
 0xbb9   :  { %14265 = vmatpush1.bf16.msra.mxu1 %v14264_v56  ;;  %v23909_v56 = vld [vmem:[#allocation103_spill] sm:$0xff] }
 0xbba   :  { %14267 = vmatprep.subr.bf16.mxu1 %v14266_v58  ;;  %v14278_v53 = vpack.c.bf16 %v20539_v46, %v23909_v56  ;;  %v14280_v58 = vpack.c.bf16 %v20559_v35, %v20554_v23  ;;  %v23912_v35 = vld [vmem:[#allocation94_spill] sm:$0xff] }
 0xbbd   :  { %14269 = vmatpush1.bf16.msra.mxu1 %v14268_v1  ;;  %v14282_v1 = vpack.c.bf16 %v20577_v12, %v20572_v13  ;;  %v10520_v13 = vld [vmem:[#allocation17 + $0xb0] sm:$0xff] }
 0xbbe   :  { %14271 = vmatprep.subr.bf16.mxu1 %v14270_v33  ;;  %v14284_v33 = vpack.c.bf16 %v20619_v37, %v20600_v18  ;;  %v23914_v37 = vld [vmem:[#allocation34_spill] sm:$0xff]  ;;  %v10502_v18 = vld [vmem:[#allocation17 + $0x20] sm:$0xff] }
 0xbc1   :  { %14273 = vmatpush1.bf16.msra.mxu1 %v14272_v4  ;;  %v14286_v4 = vpack.c.bf16 %v20643_v63, %v20624_v60  ;;  %v23916_v63 = vld [vmem:[#allocation37_spill] sm:$0xff] }
 0xbc2   :  { %14275 = vmatprep.subr.bf16.mxu1 %v14274_v15  ;;  %v14288_v15 = vpack.c.bf16 %v20655_v45, %v20650_v29  ;;  %v23918_v45 = vld [vmem:[#allocation61_spill] sm:$0xff] }
 0xbc3   :  { %v10518_v29 = vld [vmem:[#allocation17 + $0xa0] sm:$0xff] }
 0xbc5   :  { %14277 = vmatpush1.bf16.msra.mxu1 %v14276_v59  ;;  %v23910_v59 = vld [vmem:[#allocation31_spill] sm:$0xff] }
 0xbc6   :  { %14279 = vmatprep.subr.bf16.mxu1 %v14278_v53  ;;  %v23911_v53 = vld [vmem:[#allocation132_spill] sm:$0xff] }
 0xbc9   :  { %14281 = vmatpush1.bf16.msra.mxu1 %v14280_v58  ;;  %v23913_v58 = vand.u32 4294901760, %v20330_v41  ;;  %v23923_v41 = vld [vmem:[#allocation45_spill] sm:$0xff] }
 0xbca   :  { %14283 = vmatprep.subr.bf16.mxu1 %v14282_v1  ;;  %v23915_v1 = vld [vmem:[#allocation97_spill] sm:$0xff] }
 0xbcd   :  { %14285 = vmatpush1.bf16.msra.mxu1 %v14284_v33  ;;  %v23917_v33 = vld [vmem:[#allocation59_spill] sm:$0xff] }
 0xbce   :  { %14287 = vmatprep.subr.bf16.mxu1 %v14286_v4  ;;  %v23919_v4 = vld [vmem:[#allocation62_spill] sm:$0xff] }
 0xbd1   :  { %14289 = vmatpush1.bf16.msra.mxu1 %v14288_v15  ;;  %v23920_v15 = vld [vmem:[#allocation38_spill] sm:$0xff] }
 0xbd2   :  { %14291 = vmatprep.subr.bf16.mxu1 %v23910_v59  ;;  %v23921_v59 = vld [vmem:[#allocation43_spill] sm:$0xff] }
 0xbd4   :  { %9947 = vmatmul.mubr.f32.vlgmr.msra.gmra.mrb[16].mxu1 %v23911_v53 }
 0xbd5   :  { %14293 = vmatpush1.bf16.msra.mxu1 %v23912_v35  ;;  %10084 = vmatprep.mubr.f32.mxu1 %v23913_v58  ;;  %v23922_v35 = vld [vmem:[#allocation48_spill] sm:$0xff]  ;;  %v23924_v58 = vld [vmem:[#allocation55_spill] sm:$0xff] }
 0xbd6   :  { %14295 = vmatprep.subr.bf16.mxu1 %v23914_v37  ;;  %v23925_v37 = vld [vmem:[#allocation66_spill] sm:$0xff] }
 0xbd9   :  { %14297 = vmatpush1.bf16.msra.mxu1 %v23915_v1  ;;  %v23926_v1 = vld [vmem:[#allocation67_spill] sm:$0xff] }
 0xbda   :  { %14299 = vmatprep.subr.bf16.mxu1 %v23916_v63  ;;  %v23927_v63 = vld [vmem:[#allocation96_spill] sm:$0xff] }
 0xbdd   :  { %14301 = vmatpush1.bf16.msra.mxu1 %v23917_v33  ;;  %v23928_v33 = vld [vmem:[#allocation187_spill] sm:$0xff] }
 0xbde   :  { %14303 = vmatprep.subr.bf16.mxu1 %v23918_v45  ;;  %v23929_v45 = vld [vmem:[#allocation186_spill] sm:$0xff] }
 0xbe1   :  { %14305 = vmatpush1.bf16.msra.mxu1 %v23919_v4  ;;  %v23930_v4 = vld [vmem:[#allocation190_spill] sm:$0xff] }
 0xbe2   :  { %14307 = vmatprep.subr.bf16.mxu1 %v23920_v15  ;;  %v23931_v15 = vld [vmem:[#allocation191_spill] sm:$0xff] }
 0xbe5   :  { %14309 = vmatpush1.bf16.msra.mxu1 %v23921_v59  ;;  %v23932_v59 = vld [vmem:[#allocation194_spill] sm:$0xff] }
 0xbe6   :  { %14311 = vmatprep.subr.bf16.mxu1 %v23922_v35  ;;  %v23933_v35 = vld [vmem:[#allocation71_spill] sm:$0xff] }
 0xbe9   :  { %14313 = vmatpush1.bf16.msra.mxu1 %v23923_v41  ;;  %v23934_v41 = vld [vmem:[#allocation212_spill] sm:$0xff] }
 0xbea   :  { %14315 = vmatprep.subr.bf16.mxu1 %v23924_v58  ;;  %v23935_v58 = vld [vmem:[#allocation44_spill] sm:$0xff] }
 0xbed   :  { %14317 = vmatpush1.bf16.msra.mxu1 %v23925_v37  ;;  %v23936_v37 = vld [vmem:[#allocation56_spill] sm:$0xff] }
 0xbee   :  { %14319 = vmatprep.subr.bf16.mxu1 %v23926_v1  ;;  %v23937_v1 = vld [vmem:[#allocation63_spill] sm:$0xff] }
 0xbf1   :  { %14321 = vmatpush1.bf16.msra.mxu1 %v23927_v63  ;;  %v23938_v63 = vld [vmem:[#allocation72_spill] sm:$0xff] }
 0xbf2   :  { %14323 = vmatprep.subr.bf16.mxu1 %v23928_v33  ;;  %v23939_v33 = vld [vmem:[#allocation205_spill] sm:$0xff] }
 0xbf5   :  { %14325 = vmatpush1.bf16.msra.mxu1 %v23929_v45  ;;  %v23940_v45 = vld [vmem:[#allocation206_spill] sm:$0xff] }
 0xbf6   :  { %14327 = vmatprep.subr.bf16.mxu1 %v23930_v4  ;;  %v23941_v4 = vld [vmem:[#allocation78_spill] sm:$0xff] }
 0xbf9   :  { %14329 = vmatpush1.bf16.msra.mxu1 %v23931_v15  ;;  %v23942_v15 = vld [vmem:[#allocation133_spill] sm:$0xff] }
 0xbfa   :  { %14331 = vmatprep.subr.bf16.mxu1 %v23932_v59 }
 0xbfd   :  { %14333 = vmatpush1.bf16.msra.mxu1 %v23933_v35  ;;  %v23943_v35 = vand.u32 4294901760, %v23884_v42  ;;  %v23951_v42 = vand.u32 4294901760, %v23891_v50 }
 0xbfe   :  { %14335 = vmatprep.subr.bf16.mxu1 %v23934_v41  ;;  %v23944_v41 = vand.u32 4294901760, %v23885_v54 }
 0xc00   :  { %v14354_v59 = vpack.c.bf16 %v23944_v41, %v23943_v35  ;;  %v23952_v35 = vand.u32 4294901760, %v23892_v57  ;;  %v23953_v41 = vand.u32 4294901760, %v23893_v9  ;;  %v10499_v57 = vld [vmem:[#allocation17 + $0x8] sm:$0xff]  ;;  %v10517_v9 = vld [vmem:[#allocation17 + $0x98] sm:$0xff] }
 0xc01   :  { %14337 = vmatpush1.bf16.msra.mxu1 %v23935_v58  ;;  %v23945_v58 = vld [vmem:[#allocation135_spill] sm:$0xff] }
 0xc02   :  { %14339 = vmatprep.subr.bf16.mxu1 %v23936_v37  ;;  %v23946_v37 = vand.u32 4294901760, %v23886_v24  ;;  %v14360_v54 = vpack.c.bf16 %v23952_v35, %v23951_v42  ;;  %v23954_v24 = vand.u32 4294901760, %v19967_v31  ;;  %v10516_v42 = vld [vmem:[#allocation17 + $0x90] sm:$0xff]  ;;  %v23958_v31 = vand.u32 4294901760, %v20004_v22  ;;  %v10503_v22 = vld [vmem:[#allocation17 + $0x28] sm:$0xff] }
 0xc03   :  { %v23959_v35 = vand.u32 4294901760, %v20009_v0 }
 0xc05   :  { %14341 = vmatpush1.bf16.msra.mxu1 %v23937_v1  ;;  %v23947_v1 = vand.u32 4294901760, %v23887_v34  ;;  %v14362_v34 = vpack.c.bf16 %v23954_v24, %v23953_v41  ;;  %v14366_v41 = vpack.c.bf16 %v23959_v35, %v23958_v31  ;;  %v10592_v24 = vand.u32 4294901760, %v10516_v42 }
 0xc06   :  { %14343 = vmatprep.subr.bf16.mxu1 %v23938_v63 }
 0xc07   :  { %v14356_v63 = vpack.c.bf16 %v23947_v1, %v23946_v37  ;;  %v10514_v37 = vld [vmem:[#allocation17 + $0x80] sm:$0xff]  ;;  %v20839_v35 = vsub.f32 %v10516_v42, %v10592_v24 }
 0xc08   :  { %v10498_v1 = vld [vmem:[#allocation17] sm:$0xff]  ;;  %v10586_v50 = vand.u32 4294901760, %v10514_v37 }
 0xc09   :  { %14345 = vmatpush1.bf16.msra.mxu1 %v23939_v33  ;;  %v23948_v33 = vand.u32 4294901760, %v23888_v32  ;;  %v23955_v32 = vld [vmem:[#allocation90_spill] sm:$0xff]  ;;  %23966 = vst [vmem:[#allocation122_spill] sm:$0xff] %v20839_v35 }
 0xc0a   :  { %14347 = vmatprep.subr.bf16.mxu1 %v23940_v45  ;;  %v23949_v45 = vand.u32 4294901760, %v23889_v27  ;;  %v23957_v27 = vand.u32 4294901760, %v19986_v6 }
 0xc0d   :  { %14349 = vmatpush1.bf16.msra.mxu1 %v23941_v4  ;;  %v14358_v4 = vpack.c.bf16 %v23949_v45, %v23948_v33  ;;  %v23956_v45 = vand.u32 4294901760, %v19972_v19  ;;  %v10501_v19 = vld [vmem:[#allocation17 + $0x18] sm:$0xff] }
 0xc0e   :  { %14351 = vmatprep.subr.bf16.mxu1 %v23942_v15  ;;  %v23950_v15 = vand.u32 4294901760, %v23911_v53 }
 0xc0f   :  { %v14364_v53 = vpack.c.bf16 %v23957_v27, %v23956_v45  ;;  %v20827_v45 = vsub.f32 %v10514_v37, %v10586_v50 }
 0xc11   :  { %14353 = vmatpush1.bf16.msra.mxu1 %v23945_v58  ;;  %v10595_v58 = vand.u32 4294901760, %v10517_v9 }
 0xc12   :  { %14355 = vmatprep.subr.bf16.mxu1 %v14354_v59  ;;  %v10515_v59 = vld [vmem:[#allocation17 + $0x88] sm:$0xff] }
 0xc13   :  { %v10589_v33 = vand.u32 4294901760, %v10515_v59  ;;  %v20837_v31 = vpack.c.bf16 %v10595_v58, %v10592_v24  ;;  %v20842_v37 = vsub.f32 %v10517_v9, %v10595_v58  ;;  %v10505_v24 = vld [vmem:[#allocation17 + $0x38] sm:$0xff] }
 0xc14   :  { %10088 = vmatmul.mubr.f32.vlgmr.msra.gmra.mrb[16].mxu1 %v23950_v15  ;;  %v10538_v15 = vand.u32 4294901760, %v10498_v1 }
 0xc15   :  { %14357 = vmatpush1.bf16.msra.mxu1 %v14356_v63  ;;  %10351 = vmatprep.mubr.f32.mxu1 %v23955_v32  ;;  %v10541_v63 = vand.u32 4294901760, %v10499_v57  ;;  %v10500_v32 = vld [vmem:[#allocation17 + $0x10] sm:$0xff]  ;;  %v20825_v6 = vpack.c.bf16 %v10589_v33, %v10586_v50  ;;  %v20829_v27 = vsub.f32 %v10515_v59, %v10589_v33  ;;  %23965 = vst [vmem:[#allocation121_spill] sm:$0xff] %v20837_v31  ;;  %23967 = vst [vmem:[#allocation156_spill] sm:$0xff] %v20842_v37 }
 0xc16   :  { %14359 = vmatprep.subr.bf16.mxu1 %v14358_v4  ;;  %v20831_v60 = vsub.f32 %v10498_v1, %v10538_v15  ;;  %v10519_v4 = vld [vmem:[#allocation17 + $0xa8] sm:$0xff]  ;;  %v10544_v59 = vand.u32 4294901760, %v10500_v32  ;;  %v10547_v1 = vand.u32 4294901760, %v10501_v19  ;;  %v10598_v50 = vand.u32 4294901760, %v10518_v29 }
 0xc17   :  { %23960 = vst [vmem:[#allocation113_spill] sm:$0xff] %v20825_v6  ;;  %23961 = vst [vmem:[#allocation115_spill] sm:$0xff] %v20829_v27  ;;  %v20833_v12 = vpack.c.bf16 %v10541_v63, %v10538_v15  ;;  %v20835_v0 = vsub.f32 %v10499_v57, %v10541_v63  ;;  %14483 = vmatprep.subr.bf16.mxu0 %v20825_v6  ;;  %v10601_v33 = vand.u32 4294901760, %v10519_v4  ;;  %v10550_v15 = vand.u32 4294901760, %v10502_v18  ;;  %v10521_v63 = vld [vmem:[#allocation17 + $0xb8] sm:$0xff] }
 0xc18   :  { %23962 = vst [vmem:[#allocation116_spill] sm:$0xff] %v20831_v60  ;;  %v10553_v57 = vand.u32 4294901760, %v10503_v22  ;;  %v10504_v60 = vld [vmem:[#allocation17 + $0x30] sm:$0xff]  ;;  %v20846_v42 = vpack.c.bf16 %v10547_v1, %v10544_v59  ;;  %v20850_v58 = vsub.f32 %v10501_v19, %v10547_v1  ;;  %v20852_v9 = vsub.f32 %v10518_v29, %v10598_v50 }
 0xc19   :  { %23963 = vst [vmem:[#allocation118_spill] sm:$0xff] %v20833_v12  ;;  %23964 = vst [vmem:[#allocation119_spill] sm:$0xff] %v20835_v0  ;;  %14361 = vmatpush1.bf16.msra.mxu1 %v14360_v54  ;;  %14485 = vmatpush3.bf16.msra.mxu0 %v20833_v12  ;;  %v10604_v0 = vand.u32 4294901760, %v10520_v13  ;;  %v20848_v54 = vsub.f32 %v10500_v32, %v10544_v59  ;;  %v23969_v12 = vand.u32 4294901760, %v20019_v16  ;;  %v10607_v32 = vand.u32 4294901760, %v10521_v63 }
 0xc1a   :  { %14363 = vmatprep.subr.bf16.mxu1 %v14362_v34  ;;  %14487 = vmatprep.subr.bf16.mxu0 %v20837_v31  ;;  %v23968_v34 = vand.u32 4294901760, %v20014_v39  ;;  %v20858_v37 = vpack.c.bf16 %v10601_v33, %v10598_v50  ;;  %v20860_v35 = vsub.f32 %v10519_v4, %v10601_v33  ;;  %v20862_v27 = vsub.f32 %v10502_v18, %v10550_v15 }
 0xc1b   :  { %v20864_v31 = vsub.f32 %v10503_v22, %v10553_v57  ;;  %v20866_v19 = vsub.f32 %v10520_v13, %v10604_v0  ;;  %v10556_v29 = vand.u32 4294901760, %v10504_v60  ;;  %v23970_v59 = vand.u32 4294901760, %v20028_v2 }
 0xc1c   :  { %v14368_v6 = vpack.c.bf16 %v23969_v12, %v23968_v34  ;;  %v23971_v39 = vand.u32 4294901760, %v20033_v61  ;;  %v20873_v12 = vpack.c.bf16 %v10553_v57, %v10550_v15  ;;  %v10559_v4 = vand.u32 4294901760, %v10505_v24  ;;  %v23988_v34 = vld [vmem:[#allocation200_spill] sm:$0xff] }
 0xc1d   :  { %14365 = vmatpush1.bf16.msra.mxu1 %v14364_v53  ;;  %14489 = vmatpush3.bf16.msra.mxu0 %v20846_v42  ;;  %v20876_v18 = vpack.c.bf16 %v10607_v32, %v10604_v0  ;;  %v20878_v53 = vsub.f32 %v10521_v63, %v10607_v32  ;;  %v20880_v13 = vsub.f32 %v10504_v60, %v10556_v29  ;;  %v23975_v2 = vand.u32 4294901760, %v20038_v55  ;;  %v23985_v63 = vld [vmem:[#allocation95_spill] sm:$0xff] }
 0xc1e   :  { %14367 = vmatprep.subr.bf16.mxu1 %v14366_v41  ;;  %v14370_v16 = vpack.c.bf16 %v23971_v39, %v23970_v59  ;;  %23972 = vst [vmem:[#allocation157_spill] sm:$0xff] %v20873_v12  ;;  %14491 = vmatprep.subr.bf16.mxu0 %v20858_v37  ;;  %v20882_v22 = vsub.f32 %v10505_v24, %v10559_v4  ;;  %v23976_v61 = vand.u32 4294901760, %v20043_v47  ;;  %v23977_v1 = vand.u32 4294901760, %v20048_v25  ;;  %v23983_v47 = vld [vmem:[#allocation197_spill] sm:$0xff] }
 0xc1f   :  { %23973 = vst [vmem:[#allocation124_spill] sm:$0xff] %v20876_v18  ;;  %v23978_v50 = vand.u32 4294901760, %v23894_v52  ;;  %v20893_v0 = vpack.c.bf16 %v10559_v4, %v10556_v29  ;;  %v23980_v60 = vand.u32 4294901760, %v23895_v14  ;;  %v23984_v57 = vand.u32 4294901760, %v23983_v47 }
 0xc20   :  { %23974 = vst [vmem:[#allocation125_spill] sm:$0xff] %v20882_v22  ;;  %v14372_v41 = vpack.c.bf16 %v23976_v61, %v23975_v2  ;;  %v23986_v25 = vand.u32 4294901760, %v23985_v63  ;;  %v23987_v52 = vand.u32 4294901760, %v23899_v36  ;;  %v23989_v32 = vand.u32 4294901760, %v23988_v34  ;;  %v24008_v63 = vld [vmem:[#allocation136_spill] sm:$0xff] }
 0xc21   :  { %14369 = vmatpush1.bf16.msra.mxu1 %v14368_v6  ;;  %v14374_v33 = vpack.c.bf16 %v23978_v50, %v23977_v1  ;;  %14493 = vmatpush3.bf16.msra.mxu0 %v20873_v12  ;;  %23979 = vst [vmem:[#allocation127_spill] sm:$0xff] %v20893_v0  ;;  %v23981_v6 = vld [vmem:[#allocation196_spill] sm:$0xff]  ;;  %v23990_v14 = vand.u32 4294901760, %v23816_v3  ;;  %v23991_v59 = vand.u32 4294901760, %v23817_v20  ;;  %v23993_v4 = vand.u32 4294901760, %v23900_v38 }
 0xc22   :  { %14371 = vmatprep.subr.bf16.mxu1 %v14370_v16  ;;  %14495 = vmatprep.subr.bf16.mxu0 %v20876_v18  ;;  %v23982_v55 = vand.u32 4294901760, %v23981_v6  ;;  %v14378_v24 = vpack.c.bf16 %v23986_v25, %v23984_v57  ;;  %v14380_v29 = vpack.c.bf16 %v23989_v32, %v23987_v52  ;;  %v23992_v16 = vand.u32 4294901760, %v23824_v43 }
 0xc23   :  { %v14382_v39 = vpack.c.bf16 %v23991_v59, %v23990_v14  ;;  %v23994_v61 = vand.u32 4294901760, %v23901_v11  ;;  %v23997_v50 = vand.u32 4294901760, %v23830_v21  ;;  %v23998_v3 = vand.u32 4294901760, %v23903_v30 }
 0xc24   :  { %v14376_v15 = vpack.c.bf16 %v23982_v55, %v23980_v60  ;;  %v14384_v2 = vpack.c.bf16 %v23993_v4, %v23992_v16  ;;  %v23999_v20 = vand.u32 4294901760, %v23904_v17  ;;  %v24000_v60 = vld [vmem:[#allocation33_spill] sm:$0xff]  ;;  %v24002_v38 = vand.u32 4294901760, %v20228_v28  ;;  %v24003_v55 = vld [vmem:[#allocation36_spill] sm:$0xff] }
 0xc25   :  { %14373 = vmatpush1.bf16.msra.mxu1 %v14372_v41  ;;  %14497 = vmatpush3.bf16.msra.mxu0 %v20893_v0  ;;  %v23995_v41 = vld [vmem:[#allocation91_spill] sm:$0xff]  ;;  %v24001_v43 = vand.u32 4294901760, %v24000_v60  ;;  %v24004_v11 = vand.u32 4294901760, %v24003_v55  ;;  %v24005_v47 = vand.u32 4294901760, %v20238_v7  ;;  %v24006_v21 = vand.u32 4294901760, %v23845_v40  ;;  %v24021_v16 = vld [vmem:[#allocation104_spill] sm:$0xff] }
 0xc26   :  { %14375 = vmatprep.subr.bf16.mxu1 %v14374_v33  ;;  %v23996_v36 = vand.u32 4294901760, %v23995_v41  ;;  %v14388_v33 = vpack.c.bf16 %v23998_v3, %v23997_v50  ;;  %v24007_v30 = vand.u32 4294901760, %v23906_v26  ;;  %v24009_v17 = vand.u32 4294901760, %v24008_v63  ;;  %v24035_v60 = vld [vmem:[#allocation110_spill] sm:$0xff]  ;;  %v24045_v63 = vld [vmem:[#allocation37_spill] sm:$0xff] }
 0xc27   :  { %v14390_v6 = vpack.c.bf16 %v24001_v43, %v23999_v20  ;;  %v14394_v57 = vpack.c.bf16 %v24006_v21, %v24005_v47  ;;  %v24011_v28 = vand.u32 4294901760, %v20435_v62  ;;  %v24012_v34 = vand.u32 4294901760, %v20450_v49  ;;  %v24041_v47 = vld [vmem:[#allocation94_spill] sm:$0xff] }
 0xc28   :  { %v14386_v1 = vpack.c.bf16 %v23996_v36, %v23994_v61  ;;  %v14396_v25 = vpack.c.bf16 %v24009_v17, %v24007_v30  ;;  %v24013_v7 = vand.u32 4294901760, %v20455_v44  ;;  %v24014_v40 = vand.u32 4294901760, %v23907_v8  ;;  %v24025_v61 = vld [vmem:[#allocation139_spill] sm:$0xff]  ;;  %v24042_v21 = vld [vmem:[#allocation90_spill] sm:$0xff]  ;;  %v24044_v30 = vld [vmem:[#allocation97_spill] sm:$0xff] }
 0xc29   :  { %14377 = vmatpush1.bf16.msra.mxu1 %v14376_v15  ;;  %v14392_v15 = vpack.c.bf16 %v24004_v11, %v24002_v38  ;;  %v24015_v26 = vand.u32 4294901760, %v23908_v10  ;;  %v24016_v14 = vand.u32 4294901760, %v20496_v51  ;;  %v24018_v62 = vand.u32 4294901760, %v23909_v56  ;;  %v24023_v10 = vld [vmem:[#allocation138_spill] sm:$0xff]  ;;  %v24039_v11 = vld [vmem:[#allocation31_spill] sm:$0xff] }
 0xc2a   :  { %14379 = vmatprep.subr.bf16.mxu1 %v14378_v24  ;;  %v24010_v24 = vand.u32 4294901760, %v20416_v48  ;;  %v14400_v32 = vpack.c.bf16 %v24013_v7, %v24012_v34  ;;  %v24017_v48 = vand.u32 4294901760, %v20515_v5  ;;  %v24019_v49 = vand.u32 4294901760, %v20539_v46  ;;  %v24027_v5 = vld [vmem:[#allocation141_spill] sm:$0xff]  ;;  %v24031_v46 = vld [vmem:[#allocation107_spill] sm:$0xff]  ;;  %v24051_v34 = vld [vmem:[#allocation48_spill] sm:$0xff] }
 0xc2b   :  { %v24020_v44 = vand.u32 4294901760, %v20554_v23  ;;  %v24022_v8 = vand.u32 4294901760, %v24021_v16  ;;  %v24026_v51 = vand.u32 4294901760, %v24025_v61  ;;  %v24028_v36 = vand.u32 4294901760, %v24027_v5  ;;  %v24046_v17 = vld [vmem:[#allocation59_spill] sm:$0xff]  ;;  %v24052_v7 = vld [vmem:[#allocation45_spill] sm:$0xff] }
 0xc2c   :  { %v14398_v52 = vpack.c.bf16 %v24011_v28, %v24010_v24  ;;  %v14404_v59 = vpack.c.bf16 %v24017_v48, %v24016_v14  ;;  %v24032_v3 = vand.u32 4294901760, %v24031_v46  ;;  %v24036_v43 = vand.u32 4294901760, %v24035_v60  ;;  %v24048_v24 = vld [vmem:[#allocation62_spill] sm:$0xff]  ;;  %v24057_v14 = vld [vmem:[#allocation187_spill] sm:$0xff]  ;;  %v24064_v16 = vld [vmem:[#allocation44_spill] sm:$0xff] }
 0xc2d   :  { %14381 = vmatpush1.bf16.msra.mxu1 %v14380_v29  ;;  %v14402_v29 = vpack.c.bf16 %v24015_v26, %v24014_v40  ;;  %v14408_v4 = vpack.c.bf16 %v24022_v8, %v24020_v44  ;;  %v24049_v28 = vld [vmem:[#allocation38_spill] sm:$0xff]  ;;  %v24055_v26 = vld [vmem:[#allocation67_spill] sm:$0xff]  ;;  %v24063_v44 = vld [vmem:[#allocation212_spill] sm:$0xff] }
 0xc2e   :  { %14383 = vmatprep.subr.bf16.mxu1 %v14382_v39  ;;  %v14406_v39 = vpack.c.bf16 %v24019_v49, %v24018_v62  ;;  %v24054_v40 = vld [vmem:[#allocation66_spill] sm:$0xff]  ;;  %v24060_v62 = vld [vmem:[#allocation191_spill] sm:$0xff]  ;;  %v24065_v8 = vld [vmem:[#allocation56_spill] sm:$0xff] }
 0xc2f   :  { %v24058_v48 = vld [vmem:[#allocation186_spill] sm:$0xff]  ;;  %v24072_v5 = vld [vmem:[#allocation135_spill] sm:$0xff]  ;;  %v10506_v46 = vld [vmem:[#allocation17 + $0x40] sm:$0xff] }
 0xc30   :  { %v24061_v49 = vld [vmem:[#allocation194_spill] sm:$0xff] }
 0xc31   :  { %14385 = vmatpush1.bf16.msra.mxu1 %v14384_v2  ;;  %v24024_v2 = vand.u32 4294901760, %v24023_v10  ;;  %v24067_v10 = vld [vmem:[#allocation72_spill] sm:$0xff]  ;;  %v24069_v61 = vld [vmem:[#allocation206_spill] sm:$0xff] }
 0xc32   :  { %14387 = vmatprep.subr.bf16.mxu1 %v14386_v1  ;;  %v24029_v1 = vld [vmem:[#allocation106_spill] sm:$0xff] }
 0xc33   :  { %v14410_v41 = vpack.c.bf16 %v24026_v51, %v24024_v2  ;;  %v24030_v56 = vand.u32 4294901760, %v24029_v1  ;;  %v24068_v2 = vld [vmem:[#allocation205_spill] sm:$0xff]  ;;  %v24070_v51 = vld [vmem:[#allocation78_spill] sm:$0xff] }
 0xc34   :  { %v10523_v1 = vld [vmem:[#allocation17 + $0xc8] sm:$0xff] }
 0xc35   :  { %14389 = vmatpush1.bf16.msra.mxu1 %v14388_v33  ;;  %v14412_v50 = vpack.c.bf16 %v24030_v56, %v24028_v36  ;;  %v24033_v33 = vld [vmem:[#allocation109_spill] sm:$0xff] }
 0xc36   :  { %14391 = vmatprep.subr.bf16.mxu1 %v14390_v6  ;;  %v24034_v23 = vand.u32 4294901760, %v24033_v33  ;;  %v24037_v6 = vld [vmem:[#allocation112_spill] sm:$0xff]  ;;  %v10562_v33 = vand.u32 4294901760, %v10506_v46 }
 0xc37   :  { %v24038_v38 = vand.u32 4294901760, %v24037_v6  ;;  %v10522_v36 = vld [vmem:[#allocation17 + $0xc0] sm:$0xff]  ;;  %v10525_v6 = vld [vmem:[#allocation17 + $0xd8] sm:$0xff] }
 0xc38   :  { %v14414_v20 = vpack.c.bf16 %v24034_v23, %v24032_v3  ;;  %v10610_v56 = vand.u32 4294901760, %v10522_v36  ;;  %v10507_v3 = vld [vmem:[#allocation17 + $0x48] sm:$0xff] }
 0xc39   :  { %14393 = vmatpush1.bf16.msra.mxu1 %v14392_v15  ;;  %v14416_v55 = vpack.c.bf16 %v24038_v38, %v24036_v43  ;;  %v24040_v15 = vld [vmem:[#allocation87_spill] sm:$0xff]  ;;  %v10565_v23 = vand.u32 4294901760, %v10507_v3 }
 0xc3a   :  { %14395 = vmatprep.subr.bf16.mxu1 %v14394_v57  ;;  %v24043_v57 = vld [vmem:[#allocation34_spill] sm:$0xff] }
 0xc3b   :  { %v21018_v60 = vpack.c.bf16 %v10565_v23, %v10562_v33  ;;  %v10524_v43 = vld [vmem:[#allocation17 + $0xd0] sm:$0xff] }
 0xc3c   :  { %v10616_v38 = vand.u32 4294901760, %v10524_v43 }
 0xc3d   :  { %14397 = vmatpush1.bf16.msra.mxu1 %v14396_v25  ;;  %v24047_v25 = vld [vmem:[#allocation61_spill] sm:$0xff]  ;;  %24074 = vst [vmem:[#allocation165_spill] sm:$0xff] %v21018_v60 }
 0xc3e   :  { %14399 = vmatprep.subr.bf16.mxu1 %v14398_v52  ;;  %v24050_v52 = vld [vmem:[#allocation43_spill] sm:$0xff] }
 0xc41   :  { %14401 = vmatpush1.bf16.msra.mxu1 %v14400_v32  ;;  %v24053_v32 = vld [vmem:[#allocation55_spill] sm:$0xff] }
 0xc42   :  { %14403 = vmatprep.subr.bf16.mxu1 %v14402_v29  ;;  %v24056_v29 = vld [vmem:[#allocation96_spill] sm:$0xff] }
 0xc45   :  { %14405 = vmatpush1.bf16.msra.mxu1 %v14404_v59  ;;  %v24059_v59 = vld [vmem:[#allocation190_spill] sm:$0xff] }
 0xc46   :  { %14407 = vmatprep.subr.bf16.mxu1 %v14406_v39  ;;  %v24062_v39 = vld [vmem:[#allocation71_spill] sm:$0xff] }
 0xc49   :  { %14409 = vmatpush1.bf16.msra.mxu1 %v14408_v4  ;;  %v24066_v4 = vld [vmem:[#allocation63_spill] sm:$0xff] }
 0xc4a   :  { %14411 = vmatprep.subr.bf16.mxu1 %v14410_v41  ;;  %v24071_v41 = vld [vmem:[#allocation133_spill] sm:$0xff] }
 0xc4d   :  { %14413 = vmatpush1.bf16.msra.mxu1 %v14412_v50  ;;  %v10613_v50 = vand.u32 4294901760, %v10523_v1 }
 0xc4e   :  { %14415 = vmatprep.subr.bf16.mxu1 %v14414_v20 }
 0xc4f   :  { %v21016_v20 = vpack.c.bf16 %v10613_v50, %v10610_v56 }
 0xc51   :  { %14417 = vmatpush1.bf16.msra.mxu1 %v14416_v55  ;;  %24073 = vst [vmem:[#allocation128_spill] sm:$0xff] %v21016_v20  ;;  %14499 = vmatprep.subr.bf16.mxu0 %v21016_v20  ;;  %v10619_v55 = vand.u32 4294901760, %v10525_v6 }
 0xc52   :  { %14419 = vmatprep.subr.bf16.mxu1 %v24039_v11  ;;  %v10508_v11 = vld [vmem:[#allocation17 + $0x50] sm:$0xff]  ;;  %14501 = vmatpush3.bf16.msra.mxu0 %v21018_v60 }
 0xc54   :  { %10353 = vmatmul.mubr.f32.vlgmr.msra.gmra.mrb[16].mxu1 %v24040_v15 }
 0xc55   :  { %14421 = vmatpush1.bf16.msra.mxu1 %v24041_v47  ;;  %10488 = vmatprep.mubr.f32.mxu1 %v24042_v21  ;;  %v10568_v47 = vand.u32 4294901760, %v10508_v11 }
 0xc56   :  { %14423 = vmatprep.subr.bf16.mxu1 %v24043_v57  ;;  %v21022_v57 = vpack.c.bf16 %v10619_v55, %v10616_v38 }
 0xc58   :  { %24075 = vst [vmem:[#allocation166_spill] sm:$0xff] %v21022_v57  ;;  %14503 = vmatprep.subr.bf16.mxu0 %v21022_v57 }
 0xc59   :  { %14425 = vmatpush1.bf16.msra.mxu1 %v24044_v30 }
 0xc5a   :  { %14427 = vmatprep.subr.bf16.mxu1 %v24045_v63  ;;  %v10526_v63 = vld [vmem:[#allocation17 + $0xe0] sm:$0xff] }
 0xc5d   :  { %14429 = vmatpush1.bf16.msra.mxu1 %v24046_v17  ;;  %v10527_v17 = vld [vmem:[#allocation17 + $0xe8] sm:$0xff] }
 0xc5e   :  { %14431 = vmatprep.subr.bf16.mxu1 %v24047_v25  ;;  %v10622_v25 = vand.u32 4294901760, %v10526_v63 }
 0xc60   :  { %v21054_v57 = vsub.f32 %v10526_v63, %v10622_v25 }
 0xc61   :  { %14433 = vmatpush1.bf16.msra.mxu1 %v24048_v24  ;;  %v10625_v24 = vand.u32 4294901760, %v10527_v17 }
 0xc62   :  { %14435 = vmatprep.subr.bf16.mxu1 %v24049_v28  ;;  %v10510_v28 = vld [vmem:[#allocation17 + $0x60] sm:$0xff]  ;;  %24090 = vst [vmem:[#allocation180_spill] sm:$0xff] %v21054_v57 }
 0xc65   :  { %14437 = vmatpush1.bf16.msra.mxu1 %v24050_v52  ;;  %v10511_v52 = vld [vmem:[#allocation17 + $0x68] sm:$0xff] }
 0xc66   :  { %14439 = vmatprep.subr.bf16.mxu1 %v24051_v34  ;;  %v10574_v34 = vand.u32 4294901760, %v10510_v28 }
 0xc69   :  { %14441 = vmatpush1.bf16.msra.mxu1 %v24052_v7  ;;  %v10577_v7 = vand.u32 4294901760, %v10511_v52 }
 0xc6a   :  { %14443 = vmatprep.subr.bf16.mxu1 %v24053_v32  ;;  %v21028_v32 = vpack.c.bf16 %v10625_v24, %v10622_v25 }
 0xc6c   :  { %24077 = vst [vmem:[#allocation217_spill] sm:$0xff] %v21028_v32 }
 0xc6d   :  { %14445 = vmatpush1.bf16.msra.mxu1 %v24054_v40  ;;  %v21030_v40 = vpack.c.bf16 %v10577_v7, %v10574_v34 }
 0xc6e   :  { %14447 = vmatprep.subr.bf16.mxu1 %v24055_v26  ;;  %v10528_v26 = vld [vmem:[#allocation17 + $0xf0] sm:$0xff] }
 0xc6f   :  { %24078 = vst [vmem:[#allocation168_spill] sm:$0xff] %v21030_v40 }
 0xc71   :  { %14449 = vmatpush1.bf16.msra.mxu1 %v24056_v29  ;;  %v10529_v29 = vld [vmem:[#allocation17 + $0xf8] sm:$0xff] }
 0xc72   :  { %14451 = vmatprep.subr.bf16.mxu1 %v24057_v14  ;;  %v10628_v14 = vand.u32 4294901760, %v10528_v26 }
 0xc75   :  { %14453 = vmatpush1.bf16.msra.mxu1 %v24058_v48  ;;  %v10631_v48 = vand.u32 4294901760, %v10529_v29 }
 0xc76   :  { %14455 = vmatprep.subr.bf16.mxu1 %v24059_v59  ;;  %v10512_v59 = vld [vmem:[#allocation17 + $0x70] sm:$0xff] }
 0xc79   :  { %14457 = vmatpush1.bf16.msra.mxu1 %v24060_v62  ;;  %v10513_v62 = vld [vmem:[#allocation17 + $0x78] sm:$0xff] }
 0xc7a   :  { %14459 = vmatprep.subr.bf16.mxu1 %v24061_v49  ;;  %v21048_v49 = vsub.f32 %v10525_v6, %v10619_v55 }
 0xc7c   :  { %24087 = vst [vmem:[#allocation176_spill] sm:$0xff] %v21048_v49 }
 0xc7d   :  { %14461 = vmatpush1.bf16.msra.mxu1 %v24062_v39  ;;  %v24079_v39 = vld [vmem:[#allocation115_spill] sm:$0xff] }
 0xc7e   :  { %14463 = vmatprep.subr.bf16.mxu1 %v24063_v44  ;;  %v21050_v44 = vsub.f32 %v10508_v11, %v10568_v47 }
 0xc80   :  { %24088 = vst [vmem:[#allocation84_spill] sm:$0xff] %v21050_v44 }
 0xc81   :  { %14465 = vmatpush1.bf16.msra.mxu1 %v24064_v16  ;;  %v10580_v16 = vand.u32 4294901760, %v10512_v59 }
 0xc82   :  { %14467 = vmatprep.subr.bf16.mxu1 %v24065_v8  ;;  %v10583_v8 = vand.u32 4294901760, %v10513_v62 }
 0xc85   :  { %14469 = vmatpush1.bf16.msra.mxu1 %v24066_v4  ;;  %v24080_v4 = vld [vmem:[#allocation116_spill] sm:$0xff] }
 0xc86   :  { %14471 = vmatprep.subr.bf16.mxu1 %v24067_v10  ;;  %v21056_v10 = vsub.f32 %v10527_v17, %v10625_v24  ;;  %v24102_v11 = vand.u32 4294901760, %v24080_v4  ;;  %v24104_v17 = vld [vmem:[#allocation156_spill] sm:$0xff] }
 0xc87   :  { %v22353_v25 = vand.u32 4294901760, %v24104_v17 }
 0xc88   :  { %24091 = vst [vmem:[#allocation182_spill] sm:$0xff] %v21056_v10 }
 0xc89   :  { %14473 = vmatpush1.bf16.msra.mxu1 %v24068_v2  ;;  %v24081_v2 = vld [vmem:[#allocation119_spill] sm:$0xff] }
 0xc8a   :  { %14475 = vmatprep.subr.bf16.mxu1 %v24069_v61  ;;  %v22361_v61 = vand.u32 4294901760, %v24081_v2 }
 0xc8d   :  { %14477 = vmatpush1.bf16.msra.mxu1 %v24070_v51  ;;  %v21038_v51 = vsub.f32 %v10522_v36, %v10610_v56  ;;  %v21058_v36 = vsub.f32 %v10510_v28, %v10574_v34  ;;  %v21062_v56 = vpack.c.bf16 %v10631_v48, %v10628_v14  ;;  %v22348_v34 = vand.u32 4294901760, %v20850_v58 }
 0xc8e   :  { %14479 = vmatprep.subr.bf16.mxu1 %v24071_v41  ;;  %v21040_v41 = vsub.f32 %v10523_v1, %v10613_v50  ;;  %v21060_v1 = vsub.f32 %v10511_v52, %v10577_v7  ;;  %v21064_v50 = vsub.f32 %v10528_v26, %v10628_v14  ;;  %v22352_v52 = vand.u32 4294901760, %v20848_v54 }
 0xc8f   :  { %24082 = vst [vmem:[#allocation169_spill] sm:$0xff] %v21038_v51  ;;  %24092 = vst [vmem:[#allocation183_spill] sm:$0xff] %v21058_v36  ;;  %v10786_v14 = vsub.f32 %v24104_v17, %v22353_v25 }
 0xc90   :  { %24083 = vst [vmem:[#allocation171_spill] sm:$0xff] %v21040_v41  ;;  %24093 = vst [vmem:[#allocation35_spill] sm:$0xff] %v21060_v1 }
 0xc91   :  { %14481 = vmatpush1.bf16.msra.mxu1 %v24072_v5  ;;  %v21042_v5 = vsub.f32 %v10506_v46, %v10562_v33  ;;  %24094 = vst [vmem:[#allocation60_spill] sm:$0xff] %v21062_v56  ;;  %24095 = vst [vmem:[#allocation40_spill] sm:$0xff] %v21064_v50  ;;  %v21066_v46 = vsub.f32 %v10529_v29, %v10631_v48  ;;  %v21070_v33 = vsub.f32 %v10512_v59, %v10580_v16 }
 0xc92   :  { %v10667_v59 = vsub.f32 %v20848_v54, %v22352_v52  ;;  %v22357_v52 = vand.u32 4294901760, %v21040_v41 }
 0xc93   :  { %24084 = vst [vmem:[#allocation79_spill] sm:$0xff] %v21042_v5  ;;  %24096 = vst [vmem:[#allocation41_spill] sm:$0xff] %v21066_v46 }
 0xc94   :  { %10490 = vmatmul.mubr.f32.vlgmr.msra.gmra.mrb[16].mxu1 %v24040_v15  ;;  %v10509_v15 = vld [vmem:[#allocation17 + $0x58] sm:$0xff]  ;;  %24098 = vst [vmem:[#allocation64_spill] sm:$0xff] %v21070_v33 }
 0xc95   :  { %v10571_v21 = vand.u32 4294901760, %v10509_v15 }
 0xc97   :  { %v21024_v30 = vpack.c.bf16 %v10571_v21, %v10568_v47  ;;  %v10660_v47 = vsub.f32 %v24081_v2, %v22361_v61 }
 0xc99   :  { %24076 = vst [vmem:[#allocation130_spill] sm:$0xff] %v21024_v30  ;;  %14505 = vmatpush3.bf16.msra.mxu0 %v21024_v30  ;;  %v21046_v30 = vsub.f32 %v10524_v43, %v10616_v38  ;;  %v24100_v43 = vand.u32 4294901760, %v20827_v45  ;;  %v24101_v38 = vand.u32 4294901760, %v24079_v39  ;;  %v10661_v26 = vand.u32 4294901760, %v10660_v47 }
 0xc9a   :  { %14507 = vmatprep.subr.bf16.mxu0 %v21028_v32  ;;  %v21044_v32 = vsub.f32 %v10507_v3, %v10565_v23  ;;  %v21068_v3 = vpack.c.bf16 %v10583_v8, %v10580_v16  ;;  %v21072_v23 = vsub.f32 %v10513_v62, %v10583_v8  ;;  %v10674_v62 = vsub.f32 %v20850_v58, %v22348_v34 }
 0xc9b   :  { %24086 = vst [vmem:[#allocation42_spill] sm:$0xff] %v21046_v30  ;;  %v10765_v6 = vsub.f32 %v20827_v45, %v24100_v43  ;;  %v10772_v55 = vsub.f32 %v24079_v39, %v24101_v38  ;;  %v22347_v16 = vand.u32 4294901760, %v20852_v9  ;;  %v22345_v38 = vand.u32 4294901760, %v20860_v35 }
 0xc9c   :  { %24085 = vst [vmem:[#allocation173_spill] sm:$0xff] %v21044_v32  ;;  %24097 = vst [vmem:[#allocation58_spill] sm:$0xff] %v21068_v3  ;;  %v22346_v47 = vand.u32 4294901760, %v20862_v27 }
 0xc9d   :  { %14509 = vmatpush3.bf16.msra.mxu0 %v21030_v40  ;;  %v21052_v40 = vsub.f32 %v10509_v15, %v10571_v21  ;;  %24099 = vst [vmem:[#allocation68_spill] sm:$0xff] %v21072_v23  ;;  %v10653_v15 = vsub.f32 %v24080_v4, %v24102_v11  ;;  %v24103_v21 = vld [vmem:[#allocation122_spill] sm:$0xff]  ;;  %v10766_v24 = vand.u32 4294901760, %v10765_v6  ;;  %v10773_v28 = vand.u32 4294901760, %v10772_v55 }
 0xc9e   :  { %14511 = vmatprep.subr.bf16.mxu0 %v21062_v56  ;;  %v22358_v63 = vand.u32 4294901760, %v24103_v21  ;;  %v10787_v6 = vand.u32 4294901760, %v10786_v14  ;;  %v10668_v55 = vand.u32 4294901760, %v10667_v59  ;;  %v10675_v11 = vand.u32 4294901760, %v10674_v62 }
 0xc9f   :  { %24089 = vst [vmem:[#allocation32_spill] sm:$0xff] %v21052_v40  ;;  %v10654_v7 = vand.u32 4294901760, %v10653_v15  ;;  %v14514_v48 = vpack.c.bf16 %v10773_v28, %v10766_v24  ;;  %v10793_v15 = vsub.f32 %v20852_v9, %v22347_v16  ;;  %v10800_v28 = vsub.f32 %v20860_v35, %v22345_v38 }
 0xca0   :  { %v10779_v29 = vsub.f32 %v24103_v21, %v22358_v63  ;;  %v22351_v59 = vand.u32 4294901760, %v20878_v53  ;;  %v22354_v38 = vand.u32 4294901760, %v20880_v13 }
 0xca1   :  { %14513 = vmatpush3.bf16.msra.mxu0 %v21068_v3  ;;  %v21105_v8 = vpack.c.bf16 %v10661_v26, %v10654_v7  ;;  %v22349_v7 = vand.u32 4294901760, %v20864_v31  ;;  %v22350_v26 = vand.u32 4294901760, %v20866_v19  ;;  %v10794_v14 = vand.u32 4294901760, %v10793_v15 }
 0xca2   :  { %v10780_v43 = vand.u32 4294901760, %v10779_v29  ;;  %14515 = vmatprep.subr.bf16.mxu0 %v14514_v48  ;;  %v21119_v29 = vpack.c.bf16 %v10675_v11, %v10668_v55  ;;  %v10681_v48 = vsub.f32 %v20862_v27, %v22346_v47  ;;  %v10801_v62 = vand.u32 4294901760, %v10800_v28 }
 0xca3   :  { %v10814_v11 = vsub.f32 %v20878_v53, %v22351_v59  ;;  %v22355_v15 = vand.u32 4294901760, %v20882_v22  ;;  %v22356_v47 = vand.u32 4294901760, %v21038_v51  ;;  %v22370_v3 = vand.u32 4294901760, %v21056_v10 }
 0xca4   :  { %v21112_v24 = vpack.c.bf16 %v10787_v6, %v10780_v43  ;;  %v10688_v43 = vsub.f32 %v20864_v31, %v22349_v7  ;;  %v10807_v6 = vsub.f32 %v20866_v19, %v22350_v26  ;;  %v10682_v55 = vand.u32 4294901760, %v10681_v48 }
 0xca5   :  { %v21137_v28 = vpack.c.bf16 %v10801_v62, %v10794_v14  ;;  %v10695_v7 = vsub.f32 %v20880_v13, %v22354_v38  ;;  %v10815_v26 = vand.u32 4294901760, %v10814_v11  ;;  %v10702_v48 = vsub.f32 %v20882_v22, %v22355_v15 }
 0xca6   :  { %v10689_v16 = vand.u32 4294901760, %v10688_v43  ;;  %v10808_v34 = vand.u32 4294901760, %v10807_v6  ;;  %v10821_v59 = vsub.f32 %v21038_v51, %v22356_v47  ;;  %v22359_v62 = vand.u32 4294901760, %v21042_v5 }
 0xca7   :  { %v10696_v14 = vand.u32 4294901760, %v10695_v7  ;;  %v22360_v43 = vand.u32 4294901760, %v21044_v32  ;;  %v10703_v11 = vand.u32 4294901760, %v10702_v48  ;;  %v10828_v15 = vsub.f32 %v21040_v41, %v22357_v52 }
 0xca8   :  { %v21149_v25 = vpack.c.bf16 %v10689_v16, %v10682_v55  ;;  %v21153_v6 = vpack.c.bf16 %v10815_v26, %v10808_v34  ;;  %v10822_v38 = vand.u32 4294901760, %v10821_v59  ;;  %v10709_v47 = vsub.f32 %v21042_v5, %v22359_v62 }
 0xca9   :  { %v10716_v16 = vsub.f32 %v21044_v32, %v22360_v43  ;;  %v22362_v7 = vand.u32 4294901760, %v21046_v30  ;;  %v22367_v55 = vand.u32 4294901760, %v21048_v49  ;;  %v21166_v34 = vpack.c.bf16 %v10703_v11, %v10696_v14 }
 0xcaa   :  { %v10829_v26 = vand.u32 4294901760, %v10828_v15  ;;  %v22368_v59 = vand.u32 4294901760, %v21050_v44  ;;  %v22369_v48 = vand.u32 4294901760, %v21052_v40  ;;  %v10710_v52 = vand.u32 4294901760, %v10709_v47 }
 0xcab   :  { %v10717_v63 = vand.u32 4294901760, %v10716_v16  ;;  %v10835_v62 = vsub.f32 %v21046_v30, %v22362_v7  ;;  %v10842_v43 = vsub.f32 %v21048_v49, %v22367_v55  ;;  %v22371_v47 = vand.u32 4294901760, %v21054_v57 }
 0xcac   :  { %v21176_v61 = vpack.c.bf16 %v10829_v26, %v10822_v38  ;;  %v10723_v15 = vsub.f32 %v21050_v44, %v22368_v59  ;;  %v10730_v14 = vsub.f32 %v21052_v40, %v22369_v48  ;;  %v22372_v26 = vand.u32 4294901760, %v21058_v36 }
 0xcad   :  { %v21185_v11 = vpack.c.bf16 %v10717_v63, %v10710_v52  ;;  %v10836_v16 = vand.u32 4294901760, %v10835_v62  ;;  %v10843_v7 = vand.u32 4294901760, %v10842_v43  ;;  %v10849_v38 = vsub.f32 %v21054_v57, %v22371_v47 }
 0xcae   :  { %v10724_v56 = vand.u32 4294901760, %v10723_v15  ;;  %v10731_v55 = vand.u32 4294901760, %v10730_v14  ;;  %v10856_v48 = vsub.f32 %v21056_v10, %v22370_v3  ;;  %v22373_v63 = vand.u32 4294901760, %v21060_v1 }
 0xcaf   :  { %v21192_v59 = vpack.c.bf16 %v10843_v7, %v10836_v16  ;;  %v10850_v62 = vand.u32 4294901760, %v10849_v38  ;;  %v10737_v43 = vsub.f32 %v21058_v36, %v22372_v26  ;;  %v22380_v15 = vand.u32 4294901760, %v21064_v50 }
 0xcb0   :  { %v21198_v52 = vpack.c.bf16 %v10731_v55, %v10724_v56  ;;  %v10857_v14 = vand.u32 4294901760, %v10856_v48  ;;  %v10744_v7 = vsub.f32 %v21060_v1, %v22373_v63  ;;  %v22387_v16 = vand.u32 4294901760, %v21066_v46 }
 0xcb1   :  { %v22385_v3 = vand.u32 4294901760, %v21070_v33  ;;  %v10738_v47 = vand.u32 4294901760, %v10737_v43  ;;  %v10863_v56 = vsub.f32 %v21064_v50, %v22380_v15  ;;  %v22386_v55 = vand.u32 4294901760, %v21072_v23 }
 0xcb2   :  { %v14538_v38 = vpack.c.bf16 %v10857_v14, %v10850_v62  ;;  %v10745_v26 = vand.u32 4294901760, %v10744_v7  ;;  %v10870_v48 = vsub.f32 %v21066_v46, %v22387_v16  ;;  %v14546_v14 = vpack.c.bf16 %v24079_v39, %v20827_v45 }
 0xcb3   :  { %v10751_v63 = vsub.f32 %v21070_v33, %v22385_v3  ;;  %v10864_v60 = vand.u32 4294901760, %v10863_v56  ;;  %v10758_v43 = vsub.f32 %v21072_v23, %v22386_v55  ;;  %v14548_v7 = vpack.c.bf16 %v24081_v2, %v24080_v4 }
 0xcb4   :  { %v14540_v20 = vpack.c.bf16 %v10745_v26, %v10738_v47  ;;  %v10871_v0 = vand.u32 4294901760, %v10870_v48  ;;  %v14550_v3 = vpack.c.bf16 %v24104_v17, %v24103_v21  ;;  %v14552_v56 = vpack.c.bf16 %v20850_v58, %v20848_v54 }
 0xcb5   :  { %v10752_v15 = vand.u32 4294901760, %v10751_v63  ;;  %v10759_v18 = vand.u32 4294901760, %v10758_v43  ;;  %v14554_v47 = vpack.c.bf16 %v20860_v35, %v20852_v9  ;;  %v14556_v26 = vpack.c.bf16 %v20864_v31, %v20862_v27 }
 0xcb6   :  { %v14542_v12 = vpack.c.bf16 %v10871_v0, %v10864_v60  ;;  %v14560_v0 = vpack.c.bf16 %v20882_v22, %v20880_v13  ;;  %v14562_v60 = vpack.c.bf16 %v21040_v41, %v21038_v51  ;;  %v14564_v63 = vpack.c.bf16 %v21044_v32, %v21042_v5  ;;  %v7916_v32 = vld [vmem:[%s21406_s16] sm:$0x3]  ;;  %v24106_v5 = vld [vmem:[#allocation27_spill] sm:$0xff] }
 0xcb7   :  { %v14544_v62 = vpack.c.bf16 %v10759_v18, %v10752_v15  ;;  %v14558_v18 = vpack.c.bf16 %v20878_v53, %v20866_v19  ;;  %v14566_v15 = vpack.c.bf16 %v21048_v49, %v21046_v30  ;;  %v14568_v48 = vpack.c.bf16 %v21052_v40, %v21050_v44  ;;  %v24105_v49 = vld [vmem:[#allocation26_spill] sm:$0xff] }
 0xcb8   :  { %v14570_v43 = vpack.c.bf16 %v21056_v10, %v21054_v57  ;;  %v14572_v55 = vpack.c.bf16 %v21060_v1, %v21058_v36  ;;  %v14574_v16 = vpack.c.bf16 %v21066_v46, %v21064_v50  ;;  %v14576_v41 = vpack.c.bf16 %v21072_v23, %v21070_v33 }
 0xcb9   :  { %v7921_v30 = vrot.slane %v7916_v32, %v24105_v49  ;;  %v7925_v40 = vrot.slane %v7916_v32, %v24106_v5  ;;  %v24115_v5 = vld [vmem:[#allocation166_spill] sm:$0xff] }
 0xd67   :  { %v10491_v44 = vpop.f32.mrb[16].mxu1 }
 0xd68   :  { %v14716_v51 = vadd.f32 %v10491_v44, %v7921_v30  ;;  %v10493_v10 = vpop.f32.mrb[17].mxu1 }
 0xd69   :  { %v14717_v57 = vadd.f32 %v10493_v10, %v7925_v40  ;;  %v24111_v10 = vld [vmem:[#allocation124_spill] sm:$0xff] }
 0xd6a   :  { %v10496_v22 = vmax.f32 %v14716_v51, 0.0  ;;  %v24113_v51 = vld [vmem:[#allocation128_spill] sm:$0xff] }
 0xd6b   :  { %v10497_v1 = vmax.f32 %v14717_v57, 0.0  ;;  %v24110_v57 = vld [vmem:[#allocation157_spill] sm:$0xff] }
 0xd6c   :  { %v21259_v36 = vand.u32 4294901760, %v10496_v22 }
 0xd6d   :  { %v21261_v46 = vand.u32 4294901760, %v10497_v1 }
 0xd6e   :  { %v21264_v23 = vsub.f32 %v10496_v22, %v21259_v36  ;;  %v24108_v22 = vld [vmem:[#allocation118_spill] sm:$0xff] }
 0xd6f   :  { %v10634_v33 = vsub.f32 %v10497_v1, %v21261_v46  ;;  %v24116_v1 = vld [vmem:[#allocation130_spill] sm:$0xff] }
 0xd70   :  { %v10641_v50 = vand.u32 4294901760, %v21264_v23 }
 0xd71   :  { %v10635_v49 = vand.u32 4294901760, %v10634_v33 }
 0xd72   :  { %v10642_v30 = vsub.f32 %v21264_v23, %v10641_v50 }
 0xd73   :  { %v10636_v32 = vsub.f32 %v10634_v33, %v10635_v49 }
 0xd74   :  { %v10643_v44 = vand.u32 4294901760, %v10642_v30  ;;  %v24152_v30 = vld [vmem:[#allocation32_spill] sm:$0xff] }
 0xd75   :  { %v10637_v40 = vand.u32 4294901760, %v10636_v32  ;;  %v24153_v32 = vand.u32 4294901760, %v24152_v30 }
 0xd77   :  { %10638 = vmatprep.mubr.f32.mxu0 %v10637_v40 }
 0xd78   :  { %10644 = vmatmul.mubr.f32.vlgmr.msra.gmra.mrb[28].mxu0 %v10643_v44  ;;  %v24154_v44 = vld [vmem:[#allocation180_spill] sm:$0xff] }
 0xd79   :  { %14517 = vmatpush3.bf16.msra.mxu0 %v21105_v8  ;;  %10874 = vmatprep.mubr.f32.mxu0 %v21261_v46  ;;  %v24120_v8 = vand.u32 4294901760, %v20827_v45  ;;  %v24127_v45 = vand.u32 4294901760, %v20848_v54  ;;  %v24134_v54 = vand.u32 4294901760, %v20878_v53  ;;  %v24146_v53 = vld [vmem:[#allocation42_spill] sm:$0xff] }
 0xd7a   :  { %14519 = vmatprep.subr.bf16.mxu0 %v21112_v24  ;;  %v24121_v24 = vand.u32 4294901760, %v24079_v39  ;;  %v24128_v39 = vand.u32 4294901760, %v20850_v58  ;;  %v24135_v58 = vand.u32 4294901760, %v20880_v13 }
 0xd7d   :  { %14521 = vmatpush3.bf16.msra.mxu0 %v21119_v29  ;;  %v14610_v29 = vpack.c.bf16 %v24121_v24, %v24120_v8  ;;  %v24155_v8 = vand.u32 4294901760, %v24154_v44  ;;  %v24156_v24 = vld [vmem:[#allocation182_spill] sm:$0xff] }
 0xd7e   :  { %14523 = vmatprep.subr.bf16.mxu0 %v21137_v28  ;;  %v24122_v28 = vld [vmem:[#allocation58_spill] sm:$0xff] }
 0xd81   :  { %14525 = vmatpush3.bf16.msra.mxu0 %v21149_v25  ;;  %v24119_v25 = vld [vmem:[#allocation60_spill] sm:$0xff] }
 0xd82   :  { %14527 = vmatprep.subr.bf16.mxu0 %v21153_v6  ;;  %v24123_v6 = vand.u32 4294901760, %v24080_v4  ;;  %v14616_v4 = vpack.c.bf16 %v24128_v39, %v24127_v45  ;;  %v24162_v45 = vld [vmem:[#allocation40_spill] sm:$0xff] }
 0xd83   :  { %v24163_v39 = vand.u32 4294901760, %v24162_v45 }
 0xd85   :  { %14529 = vmatpush3.bf16.msra.mxu0 %v21166_v34  ;;  %v24124_v34 = vand.u32 4294901760, %v24081_v2  ;;  %v24129_v2 = vand.u32 4294901760, %v20852_v9 }
 0xd86   :  { %14531 = vmatprep.subr.bf16.mxu0 %v21176_v61  ;;  %v24112_v61 = vld [vmem:[#allocation127_spill] sm:$0xff] }
 0xd89   :  { %14533 = vmatpush3.bf16.msra.mxu0 %v21185_v11  ;;  %v24125_v11 = vand.u32 4294901760, %v24103_v21 }
 0xd8a   :  { %14535 = vmatprep.subr.bf16.mxu0 %v21192_v59  ;;  %v14612_v59 = vpack.c.bf16 %v24124_v34, %v24123_v6  ;;  %v24158_v34 = vld [vmem:[#allocation183_spill] sm:$0xff] }
 0xd8d   :  { %14537 = vmatpush3.bf16.msra.mxu0 %v21198_v52  ;;  %v24126_v52 = vand.u32 4294901760, %v24104_v17  ;;  %v24131_v17 = vand.u32 4294901760, %v20862_v27 }
 0xd8e   :  { %14539 = vmatprep.subr.bf16.mxu0 %v14538_v38  ;;  %v24133_v38 = vand.u32 4294901760, %v20866_v19 }
 0xd91   :  { %14541 = vmatpush3.bf16.msra.mxu0 %v14540_v20  ;;  %v24109_v20 = vld [vmem:[#allocation121_spill] sm:$0xff] }
 0xd92   :  { %14543 = vmatprep.subr.bf16.mxu0 %v14542_v12  ;;  %v24107_v12 = vld [vmem:[#allocation113_spill] sm:$0xff] }
 0xd95   :  { %14545 = vmatpush3.bf16.msra.mxu0 %v14544_v62  ;;  %v14622_v62 = vpack.c.bf16 %v24134_v54, %v24133_v38 }
 0xd96   :  { %14547 = vmatprep.subr.bf16.mxu0 %v14546_v14  ;;  %v24136_v14 = vld [vmem:[#allocation125_spill] sm:$0xff] }
 0xd97   :  { %v24137_v9 = vand.u32 4294901760, %v24136_v14 }
 0xd98   :  { %10876 = vmatmul.mubr.f32.vlgmr.msra.gmra.mrb[30].mxu0 %v21259_v36 }
 0xd99   :  { %14549 = vmatpush3.bf16.msra.mxu0 %v14548_v7  ;;  %11011 = vmatprep.mubr.f32.mxu0 %v10634_v33  ;;  %v24118_v33 = vld [vmem:[#allocation168_spill] sm:$0xff]  ;;  %v14624_v7 = vpack.c.bf16 %v24137_v9, %v24135_v58 }
 0xd9a   :  { %14551 = vmatprep.subr.bf16.mxu0 %v14550_v3  ;;  %v24117_v3 = vld [vmem:[#allocation217_spill] sm:$0xff] }
 0xd9d   :  { %14553 = vmatpush3.bf16.msra.mxu0 %v14552_v56 }
 0xd9e   :  { %14555 = vmatprep.subr.bf16.mxu0 %v14554_v47  ;;  %v24140_v47 = vld [vmem:[#allocation171_spill] sm:$0xff] }
 0xd9f   :  { %v24141_v27 = vand.u32 4294901760, %v24140_v47 }
 0xda1   :  { %14557 = vmatpush3.bf16.msra.mxu0 %v14556_v26 }
 0xda2   :  { %14559 = vmatprep.subr.bf16.mxu0 %v14558_v18 }
 0xda5   :  { %14561 = vmatpush3.bf16.msra.mxu0 %v14560_v0  ;;  %v24144_v0 = vld [vmem:[#allocation173_spill] sm:$0xff] }
 0xda6   :  { %14563 = vmatprep.subr.bf16.mxu0 %v14562_v60  ;;  %v24145_v19 = vand.u32 4294901760, %v24144_v0 }
 0xda9   :  { %14565 = vmatpush3.bf16.msra.mxu0 %v14564_v63  ;;  %v24147_v63 = vand.u32 4294901760, %v24146_v53 }
 0xdaa   :  { %14567 = vmatprep.subr.bf16.mxu0 %v14566_v15  ;;  %v24148_v15 = vld [vmem:[#allocation176_spill] sm:$0xff] }
 0xdab   :  { %v24149_v13 = vand.u32 4294901760, %v24148_v15 }
 0xdad   :  { %14569 = vmatpush3.bf16.msra.mxu0 %v14568_v48  ;;  %v14630_v48 = vpack.c.bf16 %v24149_v13, %v24147_v63 }
 0xdae   :  { %14571 = vmatprep.subr.bf16.mxu0 %v14570_v43  ;;  %v24150_v43 = vld [vmem:[#allocation84_spill] sm:$0xff] }
 0xdb1   :  { %14573 = vmatpush3.bf16.msra.mxu0 %v14572_v55  ;;  %v24130_v55 = vand.u32 4294901760, %v20860_v35  ;;  %v24138_v35 = vld [vmem:[#allocation169_spill] sm:$0xff] }
 0xdb2   :  { %14575 = vmatprep.subr.bf16.mxu0 %v14574_v16  ;;  %v14614_v16 = vpack.c.bf16 %v24126_v52, %v24125_v11  ;;  %v24139_v56 = vand.u32 4294901760, %v24138_v35  ;;  %v24160_v11 = vld [vmem:[#allocation35_spill] sm:$0xff] }
 0xdb3   :  { %v14618_v21 = vpack.c.bf16 %v24130_v55, %v24129_v2  ;;  %v24161_v52 = vand.u32 4294901760, %v24160_v11 }
 0xdb4   :  { %v14626_v26 = vpack.c.bf16 %v24141_v27, %v24139_v56 }
 0xdb5   :  { %14577 = vmatpush3.bf16.msra.mxu0 %v14576_v41  ;;  %v24114_v41 = vld [vmem:[#allocation165_spill] sm:$0xff] }
 0xdb6   :  { %14579 = vmatprep.subr.bf16.mxu0 %v24107_v12 }
 0xdb8   :  { %11014 = vmatmul.mubr.f32.vlgmr.msra.gmra.mrb[32].mxu0 %v21264_v23  ;;  %v24132_v23 = vand.u32 4294901760, %v20864_v31  ;;  %v24142_v31 = vld [vmem:[#allocation79_spill] sm:$0xff] }
 0xdb9   :  { %14581 = vmatpush3.bf16.msra.mxu0 %v24108_v22  ;;  %11118 = vmatprep.mubr.f32.mxu0 %v10635_v49  ;;  %v24143_v18 = vand.u32 4294901760, %v24142_v31  ;;  %v24151_v49 = vand.u32 4294901760, %v24150_v43 }
 0xdba   :  { %14583 = vmatprep.subr.bf16.mxu0 %v24109_v20 }
 0xdbb   :  { %v14628_v60 = vpack.c.bf16 %v24145_v19, %v24143_v18  ;;  %v14632_v40 = vpack.c.bf16 %v24153_v32, %v24151_v49 }
 0xdbd   :  { %14585 = vmatpush3.bf16.msra.mxu0 %v20846_v42 }
 0xdbe   :  { %14587 = vmatprep.subr.bf16.mxu0 %v20858_v37 }
 0xdc1   :  { %14589 = vmatpush3.bf16.msra.mxu0 %v24110_v57 }
 0xdc2   :  { %14591 = vmatprep.subr.bf16.mxu0 %v24111_v10 }
 0xdc5   :  { %14593 = vmatpush3.bf16.msra.mxu0 %v24112_v61 }
 0xdc6   :  { %14595 = vmatprep.subr.bf16.mxu0 %v24113_v51 }
 0xdc9   :  { %14597 = vmatpush3.bf16.msra.mxu0 %v24114_v41 }
 0xdca   :  { %14599 = vmatprep.subr.bf16.mxu0 %v24115_v5 }
 0xdcd   :  { %14601 = vmatpush3.bf16.msra.mxu0 %v24116_v1 }
 0xdce   :  { %14603 = vmatprep.subr.bf16.mxu0 %v24117_v3 }
 0xdd1   :  { %14605 = vmatpush3.bf16.msra.mxu0 %v24118_v33 }
 0xdd2   :  { %14607 = vmatprep.subr.bf16.mxu0 %v24119_v25 }
 0xdd5   :  { %14609 = vmatpush3.bf16.msra.mxu0 %v24122_v28 }
 0xdd6   :  { %14611 = vmatprep.subr.bf16.mxu0 %v14610_v29  ;;  %v24157_v29 = vand.u32 4294901760, %v24156_v24 }
 0xdd8   :  { %11122 = vmatmul.mubr.f32.vlgmr.msra.gmra.mrb[34].mxu0 %v10641_v50  ;;  %v14620_v50 = vpack.c.bf16 %v24132_v23, %v24131_v17  ;;  %v14634_v6 = vpack.c.bf16 %v24157_v29, %v24155_v8  ;;  %v24168_v23 = vld [vmem:[#allocation68_spill] sm:$0xff] }
 0xdd9   :  { %14613 = vmatpush3.bf16.msra.mxu0 %v14612_v59  ;;  %11288 = vmatprep.mubr.f32.mxu0 %v21261_v46  ;;  %v24159_v59 = vand.u32 4294901760, %v24158_v34 }
 0xdda   :  { %14615 = vmatprep.subr.bf16.mxu0 %v14614_v16 }
 0xddb   :  { %v14636_v16 = vpack.c.bf16 %v24161_v52, %v24159_v59 }
 0xddd   :  { %14617 = vmatpush3.bf16.msra.mxu0 %v14616_v4  ;;  %v24164_v4 = vld [vmem:[#allocation41_spill] sm:$0xff] }
 0xdde   :  { %14619 = vmatprep.subr.bf16.mxu0 %v14618_v21  ;;  %v24165_v2 = vand.u32 4294901760, %v24164_v4  ;;  %v24166_v21 = vld [vmem:[#allocation64_spill] sm:$0xff] }
 0xddf   :  { %v24167_v17 = vand.u32 4294901760, %v24166_v21 }
 0xde0   :  { %v14638_v55 = vpack.c.bf16 %v24165_v2, %v24163_v39 }
 0xde1   :  { %14621 = vmatpush3.bf16.msra.mxu0 %v14620_v50  ;;  %v24169_v50 = vand.u32 4294901760, %v24168_v23 }
 0xde2   :  { %14623 = vmatprep.subr.bf16.mxu0 %v14622_v62 }
 0xde3   :  { %v14640_v38 = vpack.c.bf16 %v24169_v50, %v24167_v17 }
 0xde5   :  { %14625 = vmatpush3.bf16.msra.mxu0 %v14624_v7 }
 0xde6   :  { %14627 = vmatprep.subr.bf16.mxu0 %v14626_v26 }
 0xde9   :  { %14629 = vmatpush3.bf16.msra.mxu0 %v14628_v60 }
 0xdea   :  { %14631 = vmatprep.subr.bf16.mxu0 %v14630_v48 }
 0xded   :  { %14633 = vmatpush3.bf16.msra.mxu0 %v14632_v40 }
 0xdee   :  { %14635 = vmatprep.subr.bf16.mxu0 %v14634_v6 }
 0xdf1   :  { %14637 = vmatpush3.bf16.msra.mxu0 %v14636_v16 }
 0xdf2   :  { %14639 = vmatprep.subr.bf16.mxu0 %v14638_v55 }
 0xdf5   :  { %14641 = vmatpush3.bf16.msra.mxu0 %v14640_v38 }
 0xdf6   :  { %14643 = vmatprep.subr.bf16.mxu0 %v24107_v12  ;;  %v11415_v12 = vld [vmem:[#allocation18] ss:$0 sm:$0xff] }
 0xdf8   :  { %11290 = vmatmul.mubr.f32.vlgmr.msra.gmra.mrb[36].mxu0 %v21259_v36 }
 0xdf9   :  { %14645 = vmatpush3.bf16.msra.mxu0 %v24108_v22  ;;  %11392 = vmatprep.mubr.f32.mxu0 %v21261_v46 }
 0xdfa   :  { %14647 = vmatprep.subr.bf16.mxu0 %v24109_v20 }
 0xdfd   :  { %14649 = vmatpush3.bf16.msra.mxu0 %v20846_v42 }
 0xdfe   :  { %14651 = vmatprep.subr.bf16.mxu0 %v20858_v37 }
 0xe01   :  { %14653 = vmatpush3.bf16.msra.mxu0 %v24110_v57 }
 0xe02   :  { %14655 = vmatprep.subr.bf16.mxu0 %v24111_v10 }
 0xe05   :  { %14657 = vmatpush3.bf16.msra.mxu0 %v24112_v61 }
 0xe06   :  { %14659 = vmatprep.subr.bf16.mxu0 %v24113_v51 }
 0xe09   :  { %14661 = vmatpush3.bf16.msra.mxu0 %v24114_v41 }
 0xe0a   :  { %14663 = vmatprep.subr.bf16.mxu0 %v24115_v5 }
 0xe0d   :  { %14665 = vmatpush3.bf16.msra.mxu0 %v24116_v1 }
 0xe0e   :  { %14667 = vmatprep.subr.bf16.mxu0 %v24117_v3 }
 0xe11   :  { %14669 = vmatpush3.bf16.msra.mxu0 %v24118_v33 }
 0xe12   :  { %14671 = vmatprep.subr.bf16.mxu0 %v24119_v25 }
 0xe15   :  { %14673 = vmatpush3.bf16.msra.mxu0 %v24122_v28 }
 0xe18   :  { %11394 = vmatmul.mubr.f32.vlgmr.msra.gmra.mrb[38].mxu0 %v21259_v36 }
 0xe4b   :  { %v11748_v37 = vpop.f32.mrb[28].mxu0 }
 0xe4c   :  { %v11749_v42 = vpop.f32.mrb[29].mxu0 }
 0xe4d   :  { %v11750_v46 = vadd.f32 %v11749_v42, %v11748_v37 }
 0xe4f   :  { %v10646_v57 = vadd.f32 %v11750_v46, %v11415_v12 }
 0xe6b   :  { %v11783_v22 = vpop.f32.mrb[30].mxu0 }
 0xe6c   :  { %v11784_v20 = vpop.f32.mrb[31].mxu0 }
 0xe6d   :  { %v11785_v10 = vadd.f32 %v11784_v20, %v11783_v22 }
 0xe6f   :  { %v10878_v61 = vadd.f32 %v11785_v10, %v10646_v57 }
 0xe8b   :  { %v11818_v51 = vpop.f32.mrb[32].mxu0 }
 0xe8c   :  { %v11819_v41 = vpop.f32.mrb[33].mxu0 }
 0xe8d   :  { %v11820_v5 = vadd.f32 %v11819_v41, %v11818_v51 }
 0xe8f   :  { %v11016_v1 = vadd.f32 %v11820_v5, %v10878_v61 }
 0xeab   :  { %v11853_v3 = vpop.f32.mrb[34].mxu0 }
 0xeac   :  { %v11854_v33 = vpop.f32.mrb[35].mxu0 }
 0xead   :  { %v11855_v25 = vadd.f32 %v11854_v33, %v11853_v3 }
 0xeaf   :  { %v11124_v54 = vadd.f32 %v11855_v25, %v11016_v1 }
 0xecb   :  { %v11888_v28 = vpop.f32.mrb[36].mxu0 }
 0xecc   :  { %v11889_v62 = vpop.f32.mrb[37].mxu0 }
 0xecd   :  { %v11890_v36 = vadd.f32 %v11889_v62, %v11888_v28 }
 0xecf   :  { %v11292_v58 = vadd.f32 %v11890_v36, %v11124_v54 }
 0xeeb   :  { %v11923_v14 = vpop.f32.mrb[38].mxu0 }
 0xeec   :  { %v11924_v9 = vpop.f32.mrb[39].mxu0 }
 0xeed   :  { %v11925_v7 = vadd.f32 %v11924_v9, %v11923_v14 }
 0xeef   :  { %v11396_v35 = vadd.f32 %v11925_v7, %v11292_v58 }
 0xef1   :  { %11399 = vst [vmem:[%s21409_s19] sm:$0x3] %v11396_v35 }
 0xef2   :  { %11404 = vsyncpa [#allocation8], 1 }
 0xef3   :  { %11405 = vsyncpa [#allocation10], 1 }
 0xef4   :  { %11406 = vsyncpa [#allocation13], 1 }
 0xef5   :  { %11407 = vsyncpa [#allocation16], 1 }
 0xef6   :  { %11408 = vsyncpa [#allocation19], 1 }

</bundles_post_ra>
